<compile_context>
chip_gen: v7x
topology: tpu7x:2x2x1
jax: 0.10.0
libtpu: 0.0.40
codegen_flags: <defaults>
</compile_context>

<pallas_src>
import functools

import jax
import jax.numpy as jnp
from jax.experimental import pallas as pl
from jax.experimental.pallas import tpu as pltpu

BN_EPS = 1e-5


# --------------------------------------------------------------------------
# in-kernel helpers
# --------------------------------------------------------------------------
def _lif_step(v, z, v_th):
    """One LIF step (tau=2, decay_input, hard reset to 0) -> (new_v, spike_bool)."""
    v = (v + z) * 0.5
    s = v >= v_th
    return jnp.where(s, 0.0, v), s


def _col_stats(z):
    """Per-channel (sum, sum_sq) over the token/lane axis -> two (C, 1) columns."""
    return (jnp.sum(z, axis=1, keepdims=True),
            jnp.sum(z * z, axis=1, keepdims=True))


# --------------------------------------------------------------------------
# kernels: one token-tile of (T, C, tile) per grid step, grid axis "parallel".
# Each kernel streams over the (small, static) T axis so only per-timestep
# slabs + LIF carry state are live in VMEM.
# --------------------------------------------------------------------------
def qk_stats_kernel(x_ref, wqk_ref, stats_ref):
    """Stats pass for the fused q/k conv: partial (sum, sum_sq) of [Wq;Wk] @ x."""
    T, _, _ = x_ref.shape
    C2 = wqk_ref.shape[0]
    wqk = wqk_ref[...]
    s = jnp.zeros((C2, 1), jnp.float32)
    ss = jnp.zeros((C2, 1), jnp.float32)
    for t in range(T):
        z = jnp.dot(wqk, x_ref[t].astype(jnp.bfloat16),
                    preferred_element_type=jnp.float32)          # (2C, R)
        ds, dss = _col_stats(z)
        s, ss = s + ds, ss + dss
    stats_ref[...] = jnp.concatenate([s, ss], axis=1)[None]


def attn_kernel(x_ref, wqk_ref, sc_ref, sh_ref, bd_ref, wp_ref, bp_ref,
                zp_ref, stats_ref):
    """q/k BN+LIF, token-QK attention (block-diag head-sum), proj conv.

    Emits pre-BN proj activation (bf16) + its partial moments."""
    T, C, R = x_ref.shape
    C2 = wqk_ref.shape[0]
    wqk = wqk_ref[...]
    sc, sh = sc_ref[...], sh_ref[...]
    bd, wp, bp = bd_ref[...], wp_ref[...], bp_ref[...]

    v_qk = jnp.zeros((C2, R), jnp.float32)        # q|k LIF state
    v_at = jnp.zeros((C, R), jnp.float32)         # attn LIF state
    s = jnp.zeros((C, 1), jnp.float32)
    ss = jnp.zeros((C, 1), jnp.float32)
    for t in range(T):
        z = jnp.dot(wqk, x_ref[t].astype(jnp.bfloat16),
                    preferred_element_type=jnp.float32)          # (2C, R)
        z = z * sc + sh                                          # global-BN affine
        v_qk, s_qk = _lif_step(v_qk, z, 1.0)
        qk = s_qk.astype(jnp.bfloat16)                           # spikes exact in bf16
        q = qk[:C]
        k = qk[C:]
        hs = jnp.dot(bd, q, preferred_element_type=jnp.float32)  # per-head sums (C, R)
        v_at, s_at = _lif_step(v_at, hs, 0.5)                    # attn_lif, v_th=0.5
        y = jnp.where(s_at, k, jnp.zeros_like(k))                # attn * k (bf16)
        zp = jnp.dot(wp, y, preferred_element_type=jnp.float32) + bp
        zp_ref[t] = zp.astype(zp_ref.dtype)                      # bf16 staging
        ds, dss = _col_stats(zp)
        s, ss = s + ds, ss + dss
    stats_ref[...] = jnp.concatenate([s, ss], axis=1)[None]


def proj_kernel(x_ref, zp_ref, sc_ref, sh_ref, w1_ref, b1_ref, x1_ref, stats_ref):
    """proj BN+LIF + residual-1; mlp1 conv stats pass."""
    T, C, R = x_ref.shape
    Hd = w1_ref.shape[0]
    sc, sh = sc_ref[...], sh_ref[...]
    w1, b1 = w1_ref[...], b1_ref[...]

    v_p = jnp.zeros((C, R), jnp.float32)
    s = jnp.zeros((Hd, 1), jnp.float32)
    ss = jnp.zeros((Hd, 1), jnp.float32)
    for t in range(T):
        zp = zp_ref[t].astype(jnp.float32) * sc + sh
        v_p, s_p = _lif_step(v_p, zp, 1.0)
        x1 = x_ref[t] + s_p.astype(jnp.float32)                  # x + tssa(x)
        x1_ref[t] = x1
        z1 = jnp.dot(w1, x1.astype(jnp.bfloat16),
                     preferred_element_type=jnp.float32) + b1    # (hidden, R)
        ds, dss = _col_stats(z1)
        s, ss = s + ds, ss + dss
    stats_ref[...] = jnp.concatenate([s, ss], axis=1)[None]


def mlp2_stats_kernel(x1_ref, w1_ref, b1_ref, sc1_ref, sh1_ref, w2_ref, b2_ref,
                      stats_ref):
    """mlp1 BN+LIF (z1 recomputed), mlp2 conv stats only (z2 never staged)."""
    T, C, R = x1_ref.shape
    Hd = w1_ref.shape[0]
    w1, b1 = w1_ref[...], b1_ref[...]
    sc1, sh1 = sc1_ref[...], sh1_ref[...]
    w2, b2 = w2_ref[...], b2_ref[...]

    v1 = jnp.zeros((Hd, R), jnp.float32)
    s = jnp.zeros((C, 1), jnp.float32)
    ss = jnp.zeros((C, 1), jnp.float32)
    for t in range(T):
        z1 = jnp.dot(w1, x1_ref[t].astype(jnp.bfloat16),
                     preferred_element_type=jnp.float32) + b1
        z1 = z1 * sc1 + sh1
        v1, s1 = _lif_step(v1, z1, 1.0)
        z2 = jnp.dot(w2, s1.astype(jnp.bfloat16),
                     preferred_element_type=jnp.float32) + b2
        ds, dss = _col_stats(z2)
        s, ss = s + ds, ss + dss
    stats_ref[...] = jnp.concatenate([s, ss], axis=1)[None]


def out_kernel(x1_ref, w1_ref, b1_ref, sc1_ref, sh1_ref, w2_ref, b2_ref,
               sc2_ref, sh2_ref, o_ref):
    """Recompute z1/z2 per tile, mlp2 BN+LIF + residual-2 (no z2 HBM round-trip)."""
    T, C, R = x1_ref.shape
    Hd = w1_ref.shape[0]
    w1, b1 = w1_ref[...], b1_ref[...]
    sc1, sh1 = sc1_ref[...], sh1_ref[...]
    w2, b2 = w2_ref[...], b2_ref[...]
    sc2, sh2 = sc2_ref[...], sh2_ref[...]

    v1 = jnp.zeros((Hd, R), jnp.float32)
    v2 = jnp.zeros((C, R), jnp.float32)
    for t in range(T):
        x1 = x1_ref[t]
        z1 = jnp.dot(w1, x1.astype(jnp.bfloat16),
                     preferred_element_type=jnp.float32) + b1
        z1 = z1 * sc1 + sh1
        v1, s1 = _lif_step(v1, z1, 1.0)
        z2 = jnp.dot(w2, s1.astype(jnp.bfloat16),
                     preferred_element_type=jnp.float32) + b2
        z2 = z2 * sc2 + sh2
        v2, s2 = _lif_step(v2, z2, 1.0)
        o_ref[t] = x1 + s2.astype(jnp.float32)                   # x1 + mlp(x1)


# --------------------------------------------------------------------------
# host-side glue
# --------------------------------------------------------------------------
def _vmem_limit_bytes():
    """~3/4 of physical per-TC VMEM (48 MiB on v7x, 96 MiB on v5e/v6e)."""
    cap = 64 * 1024 * 1024
    try:
        cap = int(getattr(pltpu.get_tpu_info(), "vmem_capacity_bytes", cap) or cap)
    except Exception:
        pass
    return (cap * 3) // 4


def _num_cores():
    """TensorCores per chip; default 2 (conservative: always leaves a split for v7x)."""
    try:
        info = pltpu.get_tpu_info()
        for name in ("num_cores", "core_count", "num_tensorcores"):
            v = getattr(info, name, None)
            if v:
                return int(v)
    except Exception:
        pass
    return 2


def _bytes_per_token(T, C, hidden):
    """Per-token VMEM bytes of the worst phase: 2x double-buffered in/out
    activation blocks + per-timestep live intermediates + LIF carry state."""
    f32, bf16 = 4, 2
    p_attn = (2 * T * C * f32 + 2 * T * C * bf16
              + 2 * C * (2 * f32 + bf16) + C * (3 * f32 + 2 * bf16))
    p_proj = 2 * T * C * (f32 + bf16) + 2 * T * C * f32 + 4 * C * f32 + hidden * f32
    p_mlp = 2 * T * C * f32 + hidden * (3 * f32 + bf16) + 2 * C * f32
    p_out = 4 * T * C * f32 + hidden * (3 * f32 + bf16) + 3 * C * f32
    return (max(p_attn, p_proj, p_mlp, p_out) * 5) // 4          # 25% safety


def _pick_tile(M, T, C, hidden, vmem_limit, num_cores):
    """Largest 128-multiple divisor of M that (a) fits the VMEM budget with
    headroom and (b) still leaves >= 4 grid steps per TensorCore."""
    cands = [d for d in range(128, M + 1, 128) if M % d == 0]
    if not cands:
        return M                                  # tiny M: full-dim block is allowed
    headroom = 12 * 1024 * 1024
    budget = max(vmem_limit - headroom, vmem_limit // 2)
    cap = max(128, budget // max(_bytes_per_token(T, C, hidden), 1))
    target = max(128, ((M // (4 * num_cores)) // 128) * 128)
    ok = [d for d in cands if d <= min(cap, target)]
    if not ok:
        ok = [d for d in cands if d <= cap]
    return max(ok) if ok else min(cands)


def _bn_affine(partials, count, gamma, beta):
    """Fold global batch-stats into per-channel (scale, shift) columns."""
    s = jnp.sum(partials, axis=0)                 # (Cn, 2): [sum, sum_sq]
    mean = s[:, 0] / count
    var = jnp.maximum(s[:, 1] / count - mean * mean, 0.0)        # biased variance
    scale = gamma.astype(jnp.float32) * jax.lax.rsqrt(var + BN_EPS)
    shift = beta.astype(jnp.float32) - mean * scale
    return scale.reshape(-1, 1), shift.reshape(-1, 1)


def _forward_tokens(xt, params, num_heads):
    """xt: (T, C, M) token-lane float32.  Returns (T, C, M) float32."""
    T, C, M = xt.shape
    hidden = params["w1"].shape[0]
    count = float(T * M)

    vmem_limit = _vmem_limit_bytes()
    tile = _pick_tile(M, T, C, hidden, vmem_limit, _num_cores())
    n_tiles = M // tile
    cp = pltpu.CompilerParams(dimension_semantics=("parallel",),
                              vmem_limit_bytes=vmem_limit)

    # bf16 MXU weights; biases / BN params as f32 (C_out, 1) lane-broadcast columns
    wqk = jnp.concatenate([params["wq"], params["wk"]], axis=0).astype(jnp.bfloat16)
    wp = params["wp"].astype(jnp.bfloat16)
    w1 = params["w1"].astype(jnp.bfloat16)
    w2 = params["w2"].astype(jnp.bfloat16)
    bp = params["bpc"].reshape(C, 1).astype(jnp.float32)
    b1 = params["b1"].reshape(hidden, 1).astype(jnp.float32)
    b2 = params["b2"].reshape(C, 1).astype(jnp.float32)
    head = jnp.arange(C) // (C // num_heads)
    bd = (head[:, None] == head[None, :]).astype(jnp.bfloat16)   # block-diag head-sum

    def tok(c):
        return pl.BlockSpec((T, c, tile), lambda i: (0, 0, i))

    def full(a):
        return pl.BlockSpec(a.shape, lambda i: (0,) * a.ndim)

    def stats_spec(c):
        return pl.BlockSpec((1, c, 2), lambda i: (i, 0, 0))

    def stats_shape(c):
        return jax.ShapeDtypeStruct((n_tiles, c, 2), jnp.float32)

    def act_shape(c, dt):
        return jax.ShapeDtypeStruct((T, c, M), dt)

    # ---- phase 1: fused q/k conv stats -----------------------------------
    st_qk = pl.pallas_call(
        qk_stats_kernel, grid=(n_tiles,),
        in_specs=[tok(C), full(wqk)],
        out_specs=stats_spec(2 * C), out_shape=stats_shape(2 * C),
        compiler_params=cp,
    )(xt, wqk)
    gqk = jnp.concatenate([params["gq"], params["gk"]])
    bqk = jnp.concatenate([params["bq"], params["bk"]])
    sc_qk, sh_qk = _bn_affine(st_qk, count, gqk, bqk)

    # ---- phase 2: attention + proj conv (+ proj stats), zp staged bf16 ----
    zp, st_p = pl.pallas_call(
        attn_kernel, grid=(n_tiles,),
        in_specs=[tok(C), full(wqk), full(sc_qk), full(sh_qk), full(bd),
                  full(wp), full(bp)],
        out_specs=(tok(C), stats_spec(C)),
        out_shape=(act_shape(C, jnp.bfloat16), stats_shape(C)),
        compiler_params=cp,
    )(xt, wqk, sc_qk, sh_qk, bd, wp, bp)
    sc_p, sh_p = _bn_affine(st_p, count, params["gp"], params["bp"])

    # ---- phase 3: proj BN+LIF + residual-1 (+ mlp1 stats) -----------------
    x1, st_1 = pl.pallas_call(
        proj_kernel, grid=(n_tiles,),
        in_specs=[tok(C), tok(C), full(sc_p), full(sh_p), full(w1), full(b1)],
        out_specs=(tok(C), stats_spec(hidden)),
        out_shape=(act_shape(C, jnp.float32), stats_shape(hidden)),
        compiler_params=cp,
    )(xt, zp, sc_p, sh_p, w1, b1)
    sc_1, sh_1 = _bn_affine(st_1, count, params["g1"], params["bb1"])

    # ---- phase 4: mlp1 BN+LIF + mlp2 conv stats (z2 not staged) -----------
    st_2 = pl.pallas_call(
        mlp2_stats_kernel, grid=(n_tiles,),
        in_specs=[tok(C), full(w1), full(b1), full(sc_1), full(sh_1),
                  full(w2), full(b2)],
        out_specs=stats_spec(C), out_shape=stats_shape(C),
        compiler_params=cp,
    )(x1, w1, b1, sc_1, sh_1, w2, b2)
    sc_2, sh_2 = _bn_affine(st_2, count, params["g2"], params["bb2"])

    # ---- phase 5: recompute mlp, mlp2 BN+LIF + residual-2 ------------------
    out = pl.pallas_call(
        out_kernel, grid=(n_tiles,),
        in_specs=[tok(C), full(w1), full(b1), full(sc_1), full(sh_1),
                  full(w2), full(b2), full(sc_2), full(sh_2)],
        out_specs=tok(C), out_shape=act_shape(C, jnp.float32),
        compiler_params=cp,
    )(x1, w1, b1, sc_1, sh_1, w2, b2, sc_2, sh_2)
    return out


@functools.partial(jax.jit, static_argnames=("num_heads",))
def token_spiking_transformer(x, params, *, num_heads):
    """x: (T, B, C, H, W) float32 (PyTorch layout). Returns same shape."""
    T, B, C, H, W = x.shape
    N = H * W
    M = B * N
    # TODO(synk): fold this boundary layout change into the first/last kernels'
    # index_maps to save two HBM transpose passes.
    xt = jnp.transpose(x.reshape(T, B, C, N), (0, 2, 1, 3)).reshape(T, C, M)
    out_t = _forward_tokens(xt.astype(jnp.float32), params, num_heads)
    out = jnp.transpose(out_t.reshape(T, C, B, N), (0, 2, 1, 3))
    return out.reshape(T, B, C, H, W)


# --------------------------------------------------------------------------
# synthetic parameters (conv weights stored as (C_out, C_in) for W @ x)
# --------------------------------------------------------------------------
def init_params(key, dim, num_heads, mlp_ratio=4.0):
    del num_heads  # head split is a fixed block-diagonal pattern; no parameters
    hidden = int(dim * mlp_ratio)
    ks = jax.random.split(key, 16)

    def nrm(k, shape, scale=0.2):
        return (scale * jax.random.normal(k, shape)).astype(jnp.float32)

    return {
        # Token_QK_Attention
        "wq": nrm(ks[0], (dim, dim)),
        "gq": 1.0 + nrm(ks[1], (dim,), 0.05), "bq": nrm(ks[2], (dim,), 0.05),
        "wk": nrm(ks[3], (dim, dim)),
        "gk": 1.0 + nrm(ks[4], (dim,), 0.05), "bk": nrm(ks[5], (dim,), 0.05),
        "wp": nrm(ks[6], (dim, dim)), "bpc": nrm(ks[7], (dim,), 0.05),
        "gp": 1.0 + nrm(ks[8], (dim,), 0.05), "bp": nrm(ks[9], (dim,), 0.05),
        # MLP
        "w1": nrm(ks[10], (hidden, dim)), "b1": nrm(ks[11], (hidden,), 0.05),
        "g1": 1.0 + nrm(ks[12], (hidden,), 0.05), "bb1": nrm(ks[13], (hidden,), 0.05),
        "w2": nrm(ks[14], (dim, hidden)), "b2": nrm(ks[15], (dim,), 0.05),
        "g2": jnp.ones((dim,), jnp.float32), "bb2": jnp.zeros((dim,), jnp.float32),
    }


if __name__ == "__main__":
    T, B, C, H, W = 4, 2, 32, 8, 8
    num_heads = 4
    key = jax.random.PRNGKey(0)
    kx, kp = jax.random.split(key)
    # spike-like binary input frames, (T, B, C, H, W)
    x = (jax.random.uniform(kx, (T, B, C, H, W)) < 0.5).astype(jnp.float32)
    params = init_params(kp, C, num_heads)

    out = token_spiking_transformer(x, params, num_heads=num_heads)
    jax.block_until_ready(out)
    assert out.shape == (T, B, C, H, W) and out.dtype == jnp.float32
    print("KERNEL_OK")
</pallas_src>

<mosaic_0001>
module attributes {stable_mosaic.version = 11 : i64} {
  func.func @qk_stats_kernel(%arg0: i32, %arg1: memref<4x32x128xf32, #tpu.memory_space<vmem>>, %arg2: memref<64x32xbf16, #tpu.memory_space<vmem>>, %arg3: memref<1x64x2xf32, #tpu.memory_space<vmem>>) attributes {dimension_semantics = [#tpu.dimension_semantics<parallel>], iteration_bounds = array<i64: 1>, scalar_prefetch = 0 : i64, scratch_operands = 0 : i64, tpu.core_type = #tpu.core_type<tc>, window_params = [{transform_indices = @transform_0, window_bounds = array<i64: 4, 32, 128>}, {pipeline_mode = #tpu.pipeline_mode<synchronous>, transform_indices = @transform_1, window_bounds = array<i64: 64, 32>}, {transform_indices = @transform_2, window_bounds = array<i64: 1, 64, 2>}]} {
    %c0 = arith.constant 0 : index
    %c0_0 = arith.constant 0 : index
    %0 = vector.load %arg2[%c0, %c0_0] : memref<64x32xbf16, #tpu.memory_space<vmem>>, vector<64x32xbf16>
    %cst = arith.constant 0.000000e+00 : f32
    %1 = vector.broadcast %cst : f32 to vector<64x1xf32>
    %cst_1 = arith.constant 0.000000e+00 : f32
    %2 = vector.broadcast %cst_1 : f32 to vector<64x1xf32>
    %c0_2 = arith.constant 0 : index
    %c0_3 = arith.constant 0 : index
    %c0_4 = arith.constant 0 : index
    %3 = vector.load %arg1[%c0_2, %c0_3, %c0_4] : memref<4x32x128xf32, #tpu.memory_space<vmem>>, vector<1x32x128xf32>
    %4 = vector.shape_cast %3 : vector<1x32x128xf32> to vector<32x128xf32>
    %5 = arith.truncf %4 : vector<32x128xf32> to vector<32x128xbf16>
    %cst_5 = arith.constant dense<0.000000e+00> : vector<64x128xf32>
    %6 = tpu.matmul %0, %5, %cst_5 {dimension_numbers = #tpu.dot_dimension_numbers<[1], [0], [0], [1], [0, 0, 1, 1], [], []>} : vector<64x32xbf16>, vector<32x128xbf16>, vector<64x128xf32> -> vector<64x128xf32>
    %cst_6 = arith.constant dense<0.000000e+00> : vector<64xf32>
    %7 = vector.multi_reduction <add>, %6, %cst_6 [1] : vector<64x128xf32> to vector<64xf32>
    %8 = vector.shape_cast %7 : vector<64xf32> to vector<64x1xf32>
    %9 = arith.mulf %6, %6 : vector<64x128xf32>
    %cst_7 = arith.constant dense<0.000000e+00> : vector<64xf32>
    %10 = vector.multi_reduction <add>, %9, %cst_7 [1] : vector<64x128xf32> to vector<64xf32>
    %11 = vector.shape_cast %10 : vector<64xf32> to vector<64x1xf32>
    %12 = arith.addf %1, %8 : vector<64x1xf32>
    %13 = arith.addf %2, %11 : vector<64x1xf32>
    %c1 = arith.constant 1 : index
    %c0_8 = arith.constant 0 : index
    %c0_9 = arith.constant 0 : index
    %14 = vector.load %arg1[%c1, %c0_8, %c0_9] : memref<4x32x128xf32, #tpu.memory_space<vmem>>, vector<1x32x128xf32>
    %15 = vector.shape_cast %14 : vector<1x32x128xf32> to vector<32x128xf32>
    %16 = arith.truncf %15 : vector<32x128xf32> to vector<32x128xbf16>
    %cst_10 = arith.constant dense<0.000000e+00> : vector<64x128xf32>
    %17 = tpu.matmul %0, %16, %cst_10 {dimension_numbers = #tpu.dot_dimension_numbers<[1], [0], [0], [1], [0, 0, 1, 1], [], []>} : vector<64x32xbf16>, vector<32x128xbf16>, vector<64x128xf32> -> vector<64x128xf32>
    %cst_11 = arith.constant dense<0.000000e+00> : vector<64xf32>
    %18 = vector.multi_reduction <add>, %17, %cst_11 [1] : vector<64x128xf32> to vector<64xf32>
    %19 = vector.shape_cast %18 : vector<64xf32> to vector<64x1xf32>
    %20 = arith.mulf %17, %17 : vector<64x128xf32>
    %cst_12 = arith.constant dense<0.000000e+00> : vector<64xf32>
    %21 = vector.multi_reduction <add>, %20, %cst_12 [1] : vector<64x128xf32> to vector<64xf32>
    %22 = vector.shape_cast %21 : vector<64xf32> to vector<64x1xf32>
    %23 = arith.addf %12, %19 : vector<64x1xf32>
    %24 = arith.addf %13, %22 : vector<64x1xf32>
    %c2 = arith.constant 2 : index
    %c0_13 = arith.constant 0 : index
    %c0_14 = arith.constant 0 : index
    %25 = vector.load %arg1[%c2, %c0_13, %c0_14] : memref<4x32x128xf32, #tpu.memory_space<vmem>>, vector<1x32x128xf32>
    %26 = vector.shape_cast %25 : vector<1x32x128xf32> to vector<32x128xf32>
    %27 = arith.truncf %26 : vector<32x128xf32> to vector<32x128xbf16>
    %cst_15 = arith.constant dense<0.000000e+00> : vector<64x128xf32>
    %28 = tpu.matmul %0, %27, %cst_15 {dimension_numbers = #tpu.dot_dimension_numbers<[1], [0], [0], [1], [0, 0, 1, 1], [], []>} : vector<64x32xbf16>, vector<32x128xbf16>, vector<64x128xf32> -> vector<64x128xf32>
    %cst_16 = arith.constant dense<0.000000e+00> : vector<64xf32>
    %29 = vector.multi_reduction <add>, %28, %cst_16 [1] : vector<64x128xf32> to vector<64xf32>
    %30 = vector.shape_cast %29 : vector<64xf32> to vector<64x1xf32>
    %31 = arith.mulf %28, %28 : vector<64x128xf32>
    %cst_17 = arith.constant dense<0.000000e+00> : vector<64xf32>
    %32 = vector.multi_reduction <add>, %31, %cst_17 [1] : vector<64x128xf32> to vector<64xf32>
    %33 = vector.shape_cast %32 : vector<64xf32> to vector<64x1xf32>
    %34 = arith.addf %23, %30 : vector<64x1xf32>
    %35 = arith.addf %24, %33 : vector<64x1xf32>
    %c3 = arith.constant 3 : index
    %c0_18 = arith.constant 0 : index
    %c0_19 = arith.constant 0 : index
    %36 = vector.load %arg1[%c3, %c0_18, %c0_19] : memref<4x32x128xf32, #tpu.memory_space<vmem>>, vector<1x32x128xf32>
    %37 = vector.shape_cast %36 : vector<1x32x128xf32> to vector<32x128xf32>
    %38 = arith.truncf %37 : vector<32x128xf32> to vector<32x128xbf16>
    %cst_20 = arith.constant dense<0.000000e+00> : vector<64x128xf32>
    %39 = tpu.matmul %0, %38, %cst_20 {dimension_numbers = #tpu.dot_dimension_numbers<[1], [0], [0], [1], [0, 0, 1, 1], [], []>} : vector<64x32xbf16>, vector<32x128xbf16>, vector<64x128xf32> -> vector<64x128xf32>
    %cst_21 = arith.constant dense<0.000000e+00> : vector<64xf32>
    %40 = vector.multi_reduction <add>, %39, %cst_21 [1] : vector<64x128xf32> to vector<64xf32>
    %41 = vector.shape_cast %40 : vector<64xf32> to vector<64x1xf32>
    %42 = arith.mulf %39, %39 : vector<64x128xf32>
    %cst_22 = arith.constant dense<0.000000e+00> : vector<64xf32>
    %43 = vector.multi_reduction <add>, %42, %cst_22 [1] : vector<64x128xf32> to vector<64xf32>
    %44 = vector.shape_cast %43 : vector<64xf32> to vector<64x1xf32>
    %45 = arith.addf %34, %41 : vector<64x1xf32>
    %46 = arith.addf %35, %44 : vector<64x1xf32>
    %47 = tpu.concatenate %45, %46 in 1 : vector<64x1xf32>, vector<64x1xf32> -> vector<64x2xf32>
    %48 = vector.shape_cast %47 : vector<64x2xf32> to vector<1x64x2xf32>
    %c0_23 = arith.constant 0 : index
    %c0_24 = arith.constant 0 : index
    %c0_25 = arith.constant 0 : index
    %49 = vector.load %arg3[%c0_23, %c0_24, %c0_25] : memref<1x64x2xf32, #tpu.memory_space<vmem>>, vector<1x64x2xf32>
    tpu.vector_store %arg3[%c0_23, %c0_24, %c0_25], %48 {strides = array<i32>} : memref<1x64x2xf32, #tpu.memory_space<vmem>>, vector<1x64x2xf32>,
    return
  }
  func.func @transform_0(%arg0: i32) -> (i32, i32, i32) {
    %c0_i32 = arith.constant 0 : i32
    %c0_i32_0 = arith.constant 0 : i32
    %c0_i32_1 = arith.constant 0 : i32
    return %c0_i32, %c0_i32_0, %arg0 : i32, i32, i32
  }
  func.func @transform_1(%arg0: i32) -> (i32, i32) {
    %c0_i32 = arith.constant 0 : i32
    %c0_i32_0 = arith.constant 0 : i32
    %c0_i32_1 = arith.constant 0 : i32
    return %c0_i32, %c0_i32_0 : i32, i32
  }
  func.func @transform_2(%arg0: i32) -> (i32, i32, i32) {
    %c0_i32 = arith.constant 0 : i32
    %c0_i32_0 = arith.constant 0 : i32
    %c0_i32_1 = arith.constant 0 : i32
    return %arg0, %c0_i32, %c0_i32_0 : i32, i32, i32
  }
}

module attributes {stable_mosaic.version = 11 : i64} {
  func.func @attn_kernel(%arg0: i32, %arg1: memref<4x32x128xf32, #tpu.memory_space<vmem>>, %arg2: memref<64x32xbf16, #tpu.memory_space<vmem>>, %arg3: memref<64x1xf32, #tpu.memory_space<vmem>>, %arg4: memref<64x1xf32, #tpu.memory_space<vmem>>, %arg5: memref<32x32xbf16, #tpu.memory_space<vmem>>, %arg6: memref<32x32xbf16, #tpu.memory_space<vmem>>, %arg7: memref<32x1xf32, #tpu.memory_space<vmem>>, %arg8: memref<4x32x128xbf16, #tpu.memory_space<vmem>>, %arg9: memref<1x32x2xf32, #tpu.memory_space<vmem>>) attributes {dimension_semantics = [#tpu.dimension_semantics<parallel>], iteration_bounds = array<i64: 1>, scalar_prefetch = 0 : i64, scratch_operands = 0 : i64, tpu.core_type = #tpu.core_type<tc>, window_params = [{transform_indices = @transform_0, window_bounds = array<i64: 4, 32, 128>}, {pipeline_mode = #tpu.pipeline_mode<synchronous>, transform_indices = @transform_1, window_bounds = array<i64: 64, 32>}, {pipeline_mode = #tpu.pipeline_mode<synchronous>, transform_indices = @transform_2, window_bounds = array<i64: 64, 1>}, {pipeline_mode = #tpu.pipeline_mode<synchronous>, transform_indices = @transform_3, window_bounds = array<i64: 64, 1>}, {pipeline_mode = #tpu.pipeline_mode<synchronous>, transform_indices = @transform_4, window_bounds = array<i64: 32, 32>}, {pipeline_mode = #tpu.pipeline_mode<synchronous>, transform_indices = @transform_5, window_bounds = array<i64: 32, 32>}, {pipeline_mode = #tpu.pipeline_mode<synchronous>, transform_indices = @transform_6, window_bounds = array<i64: 32, 1>}, {transform_indices = @transform_7, window_bounds = array<i64: 4, 32, 128>}, {transform_indices = @transform_8, window_bounds = array<i64: 1, 32, 2>}]} {
    %c0 = arith.constant 0 : index
    %c0_0 = arith.constant 0 : index
    %0 = vector.load %arg2[%c0, %c0_0] : memref<64x32xbf16, #tpu.memory_space<vmem>>, vector<64x32xbf16>
    %c0_1 = arith.constant 0 : index
    %c0_2 = arith.constant 0 : index
    %1 = vector.load %arg3[%c0_1, %c0_2] : memref<64x1xf32, #tpu.memory_space<vmem>>, vector<64x1xf32>
    %c0_3 = arith.constant 0 : index
    %c0_4 = arith.constant 0 : index
    %2 = vector.load %arg4[%c0_3, %c0_4] : memref<64x1xf32, #tpu.memory_space<vmem>>, vector<64x1xf32>
    %c0_5 = arith.constant 0 : index
    %c0_6 = arith.constant 0 : index
    %3 = vector.load %arg5[%c0_5, %c0_6] : memref<32x32xbf16, #tpu.memory_space<vmem>>, vector<32x32xbf16>
    %c0_7 = arith.constant 0 : index
    %c0_8 = arith.constant 0 : index
    %4 = vector.load %arg6[%c0_7, %c0_8] : memref<32x32xbf16, #tpu.memory_space<vmem>>, vector<32x32xbf16>
    %c0_9 = arith.constant 0 : index
    %c0_10 = arith.constant 0 : index
    %5 = vector.load %arg7[%c0_9, %c0_10] : memref<32x1xf32, #tpu.memory_space<vmem>>, vector<32x1xf32>
    %cst = arith.constant 0.000000e+00 : f32
    %6 = vector.broadcast %cst : f32 to vector<64x128xf32>
    %cst_11 = arith.constant 0.000000e+00 : f32
    %7 = vector.broadcast %cst_11 : f32 to vector<32x128xf32>
    %cst_12 = arith.constant 0.000000e+00 : f32
    %8 = vector.broadcast %cst_12 : f32 to vector<32x1xf32>
    %cst_13 = arith.constant 0.000000e+00 : f32
    %9 = vector.broadcast %cst_13 : f32 to vector<32x1xf32>
    %c0_14 = arith.constant 0 : index
    %c0_15 = arith.constant 0 : index
    %c0_16 = arith.constant 0 : index
    %10 = vector.load %arg1[%c0_14, %c0_15, %c0_16] : memref<4x32x128xf32, #tpu.memory_space<vmem>>, vector<1x32x128xf32>
    %11 = vector.shape_cast %10 : vector<1x32x128xf32> to vector<32x128xf32>
    %12 = arith.truncf %11 : vector<32x128xf32> to vector<32x128xbf16>
    %cst_17 = arith.constant dense<0.000000e+00> : vector<64x128xf32>
    %13 = tpu.matmul %0, %12, %cst_17 {dimension_numbers = #tpu.dot_dimension_numbers<[1], [0], [0], [1], [0, 0, 1, 1], [], []>} : vector<64x32xbf16>, vector<32x128xbf16>, vector<64x128xf32> -> vector<64x128xf32>
    %14 = vector.broadcast %1 : vector<64x1xf32> to vector<64x128xf32>
    %15 = arith.mulf %13, %14 : vector<64x128xf32>
    %16 = vector.broadcast %2 : vector<64x1xf32> to vector<64x128xf32>
    %17 = arith.addf %15, %16 : vector<64x128xf32>
    %18 = arith.addf %6, %17 : vector<64x128xf32>
    %cst_18 = arith.constant 5.000000e-01 : f32
    %19 = vector.broadcast %cst_18 : f32 to vector<64x128xf32>
    %20 = arith.mulf %18, %19 : vector<64x128xf32>
    %cst_19 = arith.constant 1.000000e+00 : f32
    %21 = vector.broadcast %cst_19 : f32 to vector<64x128xf32>
    %22 = arith.cmpf oge, %20, %21 : vector<64x128xf32>
    %cst_20 = arith.constant 0.000000e+00 : f32
    %23 = vector.broadcast %cst_20 : f32 to vector<64x128xf32>
    %24 = arith.select %22, %23, %20 : vector<64x128xi1>, vector<64x128xf32>
    %25 = arith.extui %22 : vector<64x128xi1> to vector<64x128xi32>
    %26 = arith.sitofp %25 : vector<64x128xi32> to vector<64x128xf32>
    %27 = arith.truncf %26 : vector<64x128xf32> to vector<64x128xbf16>
    %28 = vector.extract_strided_slice %27 {offsets = [0, 0], sizes = [32, 128], strides = [1, 1]} : vector<64x128xbf16> to vector<32x128xbf16>
    %29 = vector.extract_strided_slice %27 {offsets = [32, 0], sizes = [32, 128], strides = [1, 1]} : vector<64x128xbf16> to vector<32x128xbf16>
    %cst_21 = arith.constant dense<0.000000e+00> : vector<32x128xf32>
    %30 = tpu.matmul %3, %28, %cst_21 {dimension_numbers = #tpu.dot_dimension_numbers<[1], [0], [0], [1], [0, 0, 1, 1], [], []>} : vector<32x32xbf16>, vector<32x128xbf16>, vector<32x128xf32> -> vector<32x128xf32>
    %31 = arith.addf %7, %30 : vector<32x128xf32>
    %cst_22 = arith.constant 5.000000e-01 : f32
    %32 = vector.broadcast %cst_22 : f32 to vector<32x128xf32>
    %33 = arith.mulf %31, %32 : vector<32x128xf32>
    %cst_23 = arith.constant 5.000000e-01 : f32
    %34 = vector.broadcast %cst_23 : f32 to vector<32x128xf32>
    %35 = arith.cmpf oge, %33, %34 : vector<32x128xf32>
    %cst_24 = arith.constant 0.000000e+00 : f32
    %36 = vector.broadcast %cst_24 : f32 to vector<32x128xf32>
    %37 = arith.select %35, %36, %33 : vector<32x128xi1>, vector<32x128xf32>
    %cst_25 = arith.constant 0.000000e+00 : bf16
    %38 = vector.broadcast %cst_25 : bf16 to vector<32x128xbf16>
    %39 = arith.select %35, %29, %38 : vector<32x128xi1>, vector<32x128xbf16>
    %cst_26 = arith.constant dense<0.000000e+00> : vector<32x128xf32>
    %40 = tpu.matmul %4, %39, %cst_26 {dimension_numbers = #tpu.dot_dimension_numbers<[1], [0], [0], [1], [0, 0, 1, 1], [], []>} : vector<32x32xbf16>, vector<32x128xbf16>, vector<32x128xf32> -> vector<32x128xf32>
    %41 = vector.broadcast %5 : vector<32x1xf32> to vector<32x128xf32>
    %42 = arith.addf %40, %41 : vector<32x128xf32>
    %43 = arith.truncf %42 : vector<32x128xf32> to vector<32x128xbf16>
    %c0_27 = arith.constant 0 : index
    %c0_28 = arith.constant 0 : index
    %c0_29 = arith.constant 0 : index
    %44 = vector.load %arg8[%c0_27, %c0_28, %c0_29] : memref<4x32x128xbf16, #tpu.memory_space<vmem>>, vector<1x32x128xbf16>
    %45 = vector.shape_cast %44 : vector<1x32x128xbf16> to vector<32x128xbf16>
    %46 = vector.shape_cast %43 : vector<32x128xbf16> to vector<1x32x128xbf16>
    tpu.vector_store %arg8[%c0_27, %c0_28, %c0_29], %46 {strides = array<i32>} : memref<4x32x128xbf16, #tpu.memory_space<vmem>>, vector<1x32x128xbf16>,
    %cst_30 = arith.constant dense<0.000000e+00> : vector<32xf32>
    %47 = vector.multi_reduction <add>, %42, %cst_30 [1] : vector<32x128xf32> to vector<32xf32>
    %48 = vector.shape_cast %47 : vector<32xf32> to vector<32x1xf32>
    %49 = arith.mulf %42, %42 : vector<32x128xf32>
    %cst_31 = arith.constant dense<0.000000e+00> : vector<32xf32>
    %50 = vector.multi_reduction <add>, %49, %cst_31 [1] : vector<32x128xf32> to vector<32xf32>
    %51 = vector.shape_cast %50 : vector<32xf32> to vector<32x1xf32>
    %52 = arith.addf %8, %48 : vector<32x1xf32>
    %53 = arith.addf %9, %51 : vector<32x1xf32>
    %c1 = arith.constant 1 : index
    %c0_32 = arith.constant 0 : index
    %c0_33 = arith.constant 0 : index
    %54 = vector.load %arg1[%c1, %c0_32, %c0_33] : memref<4x32x128xf32, #tpu.memory_space<vmem>>, vector<1x32x128xf32>
    %55 = vector.shape_cast %54 : vector<1x32x128xf32> to vector<32x128xf32>
    %56 = arith.truncf %55 : vector<32x128xf32> to vector<32x128xbf16>
    %cst_34 = arith.constant dense<0.000000e+00> : vector<64x128xf32>
    %57 = tpu.matmul %0, %56, %cst_34 {dimension_numbers = #tpu.dot_dimension_numbers<[1], [0], [0], [1], [0, 0, 1, 1], [], []>} : vector<64x32xbf16>, vector<32x128xbf16>, vector<64x128xf32> -> vector<64x128xf32>
    %58 = vector.broadcast %1 : vector<64x1xf32> to vector<64x128xf32>
    %59 = arith.mulf %57, %58 : vector<64x128xf32>
    %60 = vector.broadcast %2 : vector<64x1xf32> to vector<64x128xf32>
    %61 = arith.addf %59, %60 : vector<64x128xf32>
    %62 = arith.addf %24, %61 : vector<64x128xf32>
    %cst_35 = arith.constant 5.000000e-01 : f32
    %63 = vector.broadcast %cst_35 : f32 to vector<64x128xf32>
    %64 = arith.mulf %62, %63 : vector<64x128xf32>
    %cst_36 = arith.constant 1.000000e+00 : f32
    %65 = vector.broadcast %cst_36 : f32 to vector<64x128xf32>
    %66 = arith.cmpf oge, %64, %65 : vector<64x128xf32>
    %cst_37 = arith.constant 0.000000e+00 : f32
    %67 = vector.broadcast %cst_37 : f32 to vector<64x128xf32>
    %68 = arith.select %66, %67, %64 : vector<64x128xi1>, vector<64x128xf32>
    %69 = arith.extui %66 : vector<64x128xi1> to vector<64x128xi32>
    %70 = arith.sitofp %69 : vector<64x128xi32> to vector<64x128xf32>
    %71 = arith.truncf %70 : vector<64x128xf32> to vector<64x128xbf16>
    %72 = vector.extract_strided_slice %71 {offsets = [0, 0], sizes = [32, 128], strides = [1, 1]} : vector<64x128xbf16> to vector<32x128xbf16>
    %73 = vector.extract_strided_slice %71 {offsets = [32, 0], sizes = [32, 128], strides = [1, 1]} : vector<64x128xbf16> to vector<32x128xbf16>
    %cst_38 = arith.constant dense<0.000000e+00> : vector<32x128xf32>
    %74 = tpu.matmul %3, %72, %cst_38 {dimension_numbers = #tpu.dot_dimension_numbers<[1], [0], [0], [1], [0, 0, 1, 1], [], []>} : vector<32x32xbf16>, vector<32x128xbf16>, vector<32x128xf32> -> vector<32x128xf32>
    %75 = arith.addf %37, %74 : vector<32x128xf32>
    %cst_39 = arith.constant 5.000000e-01 : f32
    %76 = vector.broadcast %cst_39 : f32 to vector<32x128xf32>
    %77 = arith.mulf %75, %76 : vector<32x128xf32>
    %cst_40 = arith.constant 5.000000e-01 : f32
    %78 = vector.broadcast %cst_40 : f32 to vector<32x128xf32>
    %79 = arith.cmpf oge, %77, %78 : vector<32x128xf32>
    %cst_41 = arith.constant 0.000000e+00 : f32
    %80 = vector.broadcast %cst_41 : f32 to vector<32x128xf32>
    %81 = arith.select %79, %80, %77 : vector<32x128xi1>, vector<32x128xf32>
    %cst_42 = arith.constant 0.000000e+00 : bf16
    %82 = vector.broadcast %cst_42 : bf16 to vector<32x128xbf16>
    %83 = arith.select %79, %73, %82 : vector<32x128xi1>, vector<32x128xbf16>
    %cst_43 = arith.constant dense<0.000000e+00> : vector<32x128xf32>
    %84 = tpu.matmul %4, %83, %cst_43 {dimension_numbers = #tpu.dot_dimension_numbers<[1], [0], [0], [1], [0, 0, 1, 1], [], []>} : vector<32x32xbf16>, vector<32x128xbf16>, vector<32x128xf32> -> vector<32x128xf32>
    %85 = vector.broadcast %5 : vector<32x1xf32> to vector<32x128xf32>
    %86 = arith.addf %84, %85 : vector<32x128xf32>
    %87 = arith.truncf %86 : vector<32x128xf32> to vector<32x128xbf16>
    %c1_44 = arith.constant 1 : index
    %c0_45 = arith.constant 0 : index
    %c0_46 = arith.constant 0 : index
    %88 = vector.load %arg8[%c1_44, %c0_45, %c0_46] : memref<4x32x128xbf16, #tpu.memory_space<vmem>>, vector<1x32x128xbf16>
    %89 = vector.shape_cast %88 : vector<1x32x128xbf16> to vector<32x128xbf16>
    %90 = vector.shape_cast %87 : vector<32x128xbf16> to vector<1x32x128xbf16>
    tpu.vector_store %arg8[%c1_44, %c0_45, %c0_46], %90 {strides = array<i32>} : memref<4x32x128xbf16, #tpu.memory_space<vmem>>, vector<1x32x128xbf16>,
    %cst_47 = arith.constant dense<0.000000e+00> : vector<32xf32>
    %91 = vector.multi_reduction <add>, %86, %cst_47 [1] : vector<32x128xf32> to vector<32xf32>
    %92 = vector.shape_cast %91 : vector<32xf32> to vector<32x1xf32>
    %93 = arith.mulf %86, %86 : vector<32x128xf32>
    %cst_48 = arith.constant dense<0.000000e+00> : vector<32xf32>
    %94 = vector.multi_reduction <add>, %93, %cst_48 [1] : vector<32x128xf32> to vector<32xf32>
    %95 = vector.shape_cast %94 : vector<32xf32> to vector<32x1xf32>
    %96 = arith.addf %52, %92 : vector<32x1xf32>
    %97 = arith.addf %53, %95 : vector<32x1xf32>
    %c2 = arith.constant 2 : index
    %c0_49 = arith.constant 0 : index
    %c0_50 = arith.constant 0 : index
    %98 = vector.load %arg1[%c2, %c0_49, %c0_50] : memref<4x32x128xf32, #tpu.memory_space<vmem>>, vector<1x32x128xf32>
    %99 = vector.shape_cast %98 : vector<1x32x128xf32> to vector<32x128xf32>
    %100 = arith.truncf %99 : vector<32x128xf32> to vector<32x128xbf16>
    %cst_51 = arith.constant dense<0.000000e+00> : vector<64x128xf32>
    %101 = tpu.matmul %0, %100, %cst_51 {dimension_numbers = #tpu.dot_dimension_numbers<[1], [0], [0], [1], [0, 0, 1, 1], [], []>} : vector<64x32xbf16>, vector<32x128xbf16>, vector<64x128xf32> -> vector<64x128xf32>
    %102 = vector.broadcast %1 : vector<64x1xf32> to vector<64x128xf32>
    %103 = arith.mulf %101, %102 : vector<64x128xf32>
    %104 = vector.broadcast %2 : vector<64x1xf32> to vector<64x128xf32>
    %105 = arith.addf %103, %104 : vector<64x128xf32>
    %106 = arith.addf %68, %105 : vector<64x128xf32>
    %cst_52 = arith.constant 5.000000e-01 : f32
    %107 = vector.broadcast %cst_52 : f32 to vector<64x128xf32>
    %108 = arith.mulf %106, %107 : vector<64x128xf32>
    %cst_53 = arith.constant 1.000000e+00 : f32
    %109 = vector.broadcast %cst_53 : f32 to vector<64x128xf32>
    %110 = arith.cmpf oge, %108, %109 : vector<64x128xf32>
    %cst_54 = arith.constant 0.000000e+00 : f32
    %111 = vector.broadcast %cst_54 : f32 to vector<64x128xf32>
    %112 = arith.select %110, %111, %108 : vector<64x128xi1>, vector<64x128xf32>
    %113 = arith.extui %110 : vector<64x128xi1> to vector<64x128xi32>
    %114 = arith.sitofp %113 : vector<64x128xi32> to vector<64x128xf32>
    %115 = arith.truncf %114 : vector<64x128xf32> to vector<64x128xbf16>
    %116 = vector.extract_strided_slice %115 {offsets = [0, 0], sizes = [32, 128], strides = [1, 1]} : vector<64x128xbf16> to vector<32x128xbf16>
    %117 = vector.extract_strided_slice %115 {offsets = [32, 0], sizes = [32, 128], strides = [1, 1]} : vector<64x128xbf16> to vector<32x128xbf16>
    %cst_55 = arith.constant dense<0.000000e+00> : vector<32x128xf32>
    %118 = tpu.matmul %3, %116, %cst_55 {dimension_numbers = #tpu.dot_dimension_numbers<[1], [0], [0], [1], [0, 0, 1, 1], [], []>} : vector<32x32xbf16>, vector<32x128xbf16>, vector<32x128xf32> -> vector<32x128xf32>
    %119 = arith.addf %81, %118 : vector<32x128xf32>
    %cst_56 = arith.constant 5.000000e-01 : f32
    %120 = vector.broadcast %cst_56 : f32 to vector<32x128xf32>
    %121 = arith.mulf %119, %120 : vector<32x128xf32>
    %cst_57 = arith.constant 5.000000e-01 : f32
    %122 = vector.broadcast %cst_57 : f32 to vector<32x128xf32>
    %123 = arith.cmpf oge, %121, %122 : vector<32x128xf32>
    %cst_58 = arith.constant 0.000000e+00 : f32
    %124 = vector.broadcast %cst_58 : f32 to vector<32x128xf32>
    %125 = arith.select %123, %124, %121 : vector<32x128xi1>, vector<32x128xf32>
    %cst_59 = arith.constant 0.000000e+00 : bf16
    %126 = vector.broadcast %cst_59 : bf16 to vector<32x128xbf16>
    %127 = arith.select %123, %117, %126 : vector<32x128xi1>, vector<32x128xbf16>
    %cst_60 = arith.constant dense<0.000000e+00> : vector<32x128xf32>
    %128 = tpu.matmul %4, %127, %cst_60 {dimension_numbers = #tpu.dot_dimension_numbers<[1], [0], [0], [1], [0, 0, 1, 1], [], []>} : vector<32x32xbf16>, vector<32x128xbf16>, vector<32x128xf32> -> vector<32x128xf32>
    %129 = vector.broadcast %5 : vector<32x1xf32> to vector<32x128xf32>
    %130 = arith.addf %128, %129 : vector<32x128xf32>
    %131 = arith.truncf %130 : vector<32x128xf32> to vector<32x128xbf16>
    %c2_61 = arith.constant 2 : index
    %c0_62 = arith.constant 0 : index
    %c0_63 = arith.constant 0 : index
    %132 = vector.load %arg8[%c2_61, %c0_62, %c0_63] : memref<4x32x128xbf16, #tpu.memory_space<vmem>>, vector<1x32x128xbf16>
    %133 = vector.shape_cast %132 : vector<1x32x128xbf16> to vector<32x128xbf16>
    %134 = vector.shape_cast %131 : vector<32x128xbf16> to vector<1x32x128xbf16>
    tpu.vector_store %arg8[%c2_61, %c0_62, %c0_63], %134 {strides = array<i32>} : memref<4x32x128xbf16, #tpu.memory_space<vmem>>, vector<1x32x128xbf16>,
    %cst_64 = arith.constant dense<0.000000e+00> : vector<32xf32>
    %135 = vector.multi_reduction <add>, %130, %cst_64 [1] : vector<32x128xf32> to vector<32xf32>
    %136 = vector.shape_cast %135 : vector<32xf32> to vector<32x1xf32>
    %137 = arith.mulf %130, %130 : vector<32x128xf32>
    %cst_65 = arith.constant dense<0.000000e+00> : vector<32xf32>
    %138 = vector.multi_reduction <add>, %137, %cst_65 [1] : vector<32x128xf32> to vector<32xf32>
    %139 = vector.shape_cast %138 : vector<32xf32> to vector<32x1xf32>
    %140 = arith.addf %96, %136 : vector<32x1xf32>
    %141 = arith.addf %97, %139 : vector<32x1xf32>
    %c3 = arith.constant 3 : index
    %c0_66 = arith.constant 0 : index
    %c0_67 = arith.constant 0 : index
    %142 = vector.load %arg1[%c3, %c0_66, %c0_67] : memref<4x32x128xf32, #tpu.memory_space<vmem>>, vector<1x32x128xf32>
    %143 = vector.shape_cast %142 : vector<1x32x128xf32> to vector<32x128xf32>
    %144 = arith.truncf %143 : vector<32x128xf32> to vector<32x128xbf16>
    %cst_68 = arith.constant dense<0.000000e+00> : vector<64x128xf32>
    %145 = tpu.matmul %0, %144, %cst_68 {dimension_numbers = #tpu.dot_dimension_numbers<[1], [0], [0], [1], [0, 0, 1, 1], [], []>} : vector<64x32xbf16>, vector<32x128xbf16>, vector<64x128xf32> -> vector<64x128xf32>
    %146 = vector.broadcast %1 : vector<64x1xf32> to vector<64x128xf32>
    %147 = arith.mulf %145, %146 : vector<64x128xf32>
    %148 = vector.broadcast %2 : vector<64x1xf32> to vector<64x128xf32>
    %149 = arith.addf %147, %148 : vector<64x128xf32>
    %150 = arith.addf %112, %149 : vector<64x128xf32>
    %cst_69 = arith.constant 5.000000e-01 : f32
    %151 = vector.broadcast %cst_69 : f32 to vector<64x128xf32>
    %152 = arith.mulf %150, %151 : vector<64x128xf32>
    %cst_70 = arith.constant 1.000000e+00 : f32
    %153 = vector.broadcast %cst_70 : f32 to vector<64x128xf32>
    %154 = arith.cmpf oge, %152, %153 : vector<64x128xf32>
    %155 = arith.extui %154 : vector<64x128xi1> to vector<64x128xi32>
    %156 = arith.sitofp %155 : vector<64x128xi32> to vector<64x128xf32>
    %157 = arith.truncf %156 : vector<64x128xf32> to vector<64x128xbf16>
    %158 = vector.extract_strided_slice %157 {offsets = [0, 0], sizes = [32, 128], strides = [1, 1]} : vector<64x128xbf16> to vector<32x128xbf16>
    %159 = vector.extract_strided_slice %157 {offsets = [32, 0], sizes = [32, 128], strides = [1, 1]} : vector<64x128xbf16> to vector<32x128xbf16>
    %cst_71 = arith.constant dense<0.000000e+00> : vector<32x128xf32>
    %160 = tpu.matmul %3, %158, %cst_71 {dimension_numbers = #tpu.dot_dimension_numbers<[1], [0], [0], [1], [0, 0, 1, 1], [], []>} : vector<32x32xbf16>, vector<32x128xbf16>, vector<32x128xf32> -> vector<32x128xf32>
    %161 = arith.addf %125, %160 : vector<32x128xf32>
    %cst_72 = arith.constant 5.000000e-01 : f32
    %162 = vector.broadcast %cst_72 : f32 to vector<32x128xf32>
    %163 = arith.mulf %161, %162 : vector<32x128xf32>
    %cst_73 = arith.constant 5.000000e-01 : f32
    %164 = vector.broadcast %cst_73 : f32 to vector<32x128xf32>
    %165 = arith.cmpf oge, %163, %164 : vector<32x128xf32>
    %cst_74 = arith.constant 0.000000e+00 : bf16
    %166 = vector.broadcast %cst_74 : bf16 to vector<32x128xbf16>
    %167 = arith.select %165, %159, %166 : vector<32x128xi1>, vector<32x128xbf16>
    %cst_75 = arith.constant dense<0.000000e+00> : vector<32x128xf32>
    %168 = tpu.matmul %4, %167, %cst_75 {dimension_numbers = #tpu.dot_dimension_numbers<[1], [0], [0], [1], [0, 0, 1, 1], [], []>} : vector<32x32xbf16>, vector<32x128xbf16>, vector<32x128xf32> -> vector<32x128xf32>
    %169 = vector.broadcast %5 : vector<32x1xf32> to vector<32x128xf32>
    %170 = arith.addf %168, %169 : vector<32x128xf32>
    %171 = arith.truncf %170 : vector<32x128xf32> to vector<32x128xbf16>
    %c3_76 = arith.constant 3 : index
    %c0_77 = arith.constant 0 : index
    %c0_78 = arith.constant 0 : index
    %172 = vector.load %arg8[%c3_76, %c0_77, %c0_78] : memref<4x32x128xbf16, #tpu.memory_space<vmem>>, vector<1x32x128xbf16>
    %173 = vector.shape_cast %172 : vector<1x32x128xbf16> to vector<32x128xbf16>
    %174 = vector.shape_cast %171 : vector<32x128xbf16> to vector<1x32x128xbf16>
    tpu.vector_store %arg8[%c3_76, %c0_77, %c0_78], %174 {strides = array<i32>} : memref<4x32x128xbf16, #tpu.memory_space<vmem>>, vector<1x32x128xbf16>,
    %cst_79 = arith.constant dense<0.000000e+00> : vector<32xf32>
    %175 = vector.multi_reduction <add>, %170, %cst_79 [1] : vector<32x128xf32> to vector<32xf32>
    %176 = vector.shape_cast %175 : vector<32xf32> to vector<32x1xf32>
    %177 = arith.mulf %170, %170 : vector<32x128xf32>
    %cst_80 = arith.constant dense<0.000000e+00> : vector<32xf32>
    %178 = vector.multi_reduction <add>, %177, %cst_80 [1] : vector<32x128xf32> to vector<32xf32>
    %179 = vector.shape_cast %178 : vector<32xf32> to vector<32x1xf32>
    %180 = arith.addf %140, %176 : vector<32x1xf32>
    %181 = arith.addf %141, %179 : vector<32x1xf32>
    %182 = tpu.concatenate %180, %181 in 1 : vector<32x1xf32>, vector<32x1xf32> -> vector<32x2xf32>
    %183 = vector.shape_cast %182 : vector<32x2xf32> to vector<1x32x2xf32>
    %c0_81 = arith.constant 0 : index
    %c0_82 = arith.constant 0 : index
    %c0_83 = arith.constant 0 : index
    %184 = vector.load %arg9[%c0_81, %c0_82, %c0_83] : memref<1x32x2xf32, #tpu.memory_space<vmem>>, vector<1x32x2xf32>
    tpu.vector_store %arg9[%c0_81, %c0_82, %c0_83], %183 {strides = array<i32>} : memref<1x32x2xf32, #tpu.memory_space<vmem>>, vector<1x32x2xf32>,
    return
  }
  func.func @transform_0(%arg0: i32) -> (i32, i32, i32) {
    %c0_i32 = arith.constant 0 : i32
    %c0_i32_0 = arith.constant 0 : i32
    %c0_i32_1 = arith.constant 0 : i32
    return %c0_i32, %c0_i32_0, %arg0 : i32, i32, i32
  }
  func.func @transform_1(%arg0: i32) -> (i32, i32) {
    %c0_i32 = arith.constant 0 : i32
    %c0_i32_0 = arith.constant 0 : i32
    %c0_i32_1 = arith.constant 0 : i32
    return %c0_i32, %c0_i32_0 : i32, i32
  }
  func.func @transform_2(%arg0: i32) -> (i32, i32) {
    %c0_i32 = arith.constant 0 : i32
    %c0_i32_0 = arith.constant 0 : i32
    %c0_i32_1 = arith.constant 0 : i32
    return %c0_i32, %c0_i32_0 : i32, i32
  }
  func.func @transform_3(%arg0: i32) -> (i32, i32) {
    %c0_i32 = arith.constant 0 : i32
    %c0_i32_0 = arith.constant 0 : i32
    %c0_i32_1 = arith.constant 0 : i32
    return %c0_i32, %c0_i32_0 : i32, i32
  }
  func.func @transform_4(%arg0: i32) -> (i32, i32) {
    %c0_i32 = arith.constant 0 : i32
    %c0_i32_0 = arith.constant 0 : i32
    %c0_i32_1 = arith.constant 0 : i32
    return %c0_i32, %c0_i32_0 : i32, i32
  }
  func.func @transform_5(%arg0: i32) -> (i32, i32) {
    %c0_i32 = arith.constant 0 : i32
    %c0_i32_0 = arith.constant 0 : i32
    %c0_i32_1 = arith.constant 0 : i32
    return %c0_i32, %c0_i32_0 : i32, i32
  }
  func.func @transform_6(%arg0: i32) -> (i32, i32) {
    %c0_i32 = arith.constant 0 : i32
    %c0_i32_0 = arith.constant 0 : i32
    %c0_i32_1 = arith.constant 0 : i32
    return %c0_i32, %c0_i32_0 : i32, i32
  }
  func.func @transform_7(%arg0: i32) -> (i32, i32, i32) {
    %c0_i32 = arith.constant 0 : i32
    %c0_i32_0 = arith.constant 0 : i32
    %c0_i32_1 = arith.constant 0 : i32
    return %c0_i32, %c0_i32_0, %arg0 : i32, i32, i32
  }
  func.func @transform_8(%arg0: i32) -> (i32, i32, i32) {
    %c0_i32 = arith.constant 0 : i32
    %c0_i32_0 = arith.constant 0 : i32
    %c0_i32_1 = arith.constant 0 : i32
    return %arg0, %c0_i32, %c0_i32_0 : i32, i32, i32
  }
}

module attributes {stable_mosaic.version = 11 : i64} {
  func.func @proj_kernel(%arg0: i32, %arg1: memref<4x32x128xf32, #tpu.memory_space<vmem>>, %arg2: memref<4x32x128xbf16, #tpu.memory_space<vmem>>, %arg3: memref<32x1xf32, #tpu.memory_space<vmem>>, %arg4: memref<32x1xf32, #tpu.memory_space<vmem>>, %arg5: memref<128x32xbf16, #tpu.memory_space<vmem>>, %arg6: memref<128x1xf32, #tpu.memory_space<vmem>>, %arg7: memref<4x32x128xf32, #tpu.memory_space<vmem>>, %arg8: memref<1x128x2xf32, #tpu.memory_space<vmem>>) attributes {dimension_semantics = [#tpu.dimension_semantics<parallel>], iteration_bounds = array<i64: 1>, scalar_prefetch = 0 : i64, scratch_operands = 0 : i64, tpu.core_type = #tpu.core_type<tc>, window_params = [{transform_indices = @transform_0, window_bounds = array<i64: 4, 32, 128>}, {transform_indices = @transform_1, window_bounds = array<i64: 4, 32, 128>}, {pipeline_mode = #tpu.pipeline_mode<synchronous>, transform_indices = @transform_2, window_bounds = array<i64: 32, 1>}, {pipeline_mode = #tpu.pipeline_mode<synchronous>, transform_indices = @transform_3, window_bounds = array<i64: 32, 1>}, {pipeline_mode = #tpu.pipeline_mode<synchronous>, transform_indices = @transform_4, window_bounds = array<i64: 128, 32>}, {pipeline_mode = #tpu.pipeline_mode<synchronous>, transform_indices = @transform_5, window_bounds = array<i64: 128, 1>}, {transform_indices = @transform_6, window_bounds = array<i64: 4, 32, 128>}, {transform_indices = @transform_7, window_bounds = array<i64: 1, 128, 2>}]} {
    %c0 = arith.constant 0 : index
    %c0_0 = arith.constant 0 : index
    %0 = vector.load %arg3[%c0, %c0_0] : memref<32x1xf32, #tpu.memory_space<vmem>>, vector<32x1xf32>
    %c0_1 = arith.constant 0 : index
    %c0_2 = arith.constant 0 : index
    %1 = vector.load %arg4[%c0_1, %c0_2] : memref<32x1xf32, #tpu.memory_space<vmem>>, vector<32x1xf32>
    %c0_3 = arith.constant 0 : index
    %c0_4 = arith.constant 0 : index
    %2 = vector.load %arg5[%c0_3, %c0_4] : memref<128x32xbf16, #tpu.memory_space<vmem>>, vector<128x32xbf16>
    %c0_5 = arith.constant 0 : index
    %c0_6 = arith.constant 0 : index
    %3 = vector.load %arg6[%c0_5, %c0_6] : memref<128x1xf32, #tpu.memory_space<vmem>>, vector<128x1xf32>
    %cst = arith.constant 0.000000e+00 : f32
    %4 = vector.broadcast %cst : f32 to vector<32x128xf32>
    %cst_7 = arith.constant 0.000000e+00 : f32
    %5 = vector.broadcast %cst_7 : f32 to vector<128x1xf32>
    %cst_8 = arith.constant 0.000000e+00 : f32
    %6 = vector.broadcast %cst_8 : f32 to vector<128x1xf32>
    %c0_9 = arith.constant 0 : index
    %c0_10 = arith.constant 0 : index
    %c0_11 = arith.constant 0 : index
    %7 = vector.load %arg2[%c0_9, %c0_10, %c0_11] : memref<4x32x128xbf16, #tpu.memory_space<vmem>>, vector<1x32x128xbf16>
    %8 = vector.shape_cast %7 : vector<1x32x128xbf16> to vector<32x128xbf16>
    %9 = arith.extf %8 : vector<32x128xbf16> to vector<32x128xf32>
    %10 = vector.broadcast %0 : vector<32x1xf32> to vector<32x128xf32>
    %11 = arith.mulf %9, %10 : vector<32x128xf32>
    %12 = vector.broadcast %1 : vector<32x1xf32> to vector<32x128xf32>
    %13 = arith.addf %11, %12 : vector<32x128xf32>
    %14 = arith.addf %4, %13 : vector<32x128xf32>
    %cst_12 = arith.constant 5.000000e-01 : f32
    %15 = vector.broadcast %cst_12 : f32 to vector<32x128xf32>
    %16 = arith.mulf %14, %15 : vector<32x128xf32>
    %cst_13 = arith.constant 1.000000e+00 : f32
    %17 = vector.broadcast %cst_13 : f32 to vector<32x128xf32>
    %18 = arith.cmpf oge, %16, %17 : vector<32x128xf32>
    %cst_14 = arith.constant 0.000000e+00 : f32
    %19 = vector.broadcast %cst_14 : f32 to vector<32x128xf32>
    %20 = arith.select %18, %19, %16 : vector<32x128xi1>, vector<32x128xf32>
    %c0_15 = arith.constant 0 : index
    %c0_16 = arith.constant 0 : index
    %c0_17 = arith.constant 0 : index
    %21 = vector.load %arg1[%c0_15, %c0_16, %c0_17] : memref<4x32x128xf32, #tpu.memory_space<vmem>>, vector<1x32x128xf32>
    %22 = vector.shape_cast %21 : vector<1x32x128xf32> to vector<32x128xf32>
    %23 = arith.extui %18 : vector<32x128xi1> to vector<32x128xi32>
    %24 = arith.sitofp %23 : vector<32x128xi32> to vector<32x128xf32>
    %25 = arith.addf %22, %24 : vector<32x128xf32>
    %c0_18 = arith.constant 0 : index
    %c0_19 = arith.constant 0 : index
    %c0_20 = arith.constant 0 : index
    %26 = vector.load %arg7[%c0_18, %c0_19, %c0_20] : memref<4x32x128xf32, #tpu.memory_space<vmem>>, vector<1x32x128xf32>
    %27 = vector.shape_cast %26 : vector<1x32x128xf32> to vector<32x128xf32>
    %28 = vector.shape_cast %25 : vector<32x128xf32> to vector<1x32x128xf32>
    tpu.vector_store %arg7[%c0_18, %c0_19, %c0_20], %28 {strides = array<i32>} : memref<4x32x128xf32, #tpu.memory_space<vmem>>, vector<1x32x128xf32>,
    %29 = arith.truncf %25 : vector<32x128xf32> to vector<32x128xbf16>
    %cst_21 = arith.constant dense<0.000000e+00> : vector<128x128xf32>
    %30 = tpu.matmul %2, %29, %cst_21 {dimension_numbers = #tpu.dot_dimension_numbers<[1], [0], [0], [1], [0, 0, 1, 1], [], []>} : vector<128x32xbf16>, vector<32x128xbf16>, vector<128x128xf32> -> vector<128x128xf32>
    %31 = vector.broadcast %3 : vector<128x1xf32> to vector<128x128xf32>
    %32 = arith.addf %30, %31 : vector<128x128xf32>
    %cst_22 = arith.constant dense<0.000000e+00> : vector<128xf32>
    %33 = vector.multi_reduction <add>, %32, %cst_22 [1] : vector<128x128xf32> to vector<128xf32>
    %34 = vector.shape_cast %33 : vector<128xf32> to vector<128x1xf32>
    %35 = arith.mulf %32, %32 : vector<128x128xf32>
    %cst_23 = arith.constant dense<0.000000e+00> : vector<128xf32>
    %36 = vector.multi_reduction <add>, %35, %cst_23 [1] : vector<128x128xf32> to vector<128xf32>
    %37 = vector.shape_cast %36 : vector<128xf32> to vector<128x1xf32>
    %38 = arith.addf %5, %34 : vector<128x1xf32>
    %39 = arith.addf %6, %37 : vector<128x1xf32>
    %c1 = arith.constant 1 : index
    %c0_24 = arith.constant 0 : index
    %c0_25 = arith.constant 0 : index
    %40 = vector.load %arg2[%c1, %c0_24, %c0_25] : memref<4x32x128xbf16, #tpu.memory_space<vmem>>, vector<1x32x128xbf16>
    %41 = vector.shape_cast %40 : vector<1x32x128xbf16> to vector<32x128xbf16>
    %42 = arith.extf %41 : vector<32x128xbf16> to vector<32x128xf32>
    %43 = vector.broadcast %0 : vector<32x1xf32> to vector<32x128xf32>
    %44 = arith.mulf %42, %43 : vector<32x128xf32>
    %45 = vector.broadcast %1 : vector<32x1xf32> to vector<32x128xf32>
    %46 = arith.addf %44, %45 : vector<32x128xf32>
    %47 = arith.addf %20, %46 : vector<32x128xf32>
    %cst_26 = arith.constant 5.000000e-01 : f32
    %48 = vector.broadcast %cst_26 : f32 to vector<32x128xf32>
    %49 = arith.mulf %47, %48 : vector<32x128xf32>
    %cst_27 = arith.constant 1.000000e+00 : f32
    %50 = vector.broadcast %cst_27 : f32 to vector<32x128xf32>
    %51 = arith.cmpf oge, %49, %50 : vector<32x128xf32>
    %cst_28 = arith.constant 0.000000e+00 : f32
    %52 = vector.broadcast %cst_28 : f32 to vector<32x128xf32>
    %53 = arith.select %51, %52, %49 : vector<32x128xi1>, vector<32x128xf32>
    %c1_29 = arith.constant 1 : index
    %c0_30 = arith.constant 0 : index
    %c0_31 = arith.constant 0 : index
    %54 = vector.load %arg1[%c1_29, %c0_30, %c0_31] : memref<4x32x128xf32, #tpu.memory_space<vmem>>, vector<1x32x128xf32>
    %55 = vector.shape_cast %54 : vector<1x32x128xf32> to vector<32x128xf32>
    %56 = arith.extui %51 : vector<32x128xi1> to vector<32x128xi32>
    %57 = arith.sitofp %56 : vector<32x128xi32> to vector<32x128xf32>
    %58 = arith.addf %55, %57 : vector<32x128xf32>
    %c1_32 = arith.constant 1 : index
    %c0_33 = arith.constant 0 : index
    %c0_34 = arith.constant 0 : index
    %59 = vector.load %arg7[%c1_32, %c0_33, %c0_34] : memref<4x32x128xf32, #tpu.memory_space<vmem>>, vector<1x32x128xf32>
    %60 = vector.shape_cast %59 : vector<1x32x128xf32> to vector<32x128xf32>
    %61 = vector.shape_cast %58 : vector<32x128xf32> to vector<1x32x128xf32>
    tpu.vector_store %arg7[%c1_32, %c0_33, %c0_34], %61 {strides = array<i32>} : memref<4x32x128xf32, #tpu.memory_space<vmem>>, vector<1x32x128xf32>,
    %62 = arith.truncf %58 : vector<32x128xf32> to vector<32x128xbf16>
    %cst_35 = arith.constant dense<0.000000e+00> : vector<128x128xf32>
    %63 = tpu.matmul %2, %62, %cst_35 {dimension_numbers = #tpu.dot_dimension_numbers<[1], [0], [0], [1], [0, 0, 1, 1], [], []>} : vector<128x32xbf16>, vector<32x128xbf16>, vector<128x128xf32> -> vector<128x128xf32>
    %64 = vector.broadcast %3 : vector<128x1xf32> to vector<128x128xf32>
    %65 = arith.addf %63, %64 : vector<128x128xf32>
    %cst_36 = arith.constant dense<0.000000e+00> : vector<128xf32>
    %66 = vector.multi_reduction <add>, %65, %cst_36 [1] : vector<128x128xf32> to vector<128xf32>
    %67 = vector.shape_cast %66 : vector<128xf32> to vector<128x1xf32>
    %68 = arith.mulf %65, %65 : vector<128x128xf32>
    %cst_37 = arith.constant dense<0.000000e+00> : vector<128xf32>
    %69 = vector.multi_reduction <add>, %68, %cst_37 [1] : vector<128x128xf32> to vector<128xf32>
    %70 = vector.shape_cast %69 : vector<128xf32> to vector<128x1xf32>
    %71 = arith.addf %38, %67 : vector<128x1xf32>
    %72 = arith.addf %39, %70 : vector<128x1xf32>
    %c2 = arith.constant 2 : index
    %c0_38 = arith.constant 0 : index
    %c0_39 = arith.constant 0 : index
    %73 = vector.load %arg2[%c2, %c0_38, %c0_39] : memref<4x32x128xbf16, #tpu.memory_space<vmem>>, vector<1x32x128xbf16>
    %74 = vector.shape_cast %73 : vector<1x32x128xbf16> to vector<32x128xbf16>
    %75 = arith.extf %74 : vector<32x128xbf16> to vector<32x128xf32>
    %76 = vector.broadcast %0 : vector<32x1xf32> to vector<32x128xf32>
    %77 = arith.mulf %75, %76 : vector<32x128xf32>
    %78 = vector.broadcast %1 : vector<32x1xf32> to vector<32x128xf32>
    %79 = arith.addf %77, %78 : vector<32x128xf32>
    %80 = arith.addf %53, %79 : vector<32x128xf32>
    %cst_40 = arith.constant 5.000000e-01 : f32
    %81 = vector.broadcast %cst_40 : f32 to vector<32x128xf32>
    %82 = arith.mulf %80, %81 : vector<32x128xf32>
    %cst_41 = arith.constant 1.000000e+00 : f32
    %83 = vector.broadcast %cst_41 : f32 to vector<32x128xf32>
    %84 = arith.cmpf oge, %82, %83 : vector<32x128xf32>
    %cst_42 = arith.constant 0.000000e+00 : f32
    %85 = vector.broadcast %cst_42 : f32 to vector<32x128xf32>
    %86 = arith.select %84, %85, %82 : vector<32x128xi1>, vector<32x128xf32>
    %c2_43 = arith.constant 2 : index
    %c0_44 = arith.constant 0 : index
    %c0_45 = arith.constant 0 : index
    %87 = vector.load %arg1[%c2_43, %c0_44, %c0_45] : memref<4x32x128xf32, #tpu.memory_space<vmem>>, vector<1x32x128xf32>
    %88 = vector.shape_cast %87 : vector<1x32x128xf32> to vector<32x128xf32>
    %89 = arith.extui %84 : vector<32x128xi1> to vector<32x128xi32>
    %90 = arith.sitofp %89 : vector<32x128xi32> to vector<32x128xf32>
    %91 = arith.addf %88, %90 : vector<32x128xf32>
    %c2_46 = arith.constant 2 : index
    %c0_47 = arith.constant 0 : index
    %c0_48 = arith.constant 0 : index
    %92 = vector.load %arg7[%c2_46, %c0_47, %c0_48] : memref<4x32x128xf32, #tpu.memory_space<vmem>>, vector<1x32x128xf32>
    %93 = vector.shape_cast %92 : vector<1x32x128xf32> to vector<32x128xf32>
    %94 = vector.shape_cast %91 : vector<32x128xf32> to vector<1x32x128xf32>
    tpu.vector_store %arg7[%c2_46, %c0_47, %c0_48], %94 {strides = array<i32>} : memref<4x32x128xf32, #tpu.memory_space<vmem>>, vector<1x32x128xf32>,
    %95 = arith.truncf %91 : vector<32x128xf32> to vector<32x128xbf16>
    %cst_49 = arith.constant dense<0.000000e+00> : vector<128x128xf32>
    %96 = tpu.matmul %2, %95, %cst_49 {dimension_numbers = #tpu.dot_dimension_numbers<[1], [0], [0], [1], [0, 0, 1, 1], [], []>} : vector<128x32xbf16>, vector<32x128xbf16>, vector<128x128xf32> -> vector<128x128xf32>
    %97 = vector.broadcast %3 : vector<128x1xf32> to vector<128x128xf32>
    %98 = arith.addf %96, %97 : vector<128x128xf32>
    %cst_50 = arith.constant dense<0.000000e+00> : vector<128xf32>
    %99 = vector.multi_reduction <add>, %98, %cst_50 [1] : vector<128x128xf32> to vector<128xf32>
    %100 = vector.shape_cast %99 : vector<128xf32> to vector<128x1xf32>
    %101 = arith.mulf %98, %98 : vector<128x128xf32>
    %cst_51 = arith.constant dense<0.000000e+00> : vector<128xf32>
    %102 = vector.multi_reduction <add>, %101, %cst_51 [1] : vector<128x128xf32> to vector<128xf32>
    %103 = vector.shape_cast %102 : vector<128xf32> to vector<128x1xf32>
    %104 = arith.addf %71, %100 : vector<128x1xf32>
    %105 = arith.addf %72, %103 : vector<128x1xf32>
    %c3 = arith.constant 3 : index
    %c0_52 = arith.constant 0 : index
    %c0_53 = arith.constant 0 : index
    %106 = vector.load %arg2[%c3, %c0_52, %c0_53] : memref<4x32x128xbf16, #tpu.memory_space<vmem>>, vector<1x32x128xbf16>
    %107 = vector.shape_cast %106 : vector<1x32x128xbf16> to vector<32x128xbf16>
    %108 = arith.extf %107 : vector<32x128xbf16> to vector<32x128xf32>
    %109 = vector.broadcast %0 : vector<32x1xf32> to vector<32x128xf32>
    %110 = arith.mulf %108, %109 : vector<32x128xf32>
    %111 = vector.broadcast %1 : vector<32x1xf32> to vector<32x128xf32>
    %112 = arith.addf %110, %111 : vector<32x128xf32>
    %113 = arith.addf %86, %112 : vector<32x128xf32>
    %cst_54 = arith.constant 5.000000e-01 : f32
    %114 = vector.broadcast %cst_54 : f32 to vector<32x128xf32>
    %115 = arith.mulf %113, %114 : vector<32x128xf32>
    %cst_55 = arith.constant 1.000000e+00 : f32
    %116 = vector.broadcast %cst_55 : f32 to vector<32x128xf32>
    %117 = arith.cmpf oge, %115, %116 : vector<32x128xf32>
    %c3_56 = arith.constant 3 : index
    %c0_57 = arith.constant 0 : index
    %c0_58 = arith.constant 0 : index
    %118 = vector.load %arg1[%c3_56, %c0_57, %c0_58] : memref<4x32x128xf32, #tpu.memory_space<vmem>>, vector<1x32x128xf32>
    %119 = vector.shape_cast %118 : vector<1x32x128xf32> to vector<32x128xf32>
    %120 = arith.extui %117 : vector<32x128xi1> to vector<32x128xi32>
    %121 = arith.sitofp %120 : vector<32x128xi32> to vector<32x128xf32>
    %122 = arith.addf %119, %121 : vector<32x128xf32>
    %c3_59 = arith.constant 3 : index
    %c0_60 = arith.constant 0 : index
    %c0_61 = arith.constant 0 : index
    %123 = vector.load %arg7[%c3_59, %c0_60, %c0_61] : memref<4x32x128xf32, #tpu.memory_space<vmem>>, vector<1x32x128xf32>
    %124 = vector.shape_cast %123 : vector<1x32x128xf32> to vector<32x128xf32>
    %125 = vector.shape_cast %122 : vector<32x128xf32> to vector<1x32x128xf32>
    tpu.vector_store %arg7[%c3_59, %c0_60, %c0_61], %125 {strides = array<i32>} : memref<4x32x128xf32, #tpu.memory_space<vmem>>, vector<1x32x128xf32>,
    %126 = arith.truncf %122 : vector<32x128xf32> to vector<32x128xbf16>
    %cst_62 = arith.constant dense<0.000000e+00> : vector<128x128xf32>
    %127 = tpu.matmul %2, %126, %cst_62 {dimension_numbers = #tpu.dot_dimension_numbers<[1], [0], [0], [1], [0, 0, 1, 1], [], []>} : vector<128x32xbf16>, vector<32x128xbf16>, vector<128x128xf32> -> vector<128x128xf32>
    %128 = vector.broadcast %3 : vector<128x1xf32> to vector<128x128xf32>
    %129 = arith.addf %127, %128 : vector<128x128xf32>
    %cst_63 = arith.constant dense<0.000000e+00> : vector<128xf32>
    %130 = vector.multi_reduction <add>, %129, %cst_63 [1] : vector<128x128xf32> to vector<128xf32>
    %131 = vector.shape_cast %130 : vector<128xf32> to vector<128x1xf32>
    %132 = arith.mulf %129, %129 : vector<128x128xf32>
    %cst_64 = arith.constant dense<0.000000e+00> : vector<128xf32>
    %133 = vector.multi_reduction <add>, %132, %cst_64 [1] : vector<128x128xf32> to vector<128xf32>
    %134 = vector.shape_cast %133 : vector<128xf32> to vector<128x1xf32>
    %135 = arith.addf %104, %131 : vector<128x1xf32>
    %136 = arith.addf %105, %134 : vector<128x1xf32>
    %137 = tpu.concatenate %135, %136 in 1 : vector<128x1xf32>, vector<128x1xf32> -> vector<128x2xf32>
    %138 = vector.shape_cast %137 : vector<128x2xf32> to vector<1x128x2xf32>
    %c0_65 = arith.constant 0 : index
    %c0_66 = arith.constant 0 : index
    %c0_67 = arith.constant 0 : index
    %139 = vector.load %arg8[%c0_65, %c0_66, %c0_67] : memref<1x128x2xf32, #tpu.memory_space<vmem>>, vector<1x128x2xf32>
    tpu.vector_store %arg8[%c0_65, %c0_66, %c0_67], %138 {strides = array<i32>} : memref<1x128x2xf32, #tpu.memory_space<vmem>>, vector<1x128x2xf32>,
    return
  }
  func.func @transform_0(%arg0: i32) -> (i32, i32, i32) {
    %c0_i32 = arith.constant 0 : i32
    %c0_i32_0 = arith.constant 0 : i32
    %c0_i32_1 = arith.constant 0 : i32
    return %c0_i32, %c0_i32_0, %arg0 : i32, i32, i32
  }
  func.func @transform_1(%arg0: i32) -> (i32, i32, i32) {
    %c0_i32 = arith.constant 0 : i32
    %c0_i32_0 = arith.constant 0 : i32
    %c0_i32_1 = arith.constant 0 : i32
    return %c0_i32, %c0_i32_0, %arg0 : i32, i32, i32
  }
  func.func @transform_2(%arg0: i32) -> (i32, i32) {
    %c0_i32 = arith.constant 0 : i32
    %c0_i32_0 = arith.constant 0 : i32
    %c0_i32_1 = arith.constant 0 : i32
    return %c0_i32, %c0_i32_0 : i32, i32
  }
  func.func @transform_3(%arg0: i32) -> (i32, i32) {
    %c0_i32 = arith.constant 0 : i32
    %c0_i32_0 = arith.constant 0 : i32
    %c0_i32_1 = arith.constant 0 : i32
    return %c0_i32, %c0_i32_0 : i32, i32
  }
  func.func @transform_4(%arg0: i32) -> (i32, i32) {
    %c0_i32 = arith.constant 0 : i32
    %c0_i32_0 = arith.constant 0 : i32
    %c0_i32_1 = arith.constant 0 : i32
    return %c0_i32, %c0_i32_0 : i32, i32
  }
  func.func @transform_5(%arg0: i32) -> (i32, i32) {
    %c0_i32 = arith.constant 0 : i32
    %c0_i32_0 = arith.constant 0 : i32
    %c0_i32_1 = arith.constant 0 : i32
    return %c0_i32, %c0_i32_0 : i32, i32
  }
  func.func @transform_6(%arg0: i32) -> (i32, i32, i32) {
    %c0_i32 = arith.constant 0 : i32
    %c0_i32_0 = arith.constant 0 : i32
    %c0_i32_1 = arith.constant 0 : i32
    return %c0_i32, %c0_i32_0, %arg0 : i32, i32, i32
  }
  func.func @transform_7(%arg0: i32) -> (i32, i32, i32) {
    %c0_i32 = arith.constant 0 : i32
    %c0_i32_0 = arith.constant 0 : i32
    %c0_i32_1 = arith.constant 0 : i32
    return %arg0, %c0_i32, %c0_i32_0 : i32, i32, i32
  }
}

module attributes {stable_mosaic.version = 11 : i64} {
  func.func @mlp2_stats_kernel(%arg0: i32, %arg1: memref<4x32x128xf32, #tpu.memory_space<vmem>>, %arg2: memref<128x32xbf16, #tpu.memory_space<vmem>>, %arg3: memref<128x1xf32, #tpu.memory_space<vmem>>, %arg4: memref<128x1xf32, #tpu.memory_space<vmem>>, %arg5: memref<128x1xf32, #tpu.memory_space<vmem>>, %arg6: memref<32x128xbf16, #tpu.memory_space<vmem>>, %arg7: memref<32x1xf32, #tpu.memory_space<vmem>>, %arg8: memref<1x32x2xf32, #tpu.memory_space<vmem>>) attributes {dimension_semantics = [#tpu.dimension_semantics<parallel>], iteration_bounds = array<i64: 1>, scalar_prefetch = 0 : i64, scratch_operands = 0 : i64, tpu.core_type = #tpu.core_type<tc>, window_params = [{transform_indices = @transform_0, window_bounds = array<i64: 4, 32, 128>}, {pipeline_mode = #tpu.pipeline_mode<synchronous>, transform_indices = @transform_1, window_bounds = array<i64: 128, 32>}, {pipeline_mode = #tpu.pipeline_mode<synchronous>, transform_indices = @transform_2, window_bounds = array<i64: 128, 1>}, {pipeline_mode = #tpu.pipeline_mode<synchronous>, transform_indices = @transform_3, window_bounds = array<i64: 128, 1>}, {pipeline_mode = #tpu.pipeline_mode<synchronous>, transform_indices = @transform_4, window_bounds = array<i64: 128, 1>}, {pipeline_mode = #tpu.pipeline_mode<synchronous>, transform_indices = @transform_5, window_bounds = array<i64: 32, 128>}, {pipeline_mode = #tpu.pipeline_mode<synchronous>, transform_indices = @transform_6, window_bounds = array<i64: 32, 1>}, {transform_indices = @transform_7, window_bounds = array<i64: 1, 32, 2>}]} {
    %c0 = arith.constant 0 : index
    %c0_0 = arith.constant 0 : index
    %0 = vector.load %arg2[%c0, %c0_0] : memref<128x32xbf16, #tpu.memory_space<vmem>>, vector<128x32xbf16>
    %c0_1 = arith.constant 0 : index
    %c0_2 = arith.constant 0 : index
    %1 = vector.load %arg3[%c0_1, %c0_2] : memref<128x1xf32, #tpu.memory_space<vmem>>, vector<128x1xf32>
    %c0_3 = arith.constant 0 : index
    %c0_4 = arith.constant 0 : index
    %2 = vector.load %arg4[%c0_3, %c0_4] : memref<128x1xf32, #tpu.memory_space<vmem>>, vector<128x1xf32>
    %c0_5 = arith.constant 0 : index
    %c0_6 = arith.constant 0 : index
    %3 = vector.load %arg5[%c0_5, %c0_6] : memref<128x1xf32, #tpu.memory_space<vmem>>, vector<128x1xf32>
    %c0_7 = arith.constant 0 : index
    %c0_8 = arith.constant 0 : index
    %4 = vector.load %arg6[%c0_7, %c0_8] : memref<32x128xbf16, #tpu.memory_space<vmem>>, vector<32x128xbf16>
    %c0_9 = arith.constant 0 : index
    %c0_10 = arith.constant 0 : index
    %5 = vector.load %arg7[%c0_9, %c0_10] : memref<32x1xf32, #tpu.memory_space<vmem>>, vector<32x1xf32>
    %cst = arith.constant 0.000000e+00 : f32
    %6 = vector.broadcast %cst : f32 to vector<128x128xf32>
    %cst_11 = arith.constant 0.000000e+00 : f32
    %7 = vector.broadcast %cst_11 : f32 to vector<32x1xf32>
    %cst_12 = arith.constant 0.000000e+00 : f32
    %8 = vector.broadcast %cst_12 : f32 to vector<32x1xf32>
    %c0_13 = arith.constant 0 : index
    %c0_14 = arith.constant 0 : index
    %c0_15 = arith.constant 0 : index
    %9 = vector.load %arg1[%c0_13, %c0_14, %c0_15] : memref<4x32x128xf32, #tpu.memory_space<vmem>>, vector<1x32x128xf32>
    %10 = vector.shape_cast %9 : vector<1x32x128xf32> to vector<32x128xf32>
    %11 = arith.truncf %10 : vector<32x128xf32> to vector<32x128xbf16>
    %cst_16 = arith.constant dense<0.000000e+00> : vector<128x128xf32>
    %12 = tpu.matmul %0, %11, %cst_16 {dimension_numbers = #tpu.dot_dimension_numbers<[1], [0], [0], [1], [0, 0, 1, 1], [], []>} : vector<128x32xbf16>, vector<32x128xbf16>, vector<128x128xf32> -> vector<128x128xf32>
    %13 = vector.broadcast %1 : vector<128x1xf32> to vector<128x128xf32>
    %14 = arith.addf %12, %13 : vector<128x128xf32>
    %15 = vector.broadcast %2 : vector<128x1xf32> to vector<128x128xf32>
    %16 = arith.mulf %14, %15 : vector<128x128xf32>
    %17 = vector.broadcast %3 : vector<128x1xf32> to vector<128x128xf32>
    %18 = arith.addf %16, %17 : vector<128x128xf32>
    %19 = arith.addf %6, %18 : vector<128x128xf32>
    %cst_17 = arith.constant 5.000000e-01 : f32
    %20 = vector.broadcast %cst_17 : f32 to vector<128x128xf32>
    %21 = arith.mulf %19, %20 : vector<128x128xf32>
    %cst_18 = arith.constant 1.000000e+00 : f32
    %22 = vector.broadcast %cst_18 : f32 to vector<128x128xf32>
    %23 = arith.cmpf oge, %21, %22 : vector<128x128xf32>
    %cst_19 = arith.constant 0.000000e+00 : f32
    %24 = vector.broadcast %cst_19 : f32 to vector<128x128xf32>
    %25 = arith.select %23, %24, %21 : vector<128x128xi1>, vector<128x128xf32>
    %26 = arith.extui %23 : vector<128x128xi1> to vector<128x128xi32>
    %27 = arith.sitofp %26 : vector<128x128xi32> to vector<128x128xf32>
    %28 = arith.truncf %27 : vector<128x128xf32> to vector<128x128xbf16>
    %cst_20 = arith.constant dense<0.000000e+00> : vector<32x128xf32>
    %29 = tpu.matmul %4, %28, %cst_20 {dimension_numbers = #tpu.dot_dimension_numbers<[1], [0], [0], [1], [0, 0, 1, 1], [], []>} : vector<32x128xbf16>, vector<128x128xbf16>, vector<32x128xf32> -> vector<32x128xf32>
    %30 = vector.broadcast %5 : vector<32x1xf32> to vector<32x128xf32>
    %31 = arith.addf %29, %30 : vector<32x128xf32>
    %cst_21 = arith.constant dense<0.000000e+00> : vector<32xf32>
    %32 = vector.multi_reduction <add>, %31, %cst_21 [1] : vector<32x128xf32> to vector<32xf32>
    %33 = vector.shape_cast %32 : vector<32xf32> to vector<32x1xf32>
    %34 = arith.mulf %31, %31 : vector<32x128xf32>
    %cst_22 = arith.constant dense<0.000000e+00> : vector<32xf32>
    %35 = vector.multi_reduction <add>, %34, %cst_22 [1] : vector<32x128xf32> to vector<32xf32>
    %36 = vector.shape_cast %35 : vector<32xf32> to vector<32x1xf32>
    %37 = arith.addf %7, %33 : vector<32x1xf32>
    %38 = arith.addf %8, %36 : vector<32x1xf32>
    %c1 = arith.constant 1 : index
    %c0_23 = arith.constant 0 : index
    %c0_24 = arith.constant 0 : index
    %39 = vector.load %arg1[%c1, %c0_23, %c0_24] : memref<4x32x128xf32, #tpu.memory_space<vmem>>, vector<1x32x128xf32>
    %40 = vector.shape_cast %39 : vector<1x32x128xf32> to vector<32x128xf32>
    %41 = arith.truncf %40 : vector<32x128xf32> to vector<32x128xbf16>
    %cst_25 = arith.constant dense<0.000000e+00> : vector<128x128xf32>
    %42 = tpu.matmul %0, %41, %cst_25 {dimension_numbers = #tpu.dot_dimension_numbers<[1], [0], [0], [1], [0, 0, 1, 1], [], []>} : vector<128x32xbf16>, vector<32x128xbf16>, vector<128x128xf32> -> vector<128x128xf32>
    %43 = vector.broadcast %1 : vector<128x1xf32> to vector<128x128xf32>
    %44 = arith.addf %42, %43 : vector<128x128xf32>
    %45 = vector.broadcast %2 : vector<128x1xf32> to vector<128x128xf32>
    %46 = arith.mulf %44, %45 : vector<128x128xf32>
    %47 = vector.broadcast %3 : vector<128x1xf32> to vector<128x128xf32>
    %48 = arith.addf %46, %47 : vector<128x128xf32>
    %49 = arith.addf %25, %48 : vector<128x128xf32>
    %cst_26 = arith.constant 5.000000e-01 : f32
    %50 = vector.broadcast %cst_26 : f32 to vector<128x128xf32>
    %51 = arith.mulf %49, %50 : vector<128x128xf32>
    %cst_27 = arith.constant 1.000000e+00 : f32
    %52 = vector.broadcast %cst_27 : f32 to vector<128x128xf32>
    %53 = arith.cmpf oge, %51, %52 : vector<128x128xf32>
    %cst_28 = arith.constant 0.000000e+00 : f32
    %54 = vector.broadcast %cst_28 : f32 to vector<128x128xf32>
    %55 = arith.select %53, %54, %51 : vector<128x128xi1>, vector<128x128xf32>
    %56 = arith.extui %53 : vector<128x128xi1> to vector<128x128xi32>
    %57 = arith.sitofp %56 : vector<128x128xi32> to vector<128x128xf32>
    %58 = arith.truncf %57 : vector<128x128xf32> to vector<128x128xbf16>
    %cst_29 = arith.constant dense<0.000000e+00> : vector<32x128xf32>
    %59 = tpu.matmul %4, %58, %cst_29 {dimension_numbers = #tpu.dot_dimension_numbers<[1], [0], [0], [1], [0, 0, 1, 1], [], []>} : vector<32x128xbf16>, vector<128x128xbf16>, vector<32x128xf32> -> vector<32x128xf32>
    %60 = vector.broadcast %5 : vector<32x1xf32> to vector<32x128xf32>
    %61 = arith.addf %59, %60 : vector<32x128xf32>
    %cst_30 = arith.constant dense<0.000000e+00> : vector<32xf32>
    %62 = vector.multi_reduction <add>, %61, %cst_30 [1] : vector<32x128xf32> to vector<32xf32>
    %63 = vector.shape_cast %62 : vector<32xf32> to vector<32x1xf32>
    %64 = arith.mulf %61, %61 : vector<32x128xf32>
    %cst_31 = arith.constant dense<0.000000e+00> : vector<32xf32>
    %65 = vector.multi_reduction <add>, %64, %cst_31 [1] : vector<32x128xf32> to vector<32xf32>
    %66 = vector.shape_cast %65 : vector<32xf32> to vector<32x1xf32>
    %67 = arith.addf %37, %63 : vector<32x1xf32>
    %68 = arith.addf %38, %66 : vector<32x1xf32>
    %c2 = arith.constant 2 : index
    %c0_32 = arith.constant 0 : index
    %c0_33 = arith.constant 0 : index
    %69 = vector.load %arg1[%c2, %c0_32, %c0_33] : memref<4x32x128xf32, #tpu.memory_space<vmem>>, vector<1x32x128xf32>
    %70 = vector.shape_cast %69 : vector<1x32x128xf32> to vector<32x128xf32>
    %71 = arith.truncf %70 : vector<32x128xf32> to vector<32x128xbf16>
    %cst_34 = arith.constant dense<0.000000e+00> : vector<128x128xf32>
    %72 = tpu.matmul %0, %71, %cst_34 {dimension_numbers = #tpu.dot_dimension_numbers<[1], [0], [0], [1], [0, 0, 1, 1], [], []>} : vector<128x32xbf16>, vector<32x128xbf16>, vector<128x128xf32> -> vector<128x128xf32>
    %73 = vector.broadcast %1 : vector<128x1xf32> to vector<128x128xf32>
    %74 = arith.addf %72, %73 : vector<128x128xf32>
    %75 = vector.broadcast %2 : vector<128x1xf32> to vector<128x128xf32>
    %76 = arith.mulf %74, %75 : vector<128x128xf32>
    %77 = vector.broadcast %3 : vector<128x1xf32> to vector<128x128xf32>
    %78 = arith.addf %76, %77 : vector<128x128xf32>
    %79 = arith.addf %55, %78 : vector<128x128xf32>
    %cst_35 = arith.constant 5.000000e-01 : f32
    %80 = vector.broadcast %cst_35 : f32 to vector<128x128xf32>
    %81 = arith.mulf %79, %80 : vector<128x128xf32>
    %cst_36 = arith.constant 1.000000e+00 : f32
    %82 = vector.broadcast %cst_36 : f32 to vector<128x128xf32>
    %83 = arith.cmpf oge, %81, %82 : vector<128x128xf32>
    %cst_37 = arith.constant 0.000000e+00 : f32
    %84 = vector.broadcast %cst_37 : f32 to vector<128x128xf32>
    %85 = arith.select %83, %84, %81 : vector<128x128xi1>, vector<128x128xf32>
    %86 = arith.extui %83 : vector<128x128xi1> to vector<128x128xi32>
    %87 = arith.sitofp %86 : vector<128x128xi32> to vector<128x128xf32>
    %88 = arith.truncf %87 : vector<128x128xf32> to vector<128x128xbf16>
    %cst_38 = arith.constant dense<0.000000e+00> : vector<32x128xf32>
    %89 = tpu.matmul %4, %88, %cst_38 {dimension_numbers = #tpu.dot_dimension_numbers<[1], [0], [0], [1], [0, 0, 1, 1], [], []>} : vector<32x128xbf16>, vector<128x128xbf16>, vector<32x128xf32> -> vector<32x128xf32>
    %90 = vector.broadcast %5 : vector<32x1xf32> to vector<32x128xf32>
    %91 = arith.addf %89, %90 : vector<32x128xf32>
    %cst_39 = arith.constant dense<0.000000e+00> : vector<32xf32>
    %92 = vector.multi_reduction <add>, %91, %cst_39 [1] : vector<32x128xf32> to vector<32xf32>
    %93 = vector.shape_cast %92 : vector<32xf32> to vector<32x1xf32>
    %94 = arith.mulf %91, %91 : vector<32x128xf32>
    %cst_40 = arith.constant dense<0.000000e+00> : vector<32xf32>
    %95 = vector.multi_reduction <add>, %94, %cst_40 [1] : vector<32x128xf32> to vector<32xf32>
    %96 = vector.shape_cast %95 : vector<32xf32> to vector<32x1xf32>
    %97 = arith.addf %67, %93 : vector<32x1xf32>
    %98 = arith.addf %68, %96 : vector<32x1xf32>
    %c3 = arith.constant 3 : index
    %c0_41 = arith.constant 0 : index
    %c0_42 = arith.constant 0 : index
    %99 = vector.load %arg1[%c3, %c0_41, %c0_42] : memref<4x32x128xf32, #tpu.memory_space<vmem>>, vector<1x32x128xf32>
    %100 = vector.shape_cast %99 : vector<1x32x128xf32> to vector<32x128xf32>
    %101 = arith.truncf %100 : vector<32x128xf32> to vector<32x128xbf16>
    %cst_43 = arith.constant dense<0.000000e+00> : vector<128x128xf32>
    %102 = tpu.matmul %0, %101, %cst_43 {dimension_numbers = #tpu.dot_dimension_numbers<[1], [0], [0], [1], [0, 0, 1, 1], [], []>} : vector<128x32xbf16>, vector<32x128xbf16>, vector<128x128xf32> -> vector<128x128xf32>
    %103 = vector.broadcast %1 : vector<128x1xf32> to vector<128x128xf32>
    %104 = arith.addf %102, %103 : vector<128x128xf32>
    %105 = vector.broadcast %2 : vector<128x1xf32> to vector<128x128xf32>
    %106 = arith.mulf %104, %105 : vector<128x128xf32>
    %107 = vector.broadcast %3 : vector<128x1xf32> to vector<128x128xf32>
    %108 = arith.addf %106, %107 : vector<128x128xf32>
    %109 = arith.addf %85, %108 : vector<128x128xf32>
    %cst_44 = arith.constant 5.000000e-01 : f32
    %110 = vector.broadcast %cst_44 : f32 to vector<128x128xf32>
    %111 = arith.mulf %109, %110 : vector<128x128xf32>
    %cst_45 = arith.constant 1.000000e+00 : f32
    %112 = vector.broadcast %cst_45 : f32 to vector<128x128xf32>
    %113 = arith.cmpf oge, %111, %112 : vector<128x128xf32>
    %114 = arith.extui %113 : vector<128x128xi1> to vector<128x128xi32>
    %115 = arith.sitofp %114 : vector<128x128xi32> to vector<128x128xf32>
    %116 = arith.truncf %115 : vector<128x128xf32> to vector<128x128xbf16>
    %cst_46 = arith.constant dense<0.000000e+00> : vector<32x128xf32>
    %117 = tpu.matmul %4, %116, %cst_46 {dimension_numbers = #tpu.dot_dimension_numbers<[1], [0], [0], [1], [0, 0, 1, 1], [], []>} : vector<32x128xbf16>, vector<128x128xbf16>, vector<32x128xf32> -> vector<32x128xf32>
    %118 = vector.broadcast %5 : vector<32x1xf32> to vector<32x128xf32>
    %119 = arith.addf %117, %118 : vector<32x128xf32>
    %cst_47 = arith.constant dense<0.000000e+00> : vector<32xf32>
    %120 = vector.multi_reduction <add>, %119, %cst_47 [1] : vector<32x128xf32> to vector<32xf32>
    %121 = vector.shape_cast %120 : vector<32xf32> to vector<32x1xf32>
    %122 = arith.mulf %119, %119 : vector<32x128xf32>
    %cst_48 = arith.constant dense<0.000000e+00> : vector<32xf32>
    %123 = vector.multi_reduction <add>, %122, %cst_48 [1] : vector<32x128xf32> to vector<32xf32>
    %124 = vector.shape_cast %123 : vector<32xf32> to vector<32x1xf32>
    %125 = arith.addf %97, %121 : vector<32x1xf32>
    %126 = arith.addf %98, %124 : vector<32x1xf32>
    %127 = tpu.concatenate %125, %126 in 1 : vector<32x1xf32>, vector<32x1xf32> -> vector<32x2xf32>
    %128 = vector.shape_cast %127 : vector<32x2xf32> to vector<1x32x2xf32>
    %c0_49 = arith.constant 0 : index
    %c0_50 = arith.constant 0 : index
    %c0_51 = arith.constant 0 : index
    %129 = vector.load %arg8[%c0_49, %c0_50, %c0_51] : memref<1x32x2xf32, #tpu.memory_space<vmem>>, vector<1x32x2xf32>
    tpu.vector_store %arg8[%c0_49, %c0_50, %c0_51], %128 {strides = array<i32>} : memref<1x32x2xf32, #tpu.memory_space<vmem>>, vector<1x32x2xf32>,
    return
  }
  func.func @transform_0(%arg0: i32) -> (i32, i32, i32) {
    %c0_i32 = arith.constant 0 : i32
    %c0_i32_0 = arith.constant 0 : i32
    %c0_i32_1 = arith.constant 0 : i32
    return %c0_i32, %c0_i32_0, %arg0 : i32, i32, i32
  }
  func.func @transform_1(%arg0: i32) -> (i32, i32) {
    %c0_i32 = arith.constant 0 : i32
    %c0_i32_0 = arith.constant 0 : i32
    %c0_i32_1 = arith.constant 0 : i32
    return %c0_i32, %c0_i32_0 : i32, i32
  }
  func.func @transform_2(%arg0: i32) -> (i32, i32) {
    %c0_i32 = arith.constant 0 : i32
    %c0_i32_0 = arith.constant 0 : i32
    %c0_i32_1 = arith.constant 0 : i32
    return %c0_i32, %c0_i32_0 : i32, i32
  }
  func.func @transform_3(%arg0: i32) -> (i32, i32) {
    %c0_i32 = arith.constant 0 : i32
    %c0_i32_0 = arith.constant 0 : i32
    %c0_i32_1 = arith.constant 0 : i32
    return %c0_i32, %c0_i32_0 : i32, i32
  }
  func.func @transform_4(%arg0: i32) -> (i32, i32) {
    %c0_i32 = arith.constant 0 : i32
    %c0_i32_0 = arith.constant 0 : i32
    %c0_i32_1 = arith.constant 0 : i32
    return %c0_i32, %c0_i32_0 : i32, i32
  }
  func.func @transform_5(%arg0: i32) -> (i32, i32) {
    %c0_i32 = arith.constant 0 : i32
    %c0_i32_0 = arith.constant 0 : i32
    %c0_i32_1 = arith.constant 0 : i32
    return %c0_i32, %c0_i32_0 : i32, i32
  }
  func.func @transform_6(%arg0: i32) -> (i32, i32) {
    %c0_i32 = arith.constant 0 : i32
    %c0_i32_0 = arith.constant 0 : i32
    %c0_i32_1 = arith.constant 0 : i32
    return %c0_i32, %c0_i32_0 : i32, i32
  }
  func.func @transform_7(%arg0: i32) -> (i32, i32, i32) {
    %c0_i32 = arith.constant 0 : i32
    %c0_i32_0 = arith.constant 0 : i32
    %c0_i32_1 = arith.constant 0 : i32
    return %arg0, %c0_i32, %c0_i32_0 : i32, i32, i32
  }
}

module attributes {stable_mosaic.version = 11 : i64} {
  func.func @out_kernel(%arg0: i32, %arg1: memref<4x32x128xf32, #tpu.memory_space<vmem>>, %arg2: memref<128x32xbf16, #tpu.memory_space<vmem>>, %arg3: memref<128x1xf32, #tpu.memory_space<vmem>>, %arg4: memref<128x1xf32, #tpu.memory_space<vmem>>, %arg5: memref<128x1xf32, #tpu.memory_space<vmem>>, %arg6: memref<32x128xbf16, #tpu.memory_space<vmem>>, %arg7: memref<32x1xf32, #tpu.memory_space<vmem>>, %arg8: memref<32x1xf32, #tpu.memory_space<vmem>>, %arg9: memref<32x1xf32, #tpu.memory_space<vmem>>, %arg10: memref<4x32x128xf32, #tpu.memory_space<vmem>>) attributes {dimension_semantics = [#tpu.dimension_semantics<parallel>], iteration_bounds = array<i64: 1>, scalar_prefetch = 0 : i64, scratch_operands = 0 : i64, tpu.core_type = #tpu.core_type<tc>, window_params = [{transform_indices = @transform_0, window_bounds = array<i64: 4, 32, 128>}, {pipeline_mode = #tpu.pipeline_mode<synchronous>, transform_indices = @transform_1, window_bounds = array<i64: 128, 32>}, {pipeline_mode = #tpu.pipeline_mode<synchronous>, transform_indices = @transform_2, window_bounds = array<i64: 128, 1>}, {pipeline_mode = #tpu.pipeline_mode<synchronous>, transform_indices = @transform_3, window_bounds = array<i64: 128, 1>}, {pipeline_mode = #tpu.pipeline_mode<synchronous>, transform_indices = @transform_4, window_bounds = array<i64: 128, 1>}, {pipeline_mode = #tpu.pipeline_mode<synchronous>, transform_indices = @transform_5, window_bounds = array<i64: 32, 128>}, {pipeline_mode = #tpu.pipeline_mode<synchronous>, transform_indices = @transform_6, window_bounds = array<i64: 32, 1>}, {pipeline_mode = #tpu.pipeline_mode<synchronous>, transform_indices = @transform_7, window_bounds = array<i64: 32, 1>}, {pipeline_mode = #tpu.pipeline_mode<synchronous>, transform_indices = @transform_8, window_bounds = array<i64: 32, 1>}, {transform_indices = @transform_9, window_bounds = array<i64: 4, 32, 128>}]} {
    %c0 = arith.constant 0 : index
    %c0_0 = arith.constant 0 : index
    %0 = vector.load %arg2[%c0, %c0_0] : memref<128x32xbf16, #tpu.memory_space<vmem>>, vector<128x32xbf16>
    %c0_1 = arith.constant 0 : index
    %c0_2 = arith.constant 0 : index
    %1 = vector.load %arg3[%c0_1, %c0_2] : memref<128x1xf32, #tpu.memory_space<vmem>>, vector<128x1xf32>
    %c0_3 = arith.constant 0 : index
    %c0_4 = arith.constant 0 : index
    %2 = vector.load %arg4[%c0_3, %c0_4] : memref<128x1xf32, #tpu.memory_space<vmem>>, vector<128x1xf32>
    %c0_5 = arith.constant 0 : index
    %c0_6 = arith.constant 0 : index
    %3 = vector.load %arg5[%c0_5, %c0_6] : memref<128x1xf32, #tpu.memory_space<vmem>>, vector<128x1xf32>
    %c0_7 = arith.constant 0 : index
    %c0_8 = arith.constant 0 : index
    %4 = vector.load %arg6[%c0_7, %c0_8] : memref<32x128xbf16, #tpu.memory_space<vmem>>, vector<32x128xbf16>
    %c0_9 = arith.constant 0 : index
    %c0_10 = arith.constant 0 : index
    %5 = vector.load %arg7[%c0_9, %c0_10] : memref<32x1xf32, #tpu.memory_space<vmem>>, vector<32x1xf32>
    %c0_11 = arith.constant 0 : index
    %c0_12 = arith.constant 0 : index
    %6 = vector.load %arg8[%c0_11, %c0_12] : memref<32x1xf32, #tpu.memory_space<vmem>>, vector<32x1xf32>
    %c0_13 = arith.constant 0 : index
    %c0_14 = arith.constant 0 : index
    %7 = vector.load %arg9[%c0_13, %c0_14] : memref<32x1xf32, #tpu.memory_space<vmem>>, vector<32x1xf32>
    %cst = arith.constant 0.000000e+00 : f32
    %8 = vector.broadcast %cst : f32 to vector<128x128xf32>
    %cst_15 = arith.constant 0.000000e+00 : f32
    %9 = vector.broadcast %cst_15 : f32 to vector<32x128xf32>
    %c0_16 = arith.constant 0 : index
    %c0_17 = arith.constant 0 : index
    %c0_18 = arith.constant 0 : index
    %10 = vector.load %arg1[%c0_16, %c0_17, %c0_18] : memref<4x32x128xf32, #tpu.memory_space<vmem>>, vector<1x32x128xf32>
    %11 = vector.shape_cast %10 : vector<1x32x128xf32> to vector<32x128xf32>
    %12 = arith.truncf %11 : vector<32x128xf32> to vector<32x128xbf16>
    %cst_19 = arith.constant dense<0.000000e+00> : vector<128x128xf32>
    %13 = tpu.matmul %0, %12, %cst_19 {dimension_numbers = #tpu.dot_dimension_numbers<[1], [0], [0], [1], [0, 0, 1, 1], [], []>} : vector<128x32xbf16>, vector<32x128xbf16>, vector<128x128xf32> -> vector<128x128xf32>
    %14 = vector.broadcast %1 : vector<128x1xf32> to vector<128x128xf32>
    %15 = arith.addf %13, %14 : vector<128x128xf32>
    %16 = vector.broadcast %2 : vector<128x1xf32> to vector<128x128xf32>
    %17 = arith.mulf %15, %16 : vector<128x128xf32>
    %18 = vector.broadcast %3 : vector<128x1xf32> to vector<128x128xf32>
    %19 = arith.addf %17, %18 : vector<128x128xf32>
    %20 = arith.addf %8, %19 : vector<128x128xf32>
    %cst_20 = arith.constant 5.000000e-01 : f32
    %21 = vector.broadcast %cst_20 : f32 to vector<128x128xf32>
    %22 = arith.mulf %20, %21 : vector<128x128xf32>
    %cst_21 = arith.constant 1.000000e+00 : f32
    %23 = vector.broadcast %cst_21 : f32 to vector<128x128xf32>
    %24 = arith.cmpf oge, %22, %23 : vector<128x128xf32>
    %cst_22 = arith.constant 0.000000e+00 : f32
    %25 = vector.broadcast %cst_22 : f32 to vector<128x128xf32>
    %26 = arith.select %24, %25, %22 : vector<128x128xi1>, vector<128x128xf32>
    %27 = arith.extui %24 : vector<128x128xi1> to vector<128x128xi32>
    %28 = arith.sitofp %27 : vector<128x128xi32> to vector<128x128xf32>
    %29 = arith.truncf %28 : vector<128x128xf32> to vector<128x128xbf16>
    %cst_23 = arith.constant dense<0.000000e+00> : vector<32x128xf32>
    %30 = tpu.matmul %4, %29, %cst_23 {dimension_numbers = #tpu.dot_dimension_numbers<[1], [0], [0], [1], [0, 0, 1, 1], [], []>} : vector<32x128xbf16>, vector<128x128xbf16>, vector<32x128xf32> -> vector<32x128xf32>
    %31 = vector.broadcast %5 : vector<32x1xf32> to vector<32x128xf32>
    %32 = arith.addf %30, %31 : vector<32x128xf32>
    %33 = vector.broadcast %6 : vector<32x1xf32> to vector<32x128xf32>
    %34 = arith.mulf %32, %33 : vector<32x128xf32>
    %35 = vector.broadcast %7 : vector<32x1xf32> to vector<32x128xf32>
    %36 = arith.addf %34, %35 : vector<32x128xf32>
    %37 = arith.addf %9, %36 : vector<32x128xf32>
    %cst_24 = arith.constant 5.000000e-01 : f32
    %38 = vector.broadcast %cst_24 : f32 to vector<32x128xf32>
    %39 = arith.mulf %37, %38 : vector<32x128xf32>
    %cst_25 = arith.constant 1.000000e+00 : f32
    %40 = vector.broadcast %cst_25 : f32 to vector<32x128xf32>
    %41 = arith.cmpf oge, %39, %40 : vector<32x128xf32>
    %cst_26 = arith.constant 0.000000e+00 : f32
    %42 = vector.broadcast %cst_26 : f32 to vector<32x128xf32>
    %43 = arith.select %41, %42, %39 : vector<32x128xi1>, vector<32x128xf32>
    %44 = arith.extui %41 : vector<32x128xi1> to vector<32x128xi32>
    %45 = arith.sitofp %44 : vector<32x128xi32> to vector<32x128xf32>
    %46 = arith.addf %11, %45 : vector<32x128xf32>
    %c0_27 = arith.constant 0 : index
    %c0_28 = arith.constant 0 : index
    %c0_29 = arith.constant 0 : index
    %47 = vector.load %arg10[%c0_27, %c0_28, %c0_29] : memref<4x32x128xf32, #tpu.memory_space<vmem>>, vector<1x32x128xf32>
    %48 = vector.shape_cast %47 : vector<1x32x128xf32> to vector<32x128xf32>
    %49 = vector.shape_cast %46 : vector<32x128xf32> to vector<1x32x128xf32>
    tpu.vector_store %arg10[%c0_27, %c0_28, %c0_29], %49 {strides = array<i32>} : memref<4x32x128xf32, #tpu.memory_space<vmem>>, vector<1x32x128xf32>,
    %c1 = arith.constant 1 : index
    %c0_30 = arith.constant 0 : index
    %c0_31 = arith.constant 0 : index
    %50 = vector.load %arg1[%c1, %c0_30, %c0_31] : memref<4x32x128xf32, #tpu.memory_space<vmem>>, vector<1x32x128xf32>
    %51 = vector.shape_cast %50 : vector<1x32x128xf32> to vector<32x128xf32>
    %52 = arith.truncf %51 : vector<32x128xf32> to vector<32x128xbf16>
    %cst_32 = arith.constant dense<0.000000e+00> : vector<128x128xf32>
    %53 = tpu.matmul %0, %52, %cst_32 {dimension_numbers = #tpu.dot_dimension_numbers<[1], [0], [0], [1], [0, 0, 1, 1], [], []>} : vector<128x32xbf16>, vector<32x128xbf16>, vector<128x128xf32> -> vector<128x128xf32>
    %54 = vector.broadcast %1 : vector<128x1xf32> to vector<128x128xf32>
    %55 = arith.addf %53, %54 : vector<128x128xf32>
    %56 = vector.broadcast %2 : vector<128x1xf32> to vector<128x128xf32>
    %57 = arith.mulf %55, %56 : vector<128x128xf32>
    %58 = vector.broadcast %3 : vector<128x1xf32> to vector<128x128xf32>
    %59 = arith.addf %57, %58 : vector<128x128xf32>
    %60 = arith.addf %26, %59 : vector<128x128xf32>
    %cst_33 = arith.constant 5.000000e-01 : f32
    %61 = vector.broadcast %cst_33 : f32 to vector<128x128xf32>
    %62 = arith.mulf %60, %61 : vector<128x128xf32>
    %cst_34 = arith.constant 1.000000e+00 : f32
    %63 = vector.broadcast %cst_34 : f32 to vector<128x128xf32>
    %64 = arith.cmpf oge, %62, %63 : vector<128x128xf32>
    %cst_35 = arith.constant 0.000000e+00 : f32
    %65 = vector.broadcast %cst_35 : f32 to vector<128x128xf32>
    %66 = arith.select %64, %65, %62 : vector<128x128xi1>, vector<128x128xf32>
    %67 = arith.extui %64 : vector<128x128xi1> to vector<128x128xi32>
    %68 = arith.sitofp %67 : vector<128x128xi32> to vector<128x128xf32>
    %69 = arith.truncf %68 : vector<128x128xf32> to vector<128x128xbf16>
    %cst_36 = arith.constant dense<0.000000e+00> : vector<32x128xf32>
    %70 = tpu.matmul %4, %69, %cst_36 {dimension_numbers = #tpu.dot_dimension_numbers<[1], [0], [0], [1], [0, 0, 1, 1], [], []>} : vector<32x128xbf16>, vector<128x128xbf16>, vector<32x128xf32> -> vector<32x128xf32>
    %71 = vector.broadcast %5 : vector<32x1xf32> to vector<32x128xf32>
    %72 = arith.addf %70, %71 : vector<32x128xf32>
    %73 = vector.broadcast %6 : vector<32x1xf32> to vector<32x128xf32>
    %74 = arith.mulf %72, %73 : vector<32x128xf32>
    %75 = vector.broadcast %7 : vector<32x1xf32> to vector<32x128xf32>
    %76 = arith.addf %74, %75 : vector<32x128xf32>
    %77 = arith.addf %43, %76 : vector<32x128xf32>
    %cst_37 = arith.constant 5.000000e-01 : f32
    %78 = vector.broadcast %cst_37 : f32 to vector<32x128xf32>
    %79 = arith.mulf %77, %78 : vector<32x128xf32>
    %cst_38 = arith.constant 1.000000e+00 : f32
    %80 = vector.broadcast %cst_38 : f32 to vector<32x128xf32>
    %81 = arith.cmpf oge, %79, %80 : vector<32x128xf32>
    %cst_39 = arith.constant 0.000000e+00 : f32
    %82 = vector.broadcast %cst_39 : f32 to vector<32x128xf32>
    %83 = arith.select %81, %82, %79 : vector<32x128xi1>, vector<32x128xf32>
    %84 = arith.extui %81 : vector<32x128xi1> to vector<32x128xi32>
    %85 = arith.sitofp %84 : vector<32x128xi32> to vector<32x128xf32>
    %86 = arith.addf %51, %85 : vector<32x128xf32>
    %c1_40 = arith.constant 1 : index
    %c0_41 = arith.constant 0 : index
    %c0_42 = arith.constant 0 : index
    %87 = vector.load %arg10[%c1_40, %c0_41, %c0_42] : memref<4x32x128xf32, #tpu.memory_space<vmem>>, vector<1x32x128xf32>
    %88 = vector.shape_cast %87 : vector<1x32x128xf32> to vector<32x128xf32>
    %89 = vector.shape_cast %86 : vector<32x128xf32> to vector<1x32x128xf32>
    tpu.vector_store %arg10[%c1_40, %c0_41, %c0_42], %89 {strides = array<i32>} : memref<4x32x128xf32, #tpu.memory_space<vmem>>, vector<1x32x128xf32>,
    %c2 = arith.constant 2 : index
    %c0_43 = arith.constant 0 : index
    %c0_44 = arith.constant 0 : index
    %90 = vector.load %arg1[%c2, %c0_43, %c0_44] : memref<4x32x128xf32, #tpu.memory_space<vmem>>, vector<1x32x128xf32>
    %91 = vector.shape_cast %90 : vector<1x32x128xf32> to vector<32x128xf32>
    %92 = arith.truncf %91 : vector<32x128xf32> to vector<32x128xbf16>
    %cst_45 = arith.constant dense<0.000000e+00> : vector<128x128xf32>
    %93 = tpu.matmul %0, %92, %cst_45 {dimension_numbers = #tpu.dot_dimension_numbers<[1], [0], [0], [1], [0, 0, 1, 1], [], []>} : vector<128x32xbf16>, vector<32x128xbf16>, vector<128x128xf32> -> vector<128x128xf32>
    %94 = vector.broadcast %1 : vector<128x1xf32> to vector<128x128xf32>
    %95 = arith.addf %93, %94 : vector<128x128xf32>
    %96 = vector.broadcast %2 : vector<128x1xf32> to vector<128x128xf32>
    %97 = arith.mulf %95, %96 : vector<128x128xf32>
    %98 = vector.broadcast %3 : vector<128x1xf32> to vector<128x128xf32>
    %99 = arith.addf %97, %98 : vector<128x128xf32>
    %100 = arith.addf %66, %99 : vector<128x128xf32>
    %cst_46 = arith.constant 5.000000e-01 : f32
    %101 = vector.broadcast %cst_46 : f32 to vector<128x128xf32>
    %102 = arith.mulf %100, %101 : vector<128x128xf32>
    %cst_47 = arith.constant 1.000000e+00 : f32
    %103 = vector.broadcast %cst_47 : f32 to vector<128x128xf32>
    %104 = arith.cmpf oge, %102, %103 : vector<128x128xf32>
    %cst_48 = arith.constant 0.000000e+00 : f32
    %105 = vector.broadcast %cst_48 : f32 to vector<128x128xf32>
    %106 = arith.select %104, %105, %102 : vector<128x128xi1>, vector<128x128xf32>
    %107 = arith.extui %104 : vector<128x128xi1> to vector<128x128xi32>
    %108 = arith.sitofp %107 : vector<128x128xi32> to vector<128x128xf32>
    %109 = arith.truncf %108 : vector<128x128xf32> to vector<128x128xbf16>
    %cst_49 = arith.constant dense<0.000000e+00> : vector<32x128xf32>
    %110 = tpu.matmul %4, %109, %cst_49 {dimension_numbers = #tpu.dot_dimension_numbers<[1], [0], [0], [1], [0, 0, 1, 1], [], []>} : vector<32x128xbf16>, vector<128x128xbf16>, vector<32x128xf32> -> vector<32x128xf32>
    %111 = vector.broadcast %5 : vector<32x1xf32> to vector<32x128xf32>
    %112 = arith.addf %110, %111 : vector<32x128xf32>
    %113 = vector.broadcast %6 : vector<32x1xf32> to vector<32x128xf32>
    %114 = arith.mulf %112, %113 : vector<32x128xf32>
    %115 = vector.broadcast %7 : vector<32x1xf32> to vector<32x128xf32>
    %116 = arith.addf %114, %115 : vector<32x128xf32>
    %117 = arith.addf %83, %116 : vector<32x128xf32>
    %cst_50 = arith.constant 5.000000e-01 : f32
    %118 = vector.broadcast %cst_50 : f32 to vector<32x128xf32>
    %119 = arith.mulf %117, %118 : vector<32x128xf32>
    %cst_51 = arith.constant 1.000000e+00 : f32
    %120 = vector.broadcast %cst_51 : f32 to vector<32x128xf32>
    %121 = arith.cmpf oge, %119, %120 : vector<32x128xf32>
    %cst_52 = arith.constant 0.000000e+00 : f32
    %122 = vector.broadcast %cst_52 : f32 to vector<32x128xf32>
    %123 = arith.select %121, %122, %119 : vector<32x128xi1>, vector<32x128xf32>
    %124 = arith.extui %121 : vector<32x128xi1> to vector<32x128xi32>
    %125 = arith.sitofp %124 : vector<32x128xi32> to vector<32x128xf32>
    %126 = arith.addf %91, %125 : vector<32x128xf32>
    %c2_53 = arith.constant 2 : index
    %c0_54 = arith.constant 0 : index
    %c0_55 = arith.constant 0 : index
    %127 = vector.load %arg10[%c2_53, %c0_54, %c0_55] : memref<4x32x128xf32, #tpu.memory_space<vmem>>, vector<1x32x128xf32>
    %128 = vector.shape_cast %127 : vector<1x32x128xf32> to vector<32x128xf32>
    %129 = vector.shape_cast %126 : vector<32x128xf32> to vector<1x32x128xf32>
    tpu.vector_store %arg10[%c2_53, %c0_54, %c0_55], %129 {strides = array<i32>} : memref<4x32x128xf32, #tpu.memory_space<vmem>>, vector<1x32x128xf32>,
    %c3 = arith.constant 3 : index
    %c0_56 = arith.constant 0 : index
    %c0_57 = arith.constant 0 : index
    %130 = vector.load %arg1[%c3, %c0_56, %c0_57] : memref<4x32x128xf32, #tpu.memory_space<vmem>>, vector<1x32x128xf32>
    %131 = vector.shape_cast %130 : vector<1x32x128xf32> to vector<32x128xf32>
    %132 = arith.truncf %131 : vector<32x128xf32> to vector<32x128xbf16>
    %cst_58 = arith.constant dense<0.000000e+00> : vector<128x128xf32>
    %133 = tpu.matmul %0, %132, %cst_58 {dimension_numbers = #tpu.dot_dimension_numbers<[1], [0], [0], [1], [0, 0, 1, 1], [], []>} : vector<128x32xbf16>, vector<32x128xbf16>, vector<128x128xf32> -> vector<128x128xf32>
    %134 = vector.broadcast %1 : vector<128x1xf32> to vector<128x128xf32>
    %135 = arith.addf %133, %134 : vector<128x128xf32>
    %136 = vector.broadcast %2 : vector<128x1xf32> to vector<128x128xf32>
    %137 = arith.mulf %135, %136 : vector<128x128xf32>
    %138 = vector.broadcast %3 : vector<128x1xf32> to vector<128x128xf32>
    %139 = arith.addf %137, %138 : vector<128x128xf32>
    %140 = arith.addf %106, %139 : vector<128x128xf32>
    %cst_59 = arith.constant 5.000000e-01 : f32
    %141 = vector.broadcast %cst_59 : f32 to vector<128x128xf32>
    %142 = arith.mulf %140, %141 : vector<128x128xf32>
    %cst_60 = arith.constant 1.000000e+00 : f32
    %143 = vector.broadcast %cst_60 : f32 to vector<128x128xf32>
    %144 = arith.cmpf oge, %142, %143 : vector<128x128xf32>
    %145 = arith.extui %144 : vector<128x128xi1> to vector<128x128xi32>
    %146 = arith.sitofp %145 : vector<128x128xi32> to vector<128x128xf32>
    %147 = arith.truncf %146 : vector<128x128xf32> to vector<128x128xbf16>
    %cst_61 = arith.constant dense<0.000000e+00> : vector<32x128xf32>
    %148 = tpu.matmul %4, %147, %cst_61 {dimension_numbers = #tpu.dot_dimension_numbers<[1], [0], [0], [1], [0, 0, 1, 1], [], []>} : vector<32x128xbf16>, vector<128x128xbf16>, vector<32x128xf32> -> vector<32x128xf32>
    %149 = vector.broadcast %5 : vector<32x1xf32> to vector<32x128xf32>
    %150 = arith.addf %148, %149 : vector<32x128xf32>
    %151 = vector.broadcast %6 : vector<32x1xf32> to vector<32x128xf32>
    %152 = arith.mulf %150, %151 : vector<32x128xf32>
    %153 = vector.broadcast %7 : vector<32x1xf32> to vector<32x128xf32>
    %154 = arith.addf %152, %153 : vector<32x128xf32>
    %155 = arith.addf %123, %154 : vector<32x128xf32>
    %cst_62 = arith.constant 5.000000e-01 : f32
    %156 = vector.broadcast %cst_62 : f32 to vector<32x128xf32>
    %157 = arith.mulf %155, %156 : vector<32x128xf32>
    %cst_63 = arith.constant 1.000000e+00 : f32
    %158 = vector.broadcast %cst_63 : f32 to vector<32x128xf32>
    %159 = arith.cmpf oge, %157, %158 : vector<32x128xf32>
    %160 = arith.extui %159 : vector<32x128xi1> to vector<32x128xi32>
    %161 = arith.sitofp %160 : vector<32x128xi32> to vector<32x128xf32>
    %162 = arith.addf %131, %161 : vector<32x128xf32>
    %c3_64 = arith.constant 3 : index
    %c0_65 = arith.constant 0 : index
    %c0_66 = arith.constant 0 : index
    %163 = vector.load %arg10[%c3_64, %c0_65, %c0_66] : memref<4x32x128xf32, #tpu.memory_space<vmem>>, vector<1x32x128xf32>
    %164 = vector.shape_cast %163 : vector<1x32x128xf32> to vector<32x128xf32>
    %165 = vector.shape_cast %162 : vector<32x128xf32> to vector<1x32x128xf32>
    tpu.vector_store %arg10[%c3_64, %c0_65, %c0_66], %165 {strides = array<i32>} : memref<4x32x128xf32, #tpu.memory_space<vmem>>, vector<1x32x128xf32>,
    return
  }
  func.func @transform_0(%arg0: i32) -> (i32, i32, i32) {
    %c0_i32 = arith.constant 0 : i32
    %c0_i32_0 = arith.constant 0 : i32
    %c0_i32_1 = arith.constant 0 : i32
    return %c0_i32, %c0_i32_0, %arg0 : i32, i32, i32
  }
  func.func @transform_1(%arg0: i32) -> (i32, i32) {
    %c0_i32 = arith.constant 0 : i32
    %c0_i32_0 = arith.constant 0 : i32
    %c0_i32_1 = arith.constant 0 : i32
    return %c0_i32, %c0_i32_0 : i32, i32
  }
  func.func @transform_2(%arg0: i32) -> (i32, i32) {
    %c0_i32 = arith.constant 0 : i32
    %c0_i32_0 = arith.constant 0 : i32
    %c0_i32_1 = arith.constant 0 : i32
    return %c0_i32, %c0_i32_0 : i32, i32
  }
  func.func @transform_3(%arg0: i32) -> (i32, i32) {
    %c0_i32 = arith.constant 0 : i32
    %c0_i32_0 = arith.constant 0 : i32
    %c0_i32_1 = arith.constant 0 : i32
    return %c0_i32, %c0_i32_0 : i32, i32
  }
  func.func @transform_4(%arg0: i32) -> (i32, i32) {
    %c0_i32 = arith.constant 0 : i32
    %c0_i32_0 = arith.constant 0 : i32
    %c0_i32_1 = arith.constant 0 : i32
    return %c0_i32, %c0_i32_0 : i32, i32
  }
  func.func @transform_5(%arg0: i32) -> (i32, i32) {
    %c0_i32 = arith.constant 0 : i32
    %c0_i32_0 = arith.constant 0 : i32
    %c0_i32_1 = arith.constant 0 : i32
    return %c0_i32, %c0_i32_0 : i32, i32
  }
  func.func @transform_6(%arg0: i32) -> (i32, i32) {
    %c0_i32 = arith.constant 0 : i32
    %c0_i32_0 = arith.constant 0 : i32
    %c0_i32_1 = arith.constant 0 : i32
    return %c0_i32, %c0_i32_0 : i32, i32
  }
  func.func @transform_7(%arg0: i32) -> (i32, i32) {
    %c0_i32 = arith.constant 0 : i32
    %c0_i32_0 = arith.constant 0 : i32
    %c0_i32_1 = arith.constant 0 : i32
    return %c0_i32, %c0_i32_0 : i32, i32
  }
  func.func @transform_8(%arg0: i32) -> (i32, i32) {
    %c0_i32 = arith.constant 0 : i32
    %c0_i32_0 = arith.constant 0 : i32
    %c0_i32_1 = arith.constant 0 : i32
    return %c0_i32, %c0_i32_0 : i32, i32
  }
  func.func @transform_9(%arg0: i32) -> (i32, i32, i32) {
    %c0_i32 = arith.constant 0 : i32
    %c0_i32_0 = arith.constant 0 : i32
    %c0_i32_1 = arith.constant 0 : i32
    return %c0_i32, %c0_i32_0, %arg0 : i32, i32, i32
  }
}

</mosaic_0001>

<bundles_post_ra>
// kernel: token_spiking_transformer.5
= control target key start
LH: loop header
LB: loop body
LE: loop exit
PB: predicated region body
PF: predicated region fallthrough
CT: control target
= control target key end

     0   :  { %vm46_vm0 = vcmask 261120   ;;  %vm564_vm1 = vcmask 7168   ;;  %vm573_vm2 = vcmask 15360   ;;  %s901_s0 = inlined_call_operand.vmem [shape: f32[4,32,128], index: 0, kind: input, shape index: {}]   ;;  %s902_s1 = inlined_call_operand.vmem [shape: bf16[64,32], index: 1, kind: input, shape index: {}]   ;;  %s903_s2 = inlined_call_operand.vmem [shape: f32[1,64,2], index: 2, kind: output, shape index: {}]  }
   0x1   :  { %v20_v0 = vld [vmem:[%s901_s0] sm:$0xff]  ;;  %v21_v1 = vld [vmem:[%s901_s0 + $0x8] sm:$0xff]  ;;  %v22_v5 = vld [vmem:[%s901_s0 + $0x10] sm:$0xff] }
   0x2   :  { %v594_v2 = vld [vmem:[%s901_s0 + $0x20] sm:$0xff]  ;;  %v24_v3 = vpack.c.bf16 %v21_v1, %v20_v0  ;;  %v595_v4 = vld [vmem:[%s901_s0 + $0x28] sm:$0xff]  ;;  %v23_v6 = vld [vmem:[%s901_s0 + $0x18] sm:$0xff] }
   0x3   :  { %v185_v7 = vpack.c.bf16 %v595_v4, %v594_v2  ;;  %v25_v8 = vpack.c.bf16 %v23_v6, %v22_v5  ;;  %v596_v9 = vld [vmem:[%s901_s0 + $0x30] sm:$0xff]  ;;  %v597_v10 = vld [vmem:[%s901_s0 + $0x38] sm:$0xff]  ;;  %v690_v12 = vld [vmem:[%s902_s1] sm:$0xff]  }
   0x4   :  { %642 = vmatprep.subr.bf16.mxu0 %v24_v3  ;;  %v186_v11 = vpack.c.bf16 %v597_v10, %v596_v9  ;;  %v691_v13 = vld [vmem:[%s902_s1 + $0x8] sm:$0xff]   ;;  %646 = vmatprep.mubr.msk.bf16.mxu0 %vm46_vm0, %v690_v12  ;;  %v692_v14 = vld [vmem:[%s902_s1 + $0x10] sm:$0xff]   ;;  %v602_v15 = vld [vmem:[%s901_s0 + $0x40] sm:$0xff] }
   0x5   :  { %654 = vmatprep.subr.bf16.mxu1 %v185_v7  ;;  %643 = vmatpush3.bf16.msra.mxu0 %v24_v3  ;;  %v603_v16 = vld [vmem:[%s901_s0 + $0x48] sm:$0xff]  ;;  %v610_v17 = vld [vmem:[%s901_s0 + $0x60] sm:$0xff]  ;;  %v604_v21 = vld [vmem:[%s901_s0 + $0x50] sm:$0xff] }
   0x6   :  { %655 = vmatpush3.bf16.msra.mxu1 %v185_v7  ;;  %644 = vmatprep.subr.bf16.mxu0 %v25_v8  ;;  %v611_v18 = vld [vmem:[%s901_s0 + $0x68] sm:$0xff]  ;;  %v313_v19 = vpack.c.bf16 %v603_v16, %v602_v15  ;;  %v605_v22 = vld [vmem:[%s901_s0 + $0x58] sm:$0xff]  ;;  %v612_v23 = vld [vmem:[%s901_s0 + $0x70] sm:$0xff] }
   0x7   :  { %656 = vmatprep.subr.bf16.mxu1 %v186_v11  ;;  %658 = vmatprep.mubr.msk.bf16.mxu1 %vm46_vm0, %v690_v12  ;;  %v441_v20 = vpack.c.bf16 %v611_v18, %v610_v17  ;;  %v613_v24 = vld [vmem:[%s901_s0 + $0x78] sm:$0xff]  ;;  %v314_v25 = vpack.c.bf16 %v605_v22, %v604_v21 }
   0x8   :  { %v442_v26 = vpack.c.bf16 %v613_v24, %v612_v23  ;;  %v693_v27 = vld [vmem:[%s902_s1 + $0x18] sm:$0xff]  }
   0x9   :  { %645 = vmatpush3.bf16.msra.mxu0 %v25_v8 }
   0xa   :  { %657 = vmatpush3.bf16.msra.mxu1 %v186_v11  ;;  %666 = vmatprep.subr.bf16.mxu0 %v313_v19 }
   0xb   :  { %678 = vmatprep.subr.bf16.mxu1 %v441_v20 }
   0xc   :  { %647 = vmatmul.mubr.msk.bf16.vlgmr.msra.gmra.mrb[0].mxu0 %vm46_vm0, %v691_v13 }
   0xd   :  { %659 = vmatmul.mubr.msk.bf16.vlgmr.msra.gmra.mrb[0].mxu1 %vm46_vm0, %v691_v13  ;;  %650 = vmatprep.mubr.msk.bf16.mxu0 %vm46_vm0, %v692_v14 }
   0xe   :  { %662 = vmatprep.mubr.msk.bf16.mxu1 %vm46_vm0, %v692_v14  ;;  %667 = vmatpush3.bf16.msra.mxu0 %v313_v19 }
   0xf   :  { %679 = vmatpush3.bf16.msra.mxu1 %v441_v20  ;;  %668 = vmatprep.subr.bf16.mxu0 %v314_v25 }
  0x10   :  { %680 = vmatprep.subr.bf16.mxu1 %v442_v26 }
  0x12   :  { %669 = vmatpush3.bf16.msra.mxu0 %v314_v25 }
  0x13   :  { %681 = vmatpush3.bf16.msra.mxu1 %v442_v26 }
  0x14   :  { %651 = vmatmul.mubr.msk.bf16.gmra.mrb[4].mxu0 %vm46_vm0, %v693_v27 }
  0x15   :  { %663 = vmatmul.mubr.msk.bf16.gmra.mrb[4].mxu1 %vm46_vm0, %v693_v27  ;;  %670 = vmatprep.mubr.msk.bf16.mxu0 %vm46_vm0, %v690_v12 }
  0x16   :  { %682 = vmatprep.mubr.msk.bf16.mxu1 %vm46_vm0, %v690_v12 }
  0x1c   :  { %671 = vmatmul.mubr.msk.bf16.vlgmr.msra.gmra.mrb[8].mxu0 %vm46_vm0, %v691_v13 }
  0x1d   :  { %683 = vmatmul.mubr.msk.bf16.vlgmr.msra.gmra.mrb[8].mxu1 %vm46_vm0, %v691_v13  ;;  %674 = vmatprep.mubr.msk.bf16.mxu0 %vm46_vm0, %v692_v14 }
  0x1e   :  { %686 = vmatprep.mubr.msk.bf16.mxu1 %vm46_vm0, %v692_v14 }
  0x24   :  { %675 = vmatmul.mubr.msk.bf16.gmra.mrb[12].mxu0 %vm46_vm0, %v693_v27 }
  0x25   :  { %687 = vmatmul.mubr.msk.bf16.gmra.mrb[12].mxu1 %vm46_vm0, %v693_v27 }
  0xdf   :  { %v648_v28 = vpop.f32.mrb[0].mxu0 }
  0xe0   :  { %v660_v29 = vpop.f32.mrb[0].mxu1  ;;  %128 = vadd.xlane.f32.xlu1 %v648_v28  ;;  %v93_v30 = vpop.f32.mrb[1].mxu0  ;;  %v142_v43 = vmul.f32 %v648_v28, %v648_v28 }
  0xe1   :  { %256 = vadd.xlane.f32.xlu0 %v660_v29  ;;  %v221_v31 = vpop.f32.mrb[1].mxu1  ;;  %v649_v32 = vpop.f32.mrb[2].mxu0  ;;  %v270_v46 = vmul.f32 %v660_v29, %v660_v29  ;;  %v140_v57 = vmul.f32 %v93_v30, %v93_v30 }
  0xe2   :  { %v661_v33 = vpop.f32.mrb[2].mxu1  ;;  %v96_v34 = vpop.f32.mrb[3].mxu0  ;;  %v143_v45 = vmul.f32 %v649_v32, %v649_v32  ;;  %v268_v2 = vmul.f32 %v221_v31, %v221_v31 }
  0xe3   :  { %v224_v35 = vpop.f32.mrb[3].mxu1  ;;  %v271_v52 = vmul.f32 %v661_v33, %v661_v33  ;;  %v141_v56 = vmul.f32 %v96_v34, %v96_v34 }
  0xe4   :  { %130 = vadd.xlane.f32.xlu1 %v649_v32  ;;  %v269_v63 = vmul.f32 %v224_v35, %v224_v35 }
  0xe5   :  { %124 = vadd.xlane.f32.xlu0 %v93_v30 }
  0xe7   :  { %v652_v36 = vpop.f32.mrb[4].mxu0 }
  0xe8   :  { %258 = vadd.xlane.f32.xlu1 %v661_v33  ;;  %v109_v37 = vpop.f32.mrb[5].mxu0  ;;  %v664_v38 = vpop.f32.mrb[4].mxu1  ;;  %v146_v5 = vmul.f32 %v652_v36, %v652_v36 }
  0xe9   :  { %252 = vadd.xlane.f32.xlu0 %v221_v31  ;;  %v653_v39 = vpop.f32.mrb[6].mxu0  ;;  %v237_v40 = vpop.f32.mrb[5].mxu1  ;;  %v274_v7 = vmul.f32 %v664_v38, %v664_v38  ;;  %v144_v9 = vmul.f32 %v109_v37, %v109_v37 }
  0xea   :  { %v112_v41 = vpop.f32.mrb[7].mxu0  ;;  %v665_v42 = vpop.f32.mrb[6].mxu1  ;;  %v147_v4 = vmul.f32 %v653_v39, %v653_v39  ;;  %v272_v11 = vmul.f32 %v237_v40, %v237_v40 }
  0xeb   :  { %v240_v44 = vpop.f32.mrb[7].mxu1  ;;  %v275_v6 = vmul.f32 %v665_v42, %v665_v42  ;;  %v145_v8 = vmul.f32 %v112_v41, %v112_v41 }
  0xec   :  { %254 = vadd.xlane.f32.xlu1 %v224_v35  ;;  %v273_v10 = vmul.f32 %v240_v44, %v240_v44 }
  0xed   :  { %152 = vadd.xlane.f32.xlu0 %v142_v43 }
  0xef   :  { %v672_v47 = vpop.f32.mrb[8].mxu0 }
  0xf0   :  { %154 = vadd.xlane.f32.xlu1 %v143_v45  ;;  %v785_v48 = vpop.f32.mrb[9].mxu0  ;;  %v787_v49 = vpop.f32.mrb[8].mxu1  ;;  %v398_v13 = vmul.f32 %v672_v47, %v672_v47 }
  0xf1   :  { %280 = vadd.xlane.f32.xlu0 %v270_v46  ;;  %v673_v50 = vpop.f32.mrb[10].mxu0  ;;  %v789_v51 = vpop.f32.mrb[9].mxu1  ;;  %v526_v15 = vmul.f32 %v787_v49, %v787_v49  ;;  %v396_v17 = vmul.f32 %v785_v48, %v785_v48 }
  0xf2   :  { %v352_v53 = vpop.f32.mrb[11].mxu0  ;;  %v685_v54 = vpop.f32.mrb[10].mxu1  ;;  %v399_v12 = vmul.f32 %v673_v50, %v673_v50  ;;  %v524_v19 = vmul.f32 %v789_v51, %v789_v51 }
  0xf3   :  { %v480_v55 = vpop.f32.mrb[11].mxu1  ;;  %v527_v14 = vmul.f32 %v685_v54, %v685_v54  ;;  %v397_v16 = vmul.f32 %v352_v53, %v352_v53 }
  0xf4   :  { %282 = vadd.xlane.f32.xlu1 %v271_v52  ;;  %v525_v18 = vmul.f32 %v480_v55, %v480_v55 }
  0xf5   :  { %126 = vadd.xlane.f32.xlu0 %v96_v34 }
  0xf7   :  { %v791_v58 = vpop.f32.mrb[12].mxu0 }
  0xf8   :  { %150 = vadd.xlane.f32.xlu1 %v141_v56  ;;  %v793_v59 = vpop.f32.mrb[13].mxu0  ;;  %v795_v60 = vpop.f32.mrb[12].mxu1  ;;  %v402_v21 = vmul.f32 %v791_v58, %v791_v58 }
  0xf9   :  { %148 = vadd.xlane.f32.xlu0 %v140_v57  ;;  %v797_v61 = vpop.f32.mrb[14].mxu0  ;;  %v799_v62 = vpop.f32.mrb[13].mxu1  ;;  %v400_v23 = vmul.f32 %v793_v59, %v793_v59  ;;  %v530_v27 = vmul.f32 %v795_v60, %v795_v60 }
  0xfa   :  { %v801_v0 = vpop.f32.mrb[15].mxu0  ;;  %v803_v1 = vpop.f32.mrb[14].mxu1  ;;  %v403_v20 = vmul.f32 %v797_v61, %v797_v61  ;;  %v528_v25 = vmul.f32 %v799_v62, %v799_v62 }
  0xfb   :  { %v805_v3 = vpop.f32.mrb[15].mxu1  ;;  %v401_v22 = vmul.f32 %v801_v0, %v801_v0  ;;  %v531_v26 = vmul.f32 %v803_v1, %v803_v1 }
  0xfc   :  { %278 = vadd.xlane.f32.xlu1 %v269_v63  ;;  %v529_v24 = vmul.f32 %v805_v3, %v805_v3 }
  0xfd   :  { %276 = vadd.xlane.f32.xlu0 %v268_v2 }
 0x100   :  { %138 = vadd.xlane.f32.xlu1 %v653_v39 }
 0x101   :  { %136 = vadd.xlane.f32.xlu0 %v652_v36 }
 0x104   :  { %266 = vadd.xlane.f32.xlu1 %v665_v42 }
 0x105   :  { %264 = vadd.xlane.f32.xlu0 %v664_v38 }
 0x108   :  { %134 = vadd.xlane.f32.xlu1 %v112_v41 }
 0x109   :  { %132 = vadd.xlane.f32.xlu0 %v109_v37 }
 0x10c   :  { %262 = vadd.xlane.f32.xlu1 %v240_v44 }
 0x10d   :  { %260 = vadd.xlane.f32.xlu0 %v237_v40 }
 0x110   :  { %162 = vadd.xlane.f32.xlu1 %v147_v4 }
 0x111   :  { %160 = vadd.xlane.f32.xlu0 %v146_v5 }
 0x114   :  { %290 = vadd.xlane.f32.xlu1 %v275_v6 }
 0x115   :  { %288 = vadd.xlane.f32.xlu0 %v274_v7 }
 0x118   :  { %158 = vadd.xlane.f32.xlu1 %v145_v8 }
 0x119   :  { %156 = vadd.xlane.f32.xlu0 %v144_v9 }
 0x11c   :  { %286 = vadd.xlane.f32.xlu1 %v273_v10 }
 0x11d   :  { %284 = vadd.xlane.f32.xlu0 %v272_v11 }
 0x120   :  { %386 = vadd.xlane.f32.xlu1 %v673_v50 }
 0x121   :  { %384 = vadd.xlane.f32.xlu0 %v672_v47 }
 0x124   :  { %514 = vadd.xlane.f32.xlu1 %v685_v54 }
 0x125   :  { %512 = vadd.xlane.f32.xlu0 %v787_v49 }
 0x128   :  { %382 = vadd.xlane.f32.xlu1 %v352_v53 }
 0x129   :  { %380 = vadd.xlane.f32.xlu0 %v785_v48 }
 0x12c   :  { %510 = vadd.xlane.f32.xlu1 %v480_v55 }
 0x12d   :  { %508 = vadd.xlane.f32.xlu0 %v789_v51 }
 0x130   :  { %410 = vadd.xlane.f32.xlu1 %v399_v12 }
 0x131   :  { %408 = vadd.xlane.f32.xlu0 %v398_v13 }
 0x134   :  { %538 = vadd.xlane.f32.xlu1 %v527_v14 }
 0x135   :  { %536 = vadd.xlane.f32.xlu0 %v526_v15 }
 0x138   :  { %406 = vadd.xlane.f32.xlu1 %v397_v16 }
 0x139   :  { %404 = vadd.xlane.f32.xlu0 %v396_v17 }
 0x13c   :  { %534 = vadd.xlane.f32.xlu1 %v525_v18 }
 0x13d   :  { %532 = vadd.xlane.f32.xlu0 %v524_v19 }
 0x140   :  { %394 = vadd.xlane.f32.xlu1 %v797_v61 }
 0x141   :  { %392 = vadd.xlane.f32.xlu0 %v791_v58 }
 0x144   :  { %522 = vadd.xlane.f32.xlu1 %v803_v1 }
 0x145   :  { %520 = vadd.xlane.f32.xlu0 %v795_v60 }
 0x148   :  { %390 = vadd.xlane.f32.xlu1 %v801_v0 }
 0x149   :  { %388 = vadd.xlane.f32.xlu0 %v793_v59 }
 0x14c   :  { %518 = vadd.xlane.f32.xlu1 %v805_v3 }
 0x14d   :  { %516 = vadd.xlane.f32.xlu0 %v799_v62 }
 0x150   :  { %418 = vadd.xlane.f32.xlu1 %v403_v20 }
 0x151   :  { %416 = vadd.xlane.f32.xlu0 %v402_v21 }
 0x154   :  { %414 = vadd.xlane.f32.xlu1 %v401_v22 }
 0x155   :  { %412 = vadd.xlane.f32.xlu0 %v400_v23 }
 0x158   :  { %542 = vadd.xlane.f32.xlu1 %v529_v24 }
 0x159   :  { %540 = vadd.xlane.f32.xlu0 %v528_v25 }
 0x15c   :  { %546 = vadd.xlane.f32.xlu1 %v531_v26 }
 0x15d   :  { %544 = vadd.xlane.f32.xlu0 %v530_v27 }
 0x16d   :  { %v129_v28 = vpop.xlane.xlu1 %128 }
 0x16e   :  { %v257_v29 = vpop.xlane.xlu0 %256 }
 0x16f   :  { %v294_v30 = vadd.f32 %v257_v29, %v129_v28 }
 0x171   :  { %v131_v31 = vpop.xlane.xlu1 %130 }
 0x172   :  { %v125_v32 = vpop.xlane.xlu0 %124 }
 0x175   :  { %v259_v33 = vpop.xlane.xlu1 %258 }
 0x176   :  { %v253_v34 = vpop.xlane.xlu0 %252  ;;  %v295_v35 = vadd.f32 %v259_v33, %v131_v31 }
 0x177   :  { %v840_v36 = vadd.f32 %v253_v34, %v125_v32 }
 0x179   :  { %v255_v37 = vpop.xlane.xlu1 %254 }
 0x17a   :  { %v153_v38 = vpop.xlane.xlu0 %152 }
 0x17d   :  { %v155_v39 = vpop.xlane.xlu1 %154 }
 0x17e   :  { %v281_v40 = vpop.xlane.xlu0 %280 }
 0x17f   :  { %v302_v41 = vadd.f32 %v281_v40, %v153_v38 }
 0x181   :  { %v283_v42 = vpop.xlane.xlu1 %282 }
 0x182   :  { %v127_v43 = vpop.xlane.xlu0 %126  ;;  %v303_v16 = vadd.f32 %v283_v42, %v155_v39 }
 0x183   :  { %v293_v44 = vadd.f32 %v255_v37, %v127_v43 }
 0x185   :  { %v151_v45 = vpop.xlane.xlu1 %150 }
 0x186   :  { %v149_v46 = vpop.xlane.xlu0 %148 }
 0x189   :  { %v279_v47 = vpop.xlane.xlu1 %278 }
 0x18a   :  { %v277_v48 = vpop.xlane.xlu0 %276 }
 0x18b   :  { %v300_v33 = vadd.f32 %v277_v48, %v149_v46 }
 0x18d   :  { %v139_v49 = vpop.xlane.xlu1 %138 }
 0x18e   :  { %v137_v50 = vpop.xlane.xlu0 %136 }
 0x191   :  { %v267_v51 = vpop.xlane.xlu1 %266 }
 0x192   :  { %v265_v52 = vpop.xlane.xlu0 %264  ;;  %v842_v53 = vadd.f32 %v267_v51, %v139_v49 }
 0x193   :  { %v844_v54 = vadd.f32 %v265_v52, %v137_v50 }
 0x195   :  { %v135_v55 = vpop.xlane.xlu1 %134 }
 0x196   :  { %v133_v56 = vpop.xlane.xlu0 %132 }
 0x199   :  { %v263_v57 = vpop.xlane.xlu1 %262 }
 0x19a   :  { %v261_v58 = vpop.xlane.xlu0 %260  ;;  %v846_v59 = vadd.f32 %v263_v57, %v135_v55 }
 0x19b   :  { %v848_v60 = vadd.f32 %v261_v58, %v133_v56 }
 0x19d   :  { %v163_v61 = vpop.xlane.xlu1 %162 }
 0x19e   :  { %v161_v62 = vpop.xlane.xlu0 %160 }
 0x1a1   :  { %v291_v63 = vpop.xlane.xlu1 %290 }
 0x1a2   :  { %v289_v0 = vpop.xlane.xlu0 %288  ;;  %v850_v1 = vadd.f32 %v291_v63, %v163_v61 }
 0x1a3   :  { %v852_v2 = vadd.f32 %v289_v0, %v161_v62 }
 0x1a5   :  { %v159_v3 = vpop.xlane.xlu1 %158 }
 0x1a6   :  { %v157_v4 = vpop.xlane.xlu0 %156 }
 0x1a9   :  { %v287_v5 = vpop.xlane.xlu1 %286 }
 0x1aa   :  { %v285_v6 = vpop.xlane.xlu0 %284  ;;  %v305_v61 = vadd.f32 %v287_v5, %v159_v3 }
 0x1ab   :  { %v304_v63 = vadd.f32 %v285_v6, %v157_v4 }
 0x1ad   :  { %v387_v7 = vpop.xlane.xlu1 %386 }
 0x1ae   :  { %v385_v8 = vpop.xlane.xlu0 %384  ;;  %v423_v18 = vadd.f32 %v387_v7, %v295_v35 }
 0x1af   :  { %v422_v20 = vadd.f32 %v385_v8, %v294_v30  ;;  %v301_v30 = vadd.f32 %v279_v47, %v151_v45 }
 0x1b1   :  { %v515_v9 = vpop.xlane.xlu1 %514 }
 0x1b2   :  { %v513_v10 = vpop.xlane.xlu0 %512  ;;  %v551_v23 = vadd.f32 %v515_v9, %v423_v18 }
 0x1b3   :  { %v550_v26 = vadd.f32 %v513_v10, %v422_v20 }
 0x1b5   :  { %v383_v11 = vpop.xlane.xlu1 %382 }
 0x1b6   :  { %v381_v12 = vpop.xlane.xlu0 %380  ;;  %v421_v34 = vadd.f32 %v383_v11, %v293_v44 }
 0x1b7   :  { %v420_v37 = vadd.f32 %v381_v12, %v840_v36 }
 0x1b9   :  { %v511_v13 = vpop.xlane.xlu1 %510 }
 0x1ba   :  { %v509_v14 = vpop.xlane.xlu0 %508  ;;  %v549_v40 = vadd.f32 %v511_v13, %v421_v34 }
 0x1bb   :  { %v548_v43 = vadd.f32 %v509_v14, %v420_v37 }
 0x1bd   :  { %v411_v15 = vpop.xlane.xlu1 %410 }
 0x1be   :  { %v409_v17 = vpop.xlane.xlu0 %408  ;;  %v431_v19 = vadd.f32 %v411_v15, %v303_v16 }
 0x1bf   :  { %v430_v21 = vadd.f32 %v409_v17, %v302_v41 }
 0x1c1   :  { %v539_v22 = vpop.xlane.xlu1 %538 }
 0x1c2   :  { %v537_v24 = vpop.xlane.xlu0 %536  ;;  %v559_v25 = vadd.f32 %v539_v22, %v431_v19 }
 0x1c3   :  { %v558_v27 = vadd.f32 %v537_v24, %v430_v21 }
 0x1c4   :  { %v568_v28 = vsel %vm564_vm1, %v551_v23, %v559_v25 }
 0x1c5   :  { %v567_v29 = vsel %vm564_vm1, %v550_v26, %v558_v27  ;;  %577 = vst.msk [vmem:[%s903_s2 + $0x18] sm:$0xff] %vm573_vm2, %v568_v28  ;;  %v407_v31 = vpop.xlane.xlu1 %406 }
 0x1c6   :  { %576 = vst.msk [vmem:[%s903_s2 + $0x10] sm:$0xff] %vm573_vm2, %v567_v29  ;;  %v405_v32 = vpop.xlane.xlu0 %404  ;;  %v429_v35 = vadd.f32 %v407_v31, %v301_v30 }
 0x1c7   :  { %v428_v38 = vadd.f32 %v405_v32, %v300_v33 }
 0x1c9   :  { %v535_v39 = vpop.xlane.xlu1 %534 }
 0x1ca   :  { %v533_v41 = vpop.xlane.xlu0 %532  ;;  %v557_v42 = vadd.f32 %v535_v39, %v429_v35 }
 0x1cb   :  { %v556_v49 = vadd.f32 %v533_v41, %v428_v38 }
 0x1cc   :  { %v566_v45 = vsel %vm564_vm1, %v549_v40, %v557_v42 }
 0x1cd   :  { %v565_v47 = vsel %vm564_vm1, %v548_v43, %v556_v49  ;;  %575 = vst.msk [vmem:[%s903_s2 + $0x8] sm:$0xff] %vm573_vm2, %v566_v45  ;;  %v395_v44 = vpop.xlane.xlu1 %394 }
 0x1ce   :  { %574 = vst.msk [vmem:[%s903_s2] sm:$0xff] %vm573_vm2, %v565_v47  ;;  %v393_v36 = vpop.xlane.xlu0 %392  ;;  %v427_v16 = vadd.f32 %v395_v44, %v842_v53 }
 0x1cf   :  { %v426_v4 = vadd.f32 %v393_v36, %v844_v54 }
 0x1d1   :  { %v523_v46 = vpop.xlane.xlu1 %522 }
 0x1d2   :  { %v521_v48 = vpop.xlane.xlu0 %520  ;;  %v555_v6 = vadd.f32 %v523_v46, %v427_v16 }
 0x1d3   :  { %v554_v18 = vadd.f32 %v521_v48, %v426_v4 }
 0x1d5   :  { %v391_v50 = vpop.xlane.xlu1 %390 }
 0x1d6   :  { %v389_v51 = vpop.xlane.xlu0 %388  ;;  %v425_v0 = vadd.f32 %v391_v50, %v846_v59 }
 0x1d7   :  { %v424_v8 = vadd.f32 %v389_v51, %v848_v60 }
 0x1d9   :  { %v519_v52 = vpop.xlane.xlu1 %518 }
 0x1da   :  { %v517_v55 = vpop.xlane.xlu0 %516  ;;  %v553_v11 = vadd.f32 %v519_v52, %v425_v0 }
 0x1db   :  { %v552_v14 = vadd.f32 %v517_v55, %v424_v8 }
 0x1dd   :  { %v419_v56 = vpop.xlane.xlu1 %418 }
 0x1de   :  { %v417_v57 = vpop.xlane.xlu0 %416  ;;  %v435_v17 = vadd.f32 %v419_v56, %v850_v1 }
 0x1df   :  { %v434_v59 = vadd.f32 %v417_v57, %v852_v2 }
 0x1e1   :  { %v415_v58 = vpop.xlane.xlu1 %414 }
 0x1e2   :  { %v413_v62 = vpop.xlane.xlu0 %412  ;;  %v433_v7 = vadd.f32 %v415_v58, %v305_v61 }
 0x1e3   :  { %v432_v9 = vadd.f32 %v413_v62, %v304_v63 }
 0x1e5   :  { %v543_v10 = vpop.xlane.xlu1 %542 }
 0x1e6   :  { %v541_v12 = vpop.xlane.xlu0 %540  ;;  %v561_v13 = vadd.f32 %v543_v10, %v433_v7 }
 0x1e7   :  { %v560_v15 = vadd.f32 %v541_v12, %v432_v9 }
 0x1e8   :  { %v570_v3 = vsel %vm564_vm1, %v553_v11, %v561_v13 }
 0x1e9   :  { %v569_v5 = vsel %vm564_vm1, %v552_v14, %v560_v15  ;;  %579 = vst.msk [vmem:[%s903_s2 + $0x28] sm:$0xff] %vm573_vm2, %v570_v3  ;;  %v547_v60 = vpop.xlane.xlu1 %546 }
 0x1ea   :  { %578 = vst.msk [vmem:[%s903_s2 + $0x20] sm:$0xff] %vm573_vm2, %v569_v5  ;;  %v545_v53 = vpop.xlane.xlu0 %544  ;;  %v563_v1 = vadd.f32 %v547_v60, %v435_v17 }
 0x1eb   :  { %v562_v54 = vadd.f32 %v545_v53, %v434_v59 }
 0x1ec   :  { %v572_v2 = vsel %vm564_vm1, %v555_v6, %v563_v1 }
 0x1ed   :  { %v571_v19 = vsel %vm564_vm1, %v554_v18, %v562_v54  ;;  %581 = vst.msk [vmem:[%s903_s2 + $0x38] sm:$0xff] %vm573_vm2, %v572_v2 }
 0x1ee   :  { %580 = vst.msk [vmem:[%s903_s2 + $0x30] sm:$0xff] %vm573_vm2, %v571_v19 }

// kernel: token_spiking_transformer.7
= control target key start
LH: loop header
LB: loop body
LE: loop exit
PB: predicated region body
PF: predicated region fallthrough
CT: control target
= control target key end

     0   :  { %v1613_v0 = vmov 0   ;;  %vm280_vm0 = vcmask 261120   ;;  %s2412_s3 = inlined_call_operand.vmem [shape: f32[32,1], index: 3, kind: input, shape index: {}]   ;;  %s2413_s2 = inlined_call_operand.vmem [shape: f32[32,1], index: 2, kind: input, shape index: {}]   ;;  %s2414_s5 = inlined_call_operand.vmem [shape: f32[128,1], index: 5, kind: input, shape index: {}]   ;;  %s2415_s4 = inlined_call_operand.vmem [shape: bf16[128,32], index: 4, kind: input, shape index: {}]   ;;  %s2416_s1 = inlined_call_operand.vmem [shape: bf16[4,32,128], index: 1, kind: input, shape index: {}]   ;;  %s2417_s0 = inlined_call_operand.vmem [shape: f32[4,32,128], index: 0, kind: input, shape index: {}]   ;;  %s2418_s6 = inlined_call_operand.vmem [shape: f32[4,32,128], index: 6, kind: output, shape index: {0}]   ;;  %s2419_s7 = inlined_call_operand.vmem [shape: f32[1,128,2], index: 7, kind: output, shape index: {1}]  }
   0x1   :  { %1604 = vset.pattern.permute.xlu1 %v1613_v0  ;;  %1603 = vset.pattern.permute.xlu0 %v1613_v0  ;;  %v30_v1 = vld [vmem:[%s2412_s3] sm:$0xff]  ;;  %v31_v3 = vld [vmem:[%s2412_s3 + $0x8] sm:$0xff]  ;;  %v29_v5 = vld [vmem:[%s2413_s2 + $0x18] sm:$0xff] }
   0x2   :  { %v26_v2 = vld [vmem:[%s2413_s2] sm:$0xff]  ;;  %100 = vperm.xlu1 %1604, %v30_v1   ;;  %v27_v4 = vld [vmem:[%s2413_s2 + $0x8] sm:$0xff]  ;;  %v28_v6 = vld [vmem:[%s2413_s2 + $0x10] sm:$0xff] }
   0x3   :  { %76 = vperm.xlu0 %1603, %v26_v2   ;;  %v33_v7 = vld [vmem:[%s2412_s3 + $0x18] sm:$0xff]  ;;  %v32_v8 = vld [vmem:[%s2412_s3 + $0x10] sm:$0xff]  ;;  %v51_v9 = vld [vmem:[%s2414_s5 + $0x8] sm:$0xff] }
   0x4   :  { %v50_v10 = vld [vmem:[%s2414_s5] sm:$0xff]  ;;  %v53_v11 = vld [vmem:[%s2414_s5 + $0x18] sm:$0xff]  ;;  %v52_v12 = vld [vmem:[%s2414_s5 + $0x10] sm:$0xff] }
   0x5   :  { %v55_v13 = vld [vmem:[%s2414_s5 + $0x28] sm:$0xff]  ;;  %v54_v14 = vld [vmem:[%s2414_s5 + $0x20] sm:$0xff]  ;;  %v57_v15 = vld [vmem:[%s2414_s5 + $0x38] sm:$0xff] }
   0x6   :  { %105 = vperm.xlu1 %1604, %v31_v3   ;;  %v56_v16 = vld [vmem:[%s2414_s5 + $0x30] sm:$0xff]  ;;  %v59_v17 = vld [vmem:[%s2414_s5 + $0x48] sm:$0xff]  ;;  %v58_v18 = vld [vmem:[%s2414_s5 + $0x40] sm:$0xff] }
   0x7   :  { %81 = vperm.xlu0 %1603, %v27_v4   ;;  %v1712_v19 = vld [vmem:[%s2415_s4] sm:$0xff]   ;;  %v61_v20 = vld [vmem:[%s2414_s5 + $0x58] sm:$0xff]  ;;  %v60_v21 = vld [vmem:[%s2414_s5 + $0x50] sm:$0xff] }
   0x8   :  { %1525 = vmatprep.mubr.msk.bf16.mxu0 %vm280_vm0, %v1712_v19  ;;  %1545 = vmatprep.mubr.msk.bf16.mxu1 %vm280_vm0, %v1712_v19  ;;  %v63_v22 = vld [vmem:[%s2414_s5 + $0x68] sm:$0xff]  ;;  %v62_v23 = vld [vmem:[%s2414_s5 + $0x60] sm:$0xff]  ;;  %v65_v24 = vld [vmem:[%s2414_s5 + $0x78] sm:$0xff] }
   0x9   :  { %v64_v25 = vld [vmem:[%s2414_s5 + $0x70] sm:$0xff]  ;;  %v1443_v26 = vld [vmem:[%s2416_s1] sm:$0xff]   ;;  %v1474_v38 = vld [vmem:[%s2416_s1 + $0x8] sm:$0xff]  }
   0xa   :  { %91 = vperm.xlu1 %1604, %v29_v5   ;;  %v1444_v27 = vunpack.c.l.bf16 %v1443_v26  ;;  %v1475_v28 = vld [vmem:[%s2416_s1 + $0x10] sm:$0xff]   ;;  %v1477_v29 = vld [vmem:[%s2416_s1 + $0x20] sm:$0xff]   ;;  %v1445_v34 = vunpack.c.h.bf16 %v1443_v26  ;;  %v1476_v43 = vld [vmem:[%s2416_s1 + $0x18] sm:$0xff]   ;;  %v1449_v49 = vunpack.c.h.bf16 %v1474_v38  ;;  %v1448_v61 = vunpack.c.l.bf16 %v1474_v38 }
   0xb   :  { %86 = vperm.xlu0 %1603, %v28_v6   ;;  %v1479_v30 = vld [vmem:[%s2416_s1 + $0x30] sm:$0xff]   ;;  %v1452_v35 = vunpack.c.l.bf16 %v1475_v28  ;;  %v1460_v36 = vunpack.c.l.bf16 %v1477_v29  ;;  %v1757_v44 = vld [vmem:[%s2416_s1 + $0x28] sm:$0xff]   ;;  %v1762_v45 = vld [vmem:[%s2416_s1 + $0x38] sm:$0xff]   ;;  %v1453_v47 = vunpack.c.h.bf16 %v1475_v28  ;;  %v1461_v48 = vunpack.c.h.bf16 %v1477_v29 }
   0xc   :  { %v1468_v37 = vunpack.c.l.bf16 %v1479_v30  ;;  %v1469_v42 = vunpack.c.h.bf16 %v1479_v30  ;;  %v1457_v54 = vunpack.c.h.bf16 %v1476_v43  ;;  %v1465_v55 = vunpack.c.h.bf16 %v1757_v44  ;;  %v138_v2 = vld [vmem:[%s2417_s0] sm:$0xff]  ;;  %v140_v38 = vld [vmem:[%s2417_s0 + $0x10] sm:$0xff] }
   0xd   :  { %v1473_v56 = vunpack.c.h.bf16 %v1762_v45  ;;  %v1456_v0 = vunpack.c.l.bf16 %v1476_v43  ;;  %v1464_v1 = vunpack.c.l.bf16 %v1757_v44  ;;  %v1472_v4 = vunpack.c.l.bf16 %v1762_v45 }
   0xe   :  { %115 = vperm.xlu1 %1604, %v33_v7  }
   0xf   :  { %110 = vperm.xlu0 %1603, %v32_v8  }
  0x12   :  { %167 = vperm.xlu1 %1604, %v51_v9  }
  0x13   :  { %162 = vperm.xlu0 %1603, %v50_v10   ;;  %v1614_v10 = vmov 0.0  }
  0x16   :  { %177 = vperm.xlu1 %1604, %v53_v11  }
  0x17   :  { %172 = vperm.xlu0 %1603, %v52_v12  }
  0x1a   :  { %187 = vperm.xlu1 %1604, %v55_v13  }
  0x1b   :  { %182 = vperm.xlu0 %1603, %v54_v14  }
  0x1e   :  { %197 = vperm.xlu1 %1604, %v57_v15  }
  0x1f   :  { %192 = vperm.xlu0 %1603, %v56_v16  }
  0x22   :  { %207 = vperm.xlu1 %1604, %v59_v17  }
  0x23   :  { %202 = vperm.xlu0 %1603, %v58_v18  }
  0x26   :  { %217 = vperm.xlu1 %1604, %v61_v20  }
  0x27   :  { %212 = vperm.xlu0 %1603, %v60_v21  }
  0x2a   :  { %227 = vperm.xlu1 %1604, %v63_v22  }
  0x2b   :  { %222 = vperm.xlu0 %1603, %v62_v23  }
  0x2e   :  { %237 = vperm.xlu1 %1604, %v65_v24  }
  0x2f   :  { %232 = vperm.xlu0 %1603, %v64_v25  }
  0x81   :  { %v101_v31 = vpop.permute.xlu1 %100 }
  0x82   :  { %v77_v32 = vpop.permute.xlu0 %76 }
  0x83   :  { %v94_v33 = vmul.f32 %v1444_v27, %v77_v32  ;;  %v523_v50 = vmul.f32 %v1452_v35, %v77_v32  ;;  %v789_v51 = vmul.f32 %v1460_v36, %v77_v32  ;;  %v1055_v52 = vmul.f32 %v1468_v37, %v77_v32  ;;  %v139_v27 = vld [vmem:[%s2417_s0 + $0x8] sm:$0xff]  ;;  %v141_v35 = vld [vmem:[%s2417_s0 + $0x18] sm:$0xff] }
  0x85   :  { %v118_v39 = vadd.f32 %v101_v31, %v94_v33  ;;  %v106_v40 = vpop.permute.xlu1 %105  ;;  %v1772_v3 = vadd.f32 %v1055_v52, %v101_v31  ;;  %v527_v5 = vadd.f32 %v523_v50, %v101_v31  ;;  %v793_v6 = vadd.f32 %v789_v51, %v101_v31 }
  0x86   :  { %v82_v41 = vpop.permute.xlu0 %81 }
  0x87   :  { %v95_v46 = vmul.f32 %v1445_v34, %v82_v41  ;;  %v126_v53 = vmul.f32 0.5, %v118_v39  ;;  %v1056_v58 = vmul.f32 %v1469_v42, %v82_v41  ;;  %v524_v62 = vmul.f32 %v1453_v47, %v82_v41  ;;  %v1374_v47 = vld [vmem:[%s2417_s0 + $0x20] sm:$0xff] }
  0x88   :  { %v790_v63 = vmul.f32 %v1461_v48, %v82_v41 }
  0x89   :  { %v119_v57 = vadd.f32 %v106_v40, %v95_v46  ;;  %v92_v59 = vpop.permute.xlu1 %91  ;;  %vm130_vm1 = vcmp.ge.f32.partialorder %v126_v53, 1.0  ;;  %v1776_v12 = vadd.f32 %v1056_v58, %v106_v40  ;;  %v528_v21 = vadd.f32 %v524_v62, %v106_v40 }
  0x8a   :  { %v1766_v60 = vpop.permute.xlu0 %86  ;;  %v97_v7 = vmul.f32 %v1449_v49, %v92_v59  ;;  %v134_v9 = vsel %vm130_vm1, 0.0, %v126_v53  ;;  %v1350_v11 = vsel %vm130_vm1, 1.0, %v1614_v10  ;;  %v526_v18 = vmul.f32 %v1457_v54, %v92_v59  ;;  %v1375_v54 = vld [vmem:[%s2417_s0 + $0x28] sm:$0xff] }
  0x8b   :  { %v127_v8 = vmul.f32 0.5, %v119_v57  ;;  %v96_v13 = vmul.f32 %v1448_v61, %v1766_v60  ;;  %v150_v16 = vadd.f32 %v1350_v11, %v138_v2  ;;  %v531_v17 = vadd.f32 %v527_v5, %v134_v9 }
  0x8c   :  { %v794_v22 = vadd.f32 %v790_v63, %v106_v40  ;;  %v792_v23 = vmul.f32 %v1465_v55, %v92_v59  ;;  %v1784_v24 = vmul.f32 %v1473_v56, %v92_v59  ;;  %v525_v25 = vmul.f32 %v1456_v0, %v1766_v60 }
  0x8d   :  { %v1779_v14 = vpop.permute.xlu1 %115  ;;  %154 = vst [vmem:[%s2418_s6] sm:$0xff] %v150_v16  ;;  %vm131_vm2 = vcmp.ge.f32.partialorder %v127_v8, 1.0  ;;  %v535_v30 = vmul.f32 0.5, %v531_v17  ;;  %v791_v52 = vmul.f32 %v1464_v1, %v1766_v60 }
  0x8e   :  { %v1781_v15 = vpop.permute.xlu0 %110  ;;  %v121_v20 = vadd.f32 %v1779_v14, %v97_v7  ;;  %v530_v29 = vadd.f32 %v526_v18, %v1779_v14  ;;  %v135_v33 = vsel %vm131_vm2, 0.0, %v127_v8  ;;  %v1351_v34 = vsel %vm131_vm2, 1.0, %v1614_v10  ;;  %v1377_v7 = vld [vmem:[%s2417_s0 + $0x38] sm:$0xff]  ;;  %v1839_v8 = vld [vmem:[%s2415_s4 + $0x8] sm:$0xff]  }
  0x8f   :  { %v120_v26 = vadd.f32 %v1781_v15, %v96_v13  ;;  %v529_v32 = vadd.f32 %v525_v25, %v1781_v15  ;;  %v151_v36 = vadd.f32 %v1351_v34, %v139_v27  ;;  %v532_v37 = vadd.f32 %v528_v21, %v135_v33  ;;  %v1852_v21 = vld [vmem:[%s2415_s4 + $0x10] sm:$0xff]   ;;  %v1399_v27 = vld [vmem:[%s2417_s0 + $0x48] sm:$0xff] }
  0x90   :  { %v129_v28 = vmul.f32 0.5, %v121_v20  ;;  %vm539_vm4 = vcmp.ge.f32.partialorder %v535_v30, 1.0  ;;  %v796_v53 = vadd.f32 %v792_v23, %v1779_v14  ;;  %v795_v1 = vadd.f32 %v791_v52, %v1781_v15  ;;  %v1398_v20 = vld [vmem:[%s2417_s0 + $0x40] sm:$0xff] }
  0x91   :  { %v128_v31 = vmul.f32 0.5, %v120_v26  ;;  %v543_v41 = vsel %vm539_vm4, 0.0, %v535_v30  ;;  %155 = vst [vmem:[%s2418_s6 + $0x8] sm:$0xff] %v151_v36  ;;  %v158_v42 = vpack.c.bf16 %v151_v36, %v150_v16  ;;  %v536_v51 = vmul.f32 0.5, %v532_v37 }
  0x92   :  { %vm133_vm3 = vcmp.ge.f32.partialorder %v129_v28, 1.0  ;;  %v1378_v55 = vsel %vm539_vm4, 1.0, %v1614_v10  ;;  %v797_v56 = vadd.f32 %v793_v6, %v543_v41  ;;  %v1376_v6 = vld [vmem:[%s2417_s0 + $0x30] sm:$0xff]  ;;  %v1062_v36 = vadd.f32 %v1784_v24, %v1779_v14  ;;  %v1894_v24 = vld [vmem:[%s2415_s4 + $0x18] sm:$0xff]  }
  0x93   :  { %vm132_vm5 = vcmp.ge.f32.partialorder %v128_v31, 1.0  ;;  %v137_v39 = vsel %vm133_vm3, 0.0, %v129_v28  ;;  %v1353_v40 = vsel %vm133_vm3, 1.0, %v1614_v10  ;;  %1521 = vmatprep.subr.bf16.mxu0 %v158_v42  ;;  %vm540_vm6 = vcmp.ge.f32.partialorder %v536_v51, 1.0 }
  0x94   :  { %v136_v43 = vsel %vm132_vm5, 0.0, %v128_v31  ;;  %v1352_v44 = vsel %vm132_vm5, 1.0, %v1614_v10  ;;  %v153_v46 = vadd.f32 %v1353_v40, %v141_v35  ;;  %v534_v50 = vadd.f32 %v530_v29, %v137_v39  ;;  %1522 = vmatpush3.bf16.msra.mxu0 %v158_v42  ;;  %v1401_v39 = vld [vmem:[%s2417_s0 + $0x58] sm:$0xff] }
  0x95   :  { %v152_v48 = vadd.f32 %v1352_v44, %v140_v38  ;;  %v533_v49 = vadd.f32 %v529_v32, %v136_v43  ;;  %v560_v58 = vadd.f32 %v1378_v55, %v1374_v47  ;;  %v544_v61 = vsel %vm540_vm6, 0.0, %v536_v51  ;;  %v1400_v38 = vld [vmem:[%s2417_s0 + $0x50] sm:$0xff]  ;;  %v1422_v43 = vld [vmem:[%s2417_s0 + $0x60] sm:$0xff] }
  0x96   :  { %157 = vst [vmem:[%s2418_s6 + $0x18] sm:$0xff] %v153_v46  ;;  %v1379_v62 = vsel %vm540_vm6, 1.0, %v1614_v10  ;;  %v801_v63 = vmul.f32 0.5, %v797_v56  ;;  %v538_v0 = vmul.f32 0.5, %v534_v50  ;;  %v798_v5 = vadd.f32 %v794_v22, %v544_v61  ;;  %v1425_v61 = vld [vmem:[%s2417_s0 + $0x78] sm:$0xff] }
  0x97   :  { %156 = vst [vmem:[%s2418_s6 + $0x10] sm:$0xff] %v152_v48  ;;  %v159_v57 = vpack.c.bf16 %v153_v46, %v152_v48  ;;  %v537_v59 = vmul.f32 0.5, %v533_v49  ;;  %v561_v2 = vadd.f32 %v1379_v62, %v1375_v54  ;;  %1382 = vst [vmem:[%s2418_s6 + $0x20] sm:$0xff] %v560_v58  ;;  %v1057_v28 = vmul.f32 %v1472_v4, %v1766_v60  ;;  %v1609_v48 = vld [vmem:[%s2415_s4 + $0x20] sm:$0xff]   ;;  %v1423_v49 = vld [vmem:[%s2417_s0 + $0x68] sm:$0xff] }
  0x98   :  { %vm542_vm8 = vcmp.ge.f32.partialorder %v538_v0, 1.0  ;;  %vm805_vm9 = vcmp.ge.f32.partialorder %v801_v63, 1.0  ;;  %v802_v16 = vmul.f32 0.5, %v798_v5  ;;  %v1610_v5 = vld [vmem:[%s2415_s4 + $0x28] sm:$0xff]   ;;  %vm1325_vm2 = vcmask 15360  }
  0x99   :  { %1523 = vmatprep.subr.bf16.mxu0 %v159_v57  ;;  %vm541_vm7 = vcmp.ge.f32.partialorder %v537_v59, 1.0  ;;  %1383 = vst [vmem:[%s2418_s6 + $0x28] sm:$0xff] %v561_v2  ;;  %v569_v13 = vpack.c.bf16 %v561_v2, %v560_v58  ;;  %v546_v17 = vsel %vm542_vm8, 0.0, %v538_v0  ;;  %v1381_v18 = vsel %vm542_vm8, 1.0, %v1614_v10 }
  0x9a   :  { %v545_v9 = vsel %vm541_vm7, 0.0, %v537_v59  ;;  %v1380_v11 = vsel %vm541_vm7, 1.0, %v1614_v10  ;;  %1524 = vmatpush3.bf16.msra.mxu0 %v159_v57  ;;  %v563_v23 = vadd.f32 %v1381_v18, %v1377_v7  ;;  %v800_v26 = vadd.f32 %v796_v53, %v546_v17  ;;  %v1424_v59 = vld [vmem:[%s2417_s0 + $0x70] sm:$0xff]  ;;  %v1612_v7 = vld [vmem:[%s2415_s4 + $0x38] sm:$0xff]  }
  0x9b   :  { %v562_v22 = vadd.f32 %v1380_v11, %v1376_v6  ;;  %v799_v25 = vadd.f32 %v795_v1, %v545_v9  ;;  %1541 = vmatprep.subr.bf16.mxu1 %v569_v13  ;;  %vm806_vm10 = vcmp.ge.f32.partialorder %v802_v16, 1.0  ;;  %v809_v29 = vsel %vm805_vm9, 0.0, %v801_v63  ;;  %v1611_v6 = vld [vmem:[%s2415_s4 + $0x30] sm:$0xff]   ;;  %v1988_v11 = vpop.permute.xlu1 %167 }
  0x9c   :  { %v1402_v30 = vsel %vm805_vm9, 1.0, %v1614_v10  ;;  %1542 = vmatpush3.bf16.msra.mxu1 %v569_v13  ;;  %1385 = vst [vmem:[%s2418_s6 + $0x38] sm:$0xff] %v563_v23  ;;  %v810_v60 = vsel %vm806_vm10, 0.0, %v802_v16  ;;  %v1403_v4 = vsel %vm806_vm10, 1.0, %v1614_v10  ;;  %v804_v34 = vmul.f32 0.5, %v800_v26 }
  0x9d   :  { %1526 = vmatmul.mubr.msk.bf16.vlgmr.msra.gmra.mrb[0].mxu0 %vm280_vm0, %v1839_v8  ;;  %1384 = vst [vmem:[%s2418_s6 + $0x30] sm:$0xff] %v562_v22  ;;  %v570_v45 = vpack.c.bf16 %v563_v23, %v562_v22  ;;  %v826_v31 = vadd.f32 %v1402_v30, %v1398_v20  ;;  %v827_v32 = vadd.f32 %v1403_v4, %v1399_v27  ;;  %v803_v33 = vmul.f32 0.5, %v799_v25 }
  0x9e   :  { %1529 = vmatprep.mubr.msk.bf16.mxu0 %vm280_vm0, %v1852_v21  ;;  %v1063_v35 = vadd.f32 %v1772_v3, %v809_v29  ;;  %v1061_v37 = vadd.f32 %v1057_v28, %v1781_v15  ;;  %v1064_v3 = vadd.f32 %v1776_v12, %v810_v60  ;;  %vm808_vm12 = vcmp.ge.f32.partialorder %v804_v34, 1.0 }
  0x9f   :  { %1543 = vmatprep.subr.bf16.mxu1 %v570_v45  ;;  %1406 = vst [vmem:[%s2418_s6 + $0x40] sm:$0xff] %v826_v31  ;;  %1407 = vst [vmem:[%s2418_s6 + $0x48] sm:$0xff] %v827_v32  ;;  %v835_v14 = vpack.c.bf16 %v827_v32, %v826_v31  ;;  %vm807_vm11 = vcmp.ge.f32.partialorder %v803_v33, 1.0  ;;  %v812_v41 = vsel %vm808_vm12, 0.0, %v804_v34  ;;  %v1405_v12 = vsel %vm808_vm12, 1.0, %v1614_v10  ;;  %v1992_v22 = vpop.permute.xlu1 %177 }
  0xa0   :  { %v1067_v15 = vmul.f32 0.5, %v1063_v35  ;;  %1544 = vmatpush3.bf16.msra.mxu1 %v570_v45  ;;  %v811_v40 = vsel %vm807_vm11, 0.0, %v803_v33  ;;  %v1404_v42 = vsel %vm807_vm11, 1.0, %v1614_v10  ;;  %v829_v46 = vadd.f32 %v1405_v12, %v1401_v39 }
  0xa1   :  { %1561 = vmatprep.subr.bf16.mxu0 %v835_v14  ;;  %v828_v44 = vadd.f32 %v1404_v42, %v1400_v38  ;;  %v1068_v47 = vmul.f32 0.5, %v1064_v3  ;;  %v1065_v51 = vadd.f32 %v1061_v37, %v811_v40  ;;  %v1066_v52 = vadd.f32 %v1062_v36, %v812_v41 }
  0xa2   :  { %vm1071_vm13 = vcmp.ge.f32.partialorder %v1067_v15, 1.0  ;;  %1562 = vmatpush3.bf16.msra.mxu0 %v835_v14  ;;  %1409 = vst [vmem:[%s2418_s6 + $0x58] sm:$0xff] %v829_v46 }
  0xa3   :  { %v1426_v50 = vsel %vm1071_vm13, 1.0, %v1614_v10  ;;  %1546 = vmatmul.mubr.msk.bf16.vlgmr.msra.gmra.mrb[0].mxu1 %vm280_vm0, %v1839_v8  ;;  %1408 = vst [vmem:[%s2418_s6 + $0x50] sm:$0xff] %v828_v44  ;;  %v836_v53 = vpack.c.bf16 %v829_v46, %v828_v44  ;;  %vm1072_vm14 = vcmp.ge.f32.partialorder %v1068_v47, 1.0  ;;  %v1069_v56 = vmul.f32 0.5, %v1065_v51  ;;  %v2017_v42 = vpop.permute.xlu1 %187 }
  0xa4   :  { %v1088_v54 = vadd.f32 %v1426_v50, %v1422_v43  ;;  %v1427_v55 = vsel %vm1072_vm14, 1.0, %v1614_v10  ;;  %1549 = vmatprep.mubr.msk.bf16.mxu1 %vm280_vm0, %v1852_v21  ;;  %v1070_v57 = vmul.f32 0.5, %v1066_v52 }
  0xa5   :  { %1530 = vmatmul.mubr.msk.bf16.gmra.mrb[4].mxu0 %vm280_vm0, %v1894_v24  ;;  %1563 = vmatprep.subr.bf16.mxu0 %v836_v53  ;;  %v1089_v58 = vadd.f32 %v1427_v55, %v1423_v49  ;;  %vm1073_vm15 = vcmp.ge.f32.partialorder %v1069_v56, 1.0 }
  0xa6   :  { %1430 = vst [vmem:[%s2418_s6 + $0x60] sm:$0xff] %v1088_v54  ;;  %1533 = vmatprep.mubr.msk.bf16.mxu0 %vm280_vm0, %v1609_v48  ;;  %1564 = vmatpush3.bf16.msra.mxu0 %v836_v53  ;;  %vm1074_vm1 = vcmp.ge.f32.partialorder %v1070_v57, 1.0  ;;  %v1428_v63 = vsel %vm1073_vm15, 1.0, %v1614_v10 }
  0xa7   :  { %1431 = vst [vmem:[%s2418_s6 + $0x68] sm:$0xff] %v1089_v58  ;;  %v1097_v62 = vpack.c.bf16 %v1089_v58, %v1088_v54  ;;  %v1429_v0 = vsel %vm1074_vm1, 1.0, %v1614_v10  ;;  %v1090_v1 = vadd.f32 %v1428_v63, %v1424_v59  ;;  %v2039_v55 = vpop.permute.xlu1 %197 }
  0xa8   :  { %v1091_v2 = vadd.f32 %v1429_v0, %v1425_v61 }
  0xa9   :  { %1581 = vmatprep.subr.bf16.mxu1 %v1097_v62  ;;  %1432 = vst [vmem:[%s2418_s6 + $0x70] sm:$0xff] %v1090_v1 }
  0xaa   :  { %1582 = vmatpush3.bf16.msra.mxu1 %v1097_v62  ;;  %1433 = vst [vmem:[%s2418_s6 + $0x78] sm:$0xff] %v1091_v2  ;;  %v1098_v10 = vpack.c.bf16 %v1091_v2, %v1090_v1 }
  0xab   :  { %1550 = vmatmul.mubr.msk.bf16.gmra.mrb[4].mxu1 %vm280_vm0, %v1894_v24 }
  0xac   :  { %1583 = vmatprep.subr.bf16.mxu1 %v1098_v10  ;;  %1553 = vmatprep.mubr.msk.bf16.mxu1 %vm280_vm0, %v1609_v48 }
  0xad   :  { %1534 = vmatmul.mubr.msk.bf16.gmra.mrb[8].mxu0 %vm280_vm0, %v1610_v5 }
  0xae   :  { %1537 = vmatprep.mubr.msk.bf16.mxu0 %vm280_vm0, %v1611_v6  ;;  %1584 = vmatpush3.bf16.msra.mxu1 %v1098_v10 }
  0xb3   :  { %1554 = vmatmul.mubr.msk.bf16.gmra.mrb[8].mxu1 %vm280_vm0, %v1610_v5 }
  0xb4   :  { %1557 = vmatprep.mubr.msk.bf16.mxu1 %vm280_vm0, %v1611_v6 }
  0xb5   :  { %1538 = vmatmul.mubr.msk.bf16.gmra.mrb[12].mxu0 %vm280_vm0, %v1612_v7 }
  0xb6   :  { %1565 = vmatprep.mubr.msk.bf16.mxu0 %vm280_vm0, %v1712_v19 }
  0xbb   :  { %1558 = vmatmul.mubr.msk.bf16.gmra.mrb[12].mxu1 %vm280_vm0, %v1612_v7 }
  0xbc   :  { %1585 = vmatprep.mubr.msk.bf16.mxu1 %vm280_vm0, %v1712_v19  ;;  %v1984_v19 = vpop.permute.xlu0 %162 }
  0xbd   :  { %1566 = vmatmul.mubr.msk.bf16.vlgmr.msra.gmra.mrb[16].mxu0 %vm280_vm0, %v1839_v8 }
  0xbe   :  { %1569 = vmatprep.mubr.msk.bf16.mxu0 %vm280_vm0, %v1852_v21 }
  0xc3   :  { %1586 = vmatmul.mubr.msk.bf16.vlgmr.msra.gmra.mrb[16].mxu1 %vm280_vm0, %v1839_v8  ;;  %v1986_v8 = vpop.permute.xlu0 %172 }
  0xc4   :  { %1589 = vmatprep.mubr.msk.bf16.mxu1 %vm280_vm0, %v1852_v21 }
  0xc5   :  { %1570 = vmatmul.mubr.msk.bf16.gmra.mrb[20].mxu0 %vm280_vm0, %v1894_v24 }
  0xc6   :  { %1573 = vmatprep.mubr.msk.bf16.mxu0 %vm280_vm0, %v1609_v48 }
  0xc7   :  { %v1996_v33 = vpop.permute.xlu0 %182 }
  0xcb   :  { %1590 = vmatmul.mubr.msk.bf16.gmra.mrb[20].mxu1 %vm280_vm0, %v1894_v24  ;;  %v2019_v12 = vpop.permute.xlu0 %192 }
  0xcc   :  { %1593 = vmatprep.mubr.msk.bf16.mxu1 %vm280_vm0, %v1609_v48 }
  0xcd   :  { %1574 = vmatmul.mubr.msk.bf16.gmra.mrb[24].mxu0 %vm280_vm0, %v1610_v5 }
  0xce   :  { %1577 = vmatprep.mubr.msk.bf16.mxu0 %vm280_vm0, %v1611_v6 }
  0xd3   :  { %1594 = vmatmul.mubr.msk.bf16.gmra.mrb[24].mxu1 %vm280_vm0, %v1610_v5 }
  0xd4   :  { %1597 = vmatprep.mubr.msk.bf16.mxu1 %vm280_vm0, %v1611_v6 }
  0xd5   :  { %1578 = vmatmul.mubr.msk.bf16.gmra.mrb[28].mxu0 %vm280_vm0, %v1612_v7 }
  0xdb   :  { %1598 = vmatmul.mubr.msk.bf16.gmra.mrb[28].mxu1 %vm280_vm0, %v1612_v7  ;;  %vm1308_vm0 = vcmask 7168  }
 0x170   :  { %v1527_v9 = vpop.f32.mrb[0].mxu0 }
 0x171   :  { %v348_v13 = vadd.f32 %v1527_v9, %v1986_v8  ;;  %v339_v16 = vpop.f32.mrb[1].mxu0 }
 0x172   :  { %v1528_v17 = vpop.f32.mrb[2].mxu0  ;;  %v340_v21 = vadd.f32 %v339_v16, %v1984_v19 }
 0x173   :  { %406 = vadd.xlane.f32.xlu0 %v348_v13  ;;  %v342_v18 = vpop.f32.mrb[3].mxu0  ;;  %v436_v20 = vmul.f32 %v348_v13, %v348_v13  ;;  %v351_v28 = vadd.f32 %v1528_v17, %v1992_v22 }
 0x174   :  { %v343_v23 = vadd.f32 %v342_v18, %v1988_v11  ;;  %v434_v31 = vmul.f32 %v340_v21, %v340_v21 }
 0x175   :  { %454 = vadd.xlane.f32.xlu1 %v436_v20  ;;  %v437_v32 = vmul.f32 %v351_v28, %v351_v28 }
 0x176   :  { %v1547_v25 = vpop.f32.mrb[0].mxu1  ;;  %v435_v3 = vmul.f32 %v343_v23, %v343_v23 }
 0x177   :  { %402 = vadd.xlane.f32.xlu0 %v340_v21  ;;  %v605_v26 = vpop.f32.mrb[1].mxu1  ;;  %v614_v34 = vadd.f32 %v1547_v25, %v1986_v8 }
 0x178   :  { %v1531_v27 = vpop.f32.mrb[4].mxu0  ;;  %v1548_v29 = vpop.f32.mrb[2].mxu1  ;;  %v606_v24 = vadd.f32 %v605_v26, %v1984_v19 }
 0x179   :  { %v355_v30 = vpop.f32.mrb[5].mxu0  ;;  %404 = vadd.xlane.f32.xlu1 %v343_v23  ;;  %v608_v45 = vpop.f32.mrb[3].mxu1  ;;  %v617_v41 = vadd.f32 %v1548_v29, %v1992_v22  ;;  %v364_v43 = vadd.f32 %v1531_v27, %v2019_v12  ;;  %v702_v54 = vmul.f32 %v614_v34, %v614_v34 }
 0x17a   :  { %v1532_v60 = vpop.f32.mrb[6].mxu0  ;;  %v609_v48 = vadd.f32 %v608_v45, %v1988_v11  ;;  %v356_v57 = vadd.f32 %v355_v30, %v1996_v33  ;;  %v700_v6 = vmul.f32 %v606_v24, %v606_v24 }
 0x17b   :  { %v358_v4 = vpop.f32.mrb[7].mxu0  ;;  %408 = vadd.xlane.f32.xlu0 %v351_v28  ;;  %v367_v56 = vadd.f32 %v1532_v60, %v2039_v55  ;;  %v703_v0 = vmul.f32 %v617_v41, %v617_v41  ;;  %v440_v9 = vmul.f32 %v364_v43, %v364_v43  ;;  %v2076_v28 = vpop.permute.xlu0 %202 }
 0x17c   :  { %v359_v10 = vadd.f32 %v358_v4, %v2017_v42  ;;  %v701_v20 = vmul.f32 %v609_v48, %v609_v48  ;;  %v438_v26 = vmul.f32 %v356_v57, %v356_v57 }
 0x17d   :  { %450 = vadd.xlane.f32.xlu1 %v434_v31  ;;  %v441_v27 = vmul.f32 %v367_v56, %v367_v56 }
 0x17e   :  { %v1999_v35 = vpop.f32.mrb[4].mxu1 }
 0x17f   :  { %456 = vadd.xlane.f32.xlu0 %v437_v32  ;;  %v2001_v36 = vpop.f32.mrb[5].mxu1  ;;  %v630_v29 = vadd.f32 %v1999_v35, %v2019_v12  ;;  %v439_v32 = vmul.f32 %v359_v10, %v359_v10 }
 0x180   :  { %v2003_v37 = vpop.f32.mrb[8].mxu0  ;;  %v2005_v38 = vpop.f32.mrb[6].mxu1  ;;  %v622_v35 = vadd.f32 %v2001_v36, %v1996_v33 }
 0x181   :  { %v2007_v39 = vpop.f32.mrb[9].mxu0  ;;  %672 = vadd.xlane.f32.xlu1 %v614_v34  ;;  %v2009_v14 = vpop.f32.mrb[7].mxu1 }
 0x182   :  { %v2011_v15 = vpop.f32.mrb[10].mxu0 }
 0x183   :  { %v2014_v40 = vpop.f32.mrb[11].mxu0  ;;  %452 = vadd.xlane.f32.xlu0 %v435_v3 }
 0x185   :  { %668 = vadd.xlane.f32.xlu1 %v606_v24 }
 0x186   :  { %v2022_v44 = vpop.f32.mrb[8].mxu1 }
 0x187   :  { %674 = vadd.xlane.f32.xlu0 %v617_v41  ;;  %v2024_v46 = vpop.f32.mrb[9].mxu1  ;;  %v633_v41 = vadd.f32 %v2005_v38, %v2039_v55 }
 0x188   :  { %v2026_v47 = vpop.f32.mrb[12].mxu0  ;;  %v2029_v49 = vpop.f32.mrb[10].mxu1 }
 0x189   :  { %v2031_v50 = vpop.f32.mrb[13].mxu0  ;;  %414 = vadd.xlane.f32.xlu1 %v364_v43  ;;  %v2033_v51 = vpop.f32.mrb[11].mxu1 }
 0x18a   :  { %v2035_v52 = vpop.f32.mrb[14].mxu0  ;;  %v2100_v43 = vpop.permute.xlu1 %207 }
 0x18b   :  { %v2037_v53 = vpop.f32.mrb[15].mxu0  ;;  %670 = vadd.xlane.f32.xlu0 %v609_v48  ;;  %v2102_v48 = vpop.permute.xlu0 %212 }
 0x18d   :  { %720 = vadd.xlane.f32.xlu1 %v702_v54  ;;  %v380_v54 = vadd.f32 %v2003_v37, %v2102_v48 }
 0x18e   :  { %v2043_v58 = vpop.f32.mrb[12].mxu1 }
 0x18f   :  { %416 = vadd.xlane.f32.xlu0 %v367_v56  ;;  %v2045_v59 = vpop.f32.mrb[13].mxu1 }
 0x190   :  { %v2047_v61 = vpop.f32.mrb[16].mxu0  ;;  %v2049_v62 = vpop.f32.mrb[14].mxu1 }
 0x191   :  { %v2051_v63 = vpop.f32.mrb[17].mxu0  ;;  %410 = vadd.xlane.f32.xlu1 %v356_v57  ;;  %v2053_v1 = vpop.f32.mrb[15].mxu1 }
 0x192   :  { %v2055_v2 = vpop.f32.mrb[18].mxu0 }
 0x193   :  { %v2057_v5 = vpop.f32.mrb[19].mxu0  ;;  %722 = vadd.xlane.f32.xlu0 %v703_v0  ;;  %v625_v0 = vadd.f32 %v2009_v14, %v2017_v42  ;;  %v372_v14 = vadd.f32 %v2007_v39, %v2076_v28 }
 0x195   :  { %716 = vadd.xlane.f32.xlu1 %v700_v6  ;;  %v705_v39 = vmul.f32 %v625_v0, %v625_v0 }
 0x196   :  { %v2060_v7 = vpop.f32.mrb[16].mxu1 }
 0x197   :  { %412 = vadd.xlane.f32.xlu0 %v359_v10  ;;  %v2062_v13 = vpop.f32.mrb[17].mxu1 }
 0x198   :  { %v2064_v16 = vpop.f32.mrb[20].mxu0  ;;  %v2066_v17 = vpop.f32.mrb[18].mxu1 }
 0x199   :  { %v2068_v18 = vpop.f32.mrb[21].mxu0  ;;  %462 = vadd.xlane.f32.xlu1 %v440_v9  ;;  %v2070_v21 = vpop.f32.mrb[19].mxu1 }
 0x19a   :  { %v2072_v23 = vpop.f32.mrb[22].mxu0 }
 0x19b   :  { %v2074_v25 = vpop.f32.mrb[23].mxu0  ;;  %718 = vadd.xlane.f32.xlu0 %v701_v20  ;;  %v706_v20 = vmul.f32 %v630_v29, %v630_v29 }
 0x19d   :  { %458 = vadd.xlane.f32.xlu1 %v438_v26  ;;  %v2124_v26 = vpop.permute.xlu1 %217 }
 0x19e   :  { %v2080_v30 = vpop.f32.mrb[20].mxu1 }
 0x19f   :  { %464 = vadd.xlane.f32.xlu0 %v441_v27  ;;  %v2082_v45 = vpop.f32.mrb[21].mxu1  ;;  %v383_v27 = vadd.f32 %v2011_v15, %v2124_v26  ;;  %v375_v15 = vadd.f32 %v2014_v40, %v2100_v43  ;;  %v638_v40 = vadd.f32 %v2024_v46, %v2076_v28 }
 0x1a0   :  { %v2084_v60 = vpop.f32.mrb[24].mxu0  ;;  %v2086_v4 = vpop.f32.mrb[22].mxu1 }
 0x1a1   :  { %v2088_v31 = vpop.f32.mrb[25].mxu0  ;;  %680 = vadd.xlane.f32.xlu1 %v630_v29  ;;  %v2090_v34 = vpop.f32.mrb[23].mxu1  ;;  %v704_v29 = vmul.f32 %v622_v35, %v622_v35 }
 0x1a2   :  { %v2092_v3 = vpop.f32.mrb[26].mxu0 }
 0x1a3   :  { %v2096_v24 = vpop.f32.mrb[27].mxu0  ;;  %460 = vadd.xlane.f32.xlu0 %v439_v32 }
 0x1a5   :  { %676 = vadd.xlane.f32.xlu1 %v622_v35  ;;  %v443_v35 = vmul.f32 %v375_v15, %v375_v15 }
 0x1a6   :  { %v2106_v56 = vpop.f32.mrb[24].mxu1 }
 0x1a7   :  { %682 = vadd.xlane.f32.xlu0 %v633_v41  ;;  %v2108_v57 = vpop.f32.mrb[25].mxu1 }
 0x1a8   :  { %v2110_v36 = vpop.f32.mrb[28].mxu0  ;;  %v2114_v6 = vpop.f32.mrb[26].mxu1 }
 0x1a9   :  { %v2116_v38 = vpop.f32.mrb[29].mxu0  ;;  %422 = vadd.xlane.f32.xlu1 %v380_v54  ;;  %v2118_v10 = vpop.f32.mrb[27].mxu1 }
 0x1aa   :  { %2420 = vst [vmem:[#allocation2_spill] sm:$0xff] %v2116_v38  ;;  %2421 = vst [vmem:[#allocation3_spill] sm:$0xff] %v2118_v10  ;;  %v2120_v9 = vpop.f32.mrb[30].mxu0 }
 0x1ab   :  { %2422 = vst [vmem:[#allocation4_spill] sm:$0xff] %v2120_v9  ;;  %v2122_v37 = vpop.f32.mrb[31].mxu0  ;;  %678 = vadd.xlane.f32.xlu0 %v625_v0  ;;  %v2148_v0 = vpop.permute.xlu1 %227 }
 0x1ac   :  { %2423 = vst [vmem:[#allocation5_spill] sm:$0xff] %v2122_v37  ;;  %v707_v37 = vmul.f32 %v633_v41, %v633_v41  ;;  %v2142_v41 = vpop.permute.xlu0 %222 }
 0x1ad   :  { %728 = vadd.xlane.f32.xlu1 %v706_v20  ;;  %v444_v20 = vmul.f32 %v380_v54, %v380_v54  ;;  %v649_v54 = vadd.f32 %v2029_v49, %v2124_v26 }
 0x1ae   :  { %v2130_v32 = vpop.f32.mrb[28].mxu1 }
 0x1af   :  { %2424 = vst [vmem:[#allocation6_spill] sm:$0xff] %v2130_v32  ;;  %424 = vadd.xlane.f32.xlu0 %v383_v27  ;;  %v2132_v38 = vpop.f32.mrb[29].mxu1  ;;  %v442_v32 = vmul.f32 %v372_v14, %v372_v14  ;;  %v2156_v46 = vpop.permute.xlu1 %237 }
 0x1b0   :  { %2425 = vst [vmem:[#allocation7_spill] sm:$0xff] %v2132_v38  ;;  %v2134_v10 = vpop.f32.mrb[30].mxu1  ;;  %v445_v38 = vmul.f32 %v383_v27, %v383_v27  ;;  %v399_v49 = vadd.f32 %v2035_v52, %v2156_v46 }
 0x1b1   :  { %2426 = vst [vmem:[#allocation8_spill] sm:$0xff] %v2134_v10  ;;  %418 = vadd.xlane.f32.xlu1 %v372_v14  ;;  %v2136_v9 = vpop.f32.mrb[31].mxu1  ;;  %v646_v10 = vadd.f32 %v2022_v44, %v2102_v48  ;;  %v388_v14 = vadd.f32 %v2031_v50, %v2142_v41 }
 0x1b2   :  { %v449_v52 = vmul.f32 %v399_v49, %v399_v49 }
 0x1b3   :  { %730 = vadd.xlane.f32.xlu0 %v707_v37  ;;  %v2150_v37 = vpop.permute.xlu0 %232  ;;  %v710_v27 = vmul.f32 %v646_v10, %v646_v10 }
 0x1b4   :  { %v396_v44 = vadd.f32 %v2026_v47, %v2150_v37  ;;  %v708_v47 = vmul.f32 %v638_v40, %v638_v40  ;;  %v662_v50 = vadd.f32 %v2043_v58, %v2150_v37  ;;  %v880_v58 = vadd.f32 %v2047_v61, %v1986_v8 }
 0x1b5   :  { %724 = vadd.xlane.f32.xlu1 %v704_v29  ;;  %v875_v61 = vadd.f32 %v2057_v5, %v1988_v11  ;;  %v1145_v5 = vadd.f32 %v2066_v17, %v1992_v22  ;;  %v888_v17 = vadd.f32 %v2068_v18, %v1996_v33 }
 0x1b7   :  { %420 = vadd.xlane.f32.xlu0 %v375_v15  ;;  %v446_v15 = vmul.f32 %v388_v14, %v388_v14 }
 0x1b9   :  { %470 = vadd.xlane.f32.xlu1 %v444_v20 }
 0x1bb   :  { %726 = vadd.xlane.f32.xlu0 %v705_v39  ;;  %v654_v39 = vadd.f32 %v2045_v59, %v2142_v41  ;;  %v883_v59 = vadd.f32 %v2055_v2, %v1992_v22  ;;  %v1142_v2 = vadd.f32 %v2060_v7, %v1986_v8  ;;  %v1137_v7 = vadd.f32 %v2070_v21, %v1988_v11 }
 0x1bd   :  { %466 = vadd.xlane.f32.xlu1 %v442_v32  ;;  %v711_v32 = vmul.f32 %v649_v54, %v649_v54 }
 0x1bf   :  { %472 = vadd.xlane.f32.xlu0 %v445_v38  ;;  %v641_v38 = vadd.f32 %v2033_v51, %v2100_v43  ;;  %v391_v51 = vadd.f32 %v2037_v53, %v2148_v0  ;;  %v665_v53 = vadd.f32 %v2049_v62, %v2156_v46  ;;  %v872_v62 = vadd.f32 %v2051_v63, %v1984_v19 }
 0x1c0   :  { %v967_v63 = vmul.f32 %v875_v61, %v875_v61 }
 0x1c1   :  { %688 = vadd.xlane.f32.xlu1 %v646_v10  ;;  %v448_v10 = vmul.f32 %v396_v44, %v396_v44  ;;  %v709_v29 = vmul.f32 %v641_v38, %v641_v38  ;;  %v447_v20 = vmul.f32 %v391_v51, %v391_v51 }
 0x1c3   :  { %468 = vadd.xlane.f32.xlu0 %v443_v35  ;;  %v714_v35 = vmul.f32 %v662_v50, %v662_v50 }
 0x1c5   :  { %684 = vadd.xlane.f32.xlu1 %v638_v40  ;;  %v657_v40 = vadd.f32 %v2053_v1, %v2148_v0  ;;  %v968_v1 = vmul.f32 %v880_v58, %v880_v58 }
 0x1c7   :  { %690 = vadd.xlane.f32.xlu0 %v649_v54  ;;  %v715_v54 = vmul.f32 %v665_v53, %v665_v53 }
 0x1c9   :  { %430 = vadd.xlane.f32.xlu1 %v396_v44  ;;  %v712_v44 = vmul.f32 %v654_v39, %v654_v39 }
 0x1cb   :  { %686 = vadd.xlane.f32.xlu0 %v641_v38  ;;  %v713_v38 = vmul.f32 %v657_v40, %v657_v40 }
 0x1cd   :  { %736 = vadd.xlane.f32.xlu1 %v710_v27  ;;  %v966_v27 = vmul.f32 %v872_v62, %v872_v62 }
 0x1cf   :  { %432 = vadd.xlane.f32.xlu0 %v399_v49  ;;  %v969_v49 = vmul.f32 %v883_v59, %v883_v59 }
 0x1d1   :  { %426 = vadd.xlane.f32.xlu1 %v388_v14 }
 0x1d3   :  { %738 = vadd.xlane.f32.xlu0 %v711_v32 }
 0x1d5   :  { %732 = vadd.xlane.f32.xlu1 %v708_v47  ;;  %v1134_v47 = vadd.f32 %v2062_v13, %v1984_v19  ;;  %v899_v13 = vadd.f32 %v2072_v23, %v2039_v55  ;;  %v891_v23 = vadd.f32 %v2074_v25, %v2017_v42 }
 0x1d7   :  { %428 = vadd.xlane.f32.xlu0 %v391_v51  ;;  %v1228_v21 = vmul.f32 %v1134_v47, %v1134_v47 }
 0x1d9   :  { %478 = vadd.xlane.f32.xlu1 %v448_v10 }
 0x1db   :  { %734 = vadd.xlane.f32.xlu0 %v709_v29  ;;  %v896_v29 = vadd.f32 %v2064_v16, %v2019_v12 }
 0x1dd   :  { %474 = vadd.xlane.f32.xlu1 %v446_v15  ;;  %v972_v18 = vmul.f32 %v896_v29, %v896_v29 }
 0x1df   :  { %480 = vadd.xlane.f32.xlu0 %v449_v52  ;;  %v1230_v52 = vmul.f32 %v1142_v2, %v1142_v2 }
 0x1e1   :  { %696 = vadd.xlane.f32.xlu1 %v662_v50 }
 0x1e3   :  { %476 = vadd.xlane.f32.xlu0 %v447_v20  ;;  %v1231_v20 = vmul.f32 %v1145_v5, %v1145_v5 }
 0x1e5   :  { %692 = vadd.xlane.f32.xlu1 %v654_v39 }
 0x1e7   :  { %698 = vadd.xlane.f32.xlu0 %v665_v53 }
 0x1e9   :  { %744 = vadd.xlane.f32.xlu1 %v714_v35 }
 0x1eb   :  { %694 = vadd.xlane.f32.xlu0 %v657_v40 }
 0x1ed   :  { %938 = vadd.xlane.f32.xlu1 %v880_v58 }
 0x1ef   :  { %746 = vadd.xlane.f32.xlu0 %v715_v54  ;;  %v1229_v54 = vmul.f32 %v1137_v7, %v1137_v7 }
 0x1f1   :  { %740 = vadd.xlane.f32.xlu1 %v712_v44 }
 0x1f3   :  { %940 = vadd.xlane.f32.xlu0 %v883_v59 }
 0x1f5   :  { %934 = vadd.xlane.f32.xlu1 %v872_v62  ;;  %v970_v62 = vmul.f32 %v888_v17, %v888_v17 }
 0x1f7   :  { %742 = vadd.xlane.f32.xlu0 %v713_v38 }
 0x1f9   :  { %986 = vadd.xlane.f32.xlu1 %v968_v1 }
 0x1fb   :  { %936 = vadd.xlane.f32.xlu0 %v875_v61  ;;  %v973_v61 = vmul.f32 %v899_v13, %v899_v13 }
 0x1fd   :  { %982 = vadd.xlane.f32.xlu1 %v966_v27  ;;  %v1158_v27 = vadd.f32 %v2080_v30, %v2019_v12  ;;  %v912_v12 = vadd.f32 %v2084_v60, %v2102_v48  ;;  %v904_v60 = vadd.f32 %v2088_v31, %v2076_v28 }
 0x1ff   :  { %988 = vadd.xlane.f32.xlu0 %v969_v49  ;;  %v976_v31 = vmul.f32 %v912_v12, %v912_v12 }
 0x200   :  { %v407_v14 = vpop.xlane.xlu0 %406 }
 0x201   :  { %1200 = vadd.xlane.f32.xlu1 %v1142_v2  ;;  %v971_v2 = vmul.f32 %v891_v23, %v891_v23 }
 0x202   :  { %v455_v32 = vpop.xlane.xlu1 %454 }
 0x203   :  { %984 = vadd.xlane.f32.xlu0 %v967_v63 }
 0x204   :  { %v403_v51 = vpop.xlane.xlu0 %402 }
 0x205   :  { %1196 = vadd.xlane.f32.xlu1 %v1134_v47  ;;  %v1150_v47 = vadd.f32 %v2082_v45, %v1996_v33  ;;  %v1234_v45 = vmul.f32 %v1158_v27, %v1158_v27 }
 0x206   :  { %v405_v10 = vpop.xlane.xlu1 %404 }
 0x207   :  { %1202 = vadd.xlane.f32.xlu0 %v1145_v5  ;;  %v1161_v5 = vadd.f32 %v2086_v4, %v2039_v55  ;;  %v915_v55 = vadd.f32 %v2092_v3, %v2124_v26  ;;  %v907_v3 = vadd.f32 %v2096_v24, %v2100_v43 }
 0x208   :  { %v409_v8 = vpop.xlane.xlu0 %408 }
 0x209   :  { %946 = vadd.xlane.f32.xlu1 %v896_v29  ;;  %v1153_v29 = vadd.f32 %v2090_v34, %v2017_v42  ;;  %v1235_v42 = vmul.f32 %v1161_v5, %v1161_v5 }
 0x20a   :  { %v451_v15 = vpop.xlane.xlu1 %450 }
 0x20b   :  { %1198 = vadd.xlane.f32.xlu0 %v1137_v7 }
 0x20c   :  { %v457_v19 = vpop.xlane.xlu0 %456 }
 0x20d   :  { %1248 = vadd.xlane.f32.xlu1 %v1230_v52 }
 0x20e   :  { %v673_v22 = vpop.xlane.xlu1 %672 }
 0x20f   :  { %v2194_v50 = vadd.f32 %v673_v22, %v407_v14  ;;  %948 = vadd.xlane.f32.xlu0 %v899_v13 }
 0x210   :  { %v453_v16 = vpop.xlane.xlu0 %452 }
 0x211   :  { %942 = vadd.xlane.f32.xlu1 %v888_v17 }
 0x212   :  { %v669_v11 = vpop.xlane.xlu1 %668 }
 0x213   :  { %v2196_v39 = vadd.f32 %v669_v11, %v403_v51  ;;  %1250 = vadd.xlane.f32.xlu0 %v1231_v20  ;;  %v1233_v11 = vmul.f32 %v1153_v29, %v1153_v29 }
 0x214   :  { %v675_v53 = vpop.xlane.xlu0 %674 }
 0x215   :  { %v2200_v35 = vadd.f32 %v675_v53, %v409_v8  ;;  %1244 = vadd.xlane.f32.xlu1 %v1228_v21 }
 0x216   :  { %v415_v40 = vpop.xlane.xlu1 %414 }
 0x217   :  { %944 = vadd.xlane.f32.xlu0 %v891_v23  ;;  %v974_v23 = vmul.f32 %v904_v60, %v904_v60 }
 0x218   :  { %v671_v58 = vpop.xlane.xlu0 %670 }
 0x219   :  { %v2202_v44 = vadd.f32 %v671_v58, %v405_v10  ;;  %994 = vadd.xlane.f32.xlu1 %v972_v18  ;;  %v977_v58 = vmul.f32 %v915_v55, %v915_v55 }
 0x21a   :  { %v721_v59 = vpop.xlane.xlu1 %720 }
 0x21b   :  { %v2204_v38 = vadd.f32 %v721_v59, %v455_v32  ;;  %1246 = vadd.xlane.f32.xlu0 %v1229_v54  ;;  %v1174_v54 = vadd.f32 %v2106_v56, %v2102_v48  ;;  %v928_v48 = vadd.f32 %v2110_v36, %v2150_v37 }
 0x21c   :  { %v417_v1 = vpop.xlane.xlu0 %416 }
 0x21d   :  { %990 = vadd.xlane.f32.xlu1 %v970_v62  ;;  %v975_v62 = vmul.f32 %v907_v3, %v907_v3 }
 0x21e   :  { %v411_v25 = vpop.xlane.xlu1 %410 }
 0x21f   :  { %996 = vadd.xlane.f32.xlu0 %v973_v61 }
 0x220   :  { %v723_v49 = vpop.xlane.xlu0 %722 }
 0x221   :  { %v2208_v14 = vadd.f32 %v723_v49, %v457_v19  ;;  %1208 = vadd.xlane.f32.xlu1 %v1158_v27  ;;  %v1232_v19 = vmul.f32 %v1150_v47, %v1150_v47 }
 0x222   :  { %v717_v63 = vpop.xlane.xlu1 %716 }
 0x223   :  { %v2212_v32 = vadd.f32 %v717_v63, %v451_v15  ;;  %992 = vadd.xlane.f32.xlu0 %v971_v2  ;;  %v1177_v2 = vadd.f32 %v2114_v6, %v2124_v26 }
 0x224   :  { %v413_v51 = vpop.xlane.xlu0 %412 }
 0x225   :  { %1204 = vadd.xlane.f32.xlu1 %v1150_v47  ;;  %v2427_v47 = vld [vmem:[#allocation3_spill] sm:$0xff] }
 0x226   :  { %v463_v10 = vpop.xlane.xlu1 %462 }
 0x227   :  { %1210 = vadd.xlane.f32.xlu0 %v1161_v5 }
 0x228   :  { %v719_v30 = vpop.xlane.xlu0 %718 }
 0x229   :  { %v2220_v8 = vadd.f32 %v719_v30, %v453_v16  ;;  %954 = vadd.xlane.f32.xlu1 %v912_v12  ;;  %v2428_v12 = vld [vmem:[#allocation4_spill] sm:$0xff]  ;;  %v2429_v30 = vld [vmem:[#allocation2_spill] sm:$0xff] }
 0x22a   :  { %v459_v33 = vpop.xlane.xlu1 %458  ;;  %v931_v6 = vadd.f32 %v2428_v12, %v2156_v46  ;;  %v920_v36 = vadd.f32 %v2429_v30, %v2142_v41 }
 0x22b   :  { %1206 = vadd.xlane.f32.xlu0 %v1153_v29 }
 0x22c   :  { %v465_v7 = vpop.xlane.xlu0 %464 }
 0x22d   :  { %1256 = vadd.xlane.f32.xlu1 %v1234_v45 }
 0x22e   :  { %v681_v4 = vpop.xlane.xlu1 %680 }
 0x22f   :  { %v2226_v15 = vadd.f32 %v681_v4, %v415_v40  ;;  %956 = vadd.xlane.f32.xlu0 %v915_v55 }
 0x230   :  { %v461_v52 = vpop.xlane.xlu0 %460 }
 0x231   :  { %950 = vadd.xlane.f32.xlu1 %v904_v60  ;;  %v2430_v60 = vld [vmem:[#allocation5_spill] sm:$0xff] }
 0x232   :  { %v677_v34 = vpop.xlane.xlu1 %676 }
 0x233   :  { %v2228_v13 = vadd.f32 %v677_v34, %v411_v25  ;;  %1258 = vadd.xlane.f32.xlu0 %v1235_v42  ;;  %v1166_v25 = vadd.f32 %v2108_v57, %v2076_v28  ;;  %v1238_v57 = vmul.f32 %v1174_v54, %v1174_v54 }
 0x234   :  { %v683_v22 = vpop.xlane.xlu0 %682 }
 0x235   :  { %v2232_v17 = vadd.f32 %v683_v22, %v417_v1  ;;  %1252 = vadd.xlane.f32.xlu1 %v1232_v19  ;;  %v980_v19 = vmul.f32 %v928_v48, %v928_v48 }
 0x236   :  { %v423_v16 = vpop.xlane.xlu1 %422 }
 0x237   :  { %952 = vadd.xlane.f32.xlu0 %v907_v3 }
 0x238   :  { %v679_v20 = vpop.xlane.xlu0 %678 }
 0x239   :  { %v2234_v21 = vadd.f32 %v679_v20, %v413_v51  ;;  %1002 = vadd.xlane.f32.xlu1 %v976_v31  ;;  %v1169_v51 = vadd.f32 %v2427_v47, %v2100_v43  ;;  %v1239_v43 = vmul.f32 %v1177_v2, %v1177_v2  ;;  %v978_v20 = vmul.f32 %v920_v36, %v920_v36 }
 0x23a   :  { %v729_v53 = vpop.xlane.xlu1 %728 }
 0x23b   :  { %v2236_v40 = vadd.f32 %v729_v53, %v463_v10  ;;  %1254 = vadd.xlane.f32.xlu0 %v1233_v11  ;;  %v1237_v3 = vmul.f32 %v1169_v51, %v1169_v51 }
 0x23c   :  { %v425_v18 = vpop.xlane.xlu0 %424 }
 0x23d   :  { %998 = vadd.xlane.f32.xlu1 %v974_v23  ;;  %v981_v23 = vmul.f32 %v931_v6, %v931_v6 }
 0x23e   :  { %v419_v24 = vpop.xlane.xlu1 %418 }
 0x23f   :  { %1004 = vadd.xlane.f32.xlu0 %v977_v58 }
 0x240   :  { %v731_v59 = vpop.xlane.xlu0 %730 }
 0x241   :  { %v2240_v1 = vadd.f32 %v731_v59, %v465_v7  ;;  %1216 = vadd.xlane.f32.xlu1 %v1174_v54  ;;  %v1236_v7 = vmul.f32 %v1166_v25, %v1166_v25 }
 0x242   :  { %v725_v61 = vpop.xlane.xlu1 %724 }
 0x243   :  { %v2244_v27 = vadd.f32 %v725_v61, %v459_v33  ;;  %1000 = vadd.xlane.f32.xlu0 %v975_v62 }
 0x244   :  { %v421_v49 = vpop.xlane.xlu0 %420 }
 0x245   :  { %1212 = vadd.xlane.f32.xlu1 %v1166_v25  ;;  %v2432_v25 = vld [vmem:[#allocation7_spill] sm:$0xff] }
 0x246   :  { %v471_v63 = vpop.xlane.xlu1 %470 }
 0x247   :  { %1218 = vadd.xlane.f32.xlu0 %v1177_v2 }
 0x248   :  { %v727_v56 = vpop.xlane.xlu0 %726 }
 0x249   :  { %v2252_v5 = vadd.f32 %v727_v56, %v461_v52  ;;  %962 = vadd.xlane.f32.xlu1 %v928_v48  ;;  %v923_v52 = vadd.f32 %v2430_v60, %v2148_v0  ;;  %v2433_v48 = vld [vmem:[#allocation8_spill] sm:$0xff] }
 0x24a   :  { %v467_v28 = vpop.xlane.xlu1 %466  ;;  %v1193_v56 = vadd.f32 %v2433_v48, %v2156_v46 }
 0x24b   :  { %1214 = vadd.xlane.f32.xlu0 %v1169_v51  ;;  %v979_v59 = vmul.f32 %v923_v52, %v923_v52 }
 0x24c   :  { %v473_v10 = vpop.xlane.xlu0 %472 }
 0x24d   :  { %1264 = vadd.xlane.f32.xlu1 %v1238_v57  ;;  %v1185_v57 = vadd.f32 %v2136_v9, %v2148_v0 }
 0x24e   :  { %v689_v26 = vpop.xlane.xlu1 %688 }
 0x24f   :  { %v2258_v29 = vadd.f32 %v689_v26, %v423_v16  ;;  %964 = vadd.xlane.f32.xlu0 %v931_v6  ;;  %v1241_v6 = vmul.f32 %v1185_v57, %v1185_v57 }
 0x250   :  { %v469_v33 = vpop.xlane.xlu0 %468 }
 0x251   :  { %958 = vadd.xlane.f32.xlu1 %v920_v36  ;;  %v1243_v36 = vmul.f32 %v1193_v56, %v1193_v56 }
 0x252   :  { %v685_v45 = vpop.xlane.xlu1 %684 }
 0x253   :  { %v2260_v55 = vadd.f32 %v685_v45, %v419_v24  ;;  %1266 = vadd.xlane.f32.xlu0 %v1239_v43 }
 0x254   :  { %v691_v4 = vpop.xlane.xlu0 %690 }
 0x255   :  { %v2264_v42 = vadd.f32 %v691_v4, %v425_v18  ;;  %1260 = vadd.xlane.f32.xlu1 %v1236_v7  ;;  %v2431_v18 = vld [vmem:[#allocation6_spill] sm:$0xff] }
 0x256   :  { %v431_v34 = vpop.xlane.xlu1 %430  ;;  %v1190_v24 = vadd.f32 %v2431_v18, %v2150_v37 }
 0x257   :  { %960 = vadd.xlane.f32.xlu0 %v923_v52 }
 0x258   :  { %v687_v22 = vpop.xlane.xlu0 %686 }
 0x259   :  { %v2266_v16 = vadd.f32 %v687_v22, %v421_v49  ;;  %1010 = vadd.xlane.f32.xlu1 %v980_v19  ;;  %v1182_v49 = vadd.f32 %v2432_v25, %v2142_v41  ;;  %v1242_v41 = vmul.f32 %v1190_v24, %v1190_v24 }
 0x25a   :  { %v737_v31 = vpop.xlane.xlu1 %736 }
 0x25b   :  { %v2268_v11 = vadd.f32 %v737_v31, %v471_v63  ;;  %1262 = vadd.xlane.f32.xlu0 %v1237_v3  ;;  %v1240_v37 = vmul.f32 %v1182_v49, %v1182_v49 }
 0x25c   :  { %v433_v53 = vpop.xlane.xlu0 %432 }
 0x25d   :  { %1006 = vadd.xlane.f32.xlu1 %v978_v20 }
 0x25e   :  { %v427_v58 = vpop.xlane.xlu1 %426 }
 0x25f   :  { %1012 = vadd.xlane.f32.xlu0 %v981_v23 }
 0x260   :  { %v739_v54 = vpop.xlane.xlu0 %738 }
 0x261   :  { %v2272_v62 = vadd.f32 %v739_v54, %v473_v10  ;;  %1224 = vadd.xlane.f32.xlu1 %v1190_v24 }
 0x262   :  { %v733_v61 = vpop.xlane.xlu1 %732 }
 0x263   :  { %v2276_v2 = vadd.f32 %v733_v61, %v467_v28  ;;  %1008 = vadd.xlane.f32.xlu0 %v979_v59 }
 0x264   :  { %v429_v63 = vpop.xlane.xlu0 %428 }
 0x265   :  { %1220 = vadd.xlane.f32.xlu1 %v1182_v49 }
 0x266   :  { %v479_v47 = vpop.xlane.xlu1 %478 }
 0x267   :  { %1226 = vadd.xlane.f32.xlu0 %v1193_v56 }
 0x268   :  { %v735_v51 = vpop.xlane.xlu0 %734 }
 0x269   :  { %v2282_v10 = vadd.f32 %v735_v51, %v469_v33  ;;  %1268 = vadd.xlane.f32.xlu1 %v1240_v37 }
 0x26a   :  { %v475_v12 = vpop.xlane.xlu1 %474 }
 0x26b   :  { %1222 = vadd.xlane.f32.xlu0 %v1185_v57 }
 0x26c   :  { %v481_v28 = vpop.xlane.xlu0 %480 }
 0x26d   :  { %1272 = vadd.xlane.f32.xlu1 %v1242_v41 }
 0x26e   :  { %v697_v26 = vpop.xlane.xlu1 %696 }
 0x26f   :  { %v2284_v30 = vadd.f32 %v697_v26, %v431_v34  ;;  %1270 = vadd.xlane.f32.xlu0 %v1241_v6 }
 0x270   :  { %v477_v46 = vpop.xlane.xlu0 %476 }
 0x272   :  { %v693_v43 = vpop.xlane.xlu1 %692 }
 0x273   :  { %v2286_v45 = vadd.f32 %v693_v43, %v427_v58  ;;  %1274 = vadd.xlane.f32.xlu0 %v1243_v36 }
 0x274   :  { %v699_v9 = vpop.xlane.xlu0 %698 }
 0x275   :  { %v2288_v0 = vadd.f32 %v699_v9, %v433_v53 }
 0x276   :  { %v745_v33 = vpop.xlane.xlu1 %744 }
 0x277   :  { %v2290_v7 = vadd.f32 %v745_v33, %v479_v47 }
 0x278   :  { %v695_v4 = vpop.xlane.xlu0 %694 }
 0x279   :  { %v2292_v60 = vadd.f32 %v695_v4, %v429_v63 }
 0x27a   :  { %v939_v52 = vpop.xlane.xlu1 %938 }
 0x27b   :  { %v1016_v56 = vadd.f32 %v939_v52, %v2194_v50 }
 0x27c   :  { %v747_v19 = vpop.xlane.xlu0 %746 }
 0x27d   :  { %v2294_v34 = vadd.f32 %v747_v19, %v481_v28 }
 0x27e   :  { %v741_v22 = vpop.xlane.xlu1 %740 }
 0x27f   :  { %v2296_v3 = vadd.f32 %v741_v22, %v475_v12 }
 0x280   :  { %v941_v31 = vpop.xlane.xlu0 %940 }
 0x281   :  { %v1017_v6 = vadd.f32 %v941_v31, %v2200_v35 }
 0x282   :  { %v935_v20 = vpop.xlane.xlu1 %934 }
 0x284   :  { %v743_v23 = vpop.xlane.xlu0 %742 }
 0x285   :  { %v2298_v58 = vadd.f32 %v743_v23, %v477_v46 }
 0x286   :  { %v987_v53 = vpop.xlane.xlu1 %986 }
 0x287   :  { %v1032_v47 = vadd.f32 %v987_v53, %v2204_v38  ;;  %v1014_v38 = vadd.f32 %v935_v20, %v2196_v39 }
 0x288   :  { %v937_v18 = vpop.xlane.xlu0 %936 }
 0x28a   :  { %v983_v24 = vpop.xlane.xlu1 %982 }
 0x28b   :  { %v1030_v46 = vadd.f32 %v983_v24, %v2212_v32  ;;  %v1015_v32 = vadd.f32 %v937_v18, %v2202_v44 }
 0x28c   :  { %v989_v54 = vpop.xlane.xlu0 %988 }
 0x28d   :  { %v1033_v50 = vadd.f32 %v989_v54, %v2208_v14 }
 0x28e   :  { %v1201_v59 = vpop.xlane.xlu1 %1200 }
 0x28f   :  { %v1278_v51 = vadd.f32 %v1201_v59, %v1016_v56 }
 0x290   :  { %v985_v61 = vpop.xlane.xlu0 %984 }
 0x291   :  { %v1031_v19 = vadd.f32 %v985_v61, %v2220_v8 }
 0x292   :  { %v1197_v25 = vpop.xlane.xlu1 %1196 }
 0x293   :  { %v1276_v33 = vadd.f32 %v1197_v25, %v1014_v38 }
 0x294   :  { %v1203_v49 = vpop.xlane.xlu0 %1202 }
 0x295   :  { %v1279_v36 = vadd.f32 %v1203_v49, %v1017_v6 }
 0x296   :  { %v947_v63 = vpop.xlane.xlu1 %946 }
 0x297   :  { %v1020_v8 = vadd.f32 %v947_v63, %v2226_v15 }
 0x298   :  { %v1199_v48 = vpop.xlane.xlu0 %1198 }
 0x299   :  { %v1277_v31 = vadd.f32 %v1199_v48, %v1015_v32 }
 0x29a   :  { %v1249_v37 = vpop.xlane.xlu1 %1248 }
 0x29b   :  { %v1294_v57 = vadd.f32 %v1249_v37, %v1032_v47 }
 0x29c   :  { %v949_v12 = vpop.xlane.xlu0 %948 }
 0x29d   :  { %v1311_v41 = vsel %vm1308_vm0, %v1278_v51, %v1294_v57 }
 0x29e   :  { %1328 = vst.msk [vmem:[%s2419_s7 + $0x10] sm:$0xff] %vm1325_vm2, %v1311_v41  ;;  %v943_v28 = vpop.xlane.xlu1 %942  ;;  %v1021_v41 = vadd.f32 %v949_v12, %v2232_v17 }
 0x29f   :  { %v1018_v15 = vadd.f32 %v943_v28, %v2228_v13 }
 0x2a0   :  { %v1251_v26 = vpop.xlane.xlu0 %1250 }
 0x2a1   :  { %v1295_v43 = vadd.f32 %v1251_v26, %v1033_v50 }
 0x2a2   :  { %v1245_v9 = vpop.xlane.xlu1 %1244 }
 0x2a3   :  { %v1312_v4 = vsel %vm1308_vm0, %v1279_v36, %v1295_v43  ;;  %v1292_v52 = vadd.f32 %v1245_v9, %v1030_v46 }
 0x2a4   :  { %1329 = vst.msk [vmem:[%s2419_s7 + $0x18] sm:$0xff] %vm1325_vm2, %v1312_v4  ;;  %v945_v35 = vpop.xlane.xlu0 %944 }
 0x2a5   :  { %v1309_v14 = vsel %vm1308_vm0, %v1276_v33, %v1292_v52 }
 0x2a6   :  { %1326 = vst.msk [vmem:[%s2419_s7] sm:$0xff] %vm1325_vm2, %v1309_v14  ;;  %v995_v39 = vpop.xlane.xlu1 %994 }
 0x2a7   :  { %v1036_v18 = vadd.f32 %v995_v39, %v2236_v40 }
 0x2a8   :  { %v1247_v22 = vpop.xlane.xlu0 %1246 }
 0x2a9   :  { %v1293_v20 = vadd.f32 %v1247_v22, %v1031_v19 }
 0x2aa   :  { %v991_v23 = vpop.xlane.xlu1 %990 }
 0x2ab   :  { %v1310_v53 = vsel %vm1308_vm0, %v1277_v31, %v1293_v20  ;;  %v1034_v40 = vadd.f32 %v991_v23, %v2244_v27  ;;  %v1019_v27 = vadd.f32 %v945_v35, %v2234_v21 }
 0x2ac   :  { %1327 = vst.msk [vmem:[%s2419_s7 + $0x8] sm:$0xff] %vm1325_vm2, %v1310_v53  ;;  %v997_v24 = vpop.xlane.xlu0 %996 }
 0x2ad   :  { %v1037_v6 = vadd.f32 %v997_v24, %v2240_v1 }
 0x2ae   :  { %v1209_v54 = vpop.xlane.xlu1 %1208 }
 0x2af   :  { %v1282_v48 = vadd.f32 %v1209_v54, %v1020_v8 }
 0x2b0   :  { %v993_v59 = vpop.xlane.xlu0 %992 }
 0x2b1   :  { %v1035_v12 = vadd.f32 %v993_v59, %v2252_v5 }
 0x2b2   :  { %v1205_v25 = vpop.xlane.xlu1 %1204 }
 0x2b3   :  { %v1280_v46 = vadd.f32 %v1205_v25, %v1018_v15 }
 0x2b4   :  { %v1211_v49 = vpop.xlane.xlu0 %1210 }
 0x2b5   :  { %v1283_v63 = vadd.f32 %v1211_v49, %v1021_v41 }
 0x2b6   :  { %v955_v56 = vpop.xlane.xlu1 %954 }
 0x2b7   :  { %v1024_v5 = vadd.f32 %v955_v56, %v2258_v29 }
 0x2b8   :  { %v1207_v44 = vpop.xlane.xlu0 %1206 }
 0x2b9   :  { %v1281_v9 = vadd.f32 %v1207_v44, %v1019_v27 }
 0x2ba   :  { %v1257_v61 = vpop.xlane.xlu1 %1256 }
 0x2bb   :  { %v1298_v47 = vadd.f32 %v1257_v61, %v1036_v18 }
 0x2bc   :  { %v957_v37 = vpop.xlane.xlu0 %956 }
 0x2bd   :  { %v1315_v51 = vsel %vm1308_vm0, %v1282_v48, %v1298_v47  ;;  %v1025_v25 = vadd.f32 %v957_v37, %v2264_v42 }
 0x2be   :  { %1332 = vst.msk [vmem:[%s2419_s7 + $0x30] sm:$0xff] %vm1325_vm2, %v1315_v51  ;;  %v951_v57 = vpop.xlane.xlu1 %950 }
 0x2bf   :  { %v1022_v29 = vadd.f32 %v951_v57, %v2260_v55 }
 0x2c0   :  { %v1259_v50 = vpop.xlane.xlu0 %1258 }
 0x2c1   :  { %v1299_v26 = vadd.f32 %v1259_v50, %v1037_v6 }
 0x2c2   :  { %v1253_v38 = vpop.xlane.xlu1 %1252 }
 0x2c3   :  { %v1316_v36 = vsel %vm1308_vm0, %v1283_v63, %v1299_v26  ;;  %v1296_v43 = vadd.f32 %v1253_v38, %v1034_v40 }
 0x2c4   :  { %1333 = vst.msk [vmem:[%s2419_s7 + $0x38] sm:$0xff] %vm1325_vm2, %v1316_v36  ;;  %v953_v17 = vpop.xlane.xlu0 %952 }
 0x2c5   :  { %v1313_v1 = vsel %vm1308_vm0, %v1280_v46, %v1296_v43 }
 0x2c6   :  { %1330 = vst.msk [vmem:[%s2419_s7 + $0x20] sm:$0xff] %vm1325_vm2, %v1313_v1  ;;  %v1003_v13 = vpop.xlane.xlu1 %1002 }
 0x2c7   :  { %v1040_v35 = vadd.f32 %v1003_v13, %v2268_v11 }
 0x2c8   :  { %v1255_v28 = vpop.xlane.xlu0 %1254 }
 0x2c9   :  { %v1297_v33 = vadd.f32 %v1255_v28, %v1035_v12 }
 0x2ca   :  { %v999_v4 = vpop.xlane.xlu1 %998 }
 0x2cb   :  { %v1314_v52 = vsel %vm1308_vm0, %v1281_v9, %v1297_v33  ;;  %v1038_v11 = vadd.f32 %v999_v4, %v2276_v2  ;;  %v1023_v2 = vadd.f32 %v953_v17, %v2266_v16 }
 0x2cc   :  { %1331 = vst.msk [vmem:[%s2419_s7 + $0x28] sm:$0xff] %vm1325_vm2, %v1314_v52  ;;  %v1005_v14 = vpop.xlane.xlu0 %1004 }
 0x2cd   :  { %v1041_v49 = vadd.f32 %v1005_v14, %v2272_v62 }
 0x2ce   :  { %v1217_v39 = vpop.xlane.xlu1 %1216 }
 0x2cf   :  { %v1286_v23 = vadd.f32 %v1217_v39, %v1024_v5 }
 0x2d0   :  { %v1001_v32 = vpop.xlane.xlu0 %1000 }
 0x2d1   :  { %v1039_v37 = vadd.f32 %v1001_v32, %v2282_v10 }
 0x2d2   :  { %v1213_v19 = vpop.xlane.xlu1 %1212 }
 0x2d3   :  { %v1284_v61 = vadd.f32 %v1213_v19, %v1022_v29 }
 0x2d4   :  { %v1219_v22 = vpop.xlane.xlu0 %1218 }
 0x2d5   :  { %v1287_v56 = vadd.f32 %v1219_v22, %v1025_v25 }
 0x2d6   :  { %v963_v31 = vpop.xlane.xlu1 %962 }
 0x2d7   :  { %v1028_v1 = vadd.f32 %v963_v31, %v2284_v30 }
 0x2d8   :  { %v1215_v21 = vpop.xlane.xlu0 %1214 }
 0x2d9   :  { %v1285_v57 = vadd.f32 %v1215_v21, %v1023_v2 }
 0x2da   :  { %v1265_v20 = vpop.xlane.xlu1 %1264 }
 0x2db   :  { %v1302_v53 = vadd.f32 %v1265_v20, %v1040_v35 }
 0x2dc   :  { %v965_v24 = vpop.xlane.xlu0 %964 }
 0x2dd   :  { %v1319_v54 = vsel %vm1308_vm0, %v1286_v23, %v1302_v53 }
 0x2de   :  { %1336 = vst.msk [vmem:[%s2419_s7 + $0x50] sm:$0xff] %vm1325_vm2, %v1319_v54  ;;  %v959_v59 = vpop.xlane.xlu1 %958 }
 0x2df   :  { %v1026_v16 = vadd.f32 %v959_v59, %v2286_v45 }
 0x2e0   :  { %v1267_v44 = vpop.xlane.xlu0 %1266 }
 0x2e1   :  { %v1303_v8 = vadd.f32 %v1267_v44, %v1041_v49 }
 0x2e2   :  { %v1261_v18 = vpop.xlane.xlu1 %1260 }
 0x2e3   :  { %v1320_v48 = vsel %vm1308_vm0, %v1287_v56, %v1303_v8  ;;  %v1300_v47 = vadd.f32 %v1261_v18, %v1038_v11 }
 0x2e4   :  { %1337 = vst.msk [vmem:[%s2419_s7 + $0x58] sm:$0xff] %vm1325_vm2, %v1320_v48  ;;  %v961_v42 = vpop.xlane.xlu0 %960 }
 0x2e5   :  { %v1317_v62 = vsel %vm1308_vm0, %v1284_v61, %v1300_v47  ;;  %v1027_v45 = vadd.f32 %v961_v42, %v2292_v60 }
 0x2e6   :  { %1334 = vst.msk [vmem:[%s2419_s7 + $0x40] sm:$0xff] %vm1325_vm2, %v1317_v62  ;;  %v1011_v55 = vpop.xlane.xlu1 %1010 }
 0x2e7   :  { %v1044_v13 = vadd.f32 %v1011_v55, %v2290_v7  ;;  %v1029_v7 = vadd.f32 %v965_v24, %v2288_v0 }
 0x2e8   :  { %v1263_v51 = vpop.xlane.xlu0 %1262 }
 0x2e9   :  { %v1301_v41 = vadd.f32 %v1263_v51, %v1039_v37 }
 0x2ea   :  { %v1007_v6 = vpop.xlane.xlu1 %1006 }
 0x2eb   :  { %v1318_v50 = vsel %vm1308_vm0, %v1285_v57, %v1301_v41  ;;  %v1042_v10 = vadd.f32 %v1007_v6, %v2296_v3 }
 0x2ec   :  { %1335 = vst.msk [vmem:[%s2419_s7 + $0x48] sm:$0xff] %vm1325_vm2, %v1318_v50  ;;  %v1013_v15 = vpop.xlane.xlu0 %1012 }
 0x2ed   :  { %v1045_v14 = vadd.f32 %v1013_v15, %v2294_v34 }
 0x2ee   :  { %v1225_v40 = vpop.xlane.xlu1 %1224 }
 0x2ef   :  { %v1290_v28 = vadd.f32 %v1225_v40, %v1028_v1 }
 0x2f0   :  { %v1009_v63 = vpop.xlane.xlu0 %1008 }
 0x2f1   :  { %v1043_v3 = vadd.f32 %v1009_v63, %v2298_v58 }
 0x2f2   :  { %v1221_v26 = vpop.xlane.xlu1 %1220 }
 0x2f3   :  { %v1288_v36 = vadd.f32 %v1221_v26, %v1026_v16 }
 0x2f4   :  { %v1227_v38 = vpop.xlane.xlu0 %1226 }
 0x2f5   :  { %v1291_v39 = vadd.f32 %v1227_v38, %v1029_v7 }
 0x2f6   :  { %v1269_v46 = vpop.xlane.xlu1 %1268 }
 0x2f7   :  { %v1304_v43 = vadd.f32 %v1269_v46, %v1042_v10 }
 0x2f8   :  { %v1223_v17 = vpop.xlane.xlu0 %1222 }
 0x2f9   :  { %v1321_v27 = vsel %vm1308_vm0, %v1288_v36, %v1304_v43  ;;  %v1289_v4 = vadd.f32 %v1223_v17, %v1027_v45 }
 0x2fa   :  { %1338 = vst.msk [vmem:[%s2419_s7 + $0x60] sm:$0xff] %vm1325_vm2, %v1321_v27  ;;  %v1273_v12 = vpop.xlane.xlu1 %1272 }
 0x2fb   :  { %v1306_v9 = vadd.f32 %v1273_v12, %v1044_v13 }
 0x2fc   :  { %v1271_v33 = vpop.xlane.xlu0 %1270 }
 0x2fd   :  { %v1323_v30 = vsel %vm1308_vm0, %v1290_v28, %v1306_v9  ;;  %v1305_v52 = vadd.f32 %v1271_v33, %v1043_v3 }
 0x2fe   :  { %1340 = vst.msk [vmem:[%s2419_s7 + $0x70] sm:$0xff] %vm1325_vm2, %v1323_v30 }
 0x2ff   :  { %v1322_v60 = vsel %vm1308_vm0, %v1289_v4, %v1305_v52 }
 0x300   :  { %1339 = vst.msk [vmem:[%s2419_s7 + $0x68] sm:$0xff] %vm1325_vm2, %v1322_v60  ;;  %v1275_v58 = vpop.xlane.xlu0 %1274 }
 0x301   :  { %v1307_v32 = vadd.f32 %v1275_v58, %v1045_v14 }
 0x303   :  { %v1324_v19 = vsel %vm1308_vm0, %v1291_v39, %v1307_v32 }
 0x304   :  { %1341 = vst.msk [vmem:[%s2419_s7 + $0x78] sm:$0xff] %vm1325_vm2, %v1324_v19 }

// kernel: token_spiking_transformer.6
= control target key start
LH: loop header
LB: loop body
LE: loop exit
PB: predicated region body
PF: predicated region fallthrough
CT: control target
= control target key end

     0   :  { %v1830_v3 = vmov 0   ;;  %vm91_vm0 = vcmask 261120   ;;  %s2426_s0 = inlined_call_operand.vmem [shape: f32[4,32,128], index: 0, kind: input, shape index: {}]   ;;  %s2427_s1 = inlined_call_operand.vmem [shape: bf16[64,32], index: 1, kind: input, shape index: {}]   ;;  %s2428_s3 = inlined_call_operand.vmem [shape: f32[64,1], index: 3, kind: input, shape index: {}]   ;;  %s2429_s2 = inlined_call_operand.vmem [shape: f32[64,1], index: 2, kind: input, shape index: {}]   ;;  %s2430_s6 = inlined_call_operand.vmem [shape: f32[32,1], index: 6, kind: input, shape index: {}]   ;;  %s2431_s4 = inlined_call_operand.vmem [shape: bf16[32,32], index: 4, kind: input, shape index: {}]   ;;  %s2432_s5 = inlined_call_operand.vmem [shape: bf16[32,32], index: 5, kind: input, shape index: {}]   ;;  %s2433_s7 = inlined_call_operand.vmem [shape: bf16[4,32,128], index: 7, kind: output, shape index: {0}]   ;;  %s2434_s8 = inlined_call_operand.vmem [shape: f32[1,32,2], index: 8, kind: output, shape index: {1}]  }
   0x1   :  { %v65_v0 = vld [vmem:[%s2426_s0] sm:$0xff]  ;;  %v66_v1 = vld [vmem:[%s2426_s0 + $0x8] sm:$0xff]  ;;  %v67_v2 = vld [vmem:[%s2426_s0 + $0x10] sm:$0xff]  ;;  %1821 = vset.pattern.permute.xlu1 %v1830_v3  ;;  %1820 = vset.pattern.permute.xlu0 %v1830_v3 }
   0x2   :  { %v69_v4 = vpack.c.bf16 %v66_v1, %v65_v0  ;;  %v68_v5 = vld [vmem:[%s2426_s0 + $0x18] sm:$0xff]  ;;  %v1893_v7 = vld [vmem:[%s2427_s1] sm:$0xff]   ;;  %v1491_v9 = vld [vmem:[%s2426_s0 + $0x28] sm:$0xff] }
   0x3   :  { %v70_v6 = vpack.c.bf16 %v68_v5, %v67_v2  ;;  %1709 = vmatprep.mubr.msk.bf16.mxu0 %vm91_vm0, %v1893_v7  ;;  %v1490_v8 = vld [vmem:[%s2426_s0 + $0x20] sm:$0xff]  ;;  %v1492_v11 = vld [vmem:[%s2426_s0 + $0x30] sm:$0xff]  ;;  %v1493_v12 = vld [vmem:[%s2426_s0 + $0x38] sm:$0xff] }
   0x4   :  { %1705 = vmatprep.subr.bf16.mxu0 %v69_v4  ;;  %v536_v10 = vpack.c.bf16 %v1491_v9, %v1490_v8  ;;  %v1912_v13 = vld [vmem:[%s2427_s1 + $0x8] sm:$0xff]   ;;  %v1917_v14 = vld [vmem:[%s2427_s1 + $0x10] sm:$0xff]   ;;  %v537_v15 = vpack.c.bf16 %v1493_v12, %v1492_v11  ;;  %v45_v16 = vld [vmem:[%s2428_s3] sm:$0xff] }
   0x5   :  { %1706 = vmatpush3.bf16.msra.mxu0 %v69_v4  ;;  %v37_v17 = vld [vmem:[%s2429_s2] sm:$0xff]  ;;  %v1523_v19 = vld [vmem:[%s2426_s0 + $0x48] sm:$0xff]  ;;  %219 = vperm.xlu1 %1821, %v45_v16   ;;  %v1944_v23 = vld [vmem:[%s2427_s1 + $0x18] sm:$0xff]  }
   0x6   :  { %1707 = vmatprep.subr.bf16.mxu0 %v70_v6  ;;  %v1522_v18 = vld [vmem:[%s2426_s0 + $0x40] sm:$0xff]  ;;  %171 = vperm.xlu0 %1820, %v37_v17   ;;  %v46_v20 = vld [vmem:[%s2428_s3 + $0x8] sm:$0xff]  ;;  %v40_v24 = vld [vmem:[%s2429_s2 + $0x18] sm:$0xff] }
   0x7   :  { %v38_v21 = vld [vmem:[%s2429_s2 + $0x8] sm:$0xff]  ;;  %v843_v22 = vpack.c.bf16 %v1523_v19, %v1522_v18  ;;  %v39_v25 = vld [vmem:[%s2429_s2 + $0x10] sm:$0xff]  ;;  %v48_v26 = vld [vmem:[%s2428_s3 + $0x18] sm:$0xff] }
   0x8   :  { %v47_v27 = vld [vmem:[%s2428_s3 + $0x10] sm:$0xff]  ;;  %v1525_v29 = vld [vmem:[%s2426_s0 + $0x58] sm:$0xff]  ;;  %v42_v30 = vld [vmem:[%s2429_s2 + $0x28] sm:$0xff] }
   0x9   :  { %1708 = vmatpush3.bf16.msra.mxu0 %v70_v6  ;;  %224 = vperm.xlu1 %1821, %v46_v20   ;;  %v1524_v28 = vld [vmem:[%s2426_s0 + $0x50] sm:$0xff]  ;;  %v41_v31 = vld [vmem:[%s2429_s2 + $0x20] sm:$0xff]  ;;  %v1555_v34 = vld [vmem:[%s2426_s0 + $0x68] sm:$0xff] }
   0xa   :  { %1733 = vmatprep.subr.bf16.mxu0 %v536_v10  ;;  %176 = vperm.xlu0 %1820, %v38_v21   ;;  %v844_v32 = vpack.c.bf16 %v1525_v29, %v1524_v28  ;;  %v1554_v33 = vld [vmem:[%s2426_s0 + $0x60] sm:$0xff]  ;;  %v50_v35 = vld [vmem:[%s2428_s3 + $0x28] sm:$0xff]  ;;  %v44_v38 = vld [vmem:[%s2429_s2 + $0x38] sm:$0xff] }
   0xb   :  { %v49_v36 = vld [vmem:[%s2428_s3 + $0x20] sm:$0xff]  ;;  %v1150_v37 = vpack.c.bf16 %v1555_v34, %v1554_v33  ;;  %v43_v39 = vld [vmem:[%s2429_s2 + $0x30] sm:$0xff]  ;;  %v52_v40 = vld [vmem:[%s2428_s3 + $0x38] sm:$0xff]  ;;  %v1831_v33 = vmov 1.0|1.0  }
   0xc   :  { %1710 = vmatmul.mubr.msk.bf16.vlgmr.msra.gmra.mrb[0].mxu0 %vm91_vm0, %v1912_v13  ;;  %v51_v41 = vld [vmem:[%s2428_s3 + $0x30] sm:$0xff]  ;;  %v1557_v43 = vld [vmem:[%s2426_s0 + $0x78] sm:$0xff]  ;;  %v62_v44 = vld [vmem:[%s2430_s6 + $0x8] sm:$0xff] }
   0xd   :  { %1713 = vmatprep.mubr.msk.bf16.mxu0 %vm91_vm0, %v1917_v14  ;;  %1734 = vmatpush3.bf16.msra.mxu0 %v536_v10  ;;  %v1556_v42 = vld [vmem:[%s2426_s0 + $0x70] sm:$0xff]  ;;  %v61_v45 = vld [vmem:[%s2430_s6] sm:$0xff]  ;;  %v64_v47 = vld [vmem:[%s2430_s6 + $0x18] sm:$0xff] }
   0xe   :  { %1735 = vmatprep.subr.bf16.mxu0 %v537_v15  ;;  %186 = vperm.xlu1 %1821, %v40_v24   ;;  %v1151_v46 = vpack.c.bf16 %v1557_v43, %v1556_v42  ;;  %v63_v48 = vld [vmem:[%s2430_s6 + $0x10] sm:$0xff]  ;;  %v2041_v49 = vld [vmem:[%s2431_s4] sm:$0xff]   ;;  %v2107_v42 = vld [vmem:[%s2431_s4 + $0x8] sm:$0xff]   ;;  %v1832_v43 = vmov 0.0  }
   0xf   :  { %181 = vperm.xlu0 %1820, %v39_v25   ;;  %1721 = vmatprep.mubr.msk.bf16.mxu1 %vm91_vm0, %v2041_v49 }
  0x11   :  { %1736 = vmatpush3.bf16.msra.mxu0 %v537_v15 }
  0x12   :  { %1761 = vmatprep.subr.bf16.mxu0 %v843_v22  ;;  %234 = vperm.xlu1 %1821, %v48_v26  }
  0x13   :  { %229 = vperm.xlu0 %1820, %v47_v27  }
  0x14   :  { %1714 = vmatmul.mubr.msk.bf16.gmra.mrb[4].mxu0 %vm91_vm0, %v1944_v23 }
  0x15   :  { %1737 = vmatprep.mubr.msk.bf16.mxu0 %vm91_vm0, %v1893_v7 }
  0x16   :  { %196 = vperm.xlu1 %1821, %v42_v30  }
  0x17   :  { %191 = vperm.xlu0 %1820, %v41_v31  }
  0x1a   :  { %244 = vperm.xlu1 %1821, %v50_v35  }
  0x1b   :  { %239 = vperm.xlu0 %1820, %v49_v36  }
  0x1c   :  { %1738 = vmatmul.mubr.msk.bf16.vlgmr.msra.gmra.mrb[8].mxu0 %vm91_vm0, %v1912_v13 }
  0x1d   :  { %1741 = vmatprep.mubr.msk.bf16.mxu0 %vm91_vm0, %v1917_v14  ;;  %1762 = vmatpush3.bf16.msra.mxu0 %v843_v22 }
  0x1e   :  { %1763 = vmatprep.subr.bf16.mxu0 %v844_v32  ;;  %206 = vperm.xlu1 %1821, %v44_v38  }
  0x1f   :  { %201 = vperm.xlu0 %1820, %v43_v39  }
  0x21   :  { %1764 = vmatpush3.bf16.msra.mxu0 %v844_v32 }
  0x22   :  { %1789 = vmatprep.subr.bf16.mxu0 %v1150_v37  ;;  %254 = vperm.xlu1 %1821, %v52_v40  }
  0x23   :  { %249 = vperm.xlu0 %1820, %v51_v41  }
  0x24   :  { %1742 = vmatmul.mubr.msk.bf16.gmra.mrb[12].mxu0 %vm91_vm0, %v1944_v23 }
  0x25   :  { %1765 = vmatprep.mubr.msk.bf16.mxu0 %vm91_vm0, %v1893_v7 }
  0x26   :  { %405 = vperm.xlu1 %1821, %v62_v44  }
  0x27   :  { %400 = vperm.xlu0 %1820, %v61_v45  }
  0x2a   :  { %415 = vperm.xlu1 %1821, %v64_v47  }
  0x2b   :  { %410 = vperm.xlu0 %1820, %v63_v48  }
  0x2c   :  { %1766 = vmatmul.mubr.msk.bf16.vlgmr.msra.gmra.mrb[16].mxu0 %vm91_vm0, %v1912_v13 }
  0x2d   :  { %1769 = vmatprep.mubr.msk.bf16.mxu0 %vm91_vm0, %v1917_v14  ;;  %1790 = vmatpush3.bf16.msra.mxu0 %v1150_v37 }
  0x2e   :  { %1791 = vmatprep.subr.bf16.mxu0 %v1151_v46 }
  0x31   :  { %1792 = vmatpush3.bf16.msra.mxu0 %v1151_v46 }
  0x34   :  { %1770 = vmatmul.mubr.msk.bf16.gmra.mrb[20].mxu0 %vm91_vm0, %v1944_v23 }
  0x35   :  { %1793 = vmatprep.mubr.msk.bf16.mxu0 %vm91_vm0, %v1893_v7 }
  0x3c   :  { %1794 = vmatmul.mubr.msk.bf16.vlgmr.msra.gmra.mrb[24].mxu0 %vm91_vm0, %v1912_v13 }
  0x3d   :  { %1797 = vmatprep.mubr.msk.bf16.mxu0 %vm91_vm0, %v1917_v14 }
  0x44   :  { %1798 = vmatmul.mubr.msk.bf16.gmra.mrb[28].mxu0 %vm91_vm0, %v1944_v23 }
  0x84   :  { %v2047_v51 = vpop.permute.xlu1 %219 }
  0x85   :  { %v2045_v50 = vpop.permute.xlu0 %171 }
  0x88   :  { %v2051_v53 = vpop.permute.xlu1 %224 }
  0x89   :  { %v2049_v52 = vpop.permute.xlu0 %176 }
  0x8d   :  { %v2055_v55 = vpop.permute.xlu1 %186 }
  0x8e   :  { %v2053_v54 = vpop.permute.xlu0 %181 }
  0x91   :  { %v2059_v57 = vpop.permute.xlu1 %234 }
  0x92   :  { %v2057_v56 = vpop.permute.xlu0 %229 }
  0x95   :  { %v2063_v59 = vpop.permute.xlu1 %196 }
  0x96   :  { %v2061_v58 = vpop.permute.xlu0 %191 }
  0x99   :  { %v2067_v61 = vpop.permute.xlu1 %244 }
  0x9a   :  { %v2065_v60 = vpop.permute.xlu0 %239 }
  0x9d   :  { %v2078_v11 = vpop.permute.xlu1 %206 }
  0x9e   :  { %v2073_v6 = vpop.permute.xlu0 %201 }
  0xa1   :  { %v2093_v30 = vpop.permute.xlu1 %254 }
  0xa2   :  { %v2083_v21 = vpop.permute.xlu0 %249 }
  0xdf   :  { %v1711_v62 = vpop.f32.mrb[0].mxu0 }
  0xe0   :  { %v211_v63 = vmul.f32 %v1711_v62, %v2053_v54  ;;  %v138_v0 = vpop.f32.mrb[1].mxu0 }
  0xe1   :  { %v209_v1 = vmul.f32 %v2045_v50, %v138_v0  ;;  %v1712_v2 = vpop.f32.mrb[2].mxu0 }
  0xe2   :  { %v259_v3 = vadd.f32 %v2057_v56, %v211_v63  ;;  %v212_v4 = vmul.f32 %v1712_v2, %v2055_v55  ;;  %v141_v5 = vpop.f32.mrb[3].mxu0 }
  0xe3   :  { %v257_v7 = vadd.f32 %v2047_v51, %v209_v1  ;;  %v210_v8 = vmul.f32 %v2049_v52, %v141_v5 }
  0xe4   :  { %v275_v9 = vmul.f32 0.5, %v259_v3  ;;  %v260_v10 = vadd.f32 %v2059_v57, %v212_v4 }
  0xe5   :  { %v273_v12 = vmul.f32 0.5, %v257_v7  ;;  %v258_v13 = vadd.f32 %v2051_v53, %v210_v8 }
  0xe6   :  { %v276_v14 = vmul.f32 0.5, %v260_v10  ;;  %vm283_vm1 = vcmp.ge.f32.partialorder %v275_v9, 1.0 }
  0xe7   :  { %v274_v15 = vmul.f32 0.5, %v258_v13  ;;  %v1715_v16 = vpop.f32.mrb[4].mxu0  ;;  %vm281_vm2 = vcmp.ge.f32.partialorder %v273_v12, 1.0  ;;  %v291_v17 = vsel %vm283_vm1, 0.0, %v275_v9 }
  0xe8   :  { %v215_v18 = vmul.f32 %v1715_v16, %v2073_v6  ;;  %v154_v19 = vpop.f32.mrb[5].mxu0  ;;  %v289_v20 = vsel %vm281_vm2, 0.0, %v273_v12  ;;  %vm284_vm3 = vcmp.ge.f32.partialorder %v276_v14, 1.0 }
  0xe9   :  { %v213_v22 = vmul.f32 %v2061_v58, %v154_v19  ;;  %v1716_v23 = vpop.f32.mrb[6].mxu0  ;;  %vm282_vm4 = vcmp.ge.f32.partialorder %v274_v15, 1.0  ;;  %vm2086_vm5 = vmpackc.low %vm284_vm3, %vm283_vm1  ;;  %v292_v25 = vsel %vm284_vm3, 0.0, %v276_v14 }
  0xea   :  { %v263_v26 = vadd.f32 %v2083_v21, %v215_v18  ;;  %v216_v27 = vmul.f32 %v1716_v23, %v2078_v11  ;;  %v157_v28 = vpop.f32.mrb[7].mxu0  ;;  %v290_v29 = vsel %vm282_vm4, 0.0, %v274_v15  ;;  %vm1476_vm6 = vmpackc.low %vm282_vm4, %vm281_vm2 }
  0xeb   :  { %v261_v31 = vadd.f32 %v2065_v60, %v213_v22  ;;  %v214_v32 = vmul.f32 %v2063_v59, %v157_v28  ;;  %1717 = vmatprep.subr.msk.bf16.mxu1 %vm1476_vm6, %v1831_v33 }
  0xec   :  { %v279_v34 = vmul.f32 0.5, %v263_v26  ;;  %v264_v35 = vadd.f32 %v2093_v30, %v216_v27  ;;  %1718 = vmatpush3.bf16.msk.msra.mxu1 %vm1476_vm6, %v1831_v33 }
  0xed   :  { %v277_v36 = vmul.f32 0.5, %v261_v31  ;;  %v262_v37 = vadd.f32 %v2067_v61, %v214_v32  ;;  %1719 = vmatprep.subr.msk.bf16.mxu1 %vm2086_vm5, %v1831_v33 }
  0xee   :  { %vm287_vm7 = vcmp.ge.f32.partialorder %v279_v34, 1.0  ;;  %v280_v38 = vmul.f32 0.5, %v264_v35 }
  0xef   :  { %v295_v39 = vsel %vm287_vm7, 0.0, %v279_v34  ;;  %vm285_vm8 = vcmp.ge.f32.partialorder %v277_v36, 1.0  ;;  %v278_v40 = vmul.f32 0.5, %v262_v37  ;;  %v1739_v41 = vpop.f32.mrb[8].mxu0  ;;  %v2110_v44 = vsel %vm287_vm7, 1.0, %v1832_v43 }
  0xf0   :  { %v293_v45 = vsel %vm285_vm8, 0.0, %v277_v36  ;;  %vm288_vm9 = vcmp.ge.f32.partialorder %v280_v38, 1.0  ;;  %v605_v46 = vmul.f32 %v1739_v41, %v2053_v54  ;;  %1720 = vmatpush3.bf16.msk.msra.mxu1 %vm2086_vm5, %v1831_v33  ;;  %v572_v47 = vpop.f32.mrb[9].mxu0  ;;  %v2117_v48 = vsel %vm285_vm8, 1.0, %v1832_v43 }
  0xf1   :  { %v296_v62 = vsel %vm288_vm9, 0.0, %v280_v38  ;;  %vm286_vm10 = vcmp.ge.f32.partialorder %v278_v40, 1.0  ;;  %v603_v63 = vmul.f32 %v572_v47, %v2045_v50  ;;  %v1740_v0 = vpop.f32.mrb[10].mxu0  ;;  %v2121_v1 = vsel %vm288_vm9, 1.0, %v1832_v43 }
  0xf2   :  { %v294_v2 = vsel %vm286_vm10, 0.0, %v278_v40  ;;  %v613_v3 = vadd.f32 %v605_v46, %v2057_v56  ;;  %v606_v4 = vmul.f32 %v1740_v0, %v2055_v55  ;;  %v575_v5 = vpop.f32.mrb[11].mxu0  ;;  %v2126_v7 = vsel %vm286_vm10, 1.0, %v1832_v43 }
  0xf3   :  { %v611_v8 = vadd.f32 %v603_v63, %v2047_v51  ;;  %v604_v9 = vmul.f32 %v575_v5, %v2049_v52  ;;  %1722 = vmatmul.mubr.msk.bf16.vlgmr.msra.gmra.mrb[0].mxu1 %vm91_vm0, %v2107_v42  ;;  %v315_v10 = vpack.c.bf16 %v2126_v7, %v2117_v48  ;;  %v316_v12 = vpack.c.bf16 %v2121_v1, %v2110_v44  ;;  %v2298_v44 = vpop.permute.xlu0 %400  ;;  %v2300_v48 = vpop.permute.xlu1 %405 }
  0xf4   :  { %v621_v13 = vadd.f32 %v613_v3, %v291_v17  ;;  %v614_v14 = vadd.f32 %v606_v4, %v2059_v57 }
  0xf5   :  { %v619_v15 = vadd.f32 %v611_v8, %v289_v20  ;;  %v612_v16 = vadd.f32 %v604_v9, %v2051_v53 }
  0xf6   :  { %v629_v18 = vmul.f32 0.5, %v621_v13  ;;  %v622_v19 = vadd.f32 %v614_v14, %v292_v25 }
  0xf7   :  { %v627_v22 = vmul.f32 0.5, %v619_v15  ;;  %v620_v23 = vadd.f32 %v612_v16, %v290_v29  ;;  %v1743_v24 = vpop.f32.mrb[12].mxu0  ;;  %v2302_v1 = vpop.permute.xlu0 %410 }
  0xf8   :  { %v630_v26 = vmul.f32 0.5, %v622_v19  ;;  %v609_v27 = vmul.f32 %v1743_v24, %v2073_v6  ;;  %v588_v28 = vpop.f32.mrb[13].mxu0  ;;  %vm637_vm11 = vcmp.ge.f32.partialorder %v629_v18, 1.0  ;;  %v2305_v63 = vpop.permute.xlu1 %415 }
  0xf9   :  { %v628_v31 = vmul.f32 0.5, %v620_v23  ;;  %v607_v32 = vmul.f32 %v588_v28, %v2061_v58  ;;  %v1744_v34 = vpop.f32.mrb[14].mxu0  ;;  %v645_v17 = vsel %vm637_vm11, 0.0, %v629_v18  ;;  %vm635_vm12 = vcmp.ge.f32.partialorder %v627_v22, 1.0 }
  0xfa   :  { %v617_v20 = vadd.f32 %v609_v27, %v2083_v21  ;;  %v610_v35 = vmul.f32 %v1744_v34, %v2078_v11  ;;  %v591_v25 = vpop.f32.mrb[15].mxu0  ;;  %v643_v36 = vsel %vm635_vm12, 0.0, %v627_v22  ;;  %vm638_vm13 = vcmp.ge.f32.partialorder %v630_v26, 1.0 }
  0xfb   :  { %v615_v29 = vadd.f32 %v607_v32, %v2065_v60  ;;  %v608_v37 = vmul.f32 %v591_v25, %v2063_v59  ;;  %v646_v38 = vsel %vm638_vm13, 0.0, %v630_v26  ;;  %vm636_vm14 = vcmp.ge.f32.partialorder %v628_v31, 1.0  ;;  %vm2146_vm15 = vmpackc.low %vm638_vm13, %vm637_vm11 }
  0xfc   :  { %v625_v41 = vadd.f32 %v617_v20, %v295_v39  ;;  %v618_v46 = vadd.f32 %v610_v35, %v2093_v30  ;;  %v644_v47 = vsel %vm636_vm14, 0.0, %v628_v31  ;;  %vm2151_vm1 = vmpackc.low %vm636_vm14, %vm635_vm12 }
  0xfd   :  { %v623_v0 = vadd.f32 %v615_v29, %v293_v45  ;;  %v616_v3 = vadd.f32 %v608_v37, %v2067_v61 }
  0xfe   :  { %v633_v4 = vmul.f32 0.5, %v625_v41  ;;  %v626_v5 = vadd.f32 %v618_v46, %v296_v62 }
  0xff   :  { %v631_v8 = vmul.f32 0.5, %v623_v0  ;;  %v624_v9 = vadd.f32 %v616_v3, %v294_v2  ;;  %v1767_v13 = vpop.f32.mrb[16].mxu0 }
 0x100   :  { %v634_v14 = vmul.f32 0.5, %v626_v5  ;;  %v912_v15 = vmul.f32 %v1767_v13, %v2053_v54  ;;  %v879_v16 = vpop.f32.mrb[17].mxu0  ;;  %vm641_vm2 = vcmp.ge.f32.partialorder %v633_v4, 1.0 }
 0x101   :  { %v632_v39 = vmul.f32 0.5, %v624_v9  ;;  %v910_v18 = vmul.f32 %v879_v16, %v2045_v50  ;;  %v1768_v19 = vpop.f32.mrb[18].mxu0  ;;  %v649_v22 = vsel %vm641_vm2, 0.0, %v633_v4  ;;  %vm639_vm3 = vcmp.ge.f32.partialorder %v631_v8, 1.0 }
 0x102   :  { %v920_v45 = vadd.f32 %v912_v15, %v2057_v56  ;;  %v913_v23 = vmul.f32 %v1768_v19, %v2055_v55  ;;  %v882_v62 = vpop.f32.mrb[19].mxu0  ;;  %v647_v24 = vsel %vm639_vm3, 0.0, %v631_v8  ;;  %vm642_vm4 = vcmp.ge.f32.partialorder %v634_v14, 1.0 }
 0x103   :  { %v918_v2 = vadd.f32 %v910_v18, %v2047_v51  ;;  %v911_v26 = vmul.f32 %v882_v62, %v2049_v52  ;;  %v650_v27 = vsel %vm642_vm4, 0.0, %v634_v14  ;;  %vm640_vm5 = vcmp.ge.f32.partialorder %v632_v39, 1.0 }
 0x104   :  { %v928_v28 = vadd.f32 %v920_v45, %v645_v17  ;;  %v921_v31 = vadd.f32 %v913_v23, %v2059_v57  ;;  %v648_v32 = vsel %vm640_vm5, 0.0, %v632_v39  ;;  %v2166_v34 = vsel %vm639_vm3, 1.0, %v1832_v43 }
 0x105   :  { %v926_v20 = vadd.f32 %v918_v2, %v643_v36  ;;  %v919_v35 = vadd.f32 %v911_v26, %v2051_v53  ;;  %v2170_v25 = vsel %vm640_vm5, 1.0, %v1832_v43  ;;  %v2174_v29 = vsel %vm641_vm2, 1.0, %v1832_v43 }
 0x106   :  { %v936_v37 = vmul.f32 0.5, %v928_v28  ;;  %v929_v41 = vadd.f32 %v921_v31, %v646_v38  ;;  %v669_v17 = vpack.c.bf16 %v2170_v25, %v2166_v34  ;;  %v2180_v46 = vsel %vm642_vm4, 1.0, %v1832_v43 }
 0x107   :  { %v934_v0 = vmul.f32 0.5, %v926_v20  ;;  %v927_v36 = vadd.f32 %v919_v35, %v644_v47  ;;  %v1771_v3 = vpop.f32.mrb[20].mxu0  ;;  %v670_v5 = vpack.c.bf16 %v2180_v46, %v2174_v29 }
 0x108   :  { %v937_v8 = vmul.f32 0.5, %v929_v41  ;;  %v916_v4 = vmul.f32 %v1771_v3, %v2073_v6  ;;  %v895_v9 = vpop.f32.mrb[21].mxu0  ;;  %vm944_vm6 = vcmp.ge.f32.partialorder %v936_v37, 1.0 }
 0x109   :  { %v935_v13 = vmul.f32 0.5, %v927_v36  ;;  %v914_v38 = vmul.f32 %v895_v9, %v2061_v58  ;;  %v1772_v15 = vpop.f32.mrb[22].mxu0  ;;  %v952_v16 = vsel %vm944_vm6, 0.0, %v936_v37  ;;  %vm942_vm7 = vcmp.ge.f32.partialorder %v934_v0, 1.0 }
 0x10a   :  { %v924_v14 = vadd.f32 %v916_v4, %v2083_v21  ;;  %v917_v47 = vmul.f32 %v1772_v15, %v2078_v11  ;;  %v898_v39 = vpop.f32.mrb[23].mxu0  ;;  %v950_v18 = vsel %vm942_vm7, 0.0, %v934_v0  ;;  %vm945_vm8 = vcmp.ge.f32.partialorder %v937_v8, 1.0 }
 0x10b   :  { %v922_v19 = vadd.f32 %v914_v38, %v2065_v60  ;;  %v915_v45 = vmul.f32 %v898_v39, %v2063_v59  ;;  %v953_v23 = vsel %vm945_vm8, 0.0, %v937_v8  ;;  %vm943_vm9 = vcmp.ge.f32.partialorder %v935_v13, 1.0  ;;  %vm2192_vm10 = vmpackc.low %vm945_vm8, %vm944_vm6 }
 0x10c   :  { %v932_v2 = vadd.f32 %v924_v14, %v649_v22  ;;  %v925_v26 = vadd.f32 %v917_v47, %v2093_v30  ;;  %v951_v28 = vsel %vm943_vm9, 0.0, %v935_v13  ;;  %vm2197_vm11 = vmpackc.low %vm943_vm9, %vm942_vm7 }
 0x10d   :  { %v930_v20 = vadd.f32 %v922_v19, %v647_v24  ;;  %v923_v35 = vadd.f32 %v915_v45, %v2067_v61 }
 0x10e   :  { %v940_v41 = vmul.f32 0.5, %v932_v2  ;;  %v933_v0 = vadd.f32 %v925_v26, %v650_v27 }
 0x10f   :  { %v938_v36 = vmul.f32 0.5, %v930_v20  ;;  %v931_v3 = vadd.f32 %v923_v35, %v648_v32  ;;  %v1795_v37 = vpop.f32.mrb[24].mxu0 }
 0x110   :  { %v941_v8 = vmul.f32 0.5, %v933_v0  ;;  %v1219_v4 = vmul.f32 %v1795_v37, %v2053_v54  ;;  %v1186_v9 = vpop.f32.mrb[25].mxu0  ;;  %vm948_vm12 = vcmp.ge.f32.partialorder %v940_v41, 1.0 }
 0x111   :  { %v939_v22 = vmul.f32 0.5, %v931_v3  ;;  %v1217_v13 = vmul.f32 %v1186_v9, %v2045_v50  ;;  %v1796_v38 = vpop.f32.mrb[26].mxu0  ;;  %v956_v15 = vsel %vm948_vm12, 0.0, %v940_v41  ;;  %vm946_vm13 = vcmp.ge.f32.partialorder %v938_v36, 1.0 }
 0x112   :  { %v1227_v24 = vadd.f32 %v1219_v4, %v2057_v56  ;;  %v1220_v14 = vmul.f32 %v1796_v38, %v2055_v55  ;;  %v1189_v27 = vpop.f32.mrb[27].mxu0  ;;  %v954_v47 = vsel %vm946_vm13, 0.0, %v938_v36  ;;  %vm949_vm14 = vcmp.ge.f32.partialorder %v941_v8, 1.0 }
 0x113   :  { %v1225_v32 = vadd.f32 %v1217_v13, %v2047_v51  ;;  %v1218_v54 = vmul.f32 %v1189_v27, %v2049_v52  ;;  %v957_v39 = vsel %vm949_vm14, 0.0, %v941_v8  ;;  %vm947_vm2 = vcmp.ge.f32.partialorder %v939_v22, 1.0 }
 0x114   :  { %v1235_v19 = vadd.f32 %v1227_v24, %v952_v16  ;;  %v1228_v50 = vadd.f32 %v1220_v14, %v2059_v57  ;;  %v955_v45 = vsel %vm947_vm2, 0.0, %v939_v22  ;;  %v2211_v2 = vsel %vm946_vm13, 1.0, %v1832_v43 }
 0x115   :  { %v1233_v26 = vadd.f32 %v1225_v32, %v950_v18  ;;  %v1226_v56 = vadd.f32 %v1218_v54, %v2051_v53  ;;  %v2215_v55 = vsel %vm947_vm2, 1.0, %v1832_v43  ;;  %v2219_v51 = vsel %vm948_vm12, 1.0, %v1832_v43 }
 0x116   :  { %v1236_v52 = vadd.f32 %v1228_v50, %v953_v23  ;;  %v976_v16 = vpack.c.bf16 %v2215_v55, %v2211_v2  ;;  %v2224_v57 = vsel %vm949_vm14, 1.0, %v1832_v43  ;;  %v1243_v20 = vmul.f32 0.5, %v1235_v19  ;;  %v2263_v50 = vld [vmem:[%s2432_s5] sm:$0xff]  }
 0x117   :  { %v1234_v35 = vadd.f32 %v1226_v56, %v951_v28  ;;  %v1799_v0 = vpop.f32.mrb[28].mxu0  ;;  %v977_v53 = vpack.c.bf16 %v2224_v57, %v2219_v51  ;;  %v1241_v18 = vmul.f32 0.5, %v1233_v26  ;;  %1729 = vmatprep.mubr.msk.bf16.mxu1 %vm91_vm0, %v2263_v50 }
 0x118   :  { %v1223_v36 = vmul.f32 %v1799_v0, %v2073_v6  ;;  %v1202_v3 = vpop.f32.mrb[29].mxu0  ;;  %v1244_v41 = vmul.f32 0.5, %v1236_v52  ;;  %vm1251_vm3 = vcmp.ge.f32.partialorder %v1243_v20, 1.0 }
 0x119   :  { %v1221_v37 = vmul.f32 %v1202_v3, %v2061_v58  ;;  %v1800_v23 = vpop.f32.mrb[30].mxu0  ;;  %v1242_v8 = vmul.f32 0.5, %v1234_v35  ;;  %vm1249_vm5 = vcmp.ge.f32.partialorder %v1241_v18, 1.0 }
 0x11a   :  { %v1231_v4 = vadd.f32 %v1223_v36, %v2083_v21  ;;  %v1224_v9 = vmul.f32 %v1800_v23, %v2078_v11  ;;  %v1205_v22 = vpop.f32.mrb[31].mxu0  ;;  %vm1252_vm4 = vcmp.ge.f32.partialorder %v1244_v41, 1.0 }
 0x11b   :  { %v1229_v28 = vadd.f32 %v1221_v37, %v2065_v60  ;;  %v1222_v13 = vmul.f32 %v1205_v22, %v2063_v59  ;;  %vm1250_vm6 = vcmp.ge.f32.partialorder %v1242_v8, 1.0  ;;  %vm2234_vm7 = vmpackc.low %vm1252_vm4, %vm1251_vm3  ;;  %v2276_v8 = vld [vmem:[%s2432_s5 + $0x8] sm:$0xff]  }
 0x11c   :  { %v1239_v58 = vadd.f32 %v1231_v4, %v956_v15  ;;  %v1232_v38 = vadd.f32 %v1224_v9, %v2093_v30  ;;  %vm2239_vm8 = vmpackc.low %vm1250_vm6, %vm1249_vm5 }
 0x11d   :  { %v1237_v11 = vadd.f32 %v1229_v28, %v954_v47  ;;  %v1230_v24 = vadd.f32 %v1222_v13, %v2067_v61 }
 0x11e   :  { %v1247_v14 = vmul.f32 0.5, %v1239_v58  ;;  %v1240_v60 = vadd.f32 %v1232_v38, %v957_v39 }
 0x11f   :  { %v1245_v27 = vmul.f32 0.5, %v1237_v11  ;;  %v1238_v59 = vadd.f32 %v1230_v24, %v955_v45 }
 0x120   :  { %vm1255_vm9 = vcmp.ge.f32.partialorder %v1247_v14, 1.0  ;;  %v1248_v32 = vmul.f32 0.5, %v1240_v60 }
 0x121   :  { %vm1253_vm12 = vcmp.ge.f32.partialorder %v1245_v27, 1.0  ;;  %v1246_v54 = vmul.f32 0.5, %v1238_v59  ;;  %v2245_v19 = vsel %vm1255_vm9, 1.0, %v1832_v43 }
 0x122   :  { %vm1256_vm13 = vcmp.ge.f32.partialorder %v1248_v32, 1.0  ;;  %v2248_v30 = vsel %vm1253_vm12, 1.0, %v1832_v43 }
 0x123   :  { %vm1254_vm14 = vcmp.ge.f32.partialorder %v1246_v54, 1.0  ;;  %v2251_v15 = vsel %vm1256_vm13, 1.0, %v1832_v43 }
 0x124   :  { %v2254_v61 = vsel %vm1254_vm14, 1.0, %v1832_v43  ;;  %v1276_v47 = vpack.c.bf16 %v2251_v15, %v2245_v19 }
 0x125   :  { %v1275_v39 = vpack.c.bf16 %v2254_v61, %v2248_v30 }
 0x1c6   :  { %v1723_v45 = vpop.f32.mrb[0].mxu1 }
 0x1c7   :  { %v384_v26 = vmul.f32 0.5, %v1723_v45  ;;  %v367_v56 = vpop.f32.mrb[1].mxu1 }
 0x1c8   :  { %v382_v52 = vmul.f32 0.5, %v367_v56  ;;  %v1724_v43 = vpop.f32.mrb[2].mxu1 }
 0x1c9   :  { %vm388_vm2 = vcmp.ge.f32.partialorder %v384_v26, 0.5  ;;  %v385_v20 = vmul.f32 0.5, %v1724_v43  ;;  %v370_v35 = vpop.f32.mrb[3].mxu1 }
 0x1ca   :  { %vm386_vm3 = vcmp.ge.f32.partialorder %v382_v52, 0.5  ;;  %v383_v0 = vmul.f32 0.5, %v370_v35  ;;  %v392_v18 = vsel %vm388_vm2, 0.0, %v384_v26 }
 0x1cb   :  { %vm389_vm4 = vcmp.ge.f32.partialorder %v385_v20, 0.5  ;;  %v390_v36 = vsel %vm386_vm3, 0.0, %v382_v52 }
 0x1cc   :  { %vm387_vm5 = vcmp.ge.f32.partialorder %v383_v0, 0.5  ;;  %vm395_vm6 = vmpackc.low %vm389_vm4, %vm388_vm2  ;;  %v393_v3 = vsel %vm389_vm4, 0.0, %v385_v20 }
 0x1cd   :  { %vm394_vm9 = vmpackc.low %vm387_vm5, %vm386_vm3  ;;  %v397_v41 = vsel %vm395_vm6, %v316_v12, 0  ;;  %v391_v37 = vsel %vm387_vm5, 0.0, %v383_v0 }
 0x1ce   :  { %v396_v23 = vsel %vm394_vm9, %v315_v10, 0 }
 0x1cf   :  { %1725 = vmatprep.subr.bf16.mxu1 %v396_v23 }
 0x1d0   :  { %1726 = vmatpush3.bf16.msra.mxu1 %v396_v23 }
 0x1d1   :  { %1727 = vmatprep.subr.bf16.mxu1 %v397_v41 }
 0x1d4   :  { %1728 = vmatpush3.bf16.msra.mxu1 %v397_v41 }
 0x1d5   :  { %1745 = vmatprep.subr.msk.bf16.mxu1 %vm2151_vm1, %v1831_v33 }
 0x1d7   :  { %1730 = vmatmul.mubr.msk.bf16.vlgmr.msra.gmra.mrb[4].mxu1 %vm91_vm0, %v2276_v8 }
 0x1d8   :  { %1746 = vmatpush3.bf16.msk.msra.mxu1 %vm2151_vm1, %v1831_v33  ;;  %1749 = vmatprep.mubr.msk.bf16.mxu1 %vm91_vm0, %v2041_v49 }
 0x1d9   :  { %1747 = vmatprep.subr.msk.bf16.mxu1 %vm2146_vm15, %v1831_v33 }
 0x1dc   :  { %1748 = vmatpush3.bf16.msk.msra.mxu1 %vm2146_vm15, %v1831_v33 }
 0x1df   :  { %1750 = vmatmul.mubr.msk.bf16.vlgmr.msra.gmra.mrb[8].mxu1 %vm91_vm0, %v2107_v42 }
 0x1e0   :  { %1757 = vmatprep.mubr.msk.bf16.mxu1 %vm91_vm0, %v2263_v50 }
 0x2aa   :  { %v1731_v7 = vpop.f32.mrb[4].mxu1 }
 0x2ab   :  { %v477_v10 = vadd.f32 %v1731_v7, %v2302_v1  ;;  %v468_v12 = vpop.f32.mrb[5].mxu1 }
 0x2ac   :  { %v1732_v40 = vpop.f32.mrb[6].mxu1  ;;  %v469_v28 = vadd.f32 %v468_v12, %v2298_v44 }
 0x2ad   :  { %v480_v4 = vadd.f32 %v1732_v40, %v2305_v63  ;;  %507 = vadd.xlane.f32.xlu0 %v477_v10  ;;  %v471_v9 = vpop.f32.mrb[7].mxu1  ;;  %v513_v22 = vmul.f32 %v477_v10, %v477_v10 }
 0x2ae   :  { %v472_v13 = vadd.f32 %v471_v9, %v2300_v48  ;;  %v511_v45 = vmul.f32 %v469_v28, %v469_v28 }
 0x2af   :  { %v1610_v58 = vpack.c.bf16 %v480_v4, %v477_v10  ;;  %519 = vadd.xlane.f32.xlu1 %v513_v22  ;;  %v514_v43 = vmul.f32 %v480_v4, %v480_v4 }
 0x2b0   :  { %v1605_v38 = vpack.c.bf16 %v472_v13, %v469_v28 }
 0x2b1   :  { %1642 = vst [vmem:[%s2433_s7 + $0x8] sm:$0xff] %v1610_v58   ;;  %503 = vadd.xlane.f32.xlu0 %v469_v28 }
 0x2b2   :  { %1606 = vst [vmem:[%s2433_s7] sm:$0xff] %v1605_v38   ;;  %v1751_v11 = vpop.f32.mrb[8].mxu1 }
 0x2b3   :  { %v722_v24 = vadd.f32 %v1751_v11, %v392_v18  ;;  %v705_v14 = vpop.f32.mrb[9].mxu1  ;;  %505 = vadd.xlane.f32.xlu1 %v472_v13 }
 0x2b4   :  { %v720_v60 = vadd.f32 %v705_v14, %v390_v36  ;;  %v1752_v27 = vpop.f32.mrb[10].mxu1  ;;  %v512_v36 = vmul.f32 %v472_v13, %v472_v13 }
 0x2b5   :  { %v726_v59 = vmul.f32 0.5, %v722_v24  ;;  %v723_v32 = vadd.f32 %v1752_v27, %v393_v3  ;;  %v708_v54 = vpop.f32.mrb[11].mxu1  ;;  %509 = vadd.xlane.f32.xlu0 %v480_v4 }
 0x2b6   :  { %v724_v26 = vmul.f32 0.5, %v720_v60  ;;  %v721_v56 = vadd.f32 %v708_v54, %v391_v37 }
 0x2b7   :  { %vm730_vm15 = vcmp.ge.f32.partialorder %v726_v59, 0.5  ;;  %v727_v52 = vmul.f32 0.5, %v723_v32  ;;  %515 = vadd.xlane.f32.xlu1 %v511_v45 }
 0x2b8   :  { %vm728_vm1 = vcmp.ge.f32.partialorder %v724_v26, 0.5  ;;  %v725_v20 = vmul.f32 0.5, %v721_v56  ;;  %v734_v35 = vsel %vm730_vm15, 0.0, %v726_v59 }
 0x2b9   :  { %vm731_vm12 = vcmp.ge.f32.partialorder %v727_v52, 0.5  ;;  %521 = vadd.xlane.f32.xlu0 %v514_v43  ;;  %v732_v0 = vsel %vm728_vm1, 0.0, %v724_v26 }
 0x2ba   :  { %vm729_vm13 = vcmp.ge.f32.partialorder %v725_v20, 0.5  ;;  %vm737_vm14 = vmpackc.low %vm731_vm12, %vm730_vm15  ;;  %v735_v18 = vsel %vm731_vm12, 0.0, %v727_v52 }
 0x2bb   :  { %vm736_vm2 = vmpackc.low %vm729_vm13, %vm728_vm1  ;;  %v739_v3 = vsel %vm737_vm14, %v670_v5, 0  ;;  %v733_v41 = vsel %vm729_vm13, 0.0, %v725_v20  ;;  %vm1445_vm13 = vcmask 15360  }
 0x2bc   :  { %v738_v37 = vsel %vm736_vm2, %v669_v17, 0 }
 0x2bd   :  { %517 = vadd.xlane.f32.xlu0 %v512_v36  ;;  %1753 = vmatprep.subr.bf16.mxu1 %v738_v37 }
 0x2be   :  { %1754 = vmatpush3.bf16.msra.mxu1 %v738_v37 }
 0x2bf   :  { %1755 = vmatprep.subr.bf16.mxu1 %v739_v3 }
 0x2c2   :  { %1756 = vmatpush3.bf16.msra.mxu1 %v739_v3 }
 0x2c3   :  { %1773 = vmatprep.subr.msk.bf16.mxu1 %vm2197_vm11, %v1831_v33 }
 0x2c5   :  { %1758 = vmatmul.mubr.msk.bf16.vlgmr.msra.gmra.mrb[12].mxu1 %vm91_vm0, %v2276_v8 }
 0x2c6   :  { %1774 = vmatpush3.bf16.msk.msra.mxu1 %vm2197_vm11, %v1831_v33  ;;  %1777 = vmatprep.mubr.msk.bf16.mxu1 %vm91_vm0, %v2041_v49 }
 0x2c7   :  { %1775 = vmatprep.subr.msk.bf16.mxu1 %vm2192_vm10, %v1831_v33 }
 0x2ca   :  { %1776 = vmatpush3.bf16.msk.msra.mxu1 %vm2192_vm10, %v1831_v33 }
 0x2cd   :  { %1778 = vmatmul.mubr.msk.bf16.vlgmr.msra.gmra.mrb[16].mxu1 %vm91_vm0, %v2107_v42 }
 0x2ce   :  { %1785 = vmatprep.mubr.msk.bf16.mxu1 %vm91_vm0, %v2263_v50 }
 0x398   :  { %v1759_v34 = vpop.f32.mrb[12].mxu1 }
 0x399   :  { %v783_v25 = vadd.f32 %v1759_v34, %v2302_v1  ;;  %v774_v29 = vpop.f32.mrb[13].mxu1 }
 0x39a   :  { %v1760_v17 = vpop.f32.mrb[14].mxu1  ;;  %v775_v31 = vadd.f32 %v774_v29, %v2298_v44 }
 0x39b   :  { %v786_v46 = vadd.f32 %v1760_v17, %v2305_v63  ;;  %814 = vadd.xlane.f32.xlu1 %v783_v25  ;;  %v777_v5 = vpop.f32.mrb[15].mxu1  ;;  %v820_v4 = vmul.f32 %v783_v25, %v783_v25 }
 0x39c   :  { %v778_v62 = vadd.f32 %v777_v5, %v2300_v48  ;;  %v818_v60 = vmul.f32 %v775_v31, %v775_v31 }
 0x39d   :  { %v1620_v23 = vpack.c.bf16 %v786_v46, %v783_v25  ;;  %816 = vadd.xlane.f32.xlu0 %v786_v46  ;;  %v821_v38 = vmul.f32 %v786_v46, %v786_v46 }
 0x39e   :  { %v1615_v7 = vpack.c.bf16 %v778_v62, %v775_v31  ;;  %v819_v32 = vmul.f32 %v778_v62, %v778_v62 }
 0x39f   :  { %1644 = vst [vmem:[%s2433_s7 + $0x18] sm:$0xff] %v1620_v23   ;;  %810 = vadd.xlane.f32.xlu1 %v775_v31 }
 0x3a0   :  { %1643 = vst [vmem:[%s2433_s7 + $0x10] sm:$0xff] %v1615_v7   ;;  %v1779_v10 = vpop.f32.mrb[16].mxu1 }
 0x3a1   :  { %v1029_v12 = vadd.f32 %v1779_v10, %v734_v35  ;;  %v1012_v40 = vpop.f32.mrb[17].mxu1  ;;  %812 = vadd.xlane.f32.xlu0 %v778_v62 }
 0x3a2   :  { %v1027_v9 = vadd.f32 %v1012_v40, %v732_v0  ;;  %v1780_v22 = vpop.f32.mrb[18].mxu1  ;;  %v520_v40 = vpop.xlane.xlu1 %519 }
 0x3a3   :  { %v1033_v28 = vmul.f32 0.5, %v1029_v12  ;;  %v1030_v13 = vadd.f32 %v1780_v22, %v735_v18  ;;  %v1015_v58 = vpop.f32.mrb[19].mxu1  ;;  %826 = vadd.xlane.f32.xlu1 %v820_v4 }
 0x3a4   :  { %v1031_v11 = vmul.f32 0.5, %v1027_v9  ;;  %v1028_v24 = vadd.f32 %v1015_v58, %v733_v41 }
 0x3a5   :  { %vm1037_vm10 = vcmp.ge.f32.partialorder %v1033_v28, 0.5  ;;  %v1034_v14 = vmul.f32 0.5, %v1030_v13  ;;  %828 = vadd.xlane.f32.xlu0 %v821_v38 }
 0x3a6   :  { %vm1035_vm11 = vcmp.ge.f32.partialorder %v1031_v11, 0.5  ;;  %v1032_v27 = vmul.f32 0.5, %v1028_v24  ;;  %v1041_v59 = vsel %vm1037_vm10, 0.0, %v1033_v28  ;;  %v506_v9 = vpop.xlane.xlu1 %505 }
 0x3a7   :  { %vm1038_vm3 = vcmp.ge.f32.partialorder %v1034_v14, 0.5  ;;  %822 = vadd.xlane.f32.xlu1 %v818_v60  ;;  %v1039_v54 = vsel %vm1035_vm11, 0.0, %v1031_v11 }
 0x3a8   :  { %vm1036_vm4 = vcmp.ge.f32.partialorder %v1032_v27, 0.5  ;;  %vm1044_vm5 = vmpackc.low %vm1038_vm3, %vm1037_vm10  ;;  %v1042_v45 = vsel %vm1038_vm3, 0.0, %v1034_v14 }
 0x3a9   :  { %824 = vadd.xlane.f32.xlu0 %v819_v32  ;;  %vm1043_vm6 = vmpackc.low %vm1036_vm4, %vm1035_vm11  ;;  %v1046_v26 = vsel %vm1044_vm5, %v977_v53, 0  ;;  %v1040_v56 = vsel %vm1036_vm4, 0.0, %v1032_v27 }
 0x3aa   :  { %v1045_v52 = vsel %vm1043_vm6, %v976_v16, 0  ;;  %v516_v28 = vpop.xlane.xlu1 %515 }
 0x3ab   :  { %1781 = vmatprep.subr.bf16.mxu1 %v1045_v52 }
 0x3ac   :  { %1782 = vmatpush3.bf16.msra.mxu1 %v1045_v52 }
 0x3ad   :  { %1783 = vmatprep.subr.bf16.mxu1 %v1046_v26 }
 0x3b0   :  { %1784 = vmatpush3.bf16.msra.mxu1 %v1046_v26 }
 0x3b1   :  { %1801 = vmatprep.subr.msk.bf16.mxu1 %vm2239_vm8, %v1831_v33 }
 0x3b3   :  { %1786 = vmatmul.mubr.msk.bf16.vlgmr.msra.gmra.mrb[20].mxu1 %vm91_vm0, %v2276_v8 }
 0x3b4   :  { %1802 = vmatpush3.bf16.msk.msra.mxu1 %vm2239_vm8, %v1831_v33  ;;  %1805 = vmatprep.mubr.msk.bf16.mxu1 %vm91_vm0, %v2041_v49 }
 0x3b5   :  { %1803 = vmatprep.subr.msk.bf16.mxu1 %vm2234_vm7, %v1831_v33 }
 0x3b8   :  { %1804 = vmatpush3.bf16.msk.msra.mxu1 %vm2234_vm7, %v1831_v33 }
 0x3bb   :  { %1806 = vmatmul.mubr.msk.bf16.vlgmr.msra.gmra.mrb[24].mxu1 %vm91_vm0, %v2107_v42 }
 0x3bc   :  { %1813 = vmatprep.mubr.msk.bf16.mxu1 %vm91_vm0, %v2263_v50 }
 0x428   :  { %v815_v58 = vpop.xlane.xlu1 %814 }
 0x42c   :  { %v811_v11 = vpop.xlane.xlu1 %810 }
 0x430   :  { %v827_v14 = vpop.xlane.xlu1 %826 }
 0x434   :  { %v823_v27 = vpop.xlane.xlu1 %822 }
 0x486   :  { %v1787_v2 = vpop.f32.mrb[20].mxu1 }
 0x487   :  { %v1090_v55 = vadd.f32 %v1787_v2, %v2302_v1  ;;  %v1081_v51 = vpop.f32.mrb[21].mxu1 }
 0x488   :  { %v1788_v16 = vpop.f32.mrb[22].mxu1  ;;  %v1082_v53 = vadd.f32 %v1081_v51, %v2298_v44 }
 0x489   :  { %v1093_v49 = vadd.f32 %v1788_v16, %v2305_v63  ;;  %1121 = vadd.xlane.f32.xlu1 %v1090_v55  ;;  %v1084_v57 = vpop.f32.mrb[23].mxu1  ;;  %v1127_v20 = vmul.f32 %v1090_v55, %v1090_v55 }
 0x48a   :  { %v1085_v6 = vadd.f32 %v1084_v57, %v2300_v48  ;;  %v1125_v29 = vmul.f32 %v1082_v53, %v1082_v53 }
 0x48b   :  { %v1630_v33 = vpack.c.bf16 %v1093_v49, %v1090_v55  ;;  %1123 = vadd.xlane.f32.xlu0 %v1093_v49  ;;  %v1128_v41 = vmul.f32 %v1093_v49, %v1093_v49 }
 0x48c   :  { %v1625_v21 = vpack.c.bf16 %v1085_v6, %v1082_v53  ;;  %v1126_v46 = vmul.f32 %v1085_v6, %v1085_v6 }
 0x48d   :  { %1646 = vst [vmem:[%s2433_s7 + $0x28] sm:$0xff] %v1630_v33   ;;  %1117 = vadd.xlane.f32.xlu1 %v1082_v53  ;;  %v834_v53 = vadd.f32 %v823_v27, %v516_v28 }
 0x48e   :  { %1645 = vst [vmem:[%s2433_s7 + $0x20] sm:$0xff] %v1625_v21   ;;  %v1807_v42 = vpop.f32.mrb[24].mxu1 }
 0x48f   :  { %v1328_v50 = vadd.f32 %v1807_v42, %v1041_v59  ;;  %v1311_v43 = vpop.f32.mrb[25].mxu1  ;;  %1119 = vadd.xlane.f32.xlu0 %v1085_v6 }
 0x490   :  { %v1326_v35 = vadd.f32 %v1311_v43, %v1039_v54  ;;  %v1808_v0 = vpop.f32.mrb[26].mxu1 }
 0x491   :  { %v1332_v18 = vmul.f32 0.5, %v1328_v50  ;;  %v1329_v36 = vadd.f32 %v1808_v0, %v1042_v45  ;;  %v1314_v3 = vpop.f32.mrb[27].mxu1  ;;  %1133 = vadd.xlane.f32.xlu1 %v1127_v20  ;;  %v836_v20 = vadd.f32 %v827_v14, %v520_v40 }
 0x492   :  { %v1330_v37 = vmul.f32 0.5, %v1326_v35  ;;  %v1327_v34 = vadd.f32 %v1314_v3, %v1040_v56 }
 0x493   :  { %v1333_v25 = vmul.f32 0.5, %v1329_v36  ;;  %1135 = vadd.xlane.f32.xlu0 %v1128_v41  ;;  %vm1336_vm7 = vcmp.ge.f32.partialorder %v1332_v18, 0.5 }
 0x494   :  { %v1331_v17 = vmul.f32 0.5, %v1327_v34  ;;  %vm1334_vm9 = vcmp.ge.f32.partialorder %v1330_v37, 0.5 }
 0x495   :  { %vm1337_vm8 = vcmp.ge.f32.partialorder %v1333_v25, 0.5  ;;  %1129 = vadd.xlane.f32.xlu1 %v1125_v29 }
 0x496   :  { %vm1339_vm15 = vmpackc.low %vm1337_vm8, %vm1336_vm7  ;;  %vm1335_vm1 = vcmp.ge.f32.partialorder %v1331_v17, 0.5 }
 0x497   :  { %vm1338_vm12 = vmpackc.low %vm1335_vm1, %vm1334_vm9  ;;  %1131 = vadd.xlane.f32.xlu0 %v1126_v46  ;;  %v1341_v5 = vsel %vm1339_vm15, %v1276_v47, 0 }
 0x498   :  { %v1340_v31 = vsel %vm1338_vm12, %v1275_v39, 0 }
 0x499   :  { %1809 = vmatprep.subr.bf16.mxu1 %v1340_v31 }
 0x49a   :  { %1810 = vmatpush3.bf16.msra.mxu1 %v1340_v31 }
 0x49b   :  { %1811 = vmatprep.subr.bf16.mxu1 %v1341_v5 }
 0x49e   :  { %1812 = vmatpush3.bf16.msra.mxu1 %v1341_v5 }
 0x4a1   :  { %1814 = vmatmul.mubr.msk.bf16.vlgmr.msra.gmra.mrb[28].mxu1 %vm91_vm0, %v2276_v8  ;;  %vm1440_vm0 = vcmask 7168  }
 0x516   :  { %v1122_v32 = vpop.xlane.xlu1 %1121 }
 0x51a   :  { %v1118_v45 = vpop.xlane.xlu1 %1117 }
 0x51e   :  { %v1134_v56 = vpop.xlane.xlu1 %1133 }
 0x51f   :  { %v1143_v29 = vadd.f32 %v1134_v56, %v836_v20 }
 0x522   :  { %v1130_v2 = vpop.xlane.xlu1 %1129 }
 0x523   :  { %v1141_v50 = vadd.f32 %v1130_v2, %v834_v53 }
 0x574   :  { %v1815_v62 = vpop.f32.mrb[28].mxu1 }
 0x575   :  { %v1385_v23 = vadd.f32 %v1815_v62, %v2302_v1  ;;  %v1376_v7 = vpop.f32.mrb[29].mxu1  ;;  %v508_v1 = vpop.xlane.xlu0 %507 }
 0x576   :  { %v1816_v10 = vpop.f32.mrb[30].mxu1  ;;  %v1377_v15 = vadd.f32 %v1376_v7, %v2298_v44  ;;  %v832_v43 = vadd.f32 %v815_v58, %v508_v1 }
 0x577   :  { %v1388_v12 = vadd.f32 %v1816_v10, %v2305_v63  ;;  %1416 = vadd.xlane.f32.xlu1 %v1385_v23  ;;  %v1379_v19 = vpop.f32.mrb[31].mxu1  ;;  %v1422_v44 = vmul.f32 %v1385_v23, %v1385_v23 }
 0x578   :  { %v1380_v30 = vadd.f32 %v1379_v19, %v2300_v48  ;;  %v1420_v39 = vmul.f32 %v1377_v15, %v1377_v15  ;;  %v1139_v34 = vadd.f32 %v1122_v32, %v832_v43 }
 0x579   :  { %v1640_v61 = vpack.c.bf16 %v1388_v12, %v1385_v23  ;;  %1418 = vadd.xlane.f32.xlu0 %v1388_v12  ;;  %v1423_v48 = vmul.f32 %v1388_v12, %v1388_v12  ;;  %v504_v63 = vpop.xlane.xlu0 %503 }
 0x57a   :  { %v1635_v47 = vpack.c.bf16 %v1380_v30, %v1377_v15  ;;  %v1421_v8 = vmul.f32 %v1380_v30, %v1380_v30  ;;  %v830_v57 = vadd.f32 %v811_v11, %v504_v63 }
 0x57b   :  { %1648 = vst [vmem:[%s2433_s7 + $0x38] sm:$0xff] %v1640_v61   ;;  %1412 = vadd.xlane.f32.xlu1 %v1377_v15 }
 0x57c   :  { %1647 = vst [vmem:[%s2433_s7 + $0x30] sm:$0xff] %v1635_v47   ;;  %v1137_v42 = vadd.f32 %v1118_v45, %v830_v57 }
 0x57d   :  { %1414 = vadd.xlane.f32.xlu0 %v1380_v30  ;;  %v510_v4 = vpop.xlane.xlu0 %509 }
 0x57f   :  { %1424 = vadd.xlane.f32.xlu1 %v1420_v39 }
 0x581   :  { %1426 = vadd.xlane.f32.xlu0 %v1421_v8  ;;  %v522_v22 = vpop.xlane.xlu0 %521 }
 0x583   :  { %1428 = vadd.xlane.f32.xlu1 %v1422_v44 }
 0x585   :  { %1430 = vadd.xlane.f32.xlu0 %v1423_v48  ;;  %v518_v13 = vpop.xlane.xlu0 %517 }
 0x589   :  { %v817_v38 = vpop.xlane.xlu0 %816 }
 0x58a   :  { %v833_v41 = vadd.f32 %v817_v38, %v510_v4 }
 0x58d   :  { %v813_v24 = vpop.xlane.xlu0 %812 }
 0x58e   :  { %v831_v6 = vadd.f32 %v813_v24, %v506_v9 }
 0x591   :  { %v829_v60 = vpop.xlane.xlu0 %828 }
 0x592   :  { %v837_v37 = vadd.f32 %v829_v60, %v522_v22 }
 0x595   :  { %v825_v59 = vpop.xlane.xlu0 %824 }
 0x596   :  { %v835_v21 = vadd.f32 %v825_v59, %v518_v13 }
 0x599   :  { %v1124_v54 = vpop.xlane.xlu0 %1123 }
 0x59a   :  { %v1140_v31 = vadd.f32 %v1124_v54, %v833_v41 }
 0x59d   :  { %v1120_v26 = vpop.xlane.xlu0 %1119 }
 0x59e   :  { %v1138_v35 = vadd.f32 %v1120_v26, %v831_v6 }
 0x5a1   :  { %v1136_v52 = vpop.xlane.xlu0 %1135 }
 0x5a2   :  { %v1144_v23 = vadd.f32 %v1136_v52, %v837_v37 }
 0x5a5   :  { %v1132_v55 = vpop.xlane.xlu0 %1131 }
 0x5a6   :  { %v1142_v18 = vadd.f32 %v1132_v55, %v835_v21 }
 0x604   :  { %v1417_v51 = vpop.xlane.xlu1 %1416 }
 0x605   :  { %v1434_v7 = vadd.f32 %v1417_v51, %v1139_v34 }
 0x606   :  { %v1419_v16 = vpop.xlane.xlu0 %1418 }
 0x607   :  { %v1435_v15 = vadd.f32 %v1419_v16, %v1140_v31 }
 0x608   :  { %v1413_v49 = vpop.xlane.xlu1 %1412 }
 0x609   :  { %v1432_v36 = vadd.f32 %v1413_v49, %v1137_v42 }
 0x60a   :  { %v1415_v33 = vpop.xlane.xlu0 %1414 }
 0x60b   :  { %v1433_v17 = vadd.f32 %v1415_v33, %v1138_v35 }
 0x60c   :  { %v1425_v0 = vpop.xlane.xlu1 %1424 }
 0x60d   :  { %v1436_v3 = vadd.f32 %v1425_v0, %v1141_v50 }
 0x60e   :  { %v1427_v25 = vpop.xlane.xlu0 %1426 }
 0x60f   :  { %v1441_v46 = vsel %vm1440_vm0, %v1432_v36, %v1436_v3  ;;  %v1437_v5 = vadd.f32 %v1427_v25, %v1142_v18 }
 0x610   :  { %1446 = vst.msk [vmem:[%s2434_s8] sm:$0xff] %vm1445_vm13, %v1441_v46  ;;  %v1429_v62 = vpop.xlane.xlu1 %1428 }
 0x611   :  { %v1442_v10 = vsel %vm1440_vm0, %v1433_v17, %v1437_v5  ;;  %v1438_v12 = vadd.f32 %v1429_v62, %v1143_v29 }
 0x612   :  { %1447 = vst.msk [vmem:[%s2434_s8 + $0x8] sm:$0xff] %vm1445_vm13, %v1442_v10  ;;  %v1431_v19 = vpop.xlane.xlu0 %1430 }
 0x613   :  { %v1443_v30 = vsel %vm1440_vm0, %v1434_v7, %v1438_v12  ;;  %v1439_v61 = vadd.f32 %v1431_v19, %v1144_v23 }
 0x614   :  { %1448 = vst.msk [vmem:[%s2434_s8 + $0x10] sm:$0xff] %vm1445_vm13, %v1443_v30 }
 0x615   :  { %v1444_v47 = vsel %vm1440_vm0, %v1435_v15, %v1439_v61 }
 0x616   :  { %1449 = vst.msk [vmem:[%s2434_s8 + $0x18] sm:$0xff] %vm1445_vm13, %v1444_v47 }

// kernel: token_spiking_transformer.8
= control target key start
LH: loop header
LB: loop body
LE: loop exit
PB: predicated region body
PF: predicated region fallthrough
CT: control target
= control target key end

     0   :  { %v2138_v0 = vmov 0   ;;  %vm225_vm0 = vcmask 261120   ;;  %s3402_s3 = inlined_call_operand.vmem [shape: f32[128,1], index: 3, kind: input, shape index: {}]   ;;  %s3403_s2 = inlined_call_operand.vmem [shape: f32[128,1], index: 2, kind: input, shape index: {}]   ;;  %s3404_s0 = inlined_call_operand.vmem [shape: f32[4,32,128], index: 0, kind: input, shape index: {}]   ;;  %s3405_s1 = inlined_call_operand.vmem [shape: bf16[128,32], index: 1, kind: input, shape index: {}]   ;;  %s3406_s4 = inlined_call_operand.vmem [shape: f32[128,1], index: 4, kind: input, shape index: {}]   ;;  %s3407_s6 = inlined_call_operand.vmem [shape: f32[32,1], index: 6, kind: input, shape index: {}]   ;;  %s3408_s5 = inlined_call_operand.vmem [shape: bf16[32,128], index: 5, kind: input, shape index: {}]   ;;  %s3409_s7 = inlined_call_operand.vmem [shape: f32[1,32,2], index: 7, kind: output, shape index: {}]  }
   0x1   :  { %2126 = vset.pattern.permute.xlu1 %v2138_v0  ;;  %2125 = vset.pattern.permute.xlu0 %v2138_v0  ;;  %v59_v1 = vld [vmem:[%s3402_s3] sm:$0xff]  ;;  %v100_v4 = vld [vmem:[%s3404_s0 + $0x8] sm:$0xff]  ;;  %v101_v7 = vld [vmem:[%s3404_s0 + $0x10] sm:$0xff] }
   0x2   :  { %v43_v2 = vld [vmem:[%s3403_s2] sm:$0xff]  ;;  %349 = vperm.xlu1 %2126, %v59_v1   ;;  %v60_v6 = vld [vmem:[%s3402_s3 + $0x8] sm:$0xff]  ;;  %v102_v8 = vld [vmem:[%s3404_s0 + $0x18] sm:$0xff] }
   0x3   :  { %v99_v3 = vld [vmem:[%s3404_s0] sm:$0xff]  ;;  %107 = vperm.xlu0 %2125, %v43_v2   ;;  %v44_v9 = vld [vmem:[%s3403_s2 + $0x8] sm:$0xff]  ;;  %v104_v10 = vpack.c.bf16 %v102_v8, %v101_v7  ;;  %v46_v14 = vld [vmem:[%s3403_s2 + $0x18] sm:$0xff] }
   0x4   :  { %v103_v5 = vpack.c.bf16 %v100_v4, %v99_v3  ;;  %v2207_v11 = vld [vmem:[%s3405_s1] sm:$0xff]   ;;  %v1752_v13 = vld [vmem:[%s3404_s0 + $0x28] sm:$0xff]  ;;  %v45_v16 = vld [vmem:[%s3403_s2 + $0x10] sm:$0xff] }
   0x5   :  { %v1751_v12 = vld [vmem:[%s3404_s0 + $0x20] sm:$0xff]  ;;  %1967 = vmatprep.mubr.msk.bf16.mxu0 %vm225_vm0, %v2207_v11  ;;  %v2226_v17 = vld [vmem:[%s3405_s1 + $0x8] sm:$0xff]   ;;  %v2234_v19 = vld [vmem:[%s3405_s1 + $0x10] sm:$0xff]  }
   0x6   :  { %1963 = vmatprep.subr.bf16.mxu0 %v103_v5  ;;  %354 = vperm.xlu1 %2126, %v60_v6   ;;  %v757_v15 = vpack.c.bf16 %v1752_v13, %v1751_v12  ;;  %v76_v18 = vld [vmem:[%s3406_s4 + $0x8] sm:$0xff]  ;;  %v75_v20 = vld [vmem:[%s3406_s4] sm:$0xff]  ;;  %v1753_v21 = vld [vmem:[%s3404_s0 + $0x30] sm:$0xff] }
   0x7   :  { %1964 = vmatpush3.bf16.msra.mxu0 %v103_v5  ;;  %112 = vperm.xlu0 %2125, %v44_v9   ;;  %v1754_v22 = vld [vmem:[%s3404_s0 + $0x38] sm:$0xff]  ;;  %v61_v25 = vld [vmem:[%s3402_s3 + $0x10] sm:$0xff]  ;;  %v2263_v27 = vld [vmem:[%s3405_s1 + $0x20] sm:$0xff]  }
   0x8   :  { %1965 = vmatprep.subr.bf16.mxu0 %v104_v10  ;;  %v62_v23 = vld [vmem:[%s3402_s3 + $0x18] sm:$0xff]  ;;  %v758_v24 = vpack.c.bf16 %v1754_v22, %v1753_v21  ;;  %v48_v28 = vld [vmem:[%s3403_s2 + $0x28] sm:$0xff]  ;;  %v1795_v29 = vld [vmem:[%s3404_s0 + $0x40] sm:$0xff] }
   0x9   :  { %v2258_v26 = vld [vmem:[%s3405_s1 + $0x18] sm:$0xff]   ;;  %v1796_v30 = vld [vmem:[%s3404_s0 + $0x48] sm:$0xff]  ;;  %v47_v31 = vld [vmem:[%s3403_s2 + $0x20] sm:$0xff] }
   0xa   :  { %122 = vperm.xlu1 %2126, %v46_v14   ;;  %v1074_v32 = vpack.c.bf16 %v1796_v30, %v1795_v29  ;;  %v78_v33 = vld [vmem:[%s3406_s4 + $0x18] sm:$0xff]  ;;  %v77_v34 = vld [vmem:[%s3406_s4 + $0x10] sm:$0xff]  ;;  %v2290_v35 = vld [vmem:[%s3405_s1 + $0x28] sm:$0xff]  }
   0xb   :  { %1966 = vmatpush3.bf16.msra.mxu0 %v104_v10  ;;  %117 = vperm.xlu0 %2125, %v45_v16   ;;  %v2295_v36 = vld [vmem:[%s3405_s1 + $0x30] sm:$0xff]   ;;  %v64_v37 = vld [vmem:[%s3402_s3 + $0x28] sm:$0xff]  ;;  %v63_v38 = vld [vmem:[%s3402_s3 + $0x20] sm:$0xff] }
   0xc   :  { %2003 = vmatprep.subr.bf16.mxu0 %v757_v15  ;;  %v50_v39 = vld [vmem:[%s3403_s2 + $0x38] sm:$0xff]  ;;  %v49_v40 = vld [vmem:[%s3403_s2 + $0x30] sm:$0xff]  ;;  %v80_v42 = vld [vmem:[%s3406_s4 + $0x28] sm:$0xff] }
   0xd   :  { %v2316_v41 = vld [vmem:[%s3405_s1 + $0x38] sm:$0xff]   ;;  %v79_v43 = vld [vmem:[%s3406_s4 + $0x20] sm:$0xff]  ;;  %v65_v45 = vld [vmem:[%s3402_s3 + $0x30] sm:$0xff] }
   0xe   :  { %1968 = vmatmul.mubr.msk.bf16.vlgmr.msra.gmra.mrb[0].mxu0 %vm225_vm0, %v2226_v17  ;;  %450 = vperm.xlu1 %2126, %v76_v18   ;;  %v66_v44 = vld [vmem:[%s3402_s3 + $0x38] sm:$0xff]  ;;  %v1797_v46 = vld [vmem:[%s3404_s0 + $0x50] sm:$0xff]  ;;  %v52_v48 = vld [vmem:[%s3403_s2 + $0x48] sm:$0xff] }
   0xf   :  { %2004 = vmatpush3.bf16.msra.mxu0 %v757_v15  ;;  %445 = vperm.xlu0 %2125, %v75_v20   ;;  %v1798_v47 = vld [vmem:[%s3404_s0 + $0x58] sm:$0xff]  ;;  %v51_v49 = vld [vmem:[%s3403_s2 + $0x40] sm:$0xff]  ;;  %v1840_v52 = vld [vmem:[%s3404_s0 + $0x68] sm:$0xff] }
  0x10   :  { %1971 = vmatprep.mubr.msk.bf16.mxu0 %vm225_vm0, %v2234_v19  ;;  %2005 = vmatprep.subr.bf16.mxu0 %v758_v24  ;;  %v1075_v50 = vpack.c.bf16 %v1798_v47, %v1797_v46  ;;  %v1839_v51 = vld [vmem:[%s3404_s0 + $0x60] sm:$0xff]  ;;  %v82_v53 = vld [vmem:[%s3406_s4 + $0x38] sm:$0xff]  ;;  %v81_v55 = vld [vmem:[%s3406_s4 + $0x30] sm:$0xff] }
  0x11   :  { %v1391_v54 = vpack.c.bf16 %v1840_v52, %v1839_v51  ;;  %v68_v56 = vld [vmem:[%s3402_s3 + $0x48] sm:$0xff]  ;;  %v67_v57 = vld [vmem:[%s3402_s3 + $0x40] sm:$0xff]  ;;  %v54_v58 = vld [vmem:[%s3403_s2 + $0x58] sm:$0xff] }
  0x12   :  { %364 = vperm.xlu1 %2126, %v62_v23   ;;  %v53_v59 = vld [vmem:[%s3403_s2 + $0x50] sm:$0xff]  ;;  %v84_v60 = vld [vmem:[%s3406_s4 + $0x48] sm:$0xff]  ;;  %v83_v61 = vld [vmem:[%s3406_s4 + $0x40] sm:$0xff] }
  0x13   :  { %2006 = vmatpush3.bf16.msra.mxu0 %v758_v24  ;;  %359 = vperm.xlu0 %2125, %v61_v25   ;;  %v70_v62 = vld [vmem:[%s3402_s3 + $0x58] sm:$0xff]  ;;  %v69_v63 = vld [vmem:[%s3402_s3 + $0x50] sm:$0xff]  ;;  %v56_v0 = vld [vmem:[%s3403_s2 + $0x68] sm:$0xff] }
  0x14   :  { %2043 = vmatprep.subr.bf16.mxu0 %v1074_v32  ;;  %v55_v1 = vld [vmem:[%s3403_s2 + $0x60] sm:$0xff]  ;;  %v86_v2 = vld [vmem:[%s3406_s4 + $0x58] sm:$0xff]  ;;  %v85_v3 = vld [vmem:[%s3406_s4 + $0x50] sm:$0xff] }
  0x15   :  { %v1841_v4 = vld [vmem:[%s3404_s0 + $0x70] sm:$0xff]  ;;  %v1842_v5 = vld [vmem:[%s3404_s0 + $0x78] sm:$0xff]  ;;  %v72_v6 = vld [vmem:[%s3402_s3 + $0x68] sm:$0xff] }
  0x16   :  { %1972 = vmatmul.mubr.msk.bf16.gmra.mrb[4].mxu0 %vm225_vm0, %v2258_v26  ;;  %132 = vperm.xlu1 %2126, %v48_v28   ;;  %v71_v7 = vld [vmem:[%s3402_s3 + $0x60] sm:$0xff]  ;;  %v1392_v8 = vpack.c.bf16 %v1842_v5, %v1841_v4  ;;  %v58_v9 = vld [vmem:[%s3403_s2 + $0x78] sm:$0xff]  ;;  %v57_v10 = vld [vmem:[%s3403_s2 + $0x70] sm:$0xff] }
  0x17   :  { %1975 = vmatprep.mubr.msk.bf16.mxu0 %vm225_vm0, %v2263_v27  ;;  %127 = vperm.xlu0 %2125, %v47_v31   ;;  %v88_v12 = vld [vmem:[%s3406_s4 + $0x68] sm:$0xff]  ;;  %v87_v13 = vld [vmem:[%s3406_s4 + $0x60] sm:$0xff]  ;;  %v74_v14 = vld [vmem:[%s3402_s3 + $0x78] sm:$0xff] }
  0x18   :  { %v73_v15 = vld [vmem:[%s3402_s3 + $0x70] sm:$0xff]  ;;  %v90_v16 = vld [vmem:[%s3406_s4 + $0x78] sm:$0xff]  ;;  %v96_v20 = vld [vmem:[%s3407_s6 + $0x8] sm:$0xff] }
  0x19   :  { %v89_v18 = vld [vmem:[%s3406_s4 + $0x70] sm:$0xff]  ;;  %v95_v21 = vld [vmem:[%s3407_s6] sm:$0xff]  ;;  %v98_v22 = vld [vmem:[%s3407_s6 + $0x18] sm:$0xff] }
  0x1a   :  { %460 = vperm.xlu1 %2126, %v78_v33   ;;  %v97_v23 = vld [vmem:[%s3407_s6 + $0x10] sm:$0xff] }
  0x1b   :  { %455 = vperm.xlu0 %2125, %v77_v34  }
  0x1e   :  { %1976 = vmatmul.mubr.msk.bf16.gmra.mrb[8].mxu0 %vm225_vm0, %v2290_v35  ;;  %374 = vperm.xlu1 %2126, %v64_v37  }
  0x1f   :  { %1979 = vmatprep.mubr.msk.bf16.mxu0 %vm225_vm0, %v2295_v36  ;;  %369 = vperm.xlu0 %2125, %v63_v38  }
  0x22   :  { %142 = vperm.xlu1 %2126, %v50_v39  }
  0x23   :  { %137 = vperm.xlu0 %2125, %v49_v40  }
  0x26   :  { %1980 = vmatmul.mubr.msk.bf16.gmra.mrb[12].mxu0 %vm225_vm0, %v2316_v41  ;;  %470 = vperm.xlu1 %2126, %v80_v42  }
  0x27   :  { %2007 = vmatprep.mubr.msk.bf16.mxu0 %vm225_vm0, %v2207_v11  ;;  %465 = vperm.xlu0 %2125, %v79_v43  }
  0x2a   :  { %384 = vperm.xlu1 %2126, %v66_v44  }
  0x2b   :  { %379 = vperm.xlu0 %2125, %v65_v45  }
  0x2e   :  { %2008 = vmatmul.mubr.msk.bf16.vlgmr.msra.gmra.mrb[16].mxu0 %vm225_vm0, %v2226_v17  ;;  %152 = vperm.xlu1 %2126, %v52_v48  }
  0x2f   :  { %2044 = vmatpush3.bf16.msra.mxu0 %v1074_v32  ;;  %147 = vperm.xlu0 %2125, %v51_v49  }
  0x30   :  { %2011 = vmatprep.mubr.msk.bf16.mxu0 %vm225_vm0, %v2234_v19  ;;  %2045 = vmatprep.subr.bf16.mxu0 %v1075_v50 }
  0x32   :  { %480 = vperm.xlu1 %2126, %v82_v53  }
  0x33   :  { %2046 = vmatpush3.bf16.msra.mxu0 %v1075_v50  ;;  %475 = vperm.xlu0 %2125, %v81_v55  }
  0x34   :  { %2083 = vmatprep.subr.bf16.mxu0 %v1391_v54 }
  0x36   :  { %2012 = vmatmul.mubr.msk.bf16.gmra.mrb[20].mxu0 %vm225_vm0, %v2258_v26  ;;  %394 = vperm.xlu1 %2126, %v68_v56  }
  0x37   :  { %2015 = vmatprep.mubr.msk.bf16.mxu0 %vm225_vm0, %v2263_v27  ;;  %389 = vperm.xlu0 %2125, %v67_v57  }
  0x3a   :  { %162 = vperm.xlu1 %2126, %v54_v58  }
  0x3b   :  { %157 = vperm.xlu0 %2125, %v53_v59  }
  0x3e   :  { %2016 = vmatmul.mubr.msk.bf16.gmra.mrb[24].mxu0 %vm225_vm0, %v2290_v35  ;;  %490 = vperm.xlu1 %2126, %v84_v60  }
  0x3f   :  { %2019 = vmatprep.mubr.msk.bf16.mxu0 %vm225_vm0, %v2295_v36  ;;  %485 = vperm.xlu0 %2125, %v83_v61  }
  0x42   :  { %404 = vperm.xlu1 %2126, %v70_v62  }
  0x43   :  { %399 = vperm.xlu0 %2125, %v69_v63  }
  0x46   :  { %2020 = vmatmul.mubr.msk.bf16.gmra.mrb[28].mxu0 %vm225_vm0, %v2316_v41  ;;  %172 = vperm.xlu1 %2126, %v56_v0  }
  0x47   :  { %2047 = vmatprep.mubr.msk.bf16.mxu0 %vm225_vm0, %v2207_v11  ;;  %167 = vperm.xlu0 %2125, %v55_v1  }
  0x4a   :  { %500 = vperm.xlu1 %2126, %v86_v2  }
  0x4b   :  { %495 = vperm.xlu0 %2125, %v85_v3  }
  0x4e   :  { %2048 = vmatmul.mubr.msk.bf16.vlgmr.msra.gmra.mrb[32].mxu0 %vm225_vm0, %v2226_v17  ;;  %414 = vperm.xlu1 %2126, %v72_v6  }
  0x4f   :  { %2084 = vmatpush3.bf16.msra.mxu0 %v1391_v54  ;;  %409 = vperm.xlu0 %2125, %v71_v7  }
  0x50   :  { %2051 = vmatprep.mubr.msk.bf16.mxu0 %vm225_vm0, %v2234_v19  ;;  %2085 = vmatprep.subr.bf16.mxu0 %v1392_v8 }
  0x52   :  { %182 = vperm.xlu1 %2126, %v58_v9  }
  0x53   :  { %2086 = vmatpush3.bf16.msra.mxu0 %v1392_v8  ;;  %177 = vperm.xlu0 %2125, %v57_v10  }
  0x56   :  { %2052 = vmatmul.mubr.msk.bf16.gmra.mrb[36].mxu0 %vm225_vm0, %v2258_v26  ;;  %510 = vperm.xlu1 %2126, %v88_v12  }
  0x57   :  { %2055 = vmatprep.mubr.msk.bf16.mxu0 %vm225_vm0, %v2263_v27  ;;  %505 = vperm.xlu0 %2125, %v87_v13  }
  0x5a   :  { %424 = vperm.xlu1 %2126, %v74_v14  }
  0x5b   :  { %419 = vperm.xlu0 %2125, %v73_v15  }
  0x5e   :  { %2056 = vmatmul.mubr.msk.bf16.gmra.mrb[40].mxu0 %vm225_vm0, %v2290_v35  ;;  %520 = vperm.xlu1 %2126, %v90_v16  }
  0x5f   :  { %2059 = vmatprep.mubr.msk.bf16.mxu0 %vm225_vm0, %v2295_v36  ;;  %515 = vperm.xlu0 %2125, %v89_v18  }
  0x62   :  { %650 = vperm.xlu1 %2126, %v96_v20  }
  0x63   :  { %645 = vperm.xlu0 %2125, %v95_v21  }
  0x66   :  { %2060 = vmatmul.mubr.msk.bf16.gmra.mrb[44].mxu0 %vm225_vm0, %v2316_v41  ;;  %660 = vperm.xlu1 %2126, %v98_v22  }
  0x67   :  { %2087 = vmatprep.mubr.msk.bf16.mxu0 %vm225_vm0, %v2207_v11  ;;  %655 = vperm.xlu0 %2125, %v97_v23  }
  0x6e   :  { %2088 = vmatmul.mubr.msk.bf16.vlgmr.msra.gmra.mrb[48].mxu0 %vm225_vm0, %v2226_v17 }
  0x6f   :  { %2091 = vmatprep.mubr.msk.bf16.mxu0 %vm225_vm0, %v2234_v19 }
  0x76   :  { %2092 = vmatmul.mubr.msk.bf16.gmra.mrb[52].mxu0 %vm225_vm0, %v2258_v26 }
  0x77   :  { %2095 = vmatprep.mubr.msk.bf16.mxu0 %vm225_vm0, %v2263_v27  ;;  %v2503_v27 = vld [vmem:[%s3408_s5] sm:$0xff]  }
  0x78   :  { %3470 = vst [vmem:[#allocation4_spill] sm:$0xff] %v2503_v27  ;;  %1999 = vmatprep.mubr.bf16.mxu1 %v2503_v27 }
  0x7e   :  { %2096 = vmatmul.mubr.msk.bf16.gmra.mrb[56].mxu0 %vm225_vm0, %v2290_v35 }
  0x7f   :  { %2099 = vmatprep.mubr.msk.bf16.mxu0 %vm225_vm0, %v2295_v36 }
  0x81   :  { %v2486_v11 = vpop.permute.xlu1 %349 }
  0x82   :  { %v2488_v24 = vpop.permute.xlu0 %107 }
  0x83   :  { %3468 = vst [vmem:[#allocation2_spill] sm:$0xff] %v2488_v24 }
  0x85   :  { %v2492_v17 = vpop.permute.xlu1 %354 }
  0x86   :  { %2100 = vmatmul.mubr.msk.bf16.gmra.mrb[60].mxu0 %vm225_vm0, %v2316_v41  ;;  %3469 = vst [vmem:[#allocation3_spill] sm:$0xff] %v2492_v17  ;;  %v2494_v19 = vpop.permute.xlu0 %112 }
  0x89   :  { %v2496_v25 = vpop.permute.xlu1 %122 }
  0x8a   :  { %v2498_v26 = vpop.permute.xlu0 %117 }
  0x8d   :  { %v2505_v28 = vpop.permute.xlu1 %450 }
  0x8e   :  { %v2508_v29 = vpop.permute.xlu0 %445 }
  0x91   :  { %v2510_v30 = vpop.permute.xlu1 %364 }
  0x92   :  { %3471 = vst [vmem:[#allocation5_spill] sm:$0xff] %v2510_v30  ;;  %v2512_v31 = vpop.permute.xlu0 %359 }
  0x95   :  { %v2514_v32 = vpop.permute.xlu1 %132 }
  0x96   :  { %v2516_v33 = vpop.permute.xlu0 %127 }
  0x99   :  { %v2518_v34 = vpop.permute.xlu1 %460 }
  0x9a   :  { %3472 = vst [vmem:[#allocation6_spill] sm:$0xff] %v2518_v34  ;;  %v2520_v35 = vpop.permute.xlu0 %455 }
  0x9d   :  { %v2522_v36 = vpop.permute.xlu1 %374 }
  0x9e   :  { %3473 = vst [vmem:[#allocation7_spill] sm:$0xff] %v2522_v36  ;;  %v2524_v37 = vpop.permute.xlu0 %369 }
  0xa1   :  { %v2528_v39 = vpop.permute.xlu1 %142 }
  0xa2   :  { %v2526_v38 = vpop.permute.xlu0 %137 }
  0xa5   :  { %v2532_v41 = vpop.permute.xlu1 %470 }
  0xa6   :  { %v2530_v40 = vpop.permute.xlu0 %465  ;;  %3474 = vst [vmem:[#allocation8_spill] sm:$0xff] %v2532_v41 }
  0xa9   :  { %v2536_v43 = vpop.permute.xlu1 %384 }
  0xaa   :  { %v2534_v42 = vpop.permute.xlu0 %379 }
  0xad   :  { %v2540_v45 = vpop.permute.xlu1 %152 }
  0xae   :  { %v2538_v44 = vpop.permute.xlu0 %147  ;;  %3476 = vst [vmem:[#allocation10_spill] sm:$0xff] %v2540_v45 }
  0xaf   :  { %3475 = vst [vmem:[#allocation9_spill] sm:$0xff] %v2538_v44 }
  0xb1   :  { %v2544_v47 = vpop.permute.xlu1 %480 }
  0xb2   :  { %v2542_v46 = vpop.permute.xlu0 %475  ;;  %3477 = vst [vmem:[#allocation11_spill] sm:$0xff] %v2544_v47 }
  0xb5   :  { %v2548_v49 = vpop.permute.xlu1 %394 }
  0xb6   :  { %v2546_v48 = vpop.permute.xlu0 %389  ;;  %3478 = vst [vmem:[#allocation12_spill] sm:$0xff] %v2548_v49 }
  0xb9   :  { %v2552_v51 = vpop.permute.xlu1 %162 }
  0xba   :  { %v2550_v50 = vpop.permute.xlu0 %157 }
  0xbb   :  { %3479 = vst [vmem:[#allocation13_spill] sm:$0xff] %v2550_v50 }
  0xbd   :  { %v2556_v53 = vpop.permute.xlu1 %490 }
  0xbe   :  { %v2554_v52 = vpop.permute.xlu0 %485  ;;  %3481 = vst [vmem:[#allocation15_spill] sm:$0xff] %v2556_v53 }
  0xbf   :  { %3480 = vst [vmem:[#allocation14_spill] sm:$0xff] %v2554_v52 }
  0xc1   :  { %v2560_v55 = vpop.permute.xlu1 %404 }
  0xc2   :  { %v2558_v54 = vpop.permute.xlu0 %399  ;;  %3482 = vst [vmem:[#allocation16_spill] sm:$0xff] %v2560_v55 }
  0xc5   :  { %v2564_v57 = vpop.permute.xlu1 %172 }
  0xc6   :  { %v2562_v56 = vpop.permute.xlu0 %167  ;;  %3484 = vst [vmem:[#allocation18_spill] sm:$0xff] %v2564_v57 }
  0xc7   :  { %3483 = vst [vmem:[#allocation17_spill] sm:$0xff] %v2562_v56 }
  0xc9   :  { %v2568_v59 = vpop.permute.xlu1 %500 }
  0xca   :  { %v2566_v58 = vpop.permute.xlu0 %495  ;;  %3486 = vst [vmem:[#allocation20_spill] sm:$0xff] %v2568_v59 }
  0xcb   :  { %3485 = vst [vmem:[#allocation19_spill] sm:$0xff] %v2566_v58 }
  0xcd   :  { %v2580_v9 = vpop.permute.xlu1 %414 }
  0xce   :  { %v2574_v4 = vpop.permute.xlu0 %409  ;;  %3488 = vst [vmem:[#allocation22_spill] sm:$0xff] %v2580_v9 }
  0xcf   :  { %3487 = vst [vmem:[#allocation21_spill] sm:$0xff] %v2574_v4 }
  0xd2   :  { %v2593_v23 = vpop.permute.xlu0 %177 }
  0xd3   :  { %3489 = vst [vmem:[#allocation23_spill] sm:$0xff] %v2593_v23 }
  0xe1   :  { %v1969_v60 = vpop.f32.mrb[0].mxu0 }
  0xe2   :  { %v293_v61 = vadd.f32 %v1969_v60, %v2498_v26  ;;  %v284_v62 = vpop.f32.mrb[1].mxu0 }
  0xe3   :  { %v285_v63 = vadd.f32 %v284_v62, %v2488_v24  ;;  %v1970_v0 = vpop.f32.mrb[2].mxu0 }
  0xe4   :  { %v429_v1 = vmul.f32 %v2512_v31, %v293_v61  ;;  %v296_v2 = vadd.f32 %v1970_v0, %v2496_v25  ;;  %v287_v3 = vpop.f32.mrb[3].mxu0 }
  0xe5   :  { %v427_v5 = vmul.f32 %v2486_v11, %v285_v63  ;;  %v288_v6 = vadd.f32 %v287_v3, %v2494_v19 }
  0xe6   :  { %v525_v7 = vadd.f32 %v2520_v35, %v429_v1  ;;  %v430_v8 = vmul.f32 %v2510_v30, %v296_v2  ;;  %v2602_v2 = vpop.permute.xlu1 %182 }
  0xe7   :  { %v428_v10 = vmul.f32 %v2492_v17, %v288_v6  ;;  %v523_v12 = vadd.f32 %v2508_v29, %v427_v5 }
  0xe8   :  { %v2584_v13 = vmul.f32 0.5, %v525_v7  ;;  %v526_v14 = vadd.f32 %v2518_v34, %v430_v8 }
  0xe9   :  { %v1973_v15 = vpop.f32.mrb[4].mxu0  ;;  %v524_v16 = vadd.f32 %v2505_v28, %v428_v10  ;;  %v2588_v18 = vmul.f32 0.5, %v523_v12 }
  0xea   :  { %v2590_v20 = vmul.f32 0.5, %v526_v14  ;;  %v309_v21 = vadd.f32 %v1973_v15, %v2526_v38  ;;  %v300_v22 = vpop.f32.mrb[5].mxu0  ;;  %vm573_vm1 = vcmp.ge.f32.partialorder %v2584_v13, 1.0  ;;  %v3444_v14 = vmov 1.0|1.0  }
  0xeb   :  { %v301_v60 = vadd.f32 %v300_v22, %v2516_v33  ;;  %v1974_v61 = vpop.f32.mrb[6].mxu0  ;;  %v2596_v62 = vmul.f32 0.5, %v524_v16  ;;  %vm571_vm3 = vcmp.ge.f32.partialorder %v2588_v18, 1.0 }
  0xec   :  { %v433_v63 = vmul.f32 %v2534_v42, %v309_v21  ;;  %v312_v0 = vadd.f32 %v1974_v61, %v2528_v39  ;;  %v303_v1 = vpop.f32.mrb[7].mxu0  ;;  %vm574_vm2 = vcmp.ge.f32.partialorder %v2590_v20, 1.0  ;;  %v2629_v21 = vpop.permute.xlu0 %505 }
  0xed   :  { %v431_v3 = vmul.f32 %v2524_v37, %v301_v60  ;;  %v304_v5 = vadd.f32 %v303_v1, %v2514_v32  ;;  %vm572_vm4 = vcmp.ge.f32.partialorder %v2596_v62, 1.0  ;;  %vm2612_vm5 = vmpackc.low %vm574_vm2, %vm573_vm1  ;;  %3492 = vst [vmem:[#allocation24_spill] sm:$0xff] %v2629_v21 }
  0xee   :  { %v529_v7 = vadd.f32 %v2542_v46, %v433_v63  ;;  %v434_v8 = vmul.f32 %v2536_v43, %v312_v0  ;;  %vm1735_vm6 = vmpackc.low %vm572_vm4, %vm571_vm3 }
  0xef   :  { %v527_v10 = vadd.f32 %v2530_v40, %v431_v3  ;;  %v432_v12 = vmul.f32 %v2522_v36, %v304_v5  ;;  %1983 = vmatprep.subr.msk.bf16.mxu1 %vm1735_vm6, %v3444_v14  ;;  %v2640_v3 = vpop.permute.xlu1 %510 }
  0xf0   :  { %v2625_v15 = vmul.f32 0.5, %v529_v7  ;;  %v530_v16 = vadd.f32 %v2544_v47, %v434_v8  ;;  %1984 = vmatpush3.bf16.msk.msra.mxu1 %vm1735_vm6, %v3444_v14 }
  0xf1   :  { %v2631_v22 = vmul.f32 0.5, %v527_v10  ;;  %v528_v60 = vadd.f32 %v2532_v41, %v432_v12  ;;  %v1977_v61 = vpop.f32.mrb[8].mxu0  ;;  %1985 = vmatprep.subr.msk.bf16.mxu1 %vm2612_vm5, %v3444_v14 }
  0xf2   :  { %v2637_v63 = vmul.f32 0.5, %v530_v16  ;;  %v325_v0 = vadd.f32 %v1977_v61, %v2550_v50  ;;  %v316_v1 = vpop.f32.mrb[9].mxu0  ;;  %vm577_vm7 = vcmp.ge.f32.partialorder %v2625_v15, 1.0 }
  0xf3   :  { %v2642_v5 = vmul.f32 0.5, %v528_v60  ;;  %v317_v7 = vadd.f32 %v316_v1, %v2538_v44  ;;  %v1978_v8 = vpop.f32.mrb[10].mxu0  ;;  %vm575_vm9 = vcmp.ge.f32.partialorder %v2631_v22, 1.0 }
  0xf4   :  { %v437_v10 = vmul.f32 %v2558_v54, %v325_v0  ;;  %v328_v12 = vadd.f32 %v1978_v8, %v2552_v51  ;;  %v319_v41 = vpop.f32.mrb[11].mxu0  ;;  %1986 = vmatpush3.bf16.msk.msra.mxu1 %vm2612_vm5, %v3444_v14  ;;  %vm578_vm8 = vcmp.ge.f32.partialorder %v2637_v63, 1.0 }
  0xf5   :  { %v435_v16 = vmul.f32 %v2546_v48, %v317_v7  ;;  %v320_v60 = vadd.f32 %v319_v41, %v2540_v45  ;;  %vm576_vm10 = vcmp.ge.f32.partialorder %v2642_v5, 1.0  ;;  %vm2660_vm11 = vmpackc.low %vm578_vm8, %vm577_vm7  ;;  %v2670_v41 = vpop.permute.xlu0 %419 }
  0xf6   :  { %v533_v6 = vadd.f32 %v2566_v58, %v437_v10  ;;  %v438_v0 = vmul.f32 %v2560_v55, %v328_v12  ;;  %vm1739_vm12 = vmpackc.low %vm576_vm10, %vm575_vm9  ;;  %v2679_v10 = vpop.permute.xlu1 %424 }
  0xf7   :  { %v531_v1 = vadd.f32 %v2554_v52, %v435_v16  ;;  %v436_v7 = vmul.f32 %v2548_v49, %v320_v60  ;;  %1987 = vmatprep.subr.msk.bf16.mxu1 %vm1739_vm12, %v3444_v14  ;;  %3495 = vst [vmem:[#allocation25_spill] sm:$0xff] %v2679_v10 }
  0xf8   :  { %v2675_v8 = vmul.f32 0.5, %v533_v6  ;;  %v534_v45 = vadd.f32 %v2568_v59, %v438_v0  ;;  %1988 = vmatpush3.bf16.msk.msra.mxu1 %vm1739_vm12, %v3444_v14 }
  0xf9   :  { %v2681_v12 = vmul.f32 0.5, %v531_v1  ;;  %v532_v55 = vadd.f32 %v2556_v53, %v436_v7  ;;  %v1981_v58 = vpop.f32.mrb[12].mxu0  ;;  %1989 = vmatprep.subr.msk.bf16.mxu1 %vm2660_vm11, %v3444_v14 }
  0xfa   :  { %v2687_v16 = vmul.f32 0.5, %v534_v45  ;;  %v341_v60 = vadd.f32 %v1981_v58, %v2593_v23  ;;  %v332_v6 = vpop.f32.mrb[13].mxu0  ;;  %vm581_vm13 = vcmp.ge.f32.partialorder %v2675_v8, 1.0  ;;  %v2700_v45 = vpop.permute.xlu0 %515 }
  0xfb   :  { %v2690_v49 = vmul.f32 0.5, %v532_v55  ;;  %v333_v0 = vadd.f32 %v332_v6, %v2562_v56  ;;  %v1982_v59 = vpop.f32.mrb[14].mxu0  ;;  %vm579_vm15 = vcmp.ge.f32.partialorder %v2681_v12, 1.0  ;;  %v2720_v6 = vpop.permute.xlu1 %520 }
  0xfc   :  { %v441_v1 = vmul.f32 %v2670_v41, %v341_v60  ;;  %v344_v52 = vadd.f32 %v1982_v59, %v2602_v2  ;;  %v335_v7 = vpop.f32.mrb[15].mxu0  ;;  %1990 = vmatpush3.bf16.msk.msra.mxu1 %vm2660_vm11, %v3444_v14  ;;  %vm3437_vm14 = vcmp.ge.f32.partialorder %v2687_v16, 1.0  ;;  %3498 = vst [vmem:[#allocation26_spill] sm:$0xff] %v2720_v6 }
  0xfd   :  { %v439_v55 = vmul.f32 %v2574_v4, %v333_v0  ;;  %v336_v58 = vadd.f32 %v335_v7, %v2564_v57  ;;  %vm3436_vm0 = vcmp.ge.f32.partialorder %v2690_v49, 1.0  ;;  %vm2710_vm5 = vmpackc.low %vm3437_vm14, %vm581_vm13 }
  0xfe   :  { %v537_v61 = vadd.f32 %v2700_v45, %v441_v1  ;;  %v442_v60 = vmul.f32 %v2679_v10, %v344_v52  ;;  %vm1743_vm6 = vmpackc.low %vm3436_vm0, %vm579_vm15 }
  0xff   :  { %v535_v0 = vadd.f32 %v2629_v21, %v439_v55  ;;  %v440_v7 = vmul.f32 %v2580_v9, %v336_v58  ;;  %1991 = vmatprep.subr.msk.bf16.mxu1 %vm1743_vm6, %v3444_v14 }
 0x100   :  { %v2725_v57 = vmul.f32 0.5, %v537_v61  ;;  %v538_v4 = vadd.f32 %v2720_v6, %v442_v60  ;;  %1992 = vmatpush3.bf16.msk.msra.mxu1 %vm1743_vm6, %v3444_v14 }
 0x101   :  { %v2729_v52 = vmul.f32 0.5, %v535_v0  ;;  %v536_v1 = vadd.f32 %v2640_v3, %v440_v7  ;;  %1993 = vmatprep.subr.msk.bf16.mxu1 %vm2710_vm5, %v3444_v14  ;;  %v2009_v10 = vpop.f32.mrb[16].mxu0 }
 0x102   :  { %v2735_v55 = vmul.f32 0.5, %v538_v4  ;;  %v802_v58 = vadd.f32 %v2009_v10, %v2498_v26  ;;  %v793_v9 = vpop.f32.mrb[17].mxu0  ;;  %vm585_vm11 = vcmp.ge.f32.partialorder %v2725_v57, 1.0 }
 0x103   :  { %v2738_v61 = vmul.f32 0.5, %v536_v1  ;;  %v794_v60 = vadd.f32 %v793_v9, %v2488_v24  ;;  %v2010_v6 = vpop.f32.mrb[18].mxu0  ;;  %vm583_vm6 = vcmp.ge.f32.partialorder %v2729_v52, 1.0  ;;  %v589_v1 = vsel %vm573_vm1, 0.0, %v2584_v13 }
 0x104   :  { %v858_v0 = vmul.f32 %v802_v58, %v2512_v31  ;;  %v805_v21 = vadd.f32 %v2010_v6, %v2496_v25  ;;  %1994 = vmatpush3.bf16.msk.msra.mxu1 %vm2710_vm5, %v3444_v14  ;;  %v796_v7 = vpop.f32.mrb[19].mxu0  ;;  %vm586_vm12 = vcmp.ge.f32.partialorder %v2735_v55, 1.0 }
 0x105   :  { %v856_v4 = vmul.f32 %v794_v60, %v2486_v11  ;;  %v797_v10 = vadd.f32 %v796_v7, %v2494_v19  ;;  %vm584_vm0 = vcmp.ge.f32.partialorder %v2738_v61, 1.0  ;;  %vm2756_vm14 = vmpackc.low %vm586_vm12, %vm585_vm11 }
 0x106   :  { %v874_v59 = vadd.f32 %v858_v0, %v2520_v35  ;;  %v859_v6 = vmul.f32 %v805_v21, %v2510_v30  ;;  %vm1747_vm5 = vmpackc.low %vm584_vm0, %vm583_vm6  ;;  %v587_v0 = vsel %vm571_vm3, 0.0, %v2588_v18  ;;  %v590_v30 = vsel %vm574_vm2, 0.0, %v2590_v20 }
 0x107   :  { %v872_v58 = vadd.f32 %v856_v4, %v2508_v29  ;;  %v857_v60 = vmul.f32 %v797_v10, %v2492_v17  ;;  %1995 = vmatprep.subr.msk.bf16.mxu1 %vm1747_vm5, %v3444_v14  ;;  %v588_v18 = vsel %vm572_vm4, 0.0, %v2596_v62  ;;  %v3502_v62 = vmov 1.0|1.0  }
 0x108   :  { %v890_v21 = vadd.f32 %v874_v59, %v589_v1  ;;  %v875_v7 = vadd.f32 %v859_v6, %v2518_v34  ;;  %1996 = vmatpush3.bf16.msk.msra.mxu1 %vm1747_vm5, %v3444_v14 }
 0x109   :  { %v888_v13 = vadd.f32 %v872_v58, %v587_v0  ;;  %v873_v4 = vadd.f32 %v857_v60, %v2505_v28  ;;  %1997 = vmatprep.subr.msk.bf16.mxu1 %vm2756_vm14, %v3444_v14  ;;  %v2013_v10 = vpop.f32.mrb[20].mxu0  ;;  %v2794_v60 = vld [vmem:[%s3408_s5 + $0x8] sm:$0xff]  }
 0x10a   :  { %v891_v59 = vadd.f32 %v875_v7, %v590_v30  ;;  %v818_v6 = vadd.f32 %v2013_v10, %v2526_v38  ;;  %v809_v1 = vpop.f32.mrb[21].mxu0  ;;  %v2788_v34 = vmul.f32 0.5, %v890_v21  ;;  %3501 = vst [vmem:[#allocation27_spill] sm:$0xff] %v2794_v60 }
 0x10b   :  { %v889_v17 = vadd.f32 %v873_v4, %v588_v18  ;;  %v810_v20 = vadd.f32 %v809_v1, %v2516_v33  ;;  %v2014_v58 = vpop.f32.mrb[22].mxu0  ;;  %v2796_v0 = vmul.f32 0.5, %v888_v13  ;;  %v593_v4 = vsel %vm577_vm7, 0.0, %v2625_v15 }
 0x10c   :  { %v862_v14 = vmul.f32 %v818_v6, %v2534_v42  ;;  %v821_v30 = vadd.f32 %v2014_v58, %v2528_v39  ;;  %1998 = vmatpush3.bf16.msk.msra.mxu1 %vm2756_vm14, %v3502_v62  ;;  %v812_v21 = vpop.f32.mrb[23].mxu0  ;;  %v2803_v7 = vmul.f32 0.5, %v891_v59  ;;  %vm922_vm1 = vcmp.ge.f32.partialorder %v2788_v34, 1.0 }
 0x10d   :  { %v860_v10 = vmul.f32 %v810_v20, %v2524_v37  ;;  %v813_v13 = vadd.f32 %v812_v21, %v2514_v32  ;;  %v2810_v18 = vmul.f32 0.5, %v889_v17  ;;  %vm920_vm3 = vcmp.ge.f32.partialorder %v2796_v0, 1.0  ;;  %v3505_v21 = vld [vmem:[#allocation8_spill] sm:$0xff] }
 0x10e   :  { %v878_v6 = vadd.f32 %v862_v14, %v2542_v46  ;;  %v863_v1 = vmul.f32 %v821_v30, %v2536_v43  ;;  %vm923_vm2 = vcmp.ge.f32.partialorder %v2803_v7, 1.0  ;;  %v591_v14 = vsel %vm575_vm9, 0.0, %v2631_v22 }
 0x10f   :  { %v876_v9 = vadd.f32 %v860_v10, %v2530_v40  ;;  %v861_v59 = vmul.f32 %v813_v13, %v2522_v36  ;;  %2000 = vmatmul.mubr.bf16.vlgmr.msra.gmra.mrb[0].mxu1 %v2794_v60  ;;  %vm921_vm4 = vcmp.ge.f32.partialorder %v2810_v18, 1.0  ;;  %vm2825_vm7 = vmpackc.low %vm923_vm2, %vm922_vm1  ;;  %v594_v58 = vsel %vm578_vm8, 0.0, %v2637_v63 }
 0x110   :  { %v894_v15 = vadd.f32 %v878_v6, %v593_v4  ;;  %v879_v20 = vadd.f32 %v863_v1, %v2544_v47  ;;  %vm1779_vm14 = vmpackc.low %vm921_vm4, %vm920_vm3  ;;  %2039 = vmatprep.mubr.bf16.mxu1 %v2503_v27  ;;  %v592_v22 = vsel %vm576_vm10, 0.0, %v2642_v5  ;;  %v595_v17 = vsel %vm579_vm15, 0.0, %v2681_v12 }
 0x111   :  { %v892_v30 = vadd.f32 %v876_v9, %v591_v14  ;;  %v877_v10 = vadd.f32 %v861_v59, %v3505_v21  ;;  %v2017_v13 = vpop.f32.mrb[24].mxu0  ;;  %2023 = vmatprep.subr.msk.bf16.mxu1 %vm1779_vm14, %v3502_v62  ;;  %vm3515_vm15 = vcmp.ge.f32.partialorder %v2690_v49, 1.0 }
 0x112   :  { %v895_v4 = vadd.f32 %v879_v20, %v594_v58  ;;  %v834_v6 = vadd.f32 %v2017_v13, %v2550_v50  ;;  %v825_v1 = vpop.f32.mrb[25].mxu0  ;;  %2024 = vmatpush3.bf16.msk.msra.mxu1 %vm1779_vm14, %v3502_v62  ;;  %v2848_v27 = vmul.f32 0.5, %v894_v15  ;;  %v597_v15 = vsel %vm581_vm13, 0.0, %v2675_v8  ;;  %v3506_v13 = vld [vmem:[#allocation10_spill] sm:$0xff]  ;;  %v3508_v50 = vld [vmem:[#allocation16_spill] sm:$0xff] }
 0x113   :  { %v893_v60 = vadd.f32 %v877_v10, %v592_v22  ;;  %v826_v63 = vadd.f32 %v825_v1, %v2538_v44  ;;  %v2018_v9 = vpop.f32.mrb[26].mxu0  ;;  %2025 = vmatprep.subr.msk.bf16.mxu1 %vm2825_vm7, %v3502_v62  ;;  %v2854_v59 = vmul.f32 0.5, %v892_v30  ;;  %v3507_v44 = vld [vmem:[#allocation19_spill] sm:$0xff]  ;;  %vm3514_vm14 = vcmp.ge.f32.partialorder %v2687_v16, 1.0 }
 0x114   :  { %v866_v5 = vmul.f32 %v834_v6, %v2558_v54  ;;  %v837_v14 = vadd.f32 %v2018_v9, %v2552_v51  ;;  %v828_v20 = vpop.f32.mrb[27].mxu0  ;;  %v2858_v58 = vmul.f32 0.5, %v895_v4  ;;  %vm926_vm8 = vcmp.ge.f32.partialorder %v2848_v27, 1.0  ;;  %v3509_v4 = vld [vmem:[#allocation14_spill] sm:$0xff]  ;;  %v3510_v6 = vld [vmem:[#allocation12_spill] sm:$0xff] }
 0x115   :  { %v864_v10 = vmul.f32 %v826_v63, %v2546_v48  ;;  %v829_v22 = vadd.f32 %v828_v20, %v3506_v13  ;;  %v2865_v1 = vmul.f32 0.5, %v893_v60  ;;  %vm924_vm10 = vcmp.ge.f32.partialorder %v2854_v59, 1.0 }
 0x116   :  { %v882_v30 = vadd.f32 %v866_v5, %v3507_v44  ;;  %v867_v21 = vmul.f32 %v837_v14, %v3508_v50  ;;  %2026 = vmatpush3.bf16.msk.msra.mxu1 %vm2825_vm7, %v3502_v62  ;;  %vm927_vm9 = vcmp.ge.f32.partialorder %v2858_v58, 1.0  ;;  %v3513_v5 = vld [vmem:[#allocation20_spill] sm:$0xff]  ;;  %v598_v20 = vsel %vm3514_vm14, 0.0, %v2687_v16 }
 0x117   :  { %v880_v8 = vadd.f32 %v864_v10, %v3509_v4  ;;  %v865_v63 = vmul.f32 %v829_v22, %v3510_v6  ;;  %vm3459_vm13 = vcmp.ge.f32.partialorder %v2865_v1, 1.0  ;;  %vm2882_vm5 = vmpackc.low %vm927_vm9, %vm926_vm8  ;;  %v596_v12 = vsel %vm3515_vm15, 0.0, %v2690_v49 }
 0x118   :  { %v898_v9 = vadd.f32 %v882_v30, %v597_v15  ;;  %v883_v14 = vadd.f32 %v867_v21, %v3513_v5  ;;  %vm1783_vm7 = vmpackc.low %vm3459_vm13, %vm924_vm10  ;;  %v599_v60 = vsel %vm583_vm6, 0.0, %v2729_v52  ;;  %v600_v52 = vsel %vm584_vm0, 0.0, %v2738_v61 }
 0x119   :  { %v896_v10 = vadd.f32 %v880_v8, %v595_v17  ;;  %v881_v22 = vadd.f32 %v865_v63, %v2556_v53  ;;  %v2021_v6 = vpop.f32.mrb[28].mxu0  ;;  %2027 = vmatprep.subr.msk.bf16.mxu1 %vm1783_vm7, %v3502_v62 }
 0x11a   :  { %v899_v21 = vadd.f32 %v883_v14, %v598_v20  ;;  %v850_v15 = vadd.f32 %v2021_v6, %v2593_v23  ;;  %v841_v30 = vpop.f32.mrb[29].mxu0  ;;  %2028 = vmatpush3.bf16.msk.msra.mxu1 %vm1783_vm7, %v3502_v62  ;;  %v2904_v5 = vmul.f32 0.5, %v898_v9  ;;  %v601_v9 = vsel %vm585_vm11, 0.0, %v2725_v57  ;;  %v3516_v20 = vld [vmem:[#allocation21_spill] sm:$0xff] }
 0x11b   :  { %v897_v4 = vadd.f32 %v881_v22, %v596_v12  ;;  %v842_v16 = vadd.f32 %v841_v30, %v2562_v56  ;;  %v2022_v8 = vpop.f32.mrb[30].mxu0  ;;  %2029 = vmatprep.subr.msk.bf16.mxu1 %vm2882_vm5, %v3502_v62  ;;  %v2910_v63 = vmul.f32 0.5, %v896_v10  ;;  %v3517_v12 = vld [vmem:[#allocation18_spill] sm:$0xff]  ;;  %v3518_v23 = vld [vmem:[#allocation25_spill] sm:$0xff] }
 0x11c   :  { %v870_v49 = vmul.f32 %v850_v15, %v2670_v41  ;;  %v853_v17 = vadd.f32 %v2022_v8, %v2602_v2  ;;  %v844_v6 = vpop.f32.mrb[31].mxu0  ;;  %v2914_v14 = vmul.f32 0.5, %v899_v21  ;;  %vm930_vm7 = vcmp.ge.f32.partialorder %v2904_v5, 1.0  ;;  %v3519_v21 = vld [vmem:[#allocation24_spill] sm:$0xff]  ;;  %v3520_v15 = vld [vmem:[#allocation22_spill] sm:$0xff] }
 0x11d   :  { %v868_v22 = vmul.f32 %v842_v16, %v3516_v20  ;;  %v845_v30 = vadd.f32 %v844_v6, %v3517_v12  ;;  %v2921_v56 = vmul.f32 0.5, %v897_v4  ;;  %vm928_vm11 = vcmp.ge.f32.partialorder %v2910_v63, 1.0 }
 0x11e   :  { %v886_v10 = vadd.f32 %v870_v49, %v2700_v45  ;;  %v871_v53 = vmul.f32 %v853_v17, %v3518_v23  ;;  %2030 = vmatpush3.bf16.msk.msra.mxu1 %vm2882_vm5, %v3502_v62  ;;  %vm931_vm14 = vcmp.ge.f32.partialorder %v2914_v14, 1.0  ;;  %v3523_v49 = vld [vmem:[#allocation26_spill] sm:$0xff]  ;;  %v602_v6 = vsel %vm586_vm12, 0.0, %v2735_v55 }
 0x11f   :  { %v884_v57 = vadd.f32 %v868_v22, %v3519_v21  ;;  %v869_v16 = vmul.f32 %v845_v30, %v3520_v15  ;;  %vm929_vm15 = vcmp.ge.f32.partialorder %v2921_v56, 1.0  ;;  %vm2938_vm13 = vmpackc.low %vm931_vm14, %vm930_vm7  ;;  %v936_v4 = vsel %vm920_vm3, 0.0, %v2796_v0 }
 0x120   :  { %v902_v8 = vadd.f32 %v886_v10, %v601_v9  ;;  %v887_v17 = vadd.f32 %v871_v53, %v3523_v49  ;;  %vm1787_vm5 = vmpackc.low %vm929_vm15, %vm928_vm11  ;;  %v937_v0 = vsel %vm921_vm4, 0.0, %v2810_v18 }
 0x121   :  { %v900_v22 = vadd.f32 %v884_v57, %v599_v60  ;;  %v885_v30 = vadd.f32 %v869_v16, %v2640_v3  ;;  %2031 = vmatprep.subr.msk.bf16.mxu1 %vm1787_vm5, %v3502_v62  ;;  %v2049_v15 = vpop.f32.mrb[32].mxu0 }
 0x122   :  { %v903_v53 = vadd.f32 %v887_v17, %v602_v6  ;;  %v1119_v9 = vadd.f32 %v2049_v15, %v2498_v26  ;;  %2032 = vmatpush3.bf16.msk.msra.mxu1 %vm1787_vm5, %v3502_v62  ;;  %v1110_v10 = vpop.f32.mrb[33].mxu0  ;;  %v2960_v49 = vmul.f32 0.5, %v902_v8  ;;  %v938_v8 = vsel %vm922_vm1, 0.0, %v2788_v34 }
 0x123   :  { %v901_v21 = vadd.f32 %v885_v30, %v600_v52  ;;  %v1111_v55 = vadd.f32 %v1110_v10, %v2488_v24  ;;  %2033 = vmatprep.subr.msk.bf16.mxu1 %vm2938_vm13, %v3502_v62  ;;  %v2050_v57 = vpop.f32.mrb[34].mxu0  ;;  %v2966_v16 = vmul.f32 0.5, %v900_v22  ;;  %v3524_v10 = vld [vmem:[#allocation5_spill] sm:$0xff] }
 0x124   :  { %v1175_v61 = vmul.f32 %v1119_v9, %v2512_v31  ;;  %v1122_v60 = vadd.f32 %v2050_v57, %v2496_v25  ;;  %v1113_v15 = vpop.f32.mrb[35].mxu0  ;;  %v2970_v17 = vmul.f32 0.5, %v903_v53  ;;  %vm934_vm0 = vcmp.ge.f32.partialorder %v2960_v49, 1.0  ;;  %v3525_v53 = vld [vmem:[#allocation3_spill] sm:$0xff]  ;;  %v3528_v57 = vld [vmem:[#allocation6_spill] sm:$0xff] }
 0x125   :  { %v1173_v6 = vmul.f32 %v1111_v55, %v2486_v11  ;;  %v1114_v30 = vadd.f32 %v1113_v15, %v2494_v19  ;;  %v2977_v52 = vmul.f32 0.5, %v901_v21  ;;  %vm932_vm6 = vcmp.ge.f32.partialorder %v2966_v16, 1.0 }
 0x126   :  { %v1191_v22 = vadd.f32 %v1175_v61, %v2520_v35  ;;  %v1176_v24 = vmul.f32 %v1122_v60, %v3524_v10  ;;  %2034 = vmatpush3.bf16.msk.msra.mxu1 %vm2938_vm13, %v3502_v62  ;;  %vm935_vm12 = vcmp.ge.f32.partialorder %v2970_v17, 1.0  ;;  %v939_v60 = vsel %vm923_vm2, 0.0, %v2803_v7 }
 0x127   :  { %v1189_v34 = vadd.f32 %v1173_v6, %v2508_v29  ;;  %v1174_v9 = vmul.f32 %v1114_v30, %v3525_v53  ;;  %vm933_vm1 = vcmp.ge.f32.partialorder %v2977_v52, 1.0  ;;  %vm2994_vm5 = vmpackc.low %vm935_vm12, %vm934_vm0  ;;  %v940_v21 = vsel %vm924_vm10, 0.0, %v2854_v59 }
 0x128   :  { %v1207_v55 = vadd.f32 %v1191_v22, %v938_v8  ;;  %v1192_v61 = vadd.f32 %v1176_v24, %v3528_v57  ;;  %vm1791_vm13 = vmpackc.low %vm933_vm1, %vm932_vm6  ;;  %vm3533_vm10 = vcmp.ge.f32.partialorder %v2865_v1, 1.0 }
 0x129   :  { %v1205_v15 = vadd.f32 %v1189_v34, %v936_v4  ;;  %v1190_v6 = vadd.f32 %v1174_v9, %v2505_v28  ;;  %2035 = vmatprep.subr.msk.bf16.mxu1 %vm1791_vm13, %v3502_v62  ;;  %v2053_v30 = vpop.f32.mrb[36].mxu0  ;;  %v941_v59 = vsel %vm3533_vm10, 0.0, %v2865_v1 }
 0x12a   :  { %v1208_v24 = vadd.f32 %v1192_v61, %v939_v60  ;;  %v1135_v8 = vadd.f32 %v2053_v30, %v2526_v38  ;;  %2036 = vmatpush3.bf16.msk.msra.mxu1 %vm1791_vm13, %v3502_v62  ;;  %v1126_v22 = vpop.f32.mrb[37].mxu0  ;;  %v3016_v57 = vmul.f32 0.5, %v1207_v55  ;;  %v942_v55 = vsel %vm926_vm8, 0.0, %v2848_v27 }
 0x12b   :  { %v1206_v53 = vadd.f32 %v1190_v6, %v937_v0  ;;  %v1127_v7 = vadd.f32 %v1126_v22, %v2516_v33  ;;  %2037 = vmatprep.subr.msk.bf16.mxu1 %vm2994_vm5, %v3502_v62  ;;  %v2054_v34 = vpop.f32.mrb[38].mxu0  ;;  %v3022_v9 = vmul.f32 0.5, %v1205_v15 }
 0x12c   :  { %v1179_v18 = vmul.f32 %v1135_v8, %v2534_v42  ;;  %v1138_v4 = vadd.f32 %v2054_v34, %v2528_v39  ;;  %v1129_v61 = vpop.f32.mrb[39].mxu0  ;;  %v3026_v60 = vmul.f32 0.5, %v1208_v24  ;;  %vm1239_vm2 = vcmp.ge.f32.partialorder %v3016_v57, 1.0 }
 0x12d   :  { %v1177_v6 = vmul.f32 %v1127_v7, %v2524_v37  ;;  %v1130_v30 = vadd.f32 %v1129_v61, %v2514_v32  ;;  %v3033_v0 = vmul.f32 0.5, %v1206_v53  ;;  %vm1237_vm4 = vcmp.ge.f32.partialorder %v3022_v9, 1.0 }
 0x12e   :  { %v1195_v15 = vadd.f32 %v1179_v18, %v2542_v46  ;;  %v1180_v22 = vmul.f32 %v1138_v4, %v2536_v43  ;;  %2038 = vmatpush3.bf16.msk.msra.mxu1 %vm2994_vm5, %v3502_v62  ;;  %vm1240_vm3 = vcmp.ge.f32.partialorder %v3026_v60, 1.0  ;;  %v943_v34 = vsel %vm927_vm9, 0.0, %v2858_v58  ;;  %v3531_v4 = vld [vmem:[#allocation8_spill] sm:$0xff] }
 0x12f   :  { %v1193_v27 = vadd.f32 %v1177_v6, %v2530_v40  ;;  %v1178_v24 = vmul.f32 %v1130_v30, %v2522_v36  ;;  %vm3463_vm8 = vcmp.ge.f32.partialorder %v3033_v0, 1.0  ;;  %vm3050_vm13 = vmpackc.low %vm1240_vm3, %vm1239_vm2  ;;  %v3532_v6 = vld [vmem:[#allocation27_spill] sm:$0xff]  ;;  %v3535_v58 = vld [vmem:[#allocation4_spill] sm:$0xff]  ;;  %v944_v53 = vsel %vm928_vm11, 0.0, %v2910_v63 }
 0x130   :  { %v1211_v8 = vadd.f32 %v1195_v15, %v942_v55  ;;  %v1196_v7 = vadd.f32 %v1180_v22, %v2544_v47  ;;  %vm1823_vm5 = vmpackc.low %vm3463_vm8, %vm1237_vm4  ;;  %v3534_v15 = vld [vmem:[#allocation13_spill] sm:$0xff]  ;;  %v945_v63 = vsel %vm929_vm15, 0.0, %v2921_v56 }
 0x131   :  { %v1209_v18 = vadd.f32 %v1193_v27, %v940_v21  ;;  %v1194_v61 = vadd.f32 %v1178_v24, %v3531_v4  ;;  %2040 = vmatmul.mubr.bf16.vlgmr.msra.gmra.mrb[4].mxu1 %v3532_v6  ;;  %v2057_v30 = vpop.f32.mrb[40].mxu0  ;;  %2063 = vmatprep.subr.msk.bf16.mxu1 %vm1823_vm5, %v3502_v62  ;;  %v3536_v24 = vld [vmem:[#allocation9_spill] sm:$0xff] }
 0x132   :  { %v1212_v55 = vadd.f32 %v1196_v7, %v943_v34  ;;  %v1151_v22 = vadd.f32 %v2057_v30, %v3534_v15  ;;  %v1142_v47 = vpop.f32.mrb[41].mxu0  ;;  %2064 = vmatpush3.bf16.msk.msra.mxu1 %vm1823_vm5, %v3502_v62  ;;  %v3073_v36 = vmul.f32 0.5, %v1211_v8  ;;  %2079 = vmatprep.mubr.bf16.mxu1 %v3535_v58  ;;  %v946_v8 = vsel %vm930_vm7, 0.0, %v2904_v5 }
 0x133   :  { %v1210_v27 = vadd.f32 %v1194_v61, %v941_v59  ;;  %v1143_v21 = vadd.f32 %v1142_v47, %v3536_v24  ;;  %v2058_v6 = vpop.f32.mrb[42].mxu0  ;;  %2065 = vmatprep.subr.msk.bf16.mxu1 %vm3050_vm13, %v3502_v62  ;;  %v3080_v4 = vmul.f32 0.5, %v1209_v18 }
 0x134   :  { %v1183_v1 = vmul.f32 %v1151_v22, %v2558_v54  ;;  %v1154_v7 = vadd.f32 %v2058_v6, %v2552_v51  ;;  %v1145_v34 = vpop.f32.mrb[43].mxu0  ;;  %v3084_v30 = vmul.f32 0.5, %v1212_v55  ;;  %vm1243_vm9 = vcmp.ge.f32.partialorder %v3073_v36, 1.0  ;;  %v3537_v6 = vld [vmem:[#allocation14_spill] sm:$0xff]  ;;  %v3538_v55 = vld [vmem:[#allocation12_spill] sm:$0xff] }
 0x135   :  { %v1181_v47 = vmul.f32 %v1143_v21, %v2546_v48  ;;  %v1146_v61 = vadd.f32 %v1145_v34, %v3506_v13  ;;  %v3091_v59 = vmul.f32 0.5, %v1210_v27  ;;  %vm1241_vm7 = vcmp.ge.f32.partialorder %v3080_v4, 1.0 }
 0x136   :  { %v1199_v18 = vadd.f32 %v1183_v1, %v3507_v44  ;;  %v1184_v58 = vmul.f32 %v1154_v7, %v3508_v50  ;;  %2066 = vmatpush3.bf16.msk.msra.mxu1 %vm3050_vm13, %v3502_v62  ;;  %vm1244_vm5 = vcmp.ge.f32.partialorder %v3084_v30, 1.0  ;;  %v3541_v1 = vld [vmem:[#allocation20_spill] sm:$0xff]  ;;  %v947_v34 = vsel %vm931_vm14, 0.0, %v2914_v14  ;;  %v3544_v14 = vld [vmem:[#allocation17_spill] sm:$0xff] }
 0x137   :  { %v1197_v5 = vadd.f32 %v1181_v47, %v3537_v6  ;;  %v1182_v22 = vmul.f32 %v1146_v61, %v3538_v55  ;;  %vm1242_vm10 = vcmp.ge.f32.partialorder %v3091_v59, 1.0  ;;  %vm3108_vm8 = vmpackc.low %vm1244_vm5, %vm1243_vm9  ;;  %v3542_v61 = vld [vmem:[#allocation15_spill] sm:$0xff]  ;;  %v948_v27 = vsel %vm932_vm6, 0.0, %v2966_v16 }
 0x138   :  { %v1215_v21 = vadd.f32 %v1199_v18, %v946_v8  ;;  %v1200_v7 = vadd.f32 %v1184_v58, %v3541_v1  ;;  %vm1827_vm13 = vmpackc.low %vm1242_vm10, %vm1241_vm7  ;;  %v3543_v18 = vld [vmem:[#allocation23_spill] sm:$0xff]  ;;  %v949_v16 = vsel %vm933_vm1, 0.0, %v2977_v52 }
 0x139   :  { %v1213_v47 = vadd.f32 %v1197_v5, %v944_v53  ;;  %v1198_v55 = vadd.f32 %v1182_v22, %v3542_v61  ;;  %v2061_v6 = vpop.f32.mrb[44].mxu0  ;;  %2067 = vmatprep.subr.msk.bf16.mxu1 %vm1827_vm13, %v3502_v62 }
 0x13a   :  { %v1216_v8 = vadd.f32 %v1200_v7, %v947_v34  ;;  %v1167_v58 = vadd.f32 %v2061_v6, %v3543_v18  ;;  %v1158_v1 = vpop.f32.mrb[45].mxu0  ;;  %2068 = vmatpush3.bf16.msk.msra.mxu1 %vm1827_vm13, %v3502_v62  ;;  %v3130_v50 = vmul.f32 0.5, %v1215_v21 }
 0x13b   :  { %v1214_v44 = vadd.f32 %v1198_v55, %v945_v63  ;;  %v1159_v5 = vadd.f32 %v1158_v1, %v3544_v14  ;;  %v2062_v53 = vpop.f32.mrb[46].mxu0  ;;  %2069 = vmatprep.subr.msk.bf16.mxu1 %vm3108_vm8, %v3502_v62  ;;  %v3136_v22 = vmul.f32 0.5, %v1213_v47  ;;  %v950_v55 = vsel %vm934_vm0, 0.0, %v2960_v49 }
 0x13c   :  { %v1187_v56 = vmul.f32 %v1167_v58, %v2670_v41  ;;  %v1170_v7 = vadd.f32 %v2062_v53, %v2602_v2  ;;  %v1161_v6 = vpop.f32.mrb[47].mxu0  ;;  %v3140_v34 = vmul.f32 0.5, %v1216_v8  ;;  %vm1247_vm14 = vcmp.ge.f32.partialorder %v3130_v50, 1.0  ;;  %v3545_v8 = vld [vmem:[#allocation24_spill] sm:$0xff]  ;;  %v3546_v58 = vld [vmem:[#allocation22_spill] sm:$0xff] }
 0x13d   :  { %v1185_v21 = vmul.f32 %v1159_v5, %v3516_v20  ;;  %v1162_v1 = vadd.f32 %v1161_v6, %v3517_v12  ;;  %v3147_v63 = vmul.f32 0.5, %v1214_v44  ;;  %vm1245_vm15 = vcmp.ge.f32.partialorder %v3136_v22, 1.0 }
 0x13e   :  { %v1203_v47 = vadd.f32 %v1187_v56, %v2700_v45  ;;  %v1188_v14 = vmul.f32 %v1170_v7, %v3518_v23  ;;  %2070 = vmatpush3.bf16.msk.msra.mxu1 %vm3108_vm8, %v3502_v62  ;;  %vm1248_vm11 = vcmp.ge.f32.partialorder %v3140_v34, 1.0  ;;  %v3549_v56 = vld [vmem:[#allocation26_spill] sm:$0xff]  ;;  %v951_v6 = vsel %vm935_vm12, 0.0, %v2970_v17 }
 0x13f   :  { %v1201_v49 = vadd.f32 %v1185_v21, %v3545_v8  ;;  %v1186_v5 = vmul.f32 %v1162_v1, %v3546_v58  ;;  %vm1246_vm0 = vcmp.ge.f32.partialorder %v3147_v63, 1.0  ;;  %vm3164_vm13 = vmpackc.low %vm1248_vm11, %vm1247_vm14  ;;  %v3550_v17 = vld [vmem:[#allocation2_spill] sm:$0xff] }
 0x140   :  { %v1219_v53 = vadd.f32 %v1203_v47, %v950_v55  ;;  %v1204_v7 = vadd.f32 %v1188_v14, %v3549_v56  ;;  %vm1831_vm8 = vmpackc.low %vm1246_vm0, %vm1245_vm15 }
 0x141   :  { %v1217_v21 = vadd.f32 %v1201_v49, %v948_v27  ;;  %v1202_v1 = vadd.f32 %v1186_v5, %v2640_v3  ;;  %2071 = vmatprep.subr.msk.bf16.mxu1 %vm1831_vm8, %v3502_v62  ;;  %v2089_v58 = vpop.f32.mrb[48].mxu0 }
 0x142   :  { %v1220_v14 = vadd.f32 %v1204_v7, %v951_v6  ;;  %v1436_v55 = vadd.f32 %v2089_v58, %v2498_v26  ;;  %2072 = vmatpush3.bf16.msk.msra.mxu1 %vm1831_vm8, %v3502_v62  ;;  %v1427_v47 = vpop.f32.mrb[49].mxu0  ;;  %v3186_v56 = vmul.f32 0.5, %v1219_v53  ;;  %v1255_v53 = vsel %vm1239_vm2, 0.0, %v3016_v57 }
 0x143   :  { %v1218_v8 = vadd.f32 %v1202_v1, %v949_v16  ;;  %v1428_v49 = vadd.f32 %v1427_v47, %v3550_v17  ;;  %2073 = vmatprep.subr.msk.bf16.mxu1 %vm3164_vm13, %v3502_v62  ;;  %v2090_v5 = vpop.f32.mrb[50].mxu0  ;;  %v3192_v27 = vmul.f32 0.5, %v1217_v21 }
 0x144   :  { %v1492_v52 = vmul.f32 %v1436_v55, %v2512_v31  ;;  %v1439_v7 = vadd.f32 %v2090_v5, %v2496_v25  ;;  %v1430_v26 = vpop.f32.mrb[51].mxu0  ;;  %v3196_v58 = vmul.f32 0.5, %v1220_v14  ;;  %vm1251_vm12 = vcmp.ge.f32.partialorder %v3186_v56, 1.0  ;;  %v3551_v31 = vld [vmem:[#allocation3_spill] sm:$0xff] }
 0x145   :  { %v1490_v6 = vmul.f32 %v1428_v49, %v2486_v11  ;;  %v1431_v1 = vadd.f32 %v1430_v26, %v2494_v19  ;;  %v3203_v16 = vmul.f32 0.5, %v1218_v8  ;;  %vm1249_vm1 = vcmp.ge.f32.partialorder %v3192_v27, 1.0  ;;  %v3560_v19 = vld [vmem:[#allocation8_spill] sm:$0xff] }
 0x146   :  { %v1508_v21 = vadd.f32 %v1492_v52, %v2520_v35  ;;  %v1493_v47 = vmul.f32 %v1439_v7, %v3524_v10  ;;  %2074 = vmatpush3.bf16.msk.msra.mxu1 %vm3164_vm13, %v3502_v62  ;;  %vm3467_vm6 = vcmp.ge.f32.partialorder %v3196_v58, 1.0  ;;  %v1253_v35 = vsel %vm1237_vm4, 0.0, %v3022_v9  ;;  %v3554_v10 = vld [vmem:[#allocation6_spill] sm:$0xff] }
 0x147   :  { %v1506_v25 = vadd.f32 %v1490_v6, %v2508_v29  ;;  %v1491_v11 = vmul.f32 %v1431_v1, %v3551_v31  ;;  %vm3466_vm2 = vcmp.ge.f32.partialorder %v3203_v16, 1.0  ;;  %vm3220_vm8 = vmpackc.low %vm3467_vm6, %vm1251_vm12  ;;  %v1256_v8 = vsel %vm1240_vm3, 0.0, %v3026_v60 }
 0x148   :  { %v1509_v29 = vadd.f32 %v1493_v47, %v3554_v10  ;;  %vm1835_vm13 = vmpackc.low %vm3466_vm2, %vm1249_vm1  ;;  %v1524_v57 = vadd.f32 %v1508_v21, %v1255_v53  ;;  %vm3555_vm4 = vcmp.ge.f32.partialorder %v3033_v0, 1.0  ;;  %v1259_v1 = vsel %vm1243_vm9, 0.0, %v3073_v36  ;;  %v3561_v10 = vld [vmem:[#allocation27_spill] sm:$0xff] }
 0x149   :  { %v1507_v44 = vadd.f32 %v1491_v11, %v2505_v28  ;;  %2075 = vmatprep.subr.msk.bf16.mxu1 %vm1835_vm13, %v3502_v62  ;;  %v2093_v14 = vpop.f32.mrb[52].mxu0  ;;  %v1522_v55 = vadd.f32 %v1506_v25, %v1253_v35  ;;  %v1254_v9 = vsel %vm3555_vm4, 0.0, %v3033_v0 }
 0x14a   :  { %v1452_v17 = vadd.f32 %v2093_v14, %v2526_v38  ;;  %2076 = vmatpush3.bf16.msk.msra.mxu1 %vm1835_vm13, %v3502_v62  ;;  %v1443_v49 = vpop.f32.mrb[53].mxu0  ;;  %v1525_v5 = vadd.f32 %v1509_v29, %v1256_v8  ;;  %v1540_v52 = vmul.f32 0.5, %v1524_v57 }
 0x14b   :  { %v1444_v7 = vadd.f32 %v1443_v49, %v2516_v33  ;;  %2077 = vmatprep.subr.msk.bf16.mxu1 %vm3220_vm8, %v3502_v62  ;;  %v2094_v28 = vpop.f32.mrb[54].mxu0  ;;  %v1523_v60 = vadd.f32 %v1507_v44, %v1254_v9  ;;  %v1538_v26 = vmul.f32 0.5, %v1522_v55 }
 0x14c   :  { %v1496_v53 = vmul.f32 %v1452_v17, %v2534_v42  ;;  %v1455_v0 = vadd.f32 %v2094_v28, %v2528_v39  ;;  %v1446_v6 = vpop.f32.mrb[55].mxu0  ;;  %v1541_v38 = vmul.f32 0.5, %v1525_v5  ;;  %vm1556_vm3 = vcmp.ge.f32.partialorder %v1540_v52, 1.0  ;;  %v3556_v42 = vld [vmem:[#allocation7_spill] sm:$0xff] }
 0x14d   :  { %v1494_v21 = vmul.f32 %v1444_v7, %v2524_v37  ;;  %v1447_v33 = vadd.f32 %v1446_v6, %v2514_v32  ;;  %v1539_v47 = vmul.f32 0.5, %v1523_v60  ;;  %vm1554_vm9 = vcmp.ge.f32.partialorder %v1538_v26, 1.0  ;;  %v3559_v37 = vld [vmem:[#allocation11_spill] sm:$0xff]  ;;  %v3563_v6 = vld [vmem:[#allocation16_spill] sm:$0xff] }
 0x14e   :  { %v1512_v25 = vadd.f32 %v1496_v53, %v2542_v46  ;;  %v1497_v31 = vmul.f32 %v1455_v0, %v2536_v43  ;;  %2078 = vmatpush3.bf16.msk.msra.mxu1 %vm3220_vm8, %v3502_v62  ;;  %vm1557_vm13 = vcmp.ge.f32.partialorder %v1541_v38, 1.0  ;;  %v1257_v32 = vsel %vm1241_vm7, 0.0, %v3080_v4  ;;  %v3562_v53 = vld [vmem:[#allocation19_spill] sm:$0xff] }
 0x14f   :  { %v1510_v39 = vadd.f32 %v1494_v21, %v2530_v40  ;;  %v1495_v11 = vmul.f32 %v1447_v33, %v3556_v42  ;;  %vm1555_vm4 = vcmp.ge.f32.partialorder %v1539_v47, 1.0  ;;  %vm3260_vm2 = vmpackc.low %vm1557_vm13, %vm1556_vm3  ;;  %v1260_v40 = vsel %vm1244_vm5, 0.0, %v3084_v30  ;;  %v2137_v30 = vld [vmem:[%s3408_s5] sm:$0xff]  }
 0x150   :  { %v1513_v43 = vadd.f32 %v1497_v31, %v3559_v37  ;;  %vm1867_vm6 = vmpackc.low %vm1555_vm4, %vm1554_vm9  ;;  %v1528_v46 = vadd.f32 %v1512_v25, %v1259_v1  ;;  %v1258_v4 = vsel %vm1242_vm10, 0.0, %v3091_v59  ;;  %v1263_v28 = vsel %vm1247_vm14, 0.0, %v3130_v50  ;;  %v3565_v1 = vld [vmem:[#allocation12_spill] sm:$0xff] }
 0x151   :  { %v1511_v35 = vadd.f32 %v1495_v11, %v3560_v19  ;;  %2080 = vmatmul.mubr.bf16.vlgmr.msra.gmra.mrb[8].mxu1 %v3561_v10  ;;  %v2097_v29 = vpop.f32.mrb[56].mxu0  ;;  %2103 = vmatprep.subr.msk.bf16.mxu1 %vm1867_vm6, %v3502_v62  ;;  %v1526_v57 = vadd.f32 %v1510_v39, %v1257_v32  ;;  %v1261_v50 = vsel %vm1245_vm15, 0.0, %v3136_v22  ;;  %v1264_v25 = vsel %vm1248_vm11, 0.0, %v3140_v34 }
 0x152   :  { %v1468_v8 = vadd.f32 %v2097_v29, %v3534_v15  ;;  %v1459_v44 = vpop.f32.mrb[57].mxu0  ;;  %2104 = vmatpush3.bf16.msk.msra.mxu1 %vm1867_vm6, %v3502_v62  ;;  %v1529_v14 = vadd.f32 %v1513_v43, %v1260_v40  ;;  %v1544_v55 = vmul.f32 0.5, %v1528_v46  ;;  %2119 = vmatprep.mubr.bf16.mxu1 %v2137_v30  ;;  %v1262_v11 = vsel %vm1246_vm0, 0.0, %v3147_v63  ;;  %v3569_v43 = vld [vmem:[#allocation17_spill] sm:$0xff] }
 0x153   :  { %v1460_v9 = vadd.f32 %v1459_v44, %v3536_v24  ;;  %v2098_v17 = vpop.f32.mrb[58].mxu0  ;;  %2105 = vmatprep.subr.msk.bf16.mxu1 %vm3260_vm2, %v3502_v62  ;;  %v1527_v59 = vadd.f32 %v1511_v35, %v1258_v4  ;;  %v1542_v49 = vmul.f32 0.5, %v1526_v57  ;;  %v1267_v29 = vsel %vm1251_vm12, 0.0, %v3186_v56 }
 0x154   :  { %v1500_v15 = vmul.f32 %v1468_v8, %v2558_v54  ;;  %v1471_v5 = vadd.f32 %v2098_v17, %v2552_v51  ;;  %v1462_v52 = vpop.f32.mrb[59].mxu0  ;;  %v1545_v7 = vmul.f32 0.5, %v1529_v14  ;;  %vm1560_vm5 = vcmp.ge.f32.partialorder %v1544_v55, 1.0  ;;  %v3564_v51 = vld [vmem:[#allocation14_spill] sm:$0xff] }
 0x155   :  { %v1498_v60 = vmul.f32 %v1460_v9, %v2546_v48  ;;  %v1463_v24 = vadd.f32 %v1462_v52, %v3506_v13  ;;  %v1543_v26 = vmul.f32 0.5, %v1527_v59  ;;  %vm1558_vm10 = vcmp.ge.f32.partialorder %v1542_v49, 1.0  ;;  %v3568_v13 = vld [vmem:[#allocation20_spill] sm:$0xff]  ;;  %v3571_v55 = vld [vmem:[#allocation22_spill] sm:$0xff] }
 0x156   :  { %v1516_v0 = vadd.f32 %v1500_v15, %v3562_v53  ;;  %v1501_v38 = vmul.f32 %v1471_v5, %v3563_v6  ;;  %2106 = vmatpush3.bf16.msk.msra.mxu1 %vm3260_vm2, %v3502_v62  ;;  %vm1561_vm7 = vcmp.ge.f32.partialorder %v1545_v7, 1.0  ;;  %vm3575_vm13 = vcmp.ge.f32.partialorder %v3196_v58, 1.0 }
 0x157   :  { %v1514_v54 = vadd.f32 %v1498_v60, %v3564_v51  ;;  %v1499_v21 = vmul.f32 %v1463_v24, %v3565_v1  ;;  %vm1559_vm14 = vcmp.ge.f32.partialorder %v1543_v26, 1.0  ;;  %vm3300_vm6 = vmpackc.low %vm1561_vm7, %vm1560_vm5  ;;  %v1268_v9 = vsel %vm3575_vm13, 0.0, %v3196_v58  ;;  %v3369_v26 = vpop.permute.xlu1 %650 }
 0x158   :  { %v1517_v33 = vadd.f32 %v1501_v38, %v3568_v13  ;;  %vm1871_vm8 = vmpackc.low %vm1559_vm14, %vm1558_vm10  ;;  %v1532_v47 = vadd.f32 %v1516_v0, %v1263_v28  ;;  %vm3576_vm9 = vcmp.ge.f32.partialorder %v3203_v16, 1.0 }
 0x159   :  { %v1515_v31 = vadd.f32 %v1499_v21, %v3542_v61  ;;  %v2101_v39 = vpop.f32.mrb[60].mxu0  ;;  %2107 = vmatprep.subr.msk.bf16.mxu1 %vm1871_vm8, %v3502_v62  ;;  %v1530_v42 = vadd.f32 %v1514_v54, %v1261_v50  ;;  %v1266_v49 = vsel %vm3576_vm9, 0.0, %v3203_v16 }
 0x15a   :  { %v1484_v22 = vadd.f32 %v2101_v39, %v3543_v18  ;;  %v1475_v36 = vpop.f32.mrb[61].mxu0  ;;  %2108 = vmatpush3.bf16.msk.msra.mxu1 %vm1871_vm8, %v3502_v62  ;;  %v1533_v32 = vadd.f32 %v1517_v33, %v1264_v25  ;;  %v1548_v37 = vmul.f32 0.5, %v1532_v47  ;;  %vm1692_vm8 = vcmask 15360  }
 0x15b   :  { %v1476_v46 = vadd.f32 %v1475_v36, %v3569_v43  ;;  %v2102_v34 = vpop.f32.mrb[62].mxu0  ;;  %2109 = vmatprep.subr.msk.bf16.mxu1 %vm3300_vm6, %v3502_v62  ;;  %v1531_v61 = vadd.f32 %v1515_v31, %v1262_v11  ;;  %v1546_v40 = vmul.f32 0.5, %v1530_v42 }
 0x15c   :  { %v1504_v19 = vmul.f32 %v1484_v22, %v2670_v41  ;;  %v1487_v63 = vadd.f32 %v2102_v34, %v2602_v2  ;;  %v1478_v35 = vpop.f32.mrb[63].mxu0  ;;  %v1549_v18 = vmul.f32 0.5, %v1533_v32  ;;  %vm1564_vm11 = vcmp.ge.f32.partialorder %v1548_v37, 1.0  ;;  %v3570_v2 = vld [vmem:[#allocation24_spill] sm:$0xff] }
 0x15d   :  { %v1502_v57 = vmul.f32 %v1476_v46, %v3516_v20  ;;  %v1479_v4 = vadd.f32 %v1478_v35, %v3517_v12  ;;  %v1547_v8 = vmul.f32 0.5, %v1531_v61  ;;  %vm1562_vm0 = vcmp.ge.f32.partialorder %v1546_v40, 1.0 }
 0x15e   :  { %v1520_v44 = vadd.f32 %v1504_v19, %v2700_v45  ;;  %v1505_v14 = vmul.f32 %v1487_v63, %v3518_v23  ;;  %2110 = vmatpush3.bf16.msk.msra.mxu1 %vm3300_vm6, %v3502_v62  ;;  %vm1565_vm15 = vcmp.ge.f32.partialorder %v1549_v18, 1.0  ;;  %v1265_v23 = vsel %vm1249_vm1, 0.0, %v3192_v27  ;;  %v3574_v45 = vld [vmem:[#allocation26_spill] sm:$0xff] }
 0x15f   :  { %v1518_v41 = vadd.f32 %v1502_v57, %v3570_v2  ;;  %v1503_v30 = vmul.f32 %v1479_v4, %v3571_v55  ;;  %vm1563_vm12 = vcmp.ge.f32.partialorder %v1547_v8, 1.0  ;;  %vm3336_vm2 = vmpackc.low %vm1565_vm15, %vm1564_vm11  ;;  %vm1687_vm6 = vcmask 7168  }
 0x160   :  { %v1521_v12 = vadd.f32 %v1505_v14, %v3574_v45  ;;  %vm1875_vm3 = vmpackc.low %vm1563_vm12, %vm1562_vm0  ;;  %v1536_v56 = vadd.f32 %v1520_v44, %v1267_v29 }
 0x161   :  { %v1519_v17 = vadd.f32 %v1503_v30, %v2640_v3  ;;  %2111 = vmatprep.subr.msk.bf16.mxu1 %vm1875_vm3, %v3502_v62  ;;  %v1534_v59 = vadd.f32 %v1518_v41, %v1265_v23  ;;  %v3364_v3 = vpop.permute.xlu0 %645 }
 0x162   :  { %2112 = vmatpush3.bf16.msk.msra.mxu1 %vm1875_vm3, %v3502_v62  ;;  %v1537_v27 = vadd.f32 %v1521_v12, %v1268_v9  ;;  %v1552_v15 = vmul.f32 0.5, %v1536_v56 }
 0x163   :  { %2113 = vmatprep.subr.msk.bf16.mxu1 %vm3336_vm2, %v3502_v62  ;;  %v1535_v5 = vadd.f32 %v1519_v17, %v1266_v49  ;;  %v1550_v52 = vmul.f32 0.5, %v1534_v59 }
 0x164   :  { %v1553_v58 = vmul.f32 0.5, %v1537_v27  ;;  %vm1568_vm1 = vcmp.ge.f32.partialorder %v1552_v15, 1.0 }
 0x165   :  { %v1551_v7 = vmul.f32 0.5, %v1535_v5  ;;  %vm1566_vm5 = vcmp.ge.f32.partialorder %v1550_v52, 1.0  ;;  %v3366_v16 = vpop.permute.xlu0 %655 }
 0x166   :  { %2114 = vmatpush3.bf16.msk.msra.mxu1 %vm3336_vm2, %v3502_v62  ;;  %vm1569_vm4 = vcmp.ge.f32.partialorder %v1553_v58, 1.0 }
 0x167   :  { %vm1567_vm7 = vcmp.ge.f32.partialorder %v1551_v7, 1.0  ;;  %vm1881_vm10 = vmpackc.low %vm1569_vm4, %vm1568_vm1 }
 0x168   :  { %vm1879_vm14 = vmpackc.low %vm1567_vm7, %vm1566_vm5 }
 0x169   :  { %2115 = vmatprep.subr.msk.bf16.mxu1 %vm1879_vm14, %v3502_v62 }
 0x16a   :  { %2116 = vmatpush3.bf16.msk.msra.mxu1 %vm1879_vm14, %v3502_v62 }
 0x16b   :  { %2117 = vmatprep.subr.msk.bf16.mxu1 %vm1881_vm10, %v3502_v62 }
 0x16e   :  { %2118 = vmatpush3.bf16.msk.msra.mxu1 %vm1881_vm10, %v3502_v62 }
 0x171   :  { %2120 = vmatmul.mubr.bf16.vlgmr.msra.gmra.mrb[12].mxu1 %v3561_v10  ;;  %v661_v10 = vpop.permute.xlu1 %660 }
 0x1e2   :  { %v2001_v28 = vpop.f32.mrb[0].mxu1 }
 0x1e3   :  { %v718_v60 = vadd.f32 %v2001_v28, %v3366_v16  ;;  %v709_v24 = vpop.f32.mrb[1].mxu1 }
 0x1e4   :  { %v2002_v53 = vpop.f32.mrb[2].mxu1  ;;  %v710_v38 = vadd.f32 %v709_v24, %v3364_v3 }
 0x1e5   :  { %728 = vadd.xlane.f32.xlu0 %v718_v60  ;;  %v712_v0 = vpop.f32.mrb[3].mxu1  ;;  %v734_v6 = vmul.f32 %v718_v60, %v718_v60  ;;  %v721_v51 = vadd.f32 %v2002_v53, %v661_v10 }
 0x1e6   :  { %v713_v62 = vadd.f32 %v712_v0, %v3369_v26  ;;  %v732_v54 = vmul.f32 %v710_v38, %v710_v38 }
 0x1e7   :  { %740 = vadd.xlane.f32.xlu1 %v734_v6  ;;  %v735_v1 = vmul.f32 %v721_v51, %v721_v51 }
 0x1e8   :  { %v733_v21 = vmul.f32 %v713_v62, %v713_v62 }
 0x1e9   :  { %724 = vadd.xlane.f32.xlu0 %v710_v38 }
 0x1eb   :  { %726 = vadd.xlane.f32.xlu1 %v713_v62 }
 0x1ed   :  { %730 = vadd.xlane.f32.xlu0 %v721_v51 }
 0x1ef   :  { %736 = vadd.xlane.f32.xlu1 %v732_v54 }
 0x1f1   :  { %742 = vadd.xlane.f32.xlu0 %v735_v1 }
 0x1f5   :  { %738 = vadd.xlane.f32.xlu0 %v733_v21 }
 0x204   :  { %v2041_v48 = vpop.f32.mrb[4].mxu1 }
 0x205   :  { %v1035_v50 = vadd.f32 %v2041_v48, %v3366_v16  ;;  %v1026_v13 = vpop.f32.mrb[5].mxu1 }
 0x206   :  { %v2042_v33 = vpop.f32.mrb[6].mxu1  ;;  %v1027_v31 = vadd.f32 %v1026_v13, %v3364_v3 }
 0x207   :  { %v1038_v47 = vadd.f32 %v2042_v33, %v661_v10  ;;  %1045 = vadd.xlane.f32.xlu1 %v1035_v50  ;;  %v1029_v25 = vpop.f32.mrb[7].mxu1  ;;  %v1051_v42 = vmul.f32 %v1035_v50, %v1035_v50 }
 0x208   :  { %v1030_v39 = vadd.f32 %v1029_v25, %v3369_v26  ;;  %v1049_v22 = vmul.f32 %v1027_v31, %v1027_v31 }
 0x209   :  { %1047 = vadd.xlane.f32.xlu0 %v1038_v47  ;;  %v1052_v11 = vmul.f32 %v1038_v47, %v1038_v47 }
 0x20a   :  { %v1050_v36 = vmul.f32 %v1030_v39, %v1030_v39 }
 0x20b   :  { %1041 = vadd.xlane.f32.xlu1 %v1027_v31 }
 0x20d   :  { %1043 = vadd.xlane.f32.xlu0 %v1030_v39 }
 0x20f   :  { %1057 = vadd.xlane.f32.xlu1 %v1051_v42 }
 0x211   :  { %1059 = vadd.xlane.f32.xlu0 %v1052_v11 }
 0x213   :  { %1053 = vadd.xlane.f32.xlu1 %v1049_v22 }
 0x215   :  { %1055 = vadd.xlane.f32.xlu0 %v1050_v36 }
 0x224   :  { %v2081_v32 = vpop.f32.mrb[8].mxu1 }
 0x225   :  { %v1352_v37 = vadd.f32 %v2081_v32, %v3366_v16  ;;  %v1343_v43 = vpop.f32.mrb[9].mxu1 }
 0x226   :  { %v2082_v46 = vpop.f32.mrb[10].mxu1  ;;  %v1344_v40 = vadd.f32 %v1343_v43, %v3364_v3 }
 0x227   :  { %v1355_v34 = vadd.f32 %v2082_v46, %v661_v10  ;;  %1362 = vadd.xlane.f32.xlu1 %v1352_v37  ;;  %v1346_v61 = vpop.f32.mrb[11].mxu1  ;;  %v1368_v63 = vmul.f32 %v1352_v37, %v1352_v37 }
 0x228   :  { %v1347_v19 = vadd.f32 %v1346_v61, %v3369_v26  ;;  %v1366_v18 = vmul.f32 %v1344_v40, %v1344_v40 }
 0x229   :  { %1364 = vadd.xlane.f32.xlu0 %v1355_v34  ;;  %v1369_v35 = vmul.f32 %v1355_v34, %v1355_v34 }
 0x22a   :  { %v1367_v29 = vmul.f32 %v1347_v19, %v1347_v19 }
 0x22b   :  { %1358 = vadd.xlane.f32.xlu1 %v1344_v40 }
 0x22d   :  { %1360 = vadd.xlane.f32.xlu0 %v1347_v19 }
 0x22f   :  { %1374 = vadd.xlane.f32.xlu1 %v1368_v63 }
 0x231   :  { %1376 = vadd.xlane.f32.xlu0 %v1369_v35 }
 0x233   :  { %1370 = vadd.xlane.f32.xlu1 %v1366_v18 }
 0x235   :  { %1372 = vadd.xlane.f32.xlu0 %v1367_v29 }
 0x244   :  { %v2121_v57 = vpop.f32.mrb[12].mxu1 }
 0x245   :  { %v1653_v4 = vadd.f32 %v2121_v57, %v3366_v16  ;;  %v1644_v8 = vpop.f32.mrb[13].mxu1 }
 0x246   :  { %v2122_v44 = vpop.f32.mrb[14].mxu1  ;;  %v1645_v41 = vadd.f32 %v1644_v8, %v3364_v3 }
 0x247   :  { %v1656_v14 = vadd.f32 %v2122_v44, %v661_v10  ;;  %1663 = vadd.xlane.f32.xlu1 %v1653_v4  ;;  %v1647_v2 = vpop.f32.mrb[15].mxu1  ;;  %v1669_v23 = vmul.f32 %v1653_v4, %v1653_v4 }
 0x248   :  { %v1648_v55 = vadd.f32 %v1647_v2, %v3369_v26  ;;  %v1667_v30 = vmul.f32 %v1645_v41, %v1645_v41 }
 0x249   :  { %1665 = vadd.xlane.f32.xlu0 %v1656_v14  ;;  %v1670_v45 = vmul.f32 %v1656_v14, %v1656_v14 }
 0x24a   :  { %v1668_v20 = vmul.f32 %v1648_v55, %v1648_v55 }
 0x24b   :  { %1659 = vadd.xlane.f32.xlu1 %v1645_v41 }
 0x24d   :  { %1661 = vadd.xlane.f32.xlu0 %v1648_v55 }
 0x24f   :  { %1671 = vadd.xlane.f32.xlu1 %v1667_v30 }
 0x251   :  { %1673 = vadd.xlane.f32.xlu0 %v1668_v20 }
 0x253   :  { %1675 = vadd.xlane.f32.xlu1 %v1669_v23 }
 0x255   :  { %1677 = vadd.xlane.f32.xlu0 %v1670_v45 }
 0x272   :  { %v729_v12 = vpop.xlane.xlu0 %728 }
 0x274   :  { %v741_v9 = vpop.xlane.xlu1 %740 }
 0x276   :  { %v725_v56 = vpop.xlane.xlu0 %724 }
 0x278   :  { %v727_v59 = vpop.xlane.xlu1 %726 }
 0x27a   :  { %v731_v17 = vpop.xlane.xlu0 %730 }
 0x27c   :  { %v737_v27 = vpop.xlane.xlu1 %736 }
 0x27e   :  { %v743_v49 = vpop.xlane.xlu0 %742 }
 0x282   :  { %v739_v15 = vpop.xlane.xlu0 %738 }
 0x294   :  { %v1046_v5 = vpop.xlane.xlu1 %1045 }
 0x295   :  { %v1063_v31 = vadd.f32 %v1046_v5, %v729_v12 }
 0x296   :  { %v1048_v52 = vpop.xlane.xlu0 %1047 }
 0x297   :  { %v1064_v37 = vadd.f32 %v1048_v52, %v731_v17 }
 0x298   :  { %v1042_v58 = vpop.xlane.xlu1 %1041 }
 0x299   :  { %v1061_v21 = vadd.f32 %v1042_v58, %v725_v56 }
 0x29a   :  { %v1044_v7 = vpop.xlane.xlu0 %1043 }
 0x29b   :  { %v1062_v13 = vadd.f32 %v1044_v7, %v727_v59 }
 0x29c   :  { %v1058_v3 = vpop.xlane.xlu1 %1057 }
 0x29d   :  { %v1067_v39 = vadd.f32 %v1058_v3, %v741_v9 }
 0x29e   :  { %v1060_v16 = vpop.xlane.xlu0 %1059 }
 0x29f   :  { %v1068_v43 = vadd.f32 %v1060_v16, %v743_v49 }
 0x2a0   :  { %v1054_v28 = vpop.xlane.xlu1 %1053 }
 0x2a1   :  { %v1065_v48 = vadd.f32 %v1054_v28, %v737_v27 }
 0x2a2   :  { %v1056_v60 = vpop.xlane.xlu0 %1055 }
 0x2a3   :  { %v1066_v33 = vadd.f32 %v1056_v60, %v739_v15 }
 0x2b4   :  { %v1363_v24 = vpop.xlane.xlu1 %1362 }
 0x2b5   :  { %v1380_v46 = vadd.f32 %v1363_v24, %v1063_v31 }
 0x2b6   :  { %v1365_v26 = vpop.xlane.xlu0 %1364 }
 0x2b7   :  { %v1381_v35 = vadd.f32 %v1365_v26, %v1064_v37 }
 0x2b8   :  { %v1359_v53 = vpop.xlane.xlu1 %1358 }
 0x2b9   :  { %v1378_v47 = vadd.f32 %v1359_v53, %v1061_v21 }
 0x2ba   :  { %v1361_v0 = vpop.xlane.xlu0 %1360 }
 0x2bb   :  { %v1379_v11 = vadd.f32 %v1361_v0, %v1062_v13 }
 0x2bc   :  { %v1375_v6 = vpop.xlane.xlu1 %1374 }
 0x2bd   :  { %v1384_v61 = vadd.f32 %v1375_v6, %v1067_v39 }
 0x2be   :  { %v1377_v38 = vpop.xlane.xlu0 %1376 }
 0x2bf   :  { %v1385_v29 = vadd.f32 %v1377_v38, %v1068_v43 }
 0x2c0   :  { %v1371_v62 = vpop.xlane.xlu1 %1370 }
 0x2c1   :  { %v1382_v25 = vadd.f32 %v1371_v62, %v1065_v48 }
 0x2c2   :  { %v1373_v10 = vpop.xlane.xlu0 %1372 }
 0x2c3   :  { %v1383_v22 = vadd.f32 %v1373_v10, %v1066_v33 }
 0x2d4   :  { %v1664_v51 = vpop.xlane.xlu1 %1663 }
 0x2d5   :  { %v1681_v57 = vadd.f32 %v1664_v51, %v1380_v46 }
 0x2d6   :  { %v1666_v54 = vpop.xlane.xlu0 %1665 }
 0x2d7   :  { %v1682_v14 = vadd.f32 %v1666_v54, %v1381_v35 }
 0x2d8   :  { %v1660_v1 = vpop.xlane.xlu1 %1659 }
 0x2d9   :  { %v1679_v36 = vadd.f32 %v1660_v1, %v1378_v47 }
 0x2da   :  { %v1662_v50 = vpop.xlane.xlu0 %1661 }
 0x2db   :  { %v1680_v40 = vadd.f32 %v1662_v50, %v1379_v11 }
 0x2dc   :  { %v1672_v42 = vpop.xlane.xlu1 %1671 }
 0x2dd   :  { %v1683_v32 = vadd.f32 %v1672_v42, %v1382_v25 }
 0x2de   :  { %v1674_v34 = vpop.xlane.xlu0 %1673 }
 0x2df   :  { %v1688_v19 = vsel %vm1687_vm6, %v1679_v36, %v1683_v32  ;;  %v1684_v63 = vadd.f32 %v1674_v34, %v1383_v22 }
 0x2e0   :  { %1693 = vst.msk [vmem:[%s3409_s7] sm:$0xff] %vm1692_vm8, %v1688_v19  ;;  %v1676_v18 = vpop.xlane.xlu1 %1675 }
 0x2e1   :  { %v1689_v4 = vsel %vm1687_vm6, %v1680_v40, %v1684_v63  ;;  %v1685_v8 = vadd.f32 %v1676_v18, %v1384_v61 }
 0x2e2   :  { %1694 = vst.msk [vmem:[%s3409_s7 + $0x8] sm:$0xff] %vm1692_vm8, %v1689_v4  ;;  %v1678_v44 = vpop.xlane.xlu0 %1677 }
 0x2e3   :  { %v1690_v2 = vsel %vm1687_vm6, %v1681_v57, %v1685_v8  ;;  %v1686_v41 = vadd.f32 %v1678_v44, %v1385_v29 }
 0x2e4   :  { %1695 = vst.msk [vmem:[%s3409_s7 + $0x10] sm:$0xff] %vm1692_vm8, %v1690_v2 }
 0x2e5   :  { %v1691_v55 = vsel %vm1687_vm6, %v1682_v14, %v1686_v41 }
 0x2e6   :  { %1696 = vst.msk [vmem:[%s3409_s7 + $0x18] sm:$0xff] %vm1692_vm8, %v1691_v55 }

// kernel: token_spiking_transformer.9
= control target key start
LH: loop header
LB: loop body
LE: loop exit
PB: predicated region body
PF: predicated region fallthrough
CT: control target
= control target key end

     0   :  { %v2274_v0 = vmov 0   ;;  %vm239_vm0 = vcmask 261120   ;;  %s3743_s3 = inlined_call_operand.vmem [shape: f32[128,1], index: 3, kind: input, shape index: {}]   ;;  %s3744_s2 = inlined_call_operand.vmem [shape: f32[128,1], index: 2, kind: input, shape index: {}]   ;;  %s3745_s0 = inlined_call_operand.vmem [shape: f32[4,32,128], index: 0, kind: input, shape index: {}]   ;;  %s3746_s1 = inlined_call_operand.vmem [shape: bf16[128,32], index: 1, kind: input, shape index: {}]   ;;  %s3747_s4 = inlined_call_operand.vmem [shape: f32[128,1], index: 4, kind: input, shape index: {}]   ;;  %s3748_s6 = inlined_call_operand.vmem [shape: f32[32,1], index: 6, kind: input, shape index: {}]   ;;  %s3749_s7 = inlined_call_operand.vmem [shape: f32[32,1], index: 7, kind: input, shape index: {}]   ;;  %s3750_s8 = inlined_call_operand.vmem [shape: f32[32,1], index: 8, kind: input, shape index: {}]   ;;  %s3751_s5 = inlined_call_operand.vmem [shape: bf16[32,128], index: 5, kind: input, shape index: {}]   ;;  %s3752_s9 = inlined_call_operand.vmem [shape: f32[4,32,128], index: 9, kind: output, shape index: {}]  }
   0x1   :  { %2246 = vset.pattern.permute.xlu1 %v2274_v0  ;;  %2245 = vset.pattern.permute.xlu0 %v2274_v0  ;;  %v65_v1 = vld [vmem:[%s3743_s3] sm:$0xff]  ;;  %v114_v4 = vld [vmem:[%s3745_s0 + $0x8] sm:$0xff]  ;;  %v115_v7 = vld [vmem:[%s3745_s0 + $0x10] sm:$0xff] }
   0x2   :  { %v49_v2 = vld [vmem:[%s3744_s2] sm:$0xff]  ;;  %363 = vperm.xlu1 %2246, %v65_v1   ;;  %v66_v6 = vld [vmem:[%s3743_s3 + $0x8] sm:$0xff]  ;;  %v116_v8 = vld [vmem:[%s3745_s0 + $0x18] sm:$0xff] }
   0x3   :  { %v113_v3 = vld [vmem:[%s3745_s0] sm:$0xff]  ;;  %121 = vperm.xlu0 %2245, %v49_v2   ;;  %v50_v9 = vld [vmem:[%s3744_s2 + $0x8] sm:$0xff]  ;;  %v118_v10 = vpack.c.bf16 %v116_v8, %v115_v7  ;;  %v52_v14 = vld [vmem:[%s3744_s2 + $0x18] sm:$0xff] }
   0x4   :  { %v117_v5 = vpack.c.bf16 %v114_v4, %v113_v3  ;;  %v2354_v11 = vld [vmem:[%s3746_s1] sm:$0xff]   ;;  %v1847_v13 = vld [vmem:[%s3745_s0 + $0x28] sm:$0xff]  ;;  %v51_v16 = vld [vmem:[%s3744_s2 + $0x10] sm:$0xff] }
   0x5   :  { %v1846_v12 = vld [vmem:[%s3745_s0 + $0x20] sm:$0xff]  ;;  %2086 = vmatprep.mubr.msk.bf16.mxu0 %vm239_vm0, %v2354_v11  ;;  %v2373_v17 = vld [vmem:[%s3746_s1 + $0x8] sm:$0xff]   ;;  %v2381_v19 = vld [vmem:[%s3746_s1 + $0x10] sm:$0xff]  }
   0x6   :  { %2082 = vmatprep.subr.bf16.mxu0 %v117_v5  ;;  %368 = vperm.xlu1 %2246, %v66_v6   ;;  %v823_v15 = vpack.c.bf16 %v1847_v13, %v1846_v12  ;;  %v82_v18 = vld [vmem:[%s3747_s4 + $0x8] sm:$0xff]  ;;  %v81_v20 = vld [vmem:[%s3747_s4] sm:$0xff]  ;;  %v1848_v21 = vld [vmem:[%s3745_s0 + $0x30] sm:$0xff] }
   0x7   :  { %2083 = vmatpush3.bf16.msra.mxu0 %v117_v5  ;;  %126 = vperm.xlu0 %2245, %v50_v9   ;;  %v1849_v22 = vld [vmem:[%s3745_s0 + $0x38] sm:$0xff]  ;;  %v67_v25 = vld [vmem:[%s3743_s3 + $0x10] sm:$0xff]  ;;  %v2410_v27 = vld [vmem:[%s3746_s1 + $0x20] sm:$0xff]  }
   0x8   :  { %2084 = vmatprep.subr.bf16.mxu0 %v118_v10  ;;  %v68_v23 = vld [vmem:[%s3743_s3 + $0x18] sm:$0xff]  ;;  %v824_v24 = vpack.c.bf16 %v1849_v22, %v1848_v21  ;;  %v54_v28 = vld [vmem:[%s3744_s2 + $0x28] sm:$0xff]  ;;  %v1898_v29 = vld [vmem:[%s3745_s0 + $0x40] sm:$0xff] }
   0x9   :  { %v2405_v26 = vld [vmem:[%s3746_s1 + $0x18] sm:$0xff]   ;;  %v1899_v30 = vld [vmem:[%s3745_s0 + $0x48] sm:$0xff]  ;;  %v53_v31 = vld [vmem:[%s3744_s2 + $0x20] sm:$0xff] }
   0xa   :  { %136 = vperm.xlu1 %2246, %v52_v14   ;;  %v1153_v32 = vpack.c.bf16 %v1899_v30, %v1898_v29  ;;  %v84_v33 = vld [vmem:[%s3747_s4 + $0x18] sm:$0xff]  ;;  %v83_v34 = vld [vmem:[%s3747_s4 + $0x10] sm:$0xff]  ;;  %v2437_v35 = vld [vmem:[%s3746_s1 + $0x28] sm:$0xff]  }
   0xb   :  { %2085 = vmatpush3.bf16.msra.mxu0 %v118_v10  ;;  %131 = vperm.xlu0 %2245, %v51_v16   ;;  %v2442_v36 = vld [vmem:[%s3746_s1 + $0x30] sm:$0xff]   ;;  %v70_v37 = vld [vmem:[%s3743_s3 + $0x28] sm:$0xff]  ;;  %v69_v38 = vld [vmem:[%s3743_s3 + $0x20] sm:$0xff] }
   0xc   :  { %2122 = vmatprep.subr.bf16.mxu0 %v823_v15  ;;  %v56_v39 = vld [vmem:[%s3744_s2 + $0x38] sm:$0xff]  ;;  %v55_v40 = vld [vmem:[%s3744_s2 + $0x30] sm:$0xff]  ;;  %v86_v42 = vld [vmem:[%s3747_s4 + $0x28] sm:$0xff] }
   0xd   :  { %v2463_v41 = vld [vmem:[%s3746_s1 + $0x38] sm:$0xff]   ;;  %v85_v43 = vld [vmem:[%s3747_s4 + $0x20] sm:$0xff]  ;;  %v71_v45 = vld [vmem:[%s3743_s3 + $0x30] sm:$0xff] }
   0xe   :  { %2087 = vmatmul.mubr.msk.bf16.vlgmr.msra.gmra.mrb[0].mxu0 %vm239_vm0, %v2373_v17  ;;  %464 = vperm.xlu1 %2246, %v82_v18   ;;  %v72_v44 = vld [vmem:[%s3743_s3 + $0x38] sm:$0xff]  ;;  %v1900_v46 = vld [vmem:[%s3745_s0 + $0x50] sm:$0xff]  ;;  %v58_v48 = vld [vmem:[%s3744_s2 + $0x48] sm:$0xff] }
   0xf   :  { %2123 = vmatpush3.bf16.msra.mxu0 %v823_v15  ;;  %459 = vperm.xlu0 %2245, %v81_v20   ;;  %v1901_v47 = vld [vmem:[%s3745_s0 + $0x58] sm:$0xff]  ;;  %v57_v49 = vld [vmem:[%s3744_s2 + $0x40] sm:$0xff]  ;;  %v1951_v52 = vld [vmem:[%s3745_s0 + $0x68] sm:$0xff] }
  0x10   :  { %2090 = vmatprep.mubr.msk.bf16.mxu0 %vm239_vm0, %v2381_v19  ;;  %2124 = vmatprep.subr.bf16.mxu0 %v824_v24  ;;  %v1154_v50 = vpack.c.bf16 %v1901_v47, %v1900_v46  ;;  %v1950_v51 = vld [vmem:[%s3745_s0 + $0x60] sm:$0xff]  ;;  %v88_v53 = vld [vmem:[%s3747_s4 + $0x38] sm:$0xff]  ;;  %v87_v55 = vld [vmem:[%s3747_s4 + $0x30] sm:$0xff] }
  0x11   :  { %v1483_v54 = vpack.c.bf16 %v1951_v52, %v1950_v51  ;;  %v74_v56 = vld [vmem:[%s3743_s3 + $0x48] sm:$0xff]  ;;  %v73_v57 = vld [vmem:[%s3743_s3 + $0x40] sm:$0xff]  ;;  %v60_v58 = vld [vmem:[%s3744_s2 + $0x58] sm:$0xff] }
  0x12   :  { %378 = vperm.xlu1 %2246, %v68_v23   ;;  %v59_v59 = vld [vmem:[%s3744_s2 + $0x50] sm:$0xff]  ;;  %v90_v60 = vld [vmem:[%s3747_s4 + $0x48] sm:$0xff]  ;;  %v89_v61 = vld [vmem:[%s3747_s4 + $0x40] sm:$0xff] }
  0x13   :  { %2125 = vmatpush3.bf16.msra.mxu0 %v824_v24  ;;  %373 = vperm.xlu0 %2245, %v67_v25   ;;  %v76_v62 = vld [vmem:[%s3743_s3 + $0x58] sm:$0xff]  ;;  %v75_v63 = vld [vmem:[%s3743_s3 + $0x50] sm:$0xff]  ;;  %v62_v0 = vld [vmem:[%s3744_s2 + $0x68] sm:$0xff] }
  0x14   :  { %2162 = vmatprep.subr.bf16.mxu0 %v1153_v32  ;;  %v61_v1 = vld [vmem:[%s3744_s2 + $0x60] sm:$0xff]  ;;  %v92_v2 = vld [vmem:[%s3747_s4 + $0x58] sm:$0xff]  ;;  %v91_v3 = vld [vmem:[%s3747_s4 + $0x50] sm:$0xff] }
  0x15   :  { %v1952_v4 = vld [vmem:[%s3745_s0 + $0x70] sm:$0xff]  ;;  %v1953_v5 = vld [vmem:[%s3745_s0 + $0x78] sm:$0xff]  ;;  %v78_v6 = vld [vmem:[%s3743_s3 + $0x68] sm:$0xff] }
  0x16   :  { %2091 = vmatmul.mubr.msk.bf16.gmra.mrb[4].mxu0 %vm239_vm0, %v2405_v26  ;;  %146 = vperm.xlu1 %2246, %v54_v28   ;;  %v77_v7 = vld [vmem:[%s3743_s3 + $0x60] sm:$0xff]  ;;  %v1484_v8 = vpack.c.bf16 %v1953_v5, %v1952_v4  ;;  %v64_v9 = vld [vmem:[%s3744_s2 + $0x78] sm:$0xff]  ;;  %v63_v10 = vld [vmem:[%s3744_s2 + $0x70] sm:$0xff] }
  0x17   :  { %2094 = vmatprep.mubr.msk.bf16.mxu0 %vm239_vm0, %v2410_v27  ;;  %141 = vperm.xlu0 %2245, %v53_v31   ;;  %v94_v12 = vld [vmem:[%s3747_s4 + $0x68] sm:$0xff]  ;;  %v93_v13 = vld [vmem:[%s3747_s4 + $0x60] sm:$0xff]  ;;  %v80_v14 = vld [vmem:[%s3743_s3 + $0x78] sm:$0xff] }
  0x18   :  { %v79_v15 = vld [vmem:[%s3743_s3 + $0x70] sm:$0xff]  ;;  %v96_v16 = vld [vmem:[%s3747_s4 + $0x78] sm:$0xff]  ;;  %v102_v20 = vld [vmem:[%s3748_s6 + $0x8] sm:$0xff] }
  0x19   :  { %v95_v18 = vld [vmem:[%s3747_s4 + $0x70] sm:$0xff]  ;;  %v101_v21 = vld [vmem:[%s3748_s6] sm:$0xff]  ;;  %v104_v22 = vld [vmem:[%s3748_s6 + $0x18] sm:$0xff] }
  0x1a   :  { %474 = vperm.xlu1 %2246, %v84_v33   ;;  %v103_v23 = vld [vmem:[%s3748_s6 + $0x10] sm:$0xff]  ;;  %v106_v24 = vld [vmem:[%s3749_s7 + $0x8] sm:$0xff]  ;;  %v105_v25 = vld [vmem:[%s3749_s7] sm:$0xff] }
  0x1b   :  { %469 = vperm.xlu0 %2245, %v83_v34   ;;  %v108_v28 = vld [vmem:[%s3749_s7 + $0x18] sm:$0xff]  ;;  %v107_v29 = vld [vmem:[%s3749_s7 + $0x10] sm:$0xff]  ;;  %v109_v30 = vld [vmem:[%s3750_s8] sm:$0xff] }
  0x1c   :  { %v112_v31 = vld [vmem:[%s3750_s8 + $0x18] sm:$0xff] }
  0x1e   :  { %2095 = vmatmul.mubr.msk.bf16.gmra.mrb[8].mxu0 %vm239_vm0, %v2437_v35  ;;  %388 = vperm.xlu1 %2246, %v70_v37  }
  0x1f   :  { %2098 = vmatprep.mubr.msk.bf16.mxu0 %vm239_vm0, %v2442_v36  ;;  %383 = vperm.xlu0 %2245, %v69_v38  }
  0x22   :  { %156 = vperm.xlu1 %2246, %v56_v39  }
  0x23   :  { %151 = vperm.xlu0 %2245, %v55_v40  }
  0x26   :  { %2099 = vmatmul.mubr.msk.bf16.gmra.mrb[12].mxu0 %vm239_vm0, %v2463_v41  ;;  %484 = vperm.xlu1 %2246, %v86_v42  }
  0x27   :  { %2126 = vmatprep.mubr.msk.bf16.mxu0 %vm239_vm0, %v2354_v11  ;;  %479 = vperm.xlu0 %2245, %v85_v43  }
  0x2a   :  { %398 = vperm.xlu1 %2246, %v72_v44  }
  0x2b   :  { %393 = vperm.xlu0 %2245, %v71_v45  }
  0x2e   :  { %2127 = vmatmul.mubr.msk.bf16.vlgmr.msra.gmra.mrb[16].mxu0 %vm239_vm0, %v2373_v17  ;;  %166 = vperm.xlu1 %2246, %v58_v48  }
  0x2f   :  { %2163 = vmatpush3.bf16.msra.mxu0 %v1153_v32  ;;  %161 = vperm.xlu0 %2245, %v57_v49  }
  0x30   :  { %2130 = vmatprep.mubr.msk.bf16.mxu0 %vm239_vm0, %v2381_v19  ;;  %2164 = vmatprep.subr.bf16.mxu0 %v1154_v50 }
  0x32   :  { %494 = vperm.xlu1 %2246, %v88_v53  }
  0x33   :  { %2165 = vmatpush3.bf16.msra.mxu0 %v1154_v50  ;;  %489 = vperm.xlu0 %2245, %v87_v55  }
  0x34   :  { %2202 = vmatprep.subr.bf16.mxu0 %v1483_v54 }
  0x36   :  { %2131 = vmatmul.mubr.msk.bf16.gmra.mrb[20].mxu0 %vm239_vm0, %v2405_v26  ;;  %408 = vperm.xlu1 %2246, %v74_v56  }
  0x37   :  { %2134 = vmatprep.mubr.msk.bf16.mxu0 %vm239_vm0, %v2410_v27  ;;  %403 = vperm.xlu0 %2245, %v73_v57  }
  0x3a   :  { %176 = vperm.xlu1 %2246, %v60_v58  }
  0x3b   :  { %171 = vperm.xlu0 %2245, %v59_v59  }
  0x3e   :  { %2135 = vmatmul.mubr.msk.bf16.gmra.mrb[24].mxu0 %vm239_vm0, %v2437_v35  ;;  %504 = vperm.xlu1 %2246, %v90_v60  }
  0x3f   :  { %2138 = vmatprep.mubr.msk.bf16.mxu0 %vm239_vm0, %v2442_v36  ;;  %499 = vperm.xlu0 %2245, %v89_v61  }
  0x42   :  { %418 = vperm.xlu1 %2246, %v76_v62  }
  0x43   :  { %413 = vperm.xlu0 %2245, %v75_v63  }
  0x46   :  { %2139 = vmatmul.mubr.msk.bf16.gmra.mrb[28].mxu0 %vm239_vm0, %v2463_v41  ;;  %186 = vperm.xlu1 %2246, %v62_v0  }
  0x47   :  { %2166 = vmatprep.mubr.msk.bf16.mxu0 %vm239_vm0, %v2354_v11  ;;  %181 = vperm.xlu0 %2245, %v61_v1  }
  0x4a   :  { %514 = vperm.xlu1 %2246, %v92_v2  }
  0x4b   :  { %509 = vperm.xlu0 %2245, %v91_v3  }
  0x4e   :  { %2167 = vmatmul.mubr.msk.bf16.vlgmr.msra.gmra.mrb[32].mxu0 %vm239_vm0, %v2373_v17  ;;  %428 = vperm.xlu1 %2246, %v78_v6  }
  0x4f   :  { %2203 = vmatpush3.bf16.msra.mxu0 %v1483_v54  ;;  %423 = vperm.xlu0 %2245, %v77_v7  }
  0x50   :  { %2170 = vmatprep.mubr.msk.bf16.mxu0 %vm239_vm0, %v2381_v19  ;;  %2204 = vmatprep.subr.bf16.mxu0 %v1484_v8 }
  0x52   :  { %196 = vperm.xlu1 %2246, %v64_v9  }
  0x53   :  { %2205 = vmatpush3.bf16.msra.mxu0 %v1484_v8  ;;  %191 = vperm.xlu0 %2245, %v63_v10  }
  0x56   :  { %2171 = vmatmul.mubr.msk.bf16.gmra.mrb[36].mxu0 %vm239_vm0, %v2405_v26  ;;  %524 = vperm.xlu1 %2246, %v94_v12  }
  0x57   :  { %2174 = vmatprep.mubr.msk.bf16.mxu0 %vm239_vm0, %v2410_v27  ;;  %519 = vperm.xlu0 %2245, %v93_v13  }
  0x5a   :  { %438 = vperm.xlu1 %2246, %v80_v14  }
  0x5b   :  { %433 = vperm.xlu0 %2245, %v79_v15  }
  0x5e   :  { %2175 = vmatmul.mubr.msk.bf16.gmra.mrb[40].mxu0 %vm239_vm0, %v2437_v35  ;;  %534 = vperm.xlu1 %2246, %v96_v16  }
  0x5f   :  { %2178 = vmatprep.mubr.msk.bf16.mxu0 %vm239_vm0, %v2442_v36  ;;  %529 = vperm.xlu0 %2245, %v95_v18  }
  0x62   :  { %664 = vperm.xlu1 %2246, %v102_v20  }
  0x63   :  { %659 = vperm.xlu0 %2245, %v101_v21  }
  0x66   :  { %2179 = vmatmul.mubr.msk.bf16.gmra.mrb[44].mxu0 %vm239_vm0, %v2463_v41  ;;  %674 = vperm.xlu1 %2246, %v104_v22  }
  0x67   :  { %2206 = vmatprep.mubr.msk.bf16.mxu0 %vm239_vm0, %v2354_v11  ;;  %669 = vperm.xlu0 %2245, %v103_v23   ;;  %v110_v11 = vld [vmem:[%s3750_s8 + $0x8] sm:$0xff] }
  0x6a   :  { %745 = vperm.xlu1 %2246, %v106_v24  }
  0x6b   :  { %740 = vperm.xlu0 %2245, %v105_v25  }
  0x6e   :  { %2207 = vmatmul.mubr.msk.bf16.vlgmr.msra.gmra.mrb[48].mxu0 %vm239_vm0, %v2373_v17  ;;  %755 = vperm.xlu1 %2246, %v108_v28   ;;  %v111_v17 = vld [vmem:[%s3750_s8 + $0x10] sm:$0xff] }
  0x6f   :  { %2210 = vmatprep.mubr.msk.bf16.mxu0 %vm239_vm0, %v2381_v19  ;;  %750 = vperm.xlu0 %2245, %v107_v29  }
  0x72   :  { %769 = vperm.xlu1 %2246, %v110_v11  }
  0x73   :  { %764 = vperm.xlu0 %2245, %v109_v30  }
  0x76   :  { %2211 = vmatmul.mubr.msk.bf16.gmra.mrb[52].mxu0 %vm239_vm0, %v2405_v26  ;;  %779 = vperm.xlu1 %2246, %v112_v31  }
  0x77   :  { %2214 = vmatprep.mubr.msk.bf16.mxu0 %vm239_vm0, %v2410_v27  ;;  %774 = vperm.xlu0 %2245, %v111_v17  }
  0x7e   :  { %2215 = vmatmul.mubr.msk.bf16.gmra.mrb[56].mxu0 %vm239_vm0, %v2437_v35  ;;  %v2674_v35 = vld [vmem:[%s3751_s5] sm:$0xff]  }
  0x7f   :  { %2218 = vmatprep.mubr.msk.bf16.mxu0 %vm239_vm0, %v2442_v36  ;;  %3813 = vst [vmem:[#allocation4_spill] sm:$0xff] %v2674_v35  ;;  %2118 = vmatprep.mubr.bf16.mxu1 %v2674_v35 }
  0x81   :  { %v2657_v19 = vpop.permute.xlu1 %363 }
  0x82   :  { %v2659_v32 = vpop.permute.xlu0 %121 }
  0x83   :  { %3811 = vst [vmem:[#allocation2_spill] sm:$0xff] %v2659_v32 }
  0x85   :  { %v2663_v33 = vpop.permute.xlu1 %368 }
  0x86   :  { %2219 = vmatmul.mubr.msk.bf16.gmra.mrb[60].mxu0 %vm239_vm0, %v2463_v41  ;;  %3812 = vst [vmem:[#allocation3_spill] sm:$0xff] %v2663_v33  ;;  %v2665_v26 = vpop.permute.xlu0 %126 }
  0x89   :  { %v2667_v34 = vpop.permute.xlu1 %136 }
  0x8a   :  { %v2669_v27 = vpop.permute.xlu0 %131 }
  0x8d   :  { %v2676_v36 = vpop.permute.xlu1 %464 }
  0x8e   :  { %v2679_v37 = vpop.permute.xlu0 %459 }
  0x91   :  { %v2681_v38 = vpop.permute.xlu1 %378 }
  0x92   :  { %3814 = vst [vmem:[#allocation5_spill] sm:$0xff] %v2681_v38  ;;  %v2683_v39 = vpop.permute.xlu0 %373 }
  0x95   :  { %v2685_v40 = vpop.permute.xlu1 %146 }
  0x96   :  { %v2687_v41 = vpop.permute.xlu0 %141 }
  0x99   :  { %v2689_v42 = vpop.permute.xlu1 %474 }
  0x9a   :  { %3815 = vst [vmem:[#allocation6_spill] sm:$0xff] %v2689_v42  ;;  %v2691_v43 = vpop.permute.xlu0 %469 }
  0x9d   :  { %v2693_v44 = vpop.permute.xlu1 %388 }
  0x9e   :  { %3816 = vst [vmem:[#allocation7_spill] sm:$0xff] %v2693_v44  ;;  %v2695_v45 = vpop.permute.xlu0 %383 }
  0xa1   :  { %v2699_v47 = vpop.permute.xlu1 %156 }
  0xa2   :  { %v2697_v46 = vpop.permute.xlu0 %151 }
  0xa5   :  { %v2703_v49 = vpop.permute.xlu1 %484 }
  0xa6   :  { %v2701_v48 = vpop.permute.xlu0 %479  ;;  %3817 = vst [vmem:[#allocation8_spill] sm:$0xff] %v2703_v49 }
  0xa9   :  { %v2707_v51 = vpop.permute.xlu1 %398 }
  0xaa   :  { %v2705_v50 = vpop.permute.xlu0 %393 }
  0xad   :  { %v2711_v53 = vpop.permute.xlu1 %166 }
  0xae   :  { %v2709_v52 = vpop.permute.xlu0 %161  ;;  %3819 = vst [vmem:[#allocation10_spill] sm:$0xff] %v2711_v53 }
  0xaf   :  { %3818 = vst [vmem:[#allocation9_spill] sm:$0xff] %v2709_v52 }
  0xb1   :  { %v2715_v55 = vpop.permute.xlu1 %494 }
  0xb2   :  { %v2713_v54 = vpop.permute.xlu0 %489  ;;  %3820 = vst [vmem:[#allocation11_spill] sm:$0xff] %v2715_v55 }
  0xb5   :  { %v2719_v57 = vpop.permute.xlu1 %408 }
  0xb6   :  { %v2717_v56 = vpop.permute.xlu0 %403  ;;  %3821 = vst [vmem:[#allocation12_spill] sm:$0xff] %v2719_v57 }
  0xb9   :  { %v2723_v59 = vpop.permute.xlu1 %176 }
  0xba   :  { %v2721_v58 = vpop.permute.xlu0 %171 }
  0xbb   :  { %3822 = vst [vmem:[#allocation13_spill] sm:$0xff] %v2721_v58 }
  0xbd   :  { %v2727_v61 = vpop.permute.xlu1 %504 }
  0xbe   :  { %v2725_v60 = vpop.permute.xlu0 %499  ;;  %3824 = vst [vmem:[#allocation15_spill] sm:$0xff] %v2727_v61 }
  0xbf   :  { %3823 = vst [vmem:[#allocation14_spill] sm:$0xff] %v2725_v60 }
  0xc1   :  { %v2731_v63 = vpop.permute.xlu1 %418 }
  0xc2   :  { %v2729_v62 = vpop.permute.xlu0 %413  ;;  %3825 = vst [vmem:[#allocation16_spill] sm:$0xff] %v2731_v63 }
  0xc5   :  { %v2735_v1 = vpop.permute.xlu1 %186 }
  0xc6   :  { %v2733_v0 = vpop.permute.xlu0 %181  ;;  %3827 = vst [vmem:[#allocation18_spill] sm:$0xff] %v2735_v1 }
  0xc7   :  { %3826 = vst [vmem:[#allocation17_spill] sm:$0xff] %v2733_v0 }
  0xc9   :  { %v2739_v3 = vpop.permute.xlu1 %514 }
  0xca   :  { %v2737_v2 = vpop.permute.xlu0 %509  ;;  %3829 = vst [vmem:[#allocation20_spill] sm:$0xff] %v2739_v3 }
  0xcb   :  { %3828 = vst [vmem:[#allocation19_spill] sm:$0xff] %v2737_v2 }
  0xcd   :  { %v2751_v20 = vpop.permute.xlu1 %428 }
  0xce   :  { %v2745_v13 = vpop.permute.xlu0 %423  ;;  %3831 = vst [vmem:[#allocation22_spill] sm:$0xff] %v2751_v20 }
  0xcf   :  { %3830 = vst [vmem:[#allocation21_spill] sm:$0xff] %v2745_v13 }
  0xd2   :  { %v2764_v17 = vpop.permute.xlu0 %191 }
  0xd3   :  { %3832 = vst [vmem:[#allocation23_spill] sm:$0xff] %v2764_v17 }
  0xe1   :  { %v2088_v4 = vpop.f32.mrb[0].mxu0 }
  0xe2   :  { %v307_v5 = vadd.f32 %v2088_v4, %v2669_v27  ;;  %v298_v6 = vpop.f32.mrb[1].mxu0 }
  0xe3   :  { %v299_v7 = vadd.f32 %v298_v6, %v2659_v32  ;;  %v2089_v8 = vpop.f32.mrb[2].mxu0 }
  0xe4   :  { %v443_v9 = vmul.f32 %v2683_v39, %v307_v5  ;;  %v310_v10 = vadd.f32 %v2089_v8, %v2667_v34  ;;  %v301_v12 = vpop.f32.mrb[3].mxu0 }
  0xe5   :  { %v441_v14 = vmul.f32 %v2657_v19, %v299_v7  ;;  %v302_v15 = vadd.f32 %v301_v12, %v2665_v26 }
  0xe6   :  { %v539_v16 = vadd.f32 %v2691_v43, %v443_v9  ;;  %v444_v18 = vmul.f32 %v2681_v38, %v310_v10  ;;  %v2773_v10 = vpop.permute.xlu1 %196 }
  0xe7   :  { %v442_v21 = vmul.f32 %v2663_v33, %v302_v15  ;;  %v537_v22 = vadd.f32 %v2679_v37, %v441_v14 }
  0xe8   :  { %v2755_v23 = vmul.f32 0.5, %v539_v16  ;;  %v540_v24 = vadd.f32 %v2689_v42, %v444_v18 }
  0xe9   :  { %v2092_v25 = vpop.f32.mrb[4].mxu0  ;;  %v538_v28 = vadd.f32 %v2676_v36, %v442_v21  ;;  %v2759_v29 = vmul.f32 0.5, %v537_v22 }
  0xea   :  { %v2761_v11 = vmul.f32 0.5, %v540_v24  ;;  %v323_v30 = vadd.f32 %v2092_v25, %v2697_v46  ;;  %v314_v31 = vpop.f32.mrb[5].mxu0  ;;  %vm587_vm1 = vcmp.ge.f32.partialorder %v2755_v23, 1.0  ;;  %v3787_v24 = vmov 1.0|1.0  }
  0xeb   :  { %v315_v4 = vadd.f32 %v314_v31, %v2687_v41  ;;  %v2093_v5 = vpop.f32.mrb[6].mxu0  ;;  %v2767_v6 = vmul.f32 0.5, %v538_v28  ;;  %vm585_vm3 = vcmp.ge.f32.partialorder %v2759_v29, 1.0 }
  0xec   :  { %v447_v7 = vmul.f32 %v2705_v50, %v323_v30  ;;  %v326_v8 = vadd.f32 %v2093_v5, %v2699_v47  ;;  %v317_v9 = vpop.f32.mrb[7].mxu0  ;;  %vm588_vm2 = vcmp.ge.f32.partialorder %v2761_v11, 1.0  ;;  %v2800_v30 = vpop.permute.xlu0 %519 }
  0xed   :  { %v445_v12 = vmul.f32 %v2695_v45, %v315_v4  ;;  %v318_v14 = vadd.f32 %v317_v9, %v2685_v40  ;;  %vm586_vm4 = vcmp.ge.f32.partialorder %v2767_v6, 1.0  ;;  %vm2783_vm5 = vmpackc.low %vm588_vm2, %vm587_vm1  ;;  %3835 = vst [vmem:[#allocation24_spill] sm:$0xff] %v2800_v30 }
  0xee   :  { %v543_v16 = vadd.f32 %v2713_v54, %v447_v7  ;;  %v448_v18 = vmul.f32 %v2707_v51, %v326_v8  ;;  %vm1826_vm6 = vmpackc.low %vm586_vm4, %vm585_vm3 }
  0xef   :  { %v541_v21 = vadd.f32 %v2701_v48, %v445_v12  ;;  %v446_v22 = vmul.f32 %v2693_v44, %v318_v14  ;;  %2102 = vmatprep.subr.msk.bf16.mxu1 %vm1826_vm6, %v3787_v24  ;;  %v2811_v12 = vpop.permute.xlu1 %524 }
  0xf0   :  { %v2796_v25 = vmul.f32 0.5, %v543_v16  ;;  %v544_v28 = vadd.f32 %v2715_v55, %v448_v18  ;;  %2103 = vmatpush3.bf16.msk.msra.mxu1 %vm1826_vm6, %v3787_v24 }
  0xf1   :  { %v2802_v31 = vmul.f32 0.5, %v541_v21  ;;  %v542_v4 = vadd.f32 %v2703_v49, %v446_v22  ;;  %v2096_v5 = vpop.f32.mrb[8].mxu0  ;;  %2104 = vmatprep.subr.msk.bf16.mxu1 %vm2783_vm5, %v3787_v24 }
  0xf2   :  { %v2808_v7 = vmul.f32 0.5, %v544_v28  ;;  %v339_v8 = vadd.f32 %v2096_v5, %v2721_v58  ;;  %v330_v9 = vpop.f32.mrb[9].mxu0  ;;  %vm591_vm7 = vcmp.ge.f32.partialorder %v2796_v25, 1.0 }
  0xf3   :  { %v2813_v14 = vmul.f32 0.5, %v542_v4  ;;  %v331_v16 = vadd.f32 %v330_v9, %v2709_v52  ;;  %v2097_v18 = vpop.f32.mrb[10].mxu0  ;;  %vm589_vm9 = vcmp.ge.f32.partialorder %v2802_v31, 1.0 }
  0xf4   :  { %v451_v21 = vmul.f32 %v2729_v62, %v339_v8  ;;  %v342_v22 = vadd.f32 %v2097_v18, %v2723_v59  ;;  %v333_v49 = vpop.f32.mrb[11].mxu0  ;;  %2105 = vmatpush3.bf16.msk.msra.mxu1 %vm2783_vm5, %v3787_v24  ;;  %vm592_vm8 = vcmp.ge.f32.partialorder %v2808_v7, 1.0 }
  0xf5   :  { %v449_v28 = vmul.f32 %v2717_v56, %v331_v16  ;;  %v334_v4 = vadd.f32 %v333_v49, %v2711_v53  ;;  %vm590_vm10 = vcmp.ge.f32.partialorder %v2813_v14, 1.0  ;;  %vm2831_vm11 = vmpackc.low %vm592_vm8, %vm591_vm7  ;;  %v2841_v49 = vpop.permute.xlu0 %433 }
  0xf6   :  { %v547_v15 = vadd.f32 %v2737_v2, %v451_v21  ;;  %v452_v8 = vmul.f32 %v2731_v63, %v342_v22  ;;  %vm1830_vm12 = vmpackc.low %vm590_vm10, %vm589_vm9  ;;  %v2850_v21 = vpop.permute.xlu1 %438 }
  0xf7   :  { %v545_v9 = vadd.f32 %v2725_v60, %v449_v28  ;;  %v450_v16 = vmul.f32 %v2719_v57, %v334_v4  ;;  %2106 = vmatprep.subr.msk.bf16.mxu1 %vm1830_vm12, %v3787_v24  ;;  %3838 = vst [vmem:[#allocation25_spill] sm:$0xff] %v2850_v21 }
  0xf8   :  { %v2846_v18 = vmul.f32 0.5, %v547_v15  ;;  %v548_v53 = vadd.f32 %v2739_v3, %v452_v8  ;;  %2107 = vmatpush3.bf16.msk.msra.mxu1 %vm1830_vm12, %v3787_v24 }
  0xf9   :  { %v2852_v22 = vmul.f32 0.5, %v545_v9  ;;  %v546_v63 = vadd.f32 %v2727_v61, %v450_v16  ;;  %v2100_v2 = vpop.f32.mrb[12].mxu0  ;;  %2108 = vmatprep.subr.msk.bf16.mxu1 %vm2831_vm11, %v3787_v24 }
  0xfa   :  { %v2858_v28 = vmul.f32 0.5, %v548_v53  ;;  %v355_v4 = vadd.f32 %v2100_v2, %v2764_v17  ;;  %v346_v15 = vpop.f32.mrb[13].mxu0  ;;  %vm595_vm13 = vcmp.ge.f32.partialorder %v2846_v18, 1.0  ;;  %v2871_v53 = vpop.permute.xlu0 %529 }
  0xfb   :  { %v2861_v57 = vmul.f32 0.5, %v546_v63  ;;  %v347_v8 = vadd.f32 %v346_v15, %v2733_v0  ;;  %v2101_v3 = vpop.f32.mrb[14].mxu0  ;;  %vm593_vm15 = vcmp.ge.f32.partialorder %v2852_v22, 1.0  ;;  %v2891_v15 = vpop.permute.xlu1 %534 }
  0xfc   :  { %v455_v9 = vmul.f32 %v2841_v49, %v355_v4  ;;  %v358_v60 = vadd.f32 %v2101_v3, %v2773_v10  ;;  %v349_v16 = vpop.f32.mrb[15].mxu0  ;;  %2109 = vmatpush3.bf16.msk.msra.mxu1 %vm2831_vm11, %v3787_v24  ;;  %vm3780_vm14 = vcmp.ge.f32.partialorder %v2858_v28, 1.0  ;;  %3841 = vst [vmem:[#allocation26_spill] sm:$0xff] %v2891_v15 }
  0xfd   :  { %v453_v63 = vmul.f32 %v2745_v13, %v347_v8  ;;  %v350_v2 = vadd.f32 %v349_v16, %v2735_v1  ;;  %vm3779_vm0 = vcmp.ge.f32.partialorder %v2861_v57, 1.0  ;;  %vm2881_vm5 = vmpackc.low %vm3780_vm14, %vm595_vm13 }
  0xfe   :  { %v551_v5 = vadd.f32 %v2871_v53, %v455_v9  ;;  %v456_v4 = vmul.f32 %v2850_v21, %v358_v60  ;;  %vm1834_vm6 = vmpackc.low %vm3779_vm0, %vm593_vm15 }
  0xff   :  { %v549_v8 = vadd.f32 %v2800_v30, %v453_v63  ;;  %v454_v16 = vmul.f32 %v2751_v20, %v350_v2  ;;  %2110 = vmatprep.subr.msk.bf16.mxu1 %vm1834_vm6, %v3787_v24 }
 0x100   :  { %v2896_v1 = vmul.f32 0.5, %v551_v5  ;;  %v552_v13 = vadd.f32 %v2891_v15, %v456_v4  ;;  %2111 = vmatpush3.bf16.msk.msra.mxu1 %vm1834_vm6, %v3787_v24 }
 0x101   :  { %v2900_v60 = vmul.f32 0.5, %v549_v8  ;;  %v550_v9 = vadd.f32 %v2811_v12, %v454_v16  ;;  %2112 = vmatprep.subr.msk.bf16.mxu1 %vm2881_vm5, %v3787_v24  ;;  %v2128_v21 = vpop.f32.mrb[16].mxu0 }
 0x102   :  { %v2906_v63 = vmul.f32 0.5, %v552_v13  ;;  %v868_v2 = vadd.f32 %v2128_v21, %v2669_v27  ;;  %v859_v20 = vpop.f32.mrb[17].mxu0  ;;  %vm599_vm11 = vcmp.ge.f32.partialorder %v2896_v1, 1.0 }
 0x103   :  { %v2909_v5 = vmul.f32 0.5, %v550_v9  ;;  %v860_v4 = vadd.f32 %v859_v20, %v2659_v32  ;;  %v2129_v15 = vpop.f32.mrb[18].mxu0  ;;  %vm597_vm6 = vcmp.ge.f32.partialorder %v2900_v60, 1.0  ;;  %v603_v9 = vsel %vm587_vm1, 0.0, %v2755_v23 }
 0x104   :  { %v924_v8 = vmul.f32 %v868_v2, %v2683_v39  ;;  %v871_v30 = vadd.f32 %v2129_v15, %v2667_v34  ;;  %2113 = vmatpush3.bf16.msk.msra.mxu1 %vm2881_vm5, %v3787_v24  ;;  %v862_v16 = vpop.f32.mrb[19].mxu0  ;;  %vm600_vm12 = vcmp.ge.f32.partialorder %v2906_v63, 1.0 }
 0x105   :  { %v922_v13 = vmul.f32 %v860_v4, %v2657_v19  ;;  %v863_v21 = vadd.f32 %v862_v16, %v2665_v26  ;;  %vm598_vm0 = vcmp.ge.f32.partialorder %v2909_v5, 1.0  ;;  %vm2927_vm14 = vmpackc.low %vm600_vm12, %vm599_vm11 }
 0x106   :  { %v940_v3 = vadd.f32 %v924_v8, %v2691_v43  ;;  %v925_v15 = vmul.f32 %v871_v30, %v2681_v38  ;;  %vm1838_vm5 = vmpackc.low %vm598_vm0, %vm597_vm6  ;;  %v601_v8 = vsel %vm585_vm3, 0.0, %v2759_v29  ;;  %v604_v38 = vsel %vm588_vm2, 0.0, %v2761_v11 }
 0x107   :  { %v938_v2 = vadd.f32 %v922_v13, %v2679_v37  ;;  %v923_v4 = vmul.f32 %v863_v21, %v2663_v33  ;;  %2114 = vmatprep.subr.msk.bf16.mxu1 %vm1838_vm5, %v3787_v24  ;;  %v602_v29 = vsel %vm586_vm4, 0.0, %v2767_v6  ;;  %v3845_v6 = vmov 1.0|1.0  }
 0x108   :  { %v956_v30 = vadd.f32 %v940_v3, %v603_v9  ;;  %v941_v16 = vadd.f32 %v925_v15, %v2689_v42  ;;  %2115 = vmatpush3.bf16.msk.msra.mxu1 %vm1838_vm5, %v3787_v24 }
 0x109   :  { %v954_v23 = vadd.f32 %v938_v2, %v601_v8  ;;  %v939_v13 = vadd.f32 %v923_v4, %v2676_v36  ;;  %2116 = vmatprep.subr.msk.bf16.mxu1 %vm2927_vm14, %v3787_v24  ;;  %v2132_v21 = vpop.f32.mrb[20].mxu0  ;;  %v2965_v4 = vld [vmem:[%s3751_s5 + $0x8] sm:$0xff]  }
 0x10a   :  { %v957_v3 = vadd.f32 %v941_v16, %v604_v38  ;;  %v884_v15 = vadd.f32 %v2132_v21, %v2697_v46  ;;  %v875_v9 = vpop.f32.mrb[21].mxu0  ;;  %v2959_v42 = vmul.f32 0.5, %v956_v30  ;;  %3844 = vst [vmem:[#allocation27_spill] sm:$0xff] %v2965_v4 }
 0x10b   :  { %v955_v33 = vadd.f32 %v939_v13, %v602_v29  ;;  %v876_v11 = vadd.f32 %v875_v9, %v2687_v41  ;;  %v2133_v2 = vpop.f32.mrb[22].mxu0  ;;  %v2967_v8 = vmul.f32 0.5, %v954_v23  ;;  %v607_v13 = vsel %vm591_vm7, 0.0, %v2796_v25 }
 0x10c   :  { %v928_v24 = vmul.f32 %v884_v15, %v2705_v50  ;;  %v887_v38 = vadd.f32 %v2133_v2, %v2699_v47  ;;  %2117 = vmatpush3.bf16.msk.msra.mxu1 %vm2927_vm14, %v3845_v6  ;;  %v878_v30 = vpop.f32.mrb[23].mxu0  ;;  %v2974_v16 = vmul.f32 0.5, %v957_v3  ;;  %vm988_vm1 = vcmp.ge.f32.partialorder %v2959_v42, 1.0 }
 0x10d   :  { %v926_v21 = vmul.f32 %v876_v11, %v2695_v45  ;;  %v879_v23 = vadd.f32 %v878_v30, %v2685_v40  ;;  %v2981_v29 = vmul.f32 0.5, %v955_v33  ;;  %vm986_vm3 = vcmp.ge.f32.partialorder %v2967_v8, 1.0  ;;  %v3848_v30 = vld [vmem:[#allocation8_spill] sm:$0xff] }
 0x10e   :  { %v944_v15 = vadd.f32 %v928_v24, %v2713_v54  ;;  %v929_v9 = vmul.f32 %v887_v38, %v2707_v51  ;;  %vm989_vm2 = vcmp.ge.f32.partialorder %v2974_v16, 1.0  ;;  %v605_v24 = vsel %vm589_vm9, 0.0, %v2802_v31 }
 0x10f   :  { %v942_v20 = vadd.f32 %v926_v21, %v2701_v48  ;;  %v927_v3 = vmul.f32 %v879_v23, %v2693_v44  ;;  %2119 = vmatmul.mubr.bf16.vlgmr.msra.gmra.mrb[0].mxu1 %v2965_v4  ;;  %vm987_vm4 = vcmp.ge.f32.partialorder %v2981_v29, 1.0  ;;  %vm2996_vm7 = vmpackc.low %vm989_vm2, %vm988_vm1  ;;  %v608_v2 = vsel %vm592_vm8, 0.0, %v2808_v7 }
 0x110   :  { %v960_v25 = vadd.f32 %v944_v15, %v607_v13  ;;  %v945_v11 = vadd.f32 %v929_v9, %v2715_v55  ;;  %vm1874_vm14 = vmpackc.low %vm987_vm4, %vm986_vm3  ;;  %2158 = vmatprep.mubr.bf16.mxu1 %v2674_v35  ;;  %v606_v31 = vsel %vm590_vm10, 0.0, %v2813_v14  ;;  %v609_v33 = vsel %vm593_vm15, 0.0, %v2852_v22 }
 0x111   :  { %v958_v38 = vadd.f32 %v942_v20, %v605_v24  ;;  %v943_v21 = vadd.f32 %v927_v3, %v3848_v30  ;;  %v2136_v23 = vpop.f32.mrb[24].mxu0  ;;  %2142 = vmatprep.subr.msk.bf16.mxu1 %vm1874_vm14, %v3845_v6  ;;  %vm3858_vm15 = vcmp.ge.f32.partialorder %v2861_v57, 1.0 }
 0x112   :  { %v961_v13 = vadd.f32 %v945_v11, %v608_v2  ;;  %v900_v15 = vadd.f32 %v2136_v23, %v2721_v58  ;;  %v891_v9 = vpop.f32.mrb[25].mxu0  ;;  %2143 = vmatpush3.bf16.msk.msra.mxu1 %vm1874_vm14, %v3845_v6  ;;  %v3019_v35 = vmul.f32 0.5, %v960_v25  ;;  %v611_v25 = vsel %vm595_vm13, 0.0, %v2846_v18  ;;  %v3849_v23 = vld [vmem:[#allocation10_spill] sm:$0xff]  ;;  %v3851_v58 = vld [vmem:[#allocation16_spill] sm:$0xff] }
 0x113   :  { %v959_v4 = vadd.f32 %v943_v21, %v606_v31  ;;  %v892_v7 = vadd.f32 %v891_v9, %v2709_v52  ;;  %v2137_v20 = vpop.f32.mrb[26].mxu0  ;;  %2144 = vmatprep.subr.msk.bf16.mxu1 %vm2996_vm7, %v3845_v6  ;;  %v3025_v3 = vmul.f32 0.5, %v958_v38  ;;  %v3850_v52 = vld [vmem:[#allocation19_spill] sm:$0xff]  ;;  %vm3857_vm14 = vcmp.ge.f32.partialorder %v2858_v28, 1.0 }
 0x114   :  { %v932_v14 = vmul.f32 %v900_v15, %v2729_v62  ;;  %v903_v24 = vadd.f32 %v2137_v20, %v2723_v59  ;;  %v894_v11 = vpop.f32.mrb[27].mxu0  ;;  %v3029_v2 = vmul.f32 0.5, %v961_v13  ;;  %vm992_vm8 = vcmp.ge.f32.partialorder %v3019_v35, 1.0  ;;  %v3852_v13 = vld [vmem:[#allocation14_spill] sm:$0xff]  ;;  %v3853_v15 = vld [vmem:[#allocation12_spill] sm:$0xff] }
 0x115   :  { %v930_v21 = vmul.f32 %v892_v7, %v2717_v56  ;;  %v895_v31 = vadd.f32 %v894_v11, %v3849_v23  ;;  %v3036_v9 = vmul.f32 0.5, %v959_v4  ;;  %vm990_vm10 = vcmp.ge.f32.partialorder %v3025_v3, 1.0 }
 0x116   :  { %v948_v38 = vadd.f32 %v932_v14, %v3850_v52  ;;  %v933_v30 = vmul.f32 %v903_v24, %v3851_v58  ;;  %2145 = vmatpush3.bf16.msk.msra.mxu1 %vm2996_vm7, %v3845_v6  ;;  %vm993_vm9 = vcmp.ge.f32.partialorder %v3029_v2, 1.0  ;;  %v3856_v14 = vld [vmem:[#allocation20_spill] sm:$0xff]  ;;  %v612_v11 = vsel %vm3857_vm14, 0.0, %v2858_v28 }
 0x117   :  { %v946_v18 = vadd.f32 %v930_v21, %v3852_v13  ;;  %v931_v7 = vmul.f32 %v895_v31, %v3853_v15  ;;  %vm3802_vm13 = vcmp.ge.f32.partialorder %v3036_v9, 1.0  ;;  %vm3053_vm5 = vmpackc.low %vm993_vm9, %vm992_vm8  ;;  %v610_v22 = vsel %vm3858_vm15, 0.0, %v2861_v57 }
 0x118   :  { %v964_v20 = vadd.f32 %v948_v38, %v611_v25  ;;  %v949_v24 = vadd.f32 %v933_v30, %v3856_v14  ;;  %vm1878_vm7 = vmpackc.low %vm3802_vm13, %vm990_vm10  ;;  %v613_v4 = vsel %vm597_vm6, 0.0, %v2900_v60  ;;  %v614_v60 = vsel %vm598_vm0, 0.0, %v2909_v5 }
 0x119   :  { %v962_v21 = vadd.f32 %v946_v18, %v609_v33  ;;  %v947_v31 = vadd.f32 %v931_v7, %v2727_v61  ;;  %v2140_v15 = vpop.f32.mrb[28].mxu0  ;;  %2146 = vmatprep.subr.msk.bf16.mxu1 %vm1878_vm7, %v3845_v6 }
 0x11a   :  { %v965_v30 = vadd.f32 %v949_v24, %v612_v11  ;;  %v916_v25 = vadd.f32 %v2140_v15, %v2764_v17  ;;  %v907_v38 = vpop.f32.mrb[29].mxu0  ;;  %2147 = vmatpush3.bf16.msk.msra.mxu1 %vm1878_vm7, %v3845_v6  ;;  %v3075_v14 = vmul.f32 0.5, %v964_v20  ;;  %v615_v20 = vsel %vm599_vm11, 0.0, %v2896_v1  ;;  %v3859_v11 = vld [vmem:[#allocation21_spill] sm:$0xff] }
 0x11b   :  { %v963_v13 = vadd.f32 %v947_v31, %v610_v22  ;;  %v908_v28 = vadd.f32 %v907_v38, %v2733_v0  ;;  %v2141_v18 = vpop.f32.mrb[30].mxu0  ;;  %2148 = vmatprep.subr.msk.bf16.mxu1 %vm3053_vm5, %v3845_v6  ;;  %v3081_v7 = vmul.f32 0.5, %v962_v21  ;;  %v3860_v22 = vld [vmem:[#allocation18_spill] sm:$0xff]  ;;  %v3861_v17 = vld [vmem:[#allocation25_spill] sm:$0xff] }
 0x11c   :  { %v936_v57 = vmul.f32 %v916_v25, %v2841_v49  ;;  %v919_v33 = vadd.f32 %v2141_v18, %v2773_v10  ;;  %v910_v15 = vpop.f32.mrb[31].mxu0  ;;  %v3085_v24 = vmul.f32 0.5, %v965_v30  ;;  %vm996_vm7 = vcmp.ge.f32.partialorder %v3075_v14, 1.0  ;;  %v3862_v30 = vld [vmem:[#allocation24_spill] sm:$0xff]  ;;  %v3863_v25 = vld [vmem:[#allocation22_spill] sm:$0xff] }
 0x11d   :  { %v934_v31 = vmul.f32 %v908_v28, %v3859_v11  ;;  %v911_v38 = vadd.f32 %v910_v15, %v3860_v22  ;;  %v3092_v0 = vmul.f32 0.5, %v963_v13  ;;  %vm994_vm11 = vcmp.ge.f32.partialorder %v3081_v7, 1.0 }
 0x11e   :  { %v952_v21 = vadd.f32 %v936_v57, %v2871_v53  ;;  %v937_v61 = vmul.f32 %v919_v33, %v3861_v17  ;;  %2149 = vmatpush3.bf16.msk.msra.mxu1 %vm3053_vm5, %v3845_v6  ;;  %vm997_vm14 = vcmp.ge.f32.partialorder %v3085_v24, 1.0  ;;  %v3866_v57 = vld [vmem:[#allocation26_spill] sm:$0xff]  ;;  %v616_v15 = vsel %vm600_vm12, 0.0, %v2906_v63 }
 0x11f   :  { %v950_v1 = vadd.f32 %v934_v31, %v3862_v30  ;;  %v935_v28 = vmul.f32 %v911_v38, %v3863_v25  ;;  %vm995_vm15 = vcmp.ge.f32.partialorder %v3092_v0, 1.0  ;;  %vm3109_vm13 = vmpackc.low %vm997_vm14, %vm996_vm7  ;;  %v1002_v13 = vsel %vm986_vm3, 0.0, %v2967_v8 }
 0x120   :  { %v968_v18 = vadd.f32 %v952_v21, %v615_v20  ;;  %v953_v33 = vadd.f32 %v937_v61, %v3866_v57  ;;  %vm1882_vm5 = vmpackc.low %vm995_vm15, %vm994_vm11  ;;  %v1003_v8 = vsel %vm987_vm4, 0.0, %v2981_v29 }
 0x121   :  { %v966_v31 = vadd.f32 %v950_v1, %v613_v4  ;;  %v951_v38 = vadd.f32 %v935_v28, %v2811_v12  ;;  %2150 = vmatprep.subr.msk.bf16.mxu1 %vm1882_vm5, %v3845_v6  ;;  %v2168_v25 = vpop.f32.mrb[32].mxu0 }
 0x122   :  { %v969_v61 = vadd.f32 %v953_v33, %v616_v15  ;;  %v1198_v20 = vadd.f32 %v2168_v25, %v2669_v27  ;;  %2151 = vmatpush3.bf16.msk.msra.mxu1 %vm1882_vm5, %v3845_v6  ;;  %v1189_v21 = vpop.f32.mrb[33].mxu0  ;;  %v3131_v57 = vmul.f32 0.5, %v968_v18  ;;  %v1004_v18 = vsel %vm988_vm1, 0.0, %v2959_v42 }
 0x123   :  { %v967_v30 = vadd.f32 %v951_v38, %v614_v60  ;;  %v1190_v63 = vadd.f32 %v1189_v21, %v2659_v32  ;;  %2152 = vmatprep.subr.msk.bf16.mxu1 %vm3109_vm13, %v3845_v6  ;;  %v2169_v1 = vpop.f32.mrb[34].mxu0  ;;  %v3137_v28 = vmul.f32 0.5, %v966_v31  ;;  %v3867_v21 = vld [vmem:[#allocation5_spill] sm:$0xff] }
 0x124   :  { %v1254_v5 = vmul.f32 %v1198_v20, %v2683_v39  ;;  %v1201_v4 = vadd.f32 %v2169_v1, %v2667_v34  ;;  %v1192_v25 = vpop.f32.mrb[35].mxu0  ;;  %v3141_v33 = vmul.f32 0.5, %v969_v61  ;;  %vm1000_vm0 = vcmp.ge.f32.partialorder %v3131_v57, 1.0  ;;  %v3868_v61 = vld [vmem:[#allocation3_spill] sm:$0xff]  ;;  %v3871_v1 = vld [vmem:[#allocation6_spill] sm:$0xff] }
 0x125   :  { %v1252_v15 = vmul.f32 %v1190_v63, %v2657_v19  ;;  %v1193_v38 = vadd.f32 %v1192_v25, %v2665_v26  ;;  %v3148_v60 = vmul.f32 0.5, %v967_v30  ;;  %vm998_vm6 = vcmp.ge.f32.partialorder %v3137_v28, 1.0 }
 0x126   :  { %v1270_v31 = vadd.f32 %v1254_v5, %v2691_v43  ;;  %v1255_v32 = vmul.f32 %v1201_v4, %v3867_v21  ;;  %2153 = vmatpush3.bf16.msk.msra.mxu1 %vm3109_vm13, %v3845_v6  ;;  %vm1001_vm12 = vcmp.ge.f32.partialorder %v3141_v33, 1.0  ;;  %v1005_v4 = vsel %vm989_vm2, 0.0, %v2974_v16 }
 0x127   :  { %v1268_v42 = vadd.f32 %v1252_v15, %v2679_v37  ;;  %v1253_v20 = vmul.f32 %v1193_v38, %v3868_v61  ;;  %vm999_vm1 = vcmp.ge.f32.partialorder %v3148_v60, 1.0  ;;  %vm3165_vm5 = vmpackc.low %vm1001_vm12, %vm1000_vm0  ;;  %v1006_v30 = vsel %vm990_vm10, 0.0, %v3025_v3 }
 0x128   :  { %v1286_v63 = vadd.f32 %v1270_v31, %v1004_v18  ;;  %v1271_v5 = vadd.f32 %v1255_v32, %v3871_v1  ;;  %vm1886_vm13 = vmpackc.low %vm999_vm1, %vm998_vm6  ;;  %vm3876_vm10 = vcmp.ge.f32.partialorder %v3036_v9, 1.0 }
 0x129   :  { %v1284_v25 = vadd.f32 %v1268_v42, %v1002_v13  ;;  %v1269_v15 = vadd.f32 %v1253_v20, %v2676_v36  ;;  %2154 = vmatprep.subr.msk.bf16.mxu1 %vm1886_vm13, %v3845_v6  ;;  %v2172_v38 = vpop.f32.mrb[36].mxu0  ;;  %v1007_v3 = vsel %vm3876_vm10, 0.0, %v3036_v9 }
 0x12a   :  { %v1287_v32 = vadd.f32 %v1271_v5, %v1005_v4  ;;  %v1214_v18 = vadd.f32 %v2172_v38, %v2697_v46  ;;  %2155 = vmatpush3.bf16.msk.msra.mxu1 %vm1886_vm13, %v3845_v6  ;;  %v1205_v31 = vpop.f32.mrb[37].mxu0  ;;  %v3187_v1 = vmul.f32 0.5, %v1286_v63  ;;  %v1008_v63 = vsel %vm992_vm8, 0.0, %v3019_v35 }
 0x12b   :  { %v1285_v61 = vadd.f32 %v1269_v15, %v1003_v8  ;;  %v1206_v16 = vadd.f32 %v1205_v31, %v2687_v41  ;;  %2156 = vmatprep.subr.msk.bf16.mxu1 %vm3165_vm5, %v3845_v6  ;;  %v2173_v42 = vpop.f32.mrb[38].mxu0  ;;  %v3193_v20 = vmul.f32 0.5, %v1284_v25 }
 0x12c   :  { %v1258_v29 = vmul.f32 %v1214_v18, %v2705_v50  ;;  %v1217_v13 = vadd.f32 %v2173_v42, %v2699_v47  ;;  %v1208_v5 = vpop.f32.mrb[39].mxu0  ;;  %v3197_v4 = vmul.f32 0.5, %v1287_v32  ;;  %vm1318_vm2 = vcmp.ge.f32.partialorder %v3187_v1, 1.0 }
 0x12d   :  { %v1256_v15 = vmul.f32 %v1206_v16, %v2695_v45  ;;  %v1209_v38 = vadd.f32 %v1208_v5, %v2685_v40  ;;  %v3204_v8 = vmul.f32 0.5, %v1285_v61  ;;  %vm1316_vm4 = vcmp.ge.f32.partialorder %v3193_v20, 1.0 }
 0x12e   :  { %v1274_v25 = vadd.f32 %v1258_v29, %v2713_v54  ;;  %v1259_v31 = vmul.f32 %v1217_v13, %v2707_v51  ;;  %2157 = vmatpush3.bf16.msk.msra.mxu1 %vm3165_vm5, %v3845_v6  ;;  %vm1319_vm3 = vcmp.ge.f32.partialorder %v3197_v4, 1.0  ;;  %v1009_v42 = vsel %vm993_vm9, 0.0, %v3029_v2  ;;  %v3874_v13 = vld [vmem:[#allocation8_spill] sm:$0xff] }
 0x12f   :  { %v1272_v35 = vadd.f32 %v1256_v15, %v2701_v48  ;;  %v1257_v32 = vmul.f32 %v1209_v38, %v2693_v44  ;;  %vm3806_vm8 = vcmp.ge.f32.partialorder %v3204_v8, 1.0  ;;  %vm3221_vm13 = vmpackc.low %vm1319_vm3, %vm1318_vm2  ;;  %v3875_v15 = vld [vmem:[#allocation27_spill] sm:$0xff]  ;;  %v3878_v2 = vld [vmem:[#allocation4_spill] sm:$0xff]  ;;  %v1010_v61 = vsel %vm994_vm11, 0.0, %v3081_v7 }
 0x130   :  { %v1290_v18 = vadd.f32 %v1274_v25, %v1008_v63  ;;  %v1275_v16 = vadd.f32 %v1259_v31, %v2715_v55  ;;  %vm1926_vm5 = vmpackc.low %vm3806_vm8, %vm1316_vm4  ;;  %v3877_v25 = vld [vmem:[#allocation13_spill] sm:$0xff]  ;;  %v1011_v7 = vsel %vm995_vm15, 0.0, %v3092_v0 }
 0x131   :  { %v1288_v29 = vadd.f32 %v1272_v35, %v1006_v30  ;;  %v1273_v5 = vadd.f32 %v1257_v32, %v3874_v13  ;;  %2159 = vmatmul.mubr.bf16.vlgmr.msra.gmra.mrb[4].mxu1 %v3875_v15  ;;  %v2176_v38 = vpop.f32.mrb[40].mxu0  ;;  %2182 = vmatprep.subr.msk.bf16.mxu1 %vm1926_vm5, %v3845_v6  ;;  %v3879_v32 = vld [vmem:[#allocation9_spill] sm:$0xff] }
 0x132   :  { %v1291_v63 = vadd.f32 %v1275_v16, %v1009_v42  ;;  %v1230_v31 = vadd.f32 %v2176_v38, %v3877_v25  ;;  %v1221_v55 = vpop.f32.mrb[41].mxu0  ;;  %2183 = vmatpush3.bf16.msk.msra.mxu1 %vm1926_vm5, %v3845_v6  ;;  %v3244_v44 = vmul.f32 0.5, %v1290_v18  ;;  %2198 = vmatprep.mubr.bf16.mxu1 %v3878_v2  ;;  %v1012_v18 = vsel %vm996_vm7, 0.0, %v3075_v14 }
 0x133   :  { %v1289_v35 = vadd.f32 %v1273_v5, %v1007_v3  ;;  %v1222_v30 = vadd.f32 %v1221_v55, %v3879_v32  ;;  %v2177_v15 = vpop.f32.mrb[42].mxu0  ;;  %2184 = vmatprep.subr.msk.bf16.mxu1 %vm3221_vm13, %v3845_v6  ;;  %v3251_v13 = vmul.f32 0.5, %v1288_v29 }
 0x134   :  { %v1262_v9 = vmul.f32 %v1230_v31, %v2729_v62  ;;  %v1233_v16 = vadd.f32 %v2177_v15, %v2723_v59  ;;  %v1224_v42 = vpop.f32.mrb[43].mxu0  ;;  %v3255_v38 = vmul.f32 0.5, %v1291_v63  ;;  %vm1322_vm9 = vcmp.ge.f32.partialorder %v3244_v44, 1.0  ;;  %v3880_v15 = vld [vmem:[#allocation14_spill] sm:$0xff]  ;;  %v3881_v63 = vld [vmem:[#allocation12_spill] sm:$0xff] }
 0x135   :  { %v1260_v55 = vmul.f32 %v1222_v30, %v2717_v56  ;;  %v1225_v5 = vadd.f32 %v1224_v42, %v3849_v23  ;;  %v3262_v3 = vmul.f32 0.5, %v1289_v35  ;;  %vm1320_vm7 = vcmp.ge.f32.partialorder %v3251_v13, 1.0 }
 0x136   :  { %v1278_v29 = vadd.f32 %v1262_v9, %v3850_v52  ;;  %v1263_v2 = vmul.f32 %v1233_v16, %v3851_v58  ;;  %2185 = vmatpush3.bf16.msk.msra.mxu1 %vm3221_vm13, %v3845_v6  ;;  %vm1323_vm5 = vcmp.ge.f32.partialorder %v3255_v38, 1.0  ;;  %v3884_v9 = vld [vmem:[#allocation20_spill] sm:$0xff]  ;;  %v1013_v42 = vsel %vm997_vm14, 0.0, %v3085_v24  ;;  %v3887_v24 = vld [vmem:[#allocation17_spill] sm:$0xff] }
 0x137   :  { %v1276_v14 = vadd.f32 %v1260_v55, %v3880_v15  ;;  %v1261_v31 = vmul.f32 %v1225_v5, %v3881_v63  ;;  %vm1321_vm10 = vcmp.ge.f32.partialorder %v3262_v3, 1.0  ;;  %vm3279_vm8 = vmpackc.low %vm1323_vm5, %vm1322_vm9  ;;  %v3885_v5 = vld [vmem:[#allocation15_spill] sm:$0xff]  ;;  %v1014_v35 = vsel %vm998_vm6, 0.0, %v3137_v28 }
 0x138   :  { %v1294_v30 = vadd.f32 %v1278_v29, %v1012_v18  ;;  %v1279_v16 = vadd.f32 %v1263_v2, %v3884_v9  ;;  %vm1930_vm13 = vmpackc.low %vm1321_vm10, %vm1320_vm7  ;;  %v3886_v29 = vld [vmem:[#allocation23_spill] sm:$0xff]  ;;  %v1015_v28 = vsel %vm999_vm1, 0.0, %v3148_v60 }
 0x139   :  { %v1292_v55 = vadd.f32 %v1276_v14, %v1010_v61  ;;  %v1277_v63 = vadd.f32 %v1261_v31, %v3885_v5  ;;  %v2180_v15 = vpop.f32.mrb[44].mxu0  ;;  %2186 = vmatprep.subr.msk.bf16.mxu1 %vm1930_vm13, %v3845_v6 }
 0x13a   :  { %v1295_v18 = vadd.f32 %v1279_v16, %v1013_v42  ;;  %v1246_v2 = vadd.f32 %v2180_v15, %v3886_v29  ;;  %v1237_v9 = vpop.f32.mrb[45].mxu0  ;;  %2187 = vmatpush3.bf16.msk.msra.mxu1 %vm1930_vm13, %v3845_v6  ;;  %v3301_v58 = vmul.f32 0.5, %v1294_v30 }
 0x13b   :  { %v1293_v52 = vadd.f32 %v1277_v63, %v1011_v7  ;;  %v1238_v14 = vadd.f32 %v1237_v9, %v3887_v24  ;;  %v2181_v61 = vpop.f32.mrb[46].mxu0  ;;  %2188 = vmatprep.subr.msk.bf16.mxu1 %vm3279_vm8, %v3845_v6  ;;  %v3307_v31 = vmul.f32 0.5, %v1292_v55  ;;  %v1016_v63 = vsel %vm1000_vm0, 0.0, %v3131_v57 }
 0x13c   :  { %v1266_v0 = vmul.f32 %v1246_v2, %v2841_v49  ;;  %v1249_v16 = vadd.f32 %v2181_v61, %v2773_v10  ;;  %v1240_v15 = vpop.f32.mrb[47].mxu0  ;;  %v3311_v42 = vmul.f32 0.5, %v1295_v18  ;;  %vm1326_vm14 = vcmp.ge.f32.partialorder %v3301_v58, 1.0  ;;  %v3888_v18 = vld [vmem:[#allocation24_spill] sm:$0xff]  ;;  %v3889_v2 = vld [vmem:[#allocation22_spill] sm:$0xff] }
 0x13d   :  { %v1264_v30 = vmul.f32 %v1238_v14, %v3859_v11  ;;  %v1241_v9 = vadd.f32 %v1240_v15, %v3860_v22  ;;  %v3318_v7 = vmul.f32 0.5, %v1293_v52  ;;  %vm1324_vm15 = vcmp.ge.f32.partialorder %v3307_v31, 1.0 }
 0x13e   :  { %v1282_v55 = vadd.f32 %v1266_v0, %v2871_v53  ;;  %v1267_v24 = vmul.f32 %v1249_v16, %v3861_v17  ;;  %2189 = vmatpush3.bf16.msk.msra.mxu1 %vm3279_vm8, %v3845_v6  ;;  %vm1327_vm11 = vcmp.ge.f32.partialorder %v3311_v42, 1.0  ;;  %v3892_v0 = vld [vmem:[#allocation26_spill] sm:$0xff]  ;;  %v1017_v15 = vsel %vm1001_vm12, 0.0, %v3141_v33 }
 0x13f   :  { %v1280_v57 = vadd.f32 %v1264_v30, %v3888_v18  ;;  %v1265_v14 = vmul.f32 %v1241_v9, %v3889_v2  ;;  %vm1325_vm0 = vcmp.ge.f32.partialorder %v3318_v7, 1.0  ;;  %vm3335_vm13 = vmpackc.low %vm1327_vm11, %vm1326_vm14  ;;  %v3893_v33 = vld [vmem:[#allocation2_spill] sm:$0xff] }
 0x140   :  { %v1298_v61 = vadd.f32 %v1282_v55, %v1016_v63  ;;  %v1283_v16 = vadd.f32 %v1267_v24, %v3892_v0  ;;  %vm1934_vm8 = vmpackc.low %vm1325_vm0, %vm1324_vm15 }
 0x141   :  { %v1296_v30 = vadd.f32 %v1280_v57, %v1014_v35  ;;  %v1281_v9 = vadd.f32 %v1265_v14, %v2811_v12  ;;  %2190 = vmatprep.subr.msk.bf16.mxu1 %vm1934_vm8, %v3845_v6  ;;  %v2208_v2 = vpop.f32.mrb[48].mxu0 }
 0x142   :  { %v1299_v24 = vadd.f32 %v1283_v16, %v1017_v15  ;;  %v1528_v63 = vadd.f32 %v2208_v2, %v2669_v27  ;;  %2191 = vmatpush3.bf16.msk.msra.mxu1 %vm1934_vm8, %v3845_v6  ;;  %v1519_v55 = vpop.f32.mrb[49].mxu0  ;;  %v3357_v0 = vmul.f32 0.5, %v1298_v61  ;;  %v1334_v61 = vsel %vm1318_vm2, 0.0, %v3187_v1 }
 0x143   :  { %v1297_v18 = vadd.f32 %v1281_v9, %v1015_v28  ;;  %v1520_v57 = vadd.f32 %v1519_v55, %v3893_v33  ;;  %2192 = vmatprep.subr.msk.bf16.mxu1 %vm3335_vm13, %v3845_v6  ;;  %v2209_v14 = vpop.f32.mrb[50].mxu0  ;;  %v3363_v35 = vmul.f32 0.5, %v1296_v30 }
 0x144   :  { %v1584_v60 = vmul.f32 %v1528_v63, %v2683_v39  ;;  %v1531_v16 = vadd.f32 %v2209_v14, %v2667_v34  ;;  %v1522_v27 = vpop.f32.mrb[51].mxu0  ;;  %v3367_v2 = vmul.f32 0.5, %v1299_v24  ;;  %vm1330_vm12 = vcmp.ge.f32.partialorder %v3357_v0, 1.0  ;;  %v3894_v39 = vld [vmem:[#allocation3_spill] sm:$0xff] }
 0x145   :  { %v1582_v15 = vmul.f32 %v1520_v57, %v2657_v19  ;;  %v1523_v9 = vadd.f32 %v1522_v27, %v2665_v26  ;;  %v3374_v28 = vmul.f32 0.5, %v1297_v18  ;;  %vm1328_vm1 = vcmp.ge.f32.partialorder %v3363_v35, 1.0  ;;  %v3903_v26 = vld [vmem:[#allocation8_spill] sm:$0xff] }
 0x146   :  { %v1600_v30 = vadd.f32 %v1584_v60, %v2691_v43  ;;  %v1585_v55 = vmul.f32 %v1531_v16, %v3867_v21  ;;  %2193 = vmatpush3.bf16.msk.msra.mxu1 %vm3335_vm13, %v3845_v6  ;;  %vm3810_vm6 = vcmp.ge.f32.partialorder %v3367_v2, 1.0  ;;  %v1332_v43 = vsel %vm1316_vm4, 0.0, %v3193_v20  ;;  %v3897_v21 = vld [vmem:[#allocation6_spill] sm:$0xff] }
 0x147   :  { %v1598_v34 = vadd.f32 %v1582_v15, %v2679_v37  ;;  %v1583_v19 = vmul.f32 %v1523_v9, %v3894_v39  ;;  %vm3809_vm2 = vcmp.ge.f32.partialorder %v3374_v28, 1.0  ;;  %vm3391_vm8 = vmpackc.low %vm3810_vm6, %vm1330_vm12  ;;  %v1335_v18 = vsel %vm1319_vm3, 0.0, %v3197_v4 }
 0x148   :  { %v1601_v37 = vadd.f32 %v1585_v55, %v3897_v21  ;;  %vm1938_vm13 = vmpackc.low %vm3809_vm2, %vm1328_vm1  ;;  %v1616_v1 = vadd.f32 %v1600_v30, %v1334_v61  ;;  %vm3898_vm4 = vcmp.ge.f32.partialorder %v3204_v8, 1.0  ;;  %v1338_v9 = vsel %vm1322_vm9, 0.0, %v3244_v44  ;;  %v3904_v21 = vld [vmem:[#allocation27_spill] sm:$0xff] }
 0x149   :  { %v1599_v52 = vadd.f32 %v1583_v19, %v2676_v36  ;;  %2194 = vmatprep.subr.msk.bf16.mxu1 %vm1938_vm13, %v3845_v6  ;;  %v2212_v24 = vpop.f32.mrb[52].mxu0  ;;  %v1614_v63 = vadd.f32 %v1598_v34, %v1332_v43  ;;  %v1333_v20 = vsel %vm3898_vm4, 0.0, %v3204_v8 }
 0x14a   :  { %v1544_v33 = vadd.f32 %v2212_v24, %v2697_v46  ;;  %2195 = vmatpush3.bf16.msk.msra.mxu1 %vm1938_vm13, %v3845_v6  ;;  %v1535_v57 = vpop.f32.mrb[53].mxu0  ;;  %v1617_v14 = vadd.f32 %v1601_v37, %v1335_v18  ;;  %v1632_v60 = vmul.f32 0.5, %v1616_v1 }
 0x14b   :  { %v1536_v16 = vadd.f32 %v1535_v57, %v2687_v41  ;;  %2196 = vmatprep.subr.msk.bf16.mxu1 %vm3391_vm8, %v3845_v6  ;;  %v2213_v36 = vpop.f32.mrb[54].mxu0  ;;  %v1615_v4 = vadd.f32 %v1599_v52, %v1333_v20  ;;  %v1630_v27 = vmul.f32 0.5, %v1614_v63 }
 0x14c   :  { %v1588_v61 = vmul.f32 %v1544_v33, %v2705_v50  ;;  %v1547_v8 = vadd.f32 %v2213_v36, %v2699_v47  ;;  %v1538_v15 = vpop.f32.mrb[55].mxu0  ;;  %v1633_v46 = vmul.f32 0.5, %v1617_v14  ;;  %vm1648_vm3 = vcmp.ge.f32.partialorder %v1632_v60, 1.0  ;;  %v3899_v50 = vld [vmem:[#allocation7_spill] sm:$0xff] }
 0x14d   :  { %v1586_v30 = vmul.f32 %v1536_v16, %v2695_v45  ;;  %v1539_v41 = vadd.f32 %v1538_v15, %v2685_v40  ;;  %v1631_v55 = vmul.f32 0.5, %v1615_v4  ;;  %vm1646_vm9 = vcmp.ge.f32.partialorder %v1630_v27, 1.0  ;;  %v3902_v45 = vld [vmem:[#allocation11_spill] sm:$0xff]  ;;  %v3906_v15 = vld [vmem:[#allocation16_spill] sm:$0xff] }
 0x14e   :  { %v1604_v34 = vadd.f32 %v1588_v61, %v2713_v54  ;;  %v1589_v39 = vmul.f32 %v1547_v8, %v2707_v51  ;;  %2197 = vmatpush3.bf16.msk.msra.mxu1 %vm3391_vm8, %v3845_v6  ;;  %vm1649_vm13 = vcmp.ge.f32.partialorder %v1633_v46, 1.0  ;;  %v1336_v40 = vsel %vm1320_vm7, 0.0, %v3251_v13  ;;  %v3905_v61 = vld [vmem:[#allocation19_spill] sm:$0xff] }
 0x14f   :  { %v1602_v47 = vadd.f32 %v1586_v30, %v2701_v48  ;;  %v1587_v19 = vmul.f32 %v1539_v41, %v3899_v50  ;;  %vm1647_vm4 = vcmp.ge.f32.partialorder %v1631_v55, 1.0  ;;  %vm3431_vm2 = vmpackc.low %vm1649_vm13, %vm1648_vm3  ;;  %v1339_v48 = vsel %vm1323_vm5, 0.0, %v3255_v38  ;;  %v2257_v38 = vld [vmem:[%s3751_s5] sm:$0xff]  }
 0x150   :  { %v1605_v51 = vadd.f32 %v1589_v39, %v3902_v45  ;;  %vm1978_vm6 = vmpackc.low %vm1647_vm4, %vm1646_vm9  ;;  %v1620_v54 = vadd.f32 %v1604_v34, %v1338_v9  ;;  %v1337_v13 = vsel %vm1321_vm10, 0.0, %v3262_v3  ;;  %v1342_v36 = vsel %vm1326_vm14, 0.0, %v3301_v58  ;;  %v3908_v9 = vld [vmem:[#allocation12_spill] sm:$0xff] }
 0x151   :  { %v1603_v43 = vadd.f32 %v1587_v19, %v3903_v26  ;;  %2199 = vmatmul.mubr.bf16.vlgmr.msra.gmra.mrb[8].mxu1 %v3904_v21  ;;  %v2216_v37 = vpop.f32.mrb[56].mxu0  ;;  %2222 = vmatprep.subr.msk.bf16.mxu1 %vm1978_vm6, %v3845_v6  ;;  %v1618_v1 = vadd.f32 %v1602_v47, %v1336_v40  ;;  %v1340_v58 = vsel %vm1324_vm15, 0.0, %v3307_v31  ;;  %v1343_v34 = vsel %vm1327_vm11, 0.0, %v3311_v42 }
 0x152   :  { %v1560_v18 = vadd.f32 %v2216_v37, %v3877_v25  ;;  %v1551_v52 = vpop.f32.mrb[57].mxu0  ;;  %2223 = vmatpush3.bf16.msk.msra.mxu1 %vm1978_vm6, %v3845_v6  ;;  %v1621_v24 = vadd.f32 %v1605_v51, %v1339_v48  ;;  %v1636_v63 = vmul.f32 0.5, %v1620_v54  ;;  %2238 = vmatprep.mubr.bf16.mxu1 %v2257_v38  ;;  %v1341_v19 = vsel %vm1325_vm0, 0.0, %v3318_v7  ;;  %v3912_v51 = vld [vmem:[#allocation17_spill] sm:$0xff] }
 0x153   :  { %v1552_v20 = vadd.f32 %v1551_v52, %v3879_v32  ;;  %v2217_v33 = vpop.f32.mrb[58].mxu0  ;;  %2224 = vmatprep.subr.msk.bf16.mxu1 %vm3431_vm2, %v3845_v6  ;;  %v1619_v3 = vadd.f32 %v1603_v43, %v1337_v13  ;;  %v1634_v57 = vmul.f32 0.5, %v1618_v1  ;;  %v1346_v37 = vsel %vm1330_vm12, 0.0, %v3357_v0 }
 0x154   :  { %v1592_v25 = vmul.f32 %v1560_v18, %v2729_v62  ;;  %v1563_v14 = vadd.f32 %v2217_v33, %v2723_v59  ;;  %v1554_v60 = vpop.f32.mrb[59].mxu0  ;;  %v1637_v16 = vmul.f32 0.5, %v1621_v24  ;;  %vm1652_vm5 = vcmp.ge.f32.partialorder %v1636_v63, 1.0  ;;  %v3907_v59 = vld [vmem:[#allocation14_spill] sm:$0xff] }
 0x155   :  { %v1590_v4 = vmul.f32 %v1552_v20, %v2717_v56  ;;  %v1555_v32 = vadd.f32 %v1554_v60, %v3849_v23  ;;  %v1635_v27 = vmul.f32 0.5, %v1619_v3  ;;  %vm1650_vm10 = vcmp.ge.f32.partialorder %v1634_v57, 1.0  ;;  %v3911_v23 = vld [vmem:[#allocation20_spill] sm:$0xff]  ;;  %v3914_v63 = vld [vmem:[#allocation22_spill] sm:$0xff] }
 0x156   :  { %v1608_v8 = vadd.f32 %v1592_v25, %v3905_v61  ;;  %v1593_v46 = vmul.f32 %v1563_v14, %v3906_v15  ;;  %2225 = vmatpush3.bf16.msk.msra.mxu1 %vm3431_vm2, %v3845_v6  ;;  %vm1653_vm7 = vcmp.ge.f32.partialorder %v1637_v16, 1.0  ;;  %vm3918_vm13 = vcmp.ge.f32.partialorder %v3367_v2, 1.0 }
 0x157   :  { %v1606_v62 = vadd.f32 %v1590_v4, %v3907_v59  ;;  %v1591_v30 = vmul.f32 %v1555_v32, %v3908_v9  ;;  %vm1651_vm14 = vcmp.ge.f32.partialorder %v1635_v27, 1.0  ;;  %vm3471_vm6 = vmpackc.low %vm1653_vm7, %vm1652_vm5  ;;  %v1347_v20 = vsel %vm3918_vm13, 0.0, %v3367_v2 }
 0x158   :  { %v1609_v41 = vadd.f32 %v1593_v46, %v3911_v23  ;;  %vm1982_vm8 = vmpackc.low %vm1651_vm14, %vm1650_vm10  ;;  %v1624_v55 = vadd.f32 %v1608_v8, %v1342_v36  ;;  %vm3919_vm9 = vcmp.ge.f32.partialorder %v3374_v28, 1.0 }
 0x159   :  { %v1607_v39 = vadd.f32 %v1591_v30, %v3885_v5  ;;  %v2220_v47 = vpop.f32.mrb[60].mxu0  ;;  %2226 = vmatprep.subr.msk.bf16.mxu1 %vm1982_vm8, %v3845_v6  ;;  %v1622_v50 = vadd.f32 %v1606_v62, %v1340_v58  ;;  %v1345_v57 = vsel %vm3919_vm9, 0.0, %v3374_v28  ;;  %v3537_v28 = vpop.permute.xlu1 %664 }
 0x15a   :  { %v1576_v31 = vadd.f32 %v2220_v47, %v3886_v29  ;;  %v1567_v44 = vpop.f32.mrb[61].mxu0  ;;  %2227 = vmatpush3.bf16.msk.msra.mxu1 %vm1982_vm8, %v3845_v6  ;;  %v1625_v40 = vadd.f32 %v1609_v41, %v1343_v34  ;;  %v1640_v45 = vmul.f32 0.5, %v1624_v55 }
 0x15b   :  { %v1568_v54 = vadd.f32 %v1567_v44, %v3912_v51  ;;  %v2221_v42 = vpop.f32.mrb[62].mxu0  ;;  %2228 = vmatprep.subr.msk.bf16.mxu1 %vm3471_vm6, %v3845_v6  ;;  %v1623_v5 = vadd.f32 %v1607_v39, %v1341_v19  ;;  %v1638_v48 = vmul.f32 0.5, %v1622_v50 }
 0x15c   :  { %v1596_v26 = vmul.f32 %v1576_v31, %v2841_v49  ;;  %v1579_v7 = vadd.f32 %v2221_v42, %v2773_v10  ;;  %v1570_v43 = vpop.f32.mrb[63].mxu0  ;;  %v1641_v29 = vmul.f32 0.5, %v1625_v40  ;;  %vm1656_vm11 = vcmp.ge.f32.partialorder %v1640_v45, 1.0  ;;  %v3913_v10 = vld [vmem:[#allocation24_spill] sm:$0xff] }
 0x15d   :  { %v1594_v1 = vmul.f32 %v1568_v54, %v3859_v11  ;;  %v1571_v13 = vadd.f32 %v1570_v43, %v3860_v22  ;;  %v1639_v18 = vmul.f32 0.5, %v1623_v5  ;;  %vm1654_vm0 = vcmp.ge.f32.partialorder %v1638_v48, 1.0  ;;  %v3541_v4 = vpop.permute.xlu1 %674  ;;  %v2258_v48 = vld [vmem:[%s3745_s0 + $0x10] sm:$0xff]  ;;  %v2259_v43 = vld [vmem:[%s3745_s0] sm:$0xff] }
 0x15e   :  { %v1612_v52 = vadd.f32 %v1596_v26, %v2871_v53  ;;  %v1597_v24 = vmul.f32 %v1579_v7, %v3861_v17  ;;  %2229 = vmatpush3.bf16.msk.msra.mxu1 %vm3471_vm6, %v3845_v6  ;;  %vm1657_vm15 = vcmp.ge.f32.partialorder %v1641_v29, 1.0  ;;  %v1344_v17 = vsel %vm1328_vm1, 0.0, %v3363_v35  ;;  %v3917_v53 = vld [vmem:[#allocation26_spill] sm:$0xff] }
 0x15f   :  { %v1610_v49 = vadd.f32 %v1594_v1, %v3913_v10  ;;  %v1595_v38 = vmul.f32 %v1571_v13, %v3914_v63  ;;  %vm1655_vm12 = vcmp.ge.f32.partialorder %v1639_v18, 1.0  ;;  %vm3507_vm2 = vmpackc.low %vm1657_vm15, %vm1656_vm11  ;;  %v2276_v54 = vmov 0.0   ;;  %v2260_v1 = vld [vmem:[%s3745_s0 + $0x18] sm:$0xff] }
 0x160   :  { %v1613_v22 = vadd.f32 %v1597_v24, %v3917_v53  ;;  %vm1986_vm3 = vmpackc.low %vm1655_vm12, %vm1654_vm0  ;;  %v1628_v0 = vadd.f32 %v1612_v52, %v1346_v37  ;;  %v2261_v52 = vld [vmem:[%s3745_s0 + $0x8] sm:$0xff] }
 0x161   :  { %v1611_v33 = vadd.f32 %v1595_v38, %v2811_v12  ;;  %2230 = vmatprep.subr.msk.bf16.mxu1 %vm1986_vm3, %v3845_v6  ;;  %v1626_v3 = vadd.f32 %v1610_v49, %v1344_v17  ;;  %v3535_v12 = vpop.permute.xlu0 %659  ;;  %v3545_v27 = vpop.permute.xlu1 %745 }
 0x162   :  { %2231 = vmatpush3.bf16.msk.msra.mxu1 %vm1986_vm3, %v3845_v6  ;;  %v1629_v35 = vadd.f32 %v1613_v22, %v1347_v20  ;;  %v1644_v25 = vmul.f32 0.5, %v1628_v0 }
 0x163   :  { %2232 = vmatprep.subr.msk.bf16.mxu1 %vm3507_vm2, %v3845_v6  ;;  %v1627_v14 = vadd.f32 %v1611_v33, %v1345_v57  ;;  %v1642_v60 = vmul.f32 0.5, %v1626_v3 }
 0x164   :  { %v1645_v2 = vmul.f32 0.5, %v1629_v35  ;;  %vm1660_vm1 = vcmp.ge.f32.partialorder %v1644_v25, 1.0 }
 0x165   :  { %v1643_v16 = vmul.f32 0.5, %v1627_v14  ;;  %vm1658_vm5 = vcmp.ge.f32.partialorder %v1642_v60, 1.0  ;;  %v3539_v36 = vpop.permute.xlu0 %669  ;;  %v3549_v8 = vpop.permute.xlu1 %755 }
 0x166   :  { %2233 = vmatpush3.bf16.msk.msra.mxu1 %vm3507_vm2, %v3845_v6  ;;  %vm1661_vm4 = vcmp.ge.f32.partialorder %v1645_v2, 1.0 }
 0x167   :  { %vm1659_vm7 = vcmp.ge.f32.partialorder %v1643_v16, 1.0  ;;  %vm1992_vm10 = vmpackc.low %vm1661_vm4, %vm1660_vm1 }
 0x168   :  { %vm1990_vm14 = vmpackc.low %vm1659_vm7, %vm1658_vm5 }
 0x169   :  { %2234 = vmatprep.subr.msk.bf16.mxu1 %vm1990_vm14, %v3845_v6  ;;  %v3543_v32 = vpop.permute.xlu0 %740 }
 0x16a   :  { %2235 = vmatpush3.bf16.msk.msra.mxu1 %vm1990_vm14, %v3845_v6 }
 0x16b   :  { %2236 = vmatprep.subr.msk.bf16.mxu1 %vm1992_vm10, %v3845_v6 }
 0x16d   :  { %v3547_v61 = vpop.permute.xlu0 %750 }
 0x16e   :  { %2237 = vmatpush3.bf16.msk.msra.mxu1 %vm1992_vm10, %v3845_v6  ;;  %v3553_v6 = vpop.permute.xlu1 %769 }
 0x171   :  { %2239 = vmatmul.mubr.bf16.vlgmr.msra.gmra.mrb[12].mxu1 %v3904_v21  ;;  %v3551_v15 = vpop.permute.xlu0 %764 }
 0x172   :  { %v3565_v47 = vpop.permute.xlu1 %779 }
 0x175   :  { %v3559_v23 = vpop.permute.xlu0 %774 }
 0x1e2   :  { %v2120_v21 = vpop.f32.mrb[0].mxu1 }
 0x1e3   :  { %v732_v46 = vadd.f32 %v2120_v21, %v3539_v36  ;;  %v723_v59 = vpop.f32.mrb[1].mxu1 }
 0x1e4   :  { %v724_v62 = vadd.f32 %v723_v59, %v3535_v12  ;;  %v2121_v9 = vpop.f32.mrb[2].mxu1 }
 0x1e5   :  { %v760_v30 = vmul.f32 %v3547_v61, %v732_v46  ;;  %v735_v56 = vadd.f32 %v2121_v9, %v3541_v4  ;;  %v726_v58 = vpop.f32.mrb[3].mxu1 }
 0x1e6   :  { %v758_v41 = vmul.f32 %v3543_v32, %v724_v62  ;;  %v727_v55 = vadd.f32 %v726_v58, %v3537_v28 }
 0x1e7   :  { %v784_v34 = vadd.f32 %v3559_v23, %v760_v30  ;;  %v761_v39 = vmul.f32 %v3549_v8, %v735_v56 }
 0x1e8   :  { %v782_v50 = vadd.f32 %v3551_v15, %v758_v41  ;;  %v759_v19 = vmul.f32 %v3545_v27, %v727_v55 }
 0x1e9   :  { %v792_v31 = vmul.f32 0.5, %v784_v34  ;;  %v785_v44 = vadd.f32 %v3565_v47, %v761_v39  ;;  %v2262_v34 = vld [vmem:[%s3745_s0 + $0x30] sm:$0xff] }
 0x1ea   :  { %v790_v40 = vmul.f32 0.5, %v782_v50  ;;  %v783_v45 = vadd.f32 %v3553_v6, %v759_v19  ;;  %v2263_v19 = vld [vmem:[%s3745_s0 + $0x20] sm:$0xff] }
 0x1eb   :  { %vm796_vm6 = vcmp.ge.f32.partialorder %v792_v31, 1.0  ;;  %v793_v51 = vmul.f32 0.5, %v785_v44 }
 0x1ec   :  { %v1844_v42 = vsel %vm796_vm6, 1.0, %v2276_v54  ;;  %vm794_vm8 = vcmp.ge.f32.partialorder %v790_v40, 1.0  ;;  %v791_v5 = vmul.f32 0.5, %v783_v45  ;;  %v800_v57 = vsel %vm796_vm6, 0.0, %v792_v31 }
 0x1ed   :  { %v812_v26 = vadd.f32 %v2258_v48, %v1844_v42  ;;  %v1842_v7 = vsel %vm794_vm8, 1.0, %v2276_v54  ;;  %vm797_vm11 = vcmp.ge.f32.partialorder %v793_v51, 1.0  ;;  %v798_v14 = vsel %vm794_vm8, 0.0, %v790_v40  ;;  %v2264_v40 = vld [vmem:[%s3745_s0 + $0x38] sm:$0xff]  ;;  %v2265_v42 = vld [vmem:[%s3745_s0 + $0x28] sm:$0xff] }
 0x1ee   :  { %v810_v29 = vadd.f32 %v2259_v43, %v1842_v7  ;;  %v1845_v37 = vsel %vm797_vm11, 1.0, %v2276_v54  ;;  %vm795_vm15 = vcmp.ge.f32.partialorder %v791_v5, 1.0  ;;  %v801_v16 = vsel %vm797_vm11, 0.0, %v793_v51 }
 0x1ef   :  { %816 = vst [vmem:[%s3752_s9 + $0x10] sm:$0xff] %v812_v26  ;;  %v813_v13 = vadd.f32 %v2260_v1, %v1845_v37  ;;  %v1843_v18 = vsel %vm795_vm15, 1.0, %v2276_v54  ;;  %v799_v59 = vsel %vm795_vm15, 0.0, %v791_v5 }
 0x1f0   :  { %814 = vst [vmem:[%s3752_s9] sm:$0xff] %v810_v29  ;;  %v811_v24 = vadd.f32 %v2261_v52, %v1843_v18 }
 0x1f1   :  { %817 = vst [vmem:[%s3752_s9 + $0x18] sm:$0xff] %v813_v13 }
 0x1f2   :  { %815 = vst [vmem:[%s3752_s9 + $0x8] sm:$0xff] %v811_v24 }
 0x204   :  { %v2160_v10 = vpop.f32.mrb[4].mxu1 }
 0x205   :  { %v1101_v49 = vadd.f32 %v2160_v10, %v3539_v36  ;;  %v1092_v63 = vpop.f32.mrb[5].mxu1 }
 0x206   :  { %v1093_v38 = vadd.f32 %v1092_v63, %v3535_v12  ;;  %v2161_v11 = vpop.f32.mrb[6].mxu1 }
 0x207   :  { %v1109_v17 = vmul.f32 %v1101_v49, %v3547_v61  ;;  %v1104_v53 = vadd.f32 %v2161_v11, %v3541_v4  ;;  %v1095_v22 = vpop.f32.mrb[7].mxu1 }
 0x208   :  { %v1107_v0 = vmul.f32 %v1093_v38, %v3543_v32  ;;  %v1096_v20 = vadd.f32 %v1095_v22, %v3537_v28 }
 0x209   :  { %v1113_v33 = vadd.f32 %v1109_v17, %v3559_v23  ;;  %v1110_v3 = vmul.f32 %v1104_v53, %v3549_v8 }
 0x20a   :  { %v1111_v35 = vadd.f32 %v1107_v0, %v3551_v15  ;;  %v1108_v25 = vmul.f32 %v1096_v20, %v3545_v27 }
 0x20b   :  { %v1117_v60 = vadd.f32 %v1113_v33, %v800_v57  ;;  %v1114_v2 = vadd.f32 %v1110_v3, %v3565_v47 }
 0x20c   :  { %v1115_v21 = vadd.f32 %v1111_v35, %v798_v14  ;;  %v1112_v46 = vadd.f32 %v1108_v25, %v3553_v6 }
 0x20d   :  { %v1121_v62 = vmul.f32 0.5, %v1117_v60  ;;  %v1118_v9 = vadd.f32 %v1114_v2, %v801_v16  ;;  %v2266_v16 = vld [vmem:[%s3745_s0 + $0x50] sm:$0xff] }
 0x20e   :  { %v1119_v30 = vmul.f32 0.5, %v1115_v21  ;;  %v1116_v56 = vadd.f32 %v1112_v46, %v799_v59  ;;  %v2267_v59 = vld [vmem:[%s3745_s0 + $0x40] sm:$0xff] }
 0x20f   :  { %v1122_v58 = vmul.f32 0.5, %v1118_v9  ;;  %vm1125_vm0 = vcmp.ge.f32.partialorder %v1121_v62, 1.0 }
 0x210   :  { %v1120_v41 = vmul.f32 0.5, %v1116_v56  ;;  %v1892_v55 = vsel %vm1125_vm0, 1.0, %v2276_v54  ;;  %vm1123_vm12 = vcmp.ge.f32.partialorder %v1119_v30, 1.0  ;;  %v1129_v49 = vsel %vm1125_vm0, 0.0, %v1121_v62 }
 0x211   :  { %v1141_v39 = vadd.f32 %v2262_v34, %v1892_v55  ;;  %v1890_v50 = vsel %vm1123_vm12, 1.0, %v2276_v54  ;;  %vm1126_vm2 = vcmp.ge.f32.partialorder %v1122_v58, 1.0  ;;  %v1127_v17 = vsel %vm1123_vm12, 0.0, %v1119_v30  ;;  %v2268_v30 = vld [vmem:[%s3745_s0 + $0x58] sm:$0xff] }
 0x212   :  { %v1139_v31 = vadd.f32 %v2263_v19, %v1890_v50  ;;  %v1893_v44 = vsel %vm1126_vm2, 1.0, %v2276_v54  ;;  %vm1124_vm3 = vcmp.ge.f32.partialorder %v1120_v41, 1.0  ;;  %v1130_v0 = vsel %vm1126_vm2, 0.0, %v1122_v58 }
 0x213   :  { %1896 = vst [vmem:[%s3752_s9 + $0x30] sm:$0xff] %v1141_v39  ;;  %v1142_v45 = vadd.f32 %v2264_v40, %v1893_v44  ;;  %v1891_v51 = vsel %vm1124_vm3, 1.0, %v2276_v54  ;;  %v1128_v57 = vsel %vm1124_vm3, 0.0, %v1120_v41  ;;  %v2269_v41 = vld [vmem:[%s3745_s0 + $0x48] sm:$0xff] }
 0x214   :  { %1894 = vst [vmem:[%s3752_s9 + $0x20] sm:$0xff] %v1139_v31  ;;  %v1140_v5 = vadd.f32 %v2265_v42, %v1891_v51 }
 0x215   :  { %1897 = vst [vmem:[%s3752_s9 + $0x38] sm:$0xff] %v1142_v45 }
 0x216   :  { %1895 = vst [vmem:[%s3752_s9 + $0x28] sm:$0xff] %v1140_v5 }
 0x224   :  { %v2200_v48 = vpop.f32.mrb[8].mxu1 }
 0x225   :  { %v1431_v26 = vadd.f32 %v2200_v48, %v3539_v36  ;;  %v1422_v7 = vpop.f32.mrb[9].mxu1 }
 0x226   :  { %v1423_v43 = vadd.f32 %v1422_v7, %v3535_v12  ;;  %v2201_v29 = vpop.f32.mrb[10].mxu1 }
 0x227   :  { %v1439_v37 = vmul.f32 %v1431_v26, %v3547_v61  ;;  %v1434_v1 = vadd.f32 %v2201_v29, %v3541_v4  ;;  %v1425_v13 = vpop.f32.mrb[11].mxu1 }
 0x228   :  { %v1437_v18 = vmul.f32 %v1423_v43, %v3543_v32  ;;  %v1426_v52 = vadd.f32 %v1425_v13, %v3537_v28 }
 0x229   :  { %v1443_v24 = vadd.f32 %v1439_v37, %v3559_v23  ;;  %v1440_v10 = vmul.f32 %v1434_v1, %v3549_v8 }
 0x22a   :  { %v1441_v63 = vadd.f32 %v1437_v18, %v3551_v15  ;;  %v1438_v38 = vmul.f32 %v1426_v52, %v3545_v27 }
 0x22b   :  { %v1447_v11 = vadd.f32 %v1443_v24, %v1129_v49  ;;  %v1444_v53 = vadd.f32 %v1440_v10, %v3565_v47  ;;  %v2272_v49 = vld [vmem:[%s3745_s0 + $0x78] sm:$0xff] }
 0x22c   :  { %v1445_v22 = vadd.f32 %v1441_v63, %v1127_v17  ;;  %v1442_v20 = vadd.f32 %v1438_v38, %v3553_v6 }
 0x22d   :  { %v1451_v33 = vmul.f32 0.5, %v1447_v11  ;;  %v1448_v3 = vadd.f32 %v1444_v53, %v1130_v0  ;;  %v2273_v11 = vld [vmem:[%s3745_s0 + $0x68] sm:$0xff] }
 0x22e   :  { %v1449_v35 = vmul.f32 0.5, %v1445_v22  ;;  %v1446_v25 = vadd.f32 %v1442_v20, %v1128_v57 }
 0x22f   :  { %v1452_v14 = vmul.f32 0.5, %v1448_v3  ;;  %vm1455_vm13 = vcmp.ge.f32.partialorder %v1451_v33, 1.0 }
 0x230   :  { %v1450_v60 = vmul.f32 0.5, %v1446_v25  ;;  %v1944_v2 = vsel %vm1455_vm13, 1.0, %v2276_v54  ;;  %vm1453_vm9 = vcmp.ge.f32.partialorder %v1449_v35, 1.0  ;;  %v1459_v26 = vsel %vm1455_vm13, 0.0, %v1451_v33 }
 0x231   :  { %v1471_v21 = vadd.f32 %v2266_v16, %v1944_v2  ;;  %v1942_v46 = vsel %vm1453_vm9, 1.0, %v2276_v54  ;;  %vm1456_vm1 = vcmp.ge.f32.partialorder %v1452_v14, 1.0 }
 0x232   :  { %v1469_v62 = vadd.f32 %v2267_v59, %v1942_v46  ;;  %v1945_v9 = vsel %vm1456_vm1, 1.0, %v2276_v54  ;;  %vm1454_vm4 = vcmp.ge.f32.partialorder %v1450_v60, 1.0 }
 0x233   :  { %1948 = vst [vmem:[%s3752_s9 + $0x50] sm:$0xff] %v1471_v21  ;;  %v1472_v56 = vadd.f32 %v2268_v30, %v1945_v9  ;;  %v1943_v58 = vsel %vm1454_vm4, 1.0, %v2276_v54 }
 0x234   :  { %1946 = vst [vmem:[%s3752_s9 + $0x40] sm:$0xff] %v1469_v62  ;;  %v1470_v55 = vadd.f32 %v2269_v41, %v1943_v58 }
 0x235   :  { %1949 = vst [vmem:[%s3752_s9 + $0x58] sm:$0xff] %v1472_v56 }
 0x236   :  { %1947 = vst [vmem:[%s3752_s9 + $0x48] sm:$0xff] %v1470_v55 }
 0x244   :  { %v2240_v34 = vpop.f32.mrb[12].mxu1 }
 0x245   :  { %v1745_v39 = vadd.f32 %v2240_v34, %v3539_v36  ;;  %v1736_v50 = vpop.f32.mrb[13].mxu1 }
 0x246   :  { %v1737_v19 = vadd.f32 %v1736_v50, %v3535_v12  ;;  %v2241_v31 = vpop.f32.mrb[14].mxu1 }
 0x247   :  { %v1753_v44 = vmul.f32 %v1745_v39, %v3547_v61  ;;  %v1748_v40 = vadd.f32 %v2241_v31, %v3541_v4  ;;  %v1739_v45 = vpop.f32.mrb[15].mxu1  ;;  %v1457_v61 = vsel %vm1453_vm9, 0.0, %v1449_v35 }
 0x248   :  { %v1751_v51 = vmul.f32 %v1737_v19, %v3543_v32  ;;  %v1740_v42 = vadd.f32 %v1739_v45, %v3537_v28  ;;  %v1460_v32 = vsel %vm1456_vm1, 0.0, %v1452_v14 }
 0x249   :  { %v1757_v5 = vadd.f32 %v1753_v44, %v3559_v23  ;;  %v1754_v48 = vmul.f32 %v1748_v40, %v3549_v8  ;;  %v1458_v8 = vsel %vm1454_vm4, 0.0, %v1450_v60 }
 0x24a   :  { %v1755_v36 = vadd.f32 %v1751_v51, %v3551_v15  ;;  %v1752_v12 = vmul.f32 %v1740_v42, %v3545_v27 }
 0x24b   :  { %v1761_v7 = vadd.f32 %v1757_v5, %v1459_v26  ;;  %v1758_v4 = vadd.f32 %v1754_v48, %v3565_v47  ;;  %v2270_v47 = vld [vmem:[%s3745_s0 + $0x70] sm:$0xff] }
 0x24c   :  { %v1759_v43 = vadd.f32 %v1755_v36, %v1457_v61  ;;  %v1756_v28 = vadd.f32 %v1752_v12, %v3553_v6  ;;  %v2271_v6 = vld [vmem:[%s3745_s0 + $0x60] sm:$0xff] }
 0x24d   :  { %v1765_v29 = vmul.f32 0.5, %v1761_v7  ;;  %v1762_v23 = vadd.f32 %v1758_v4, %v1460_v32 }
 0x24e   :  { %v1763_v37 = vmul.f32 0.5, %v1759_v43  ;;  %v1760_v1 = vadd.f32 %v1756_v28, %v1458_v8 }
 0x24f   :  { %vm1769_vm5 = vcmp.ge.f32.partialorder %v1765_v29, 1.0  ;;  %v1766_v15 = vmul.f32 0.5, %v1762_v23 }
 0x250   :  { %v1996_v27 = vsel %vm1769_vm5, 1.0, %v2276_v54  ;;  %vm1767_vm7 = vcmp.ge.f32.partialorder %v1763_v37, 1.0  ;;  %v1764_v13 = vmul.f32 0.5, %v1760_v1 }
 0x251   :  { %v1781_v18 = vadd.f32 %v2270_v47, %v1996_v27  ;;  %v1994_v52 = vsel %vm1767_vm7, 1.0, %v2276_v54  ;;  %vm1770_vm10 = vcmp.ge.f32.partialorder %v1766_v15, 1.0 }
 0x252   :  { %v1779_v24 = vadd.f32 %v2271_v6, %v1994_v52  ;;  %v1997_v10 = vsel %vm1770_vm10, 1.0, %v2276_v54  ;;  %vm1768_vm14 = vcmp.ge.f32.partialorder %v1764_v13, 1.0 }
 0x253   :  { %2000 = vst [vmem:[%s3752_s9 + $0x70] sm:$0xff] %v1781_v18  ;;  %v1782_v63 = vadd.f32 %v2272_v49, %v1997_v10  ;;  %v1995_v38 = vsel %vm1768_vm14, 1.0, %v2276_v54 }
 0x254   :  { %1998 = vst [vmem:[%s3752_s9 + $0x60] sm:$0xff] %v1779_v24  ;;  %v1780_v17 = vadd.f32 %v2273_v11, %v1995_v38 }
 0x255   :  { %2001 = vst [vmem:[%s3752_s9 + $0x78] sm:$0xff] %v1782_v63 }
 0x256   :  { %1999 = vst [vmem:[%s3752_s9 + $0x68] sm:$0xff] %v1780_v17 }

</bundles_post_ra>
